<compile_context>
chip_gen: v7x
topology: tpu7x:2x2x1
jax: 0.10.0
libtpu: 0.0.40
codegen_flags: <defaults>
</compile_context>

<pallas_src>
import functools
import math

import jax
import jax.numpy as jnp
from jax import lax
from jax.experimental import pallas as pl
from jax.experimental.pallas import tpu as pltpu


def _round_up(x, m):
    return (x + m - 1) // m * m


# ----------------------------- Pallas kernel --------------------------------

def _fused_matmul_kernel(*refs, relu, has_res):
    """Tiled matmul with f32 accumulation; bias (+residual) (+ReLU) epilogue."""
    if has_res:
        x_ref, w_ref, b_ref, r_ref, o_ref, acc_ref = refs
    else:
        x_ref, w_ref, b_ref, o_ref, acc_ref = refs
        r_ref = None
    k = pl.program_id(2)

    @pl.when(k == 0)
    def _init():
        acc_ref[...] = jnp.zeros_like(acc_ref)

    acc_ref[...] += jnp.dot(x_ref[...], w_ref[...],
                            preferred_element_type=jnp.float32)

    @pl.when(k == pl.num_programs(2) - 1)
    def _finalize():
        y = acc_ref[...] + b_ref[...]                 # f32 epilogue
        if has_res:
            y = y + r_ref[...].astype(jnp.float32)    # fused residual add
        if relu:
            y = jnp.maximum(y, 0.0)
        o_ref[...] = y.astype(o_ref.dtype)


def _pick_tm(m):
    for t in (512, 384, 256, 128):
        if m >= t and m % t == 0:
            return t
    return 128


def _pick_tile(dim_padded, cap):
    if dim_padded <= cap:
        return dim_padded
    for t in (cap, 512, 256, 128):
        if dim_padded % t == 0:
            return t
    return 128


def fused_matmul(x, w_pad, b_pad, n_true, *, relu=False, residual=None,
                 out_dtype=jnp.bfloat16):
    """y[:M, :n_true] = act(x @ W + b (+ residual)) via a tiled Pallas matmul.

    `w_pad`: (Kp, Np) bf16, Kp/Np multiples of 128, zero padded at init.
    `b_pad`: (1, Np) f32.  `x`: (M, K) bf16 with K <= Kp.
    """
    M, K = x.shape
    Kp, Np = w_pad.shape
    assert K <= Kp and Kp % 128 == 0 and Np % 128 == 0

    tm = _pick_tm(M)
    Mp = _round_up(M, tm)
    tn = _pick_tile(Np, 512)
    tk = _pick_tile(Kp, 1024)

    if x.dtype != jnp.bfloat16:
        x = x.astype(jnp.bfloat16)
    if (Mp, Kp) != (M, K):
        x = jnp.pad(x, ((0, Mp - M), (0, Kp - K)))

    in_specs = [
        pl.BlockSpec((tm, tk), lambda i, j, k: (i, k)),
        pl.BlockSpec((tk, tn), lambda i, j, k: (k, j)),
        pl.BlockSpec((1, tn), lambda i, j, k: (0, j)),
    ]
    args = [x, w_pad, b_pad]
    has_res = residual is not None
    if has_res:
        r = residual
        if r.dtype != jnp.bfloat16:
            r = r.astype(jnp.bfloat16)
        rM, rN = r.shape
        if (Mp, Np) != (rM, rN):
            r = jnp.pad(r, ((0, Mp - rM), (0, Np - rN)))
        in_specs.append(pl.BlockSpec((tm, tn), lambda i, j, k: (i, j)))
        args.append(r)

    out_bytes = Mp * Np * jnp.dtype(out_dtype).itemsize
    cost = pl.CostEstimate(
        flops=2 * Mp * Np * Kp,
        transcendentals=0,
        bytes_accessed=(Mp * Kp * 2 + Kp * Np * 2 + Np * 4
                        + (Mp * Np * 2 if has_res else 0) + out_bytes))

    out = pl.pallas_call(
        functools.partial(_fused_matmul_kernel, relu=relu, has_res=has_res),
        out_shape=jax.ShapeDtypeStruct((Mp, Np), out_dtype),
        grid_spec=pltpu.PrefetchScalarGridSpec(
            num_scalar_prefetch=0,
            grid=(Mp // tm, Np // tn, Kp // tk),
            in_specs=in_specs,
            out_specs=pl.BlockSpec((tm, tn), lambda i, j, k: (i, j)),
            scratch_shapes=[pltpu.VMEM((tm, tn), jnp.float32)]),
        compiler_params=pltpu.CompilerParams(
            dimension_semantics=("parallel", "parallel", "arbitrary"),
            vmem_limit_bytes=32 * 1024 * 1024),
        cost_estimate=cost,
    )(*args)
    return out[:M, :n_true]


# ------------------------------ JAX glue ops --------------------------------

def im2col(x, kh, kw, stride, pad):
    """x: (N, H, W, C) bf16 -> (N, Ho, Wo, kh*kw*C) patch matrix."""
    # TODO(synk): fuse patch extraction into the conv kernel (tap-indexed K
    # grid axis / halo BlockSpecs) to remove the kh*kw HBM read amplification
    # of this explicit im2col.
    N, H, W, C = x.shape
    xp = jnp.pad(x, ((0, 0), (pad, pad), (pad, pad), (0, 0)))
    Ho = (H + 2 * pad - kh) // stride + 1
    Wo = (W + 2 * pad - kw) // stride + 1
    cols = []
    for i in range(kh):
        for j in range(kw):
            cols.append(xp[:, i:i + stride * Ho:stride,
                           j:j + stride * Wo:stride, :])
    return jnp.concatenate(cols, axis=-1), Ho, Wo


def conv_bn(x, layer, *, relu, residual=None):
    """Conv2d + folded BatchNorm (+residual) (+ReLU) via im2col + fused matmul."""
    kh, kw, cin, cout = layer["kh"], layer["kw"], layer["cin"], layer["cout"]
    cols, Ho, Wo = im2col(x, kh, kw, layer["stride"], layer["pad"])
    N = x.shape[0]
    M = N * Ho * Wo
    res2d = residual.reshape(M, cout) if residual is not None else None
    y = fused_matmul(cols.reshape(M, kh * kw * cin), layer["w"], layer["b"],
                     cout, relu=relu, residual=res2d)
    return y.reshape(N, Ho, Wo, cout)


def basic_block(x, blk):
    out = conv_bn(x, blk["conv1"], relu=True)
    ident = (conv_bn(x, blk["downsample"], relu=False)
             if "downsample" in blk else x)
    # conv2 + BN + residual add + ReLU, all in one kernel epilogue.
    return conv_bn(out, blk["conv2"], relu=True, residual=ident)


def resnet_forward(p, x):
    x = conv_bn(x, p["conv1"], relu=True)
    # TODO(synk): 3x3/2 max-pool kept as XLA reduce_window glue (tiny op).
    x = lax.reduce_window(x, jnp.array(-jnp.inf, x.dtype), lax.max,
                          (1, 3, 3, 1), (1, 2, 2, 1),
                          [(0, 0), (1, 1), (1, 1), (0, 0)])
    for blocks in p["layers"]:
        for blk in blocks:
            x = basic_block(x, blk)
    # Global average pool fused into the fc matmul:
    #   mean_{h,w}(x) @ Wfc == x.reshape(N, H*W*C) @ tile(Wfc, (H*W, 1)) / (H*W)
    N, H, W, C = x.shape
    w_fc, b_fc, ncls = p["fc"]["w"], p["fc"]["b"], p["fc"]["n"]
    K = H * W * C
    Kp, Np = _round_up(K, 128), _round_up(ncls, 128)
    w_pool = jnp.tile(w_fc, (H * W, 1)) / float(H * W)
    w_pool = jnp.pad(w_pool, ((0, Kp - K), (0, Np - ncls))).astype(jnp.bfloat16)
    b_pool = jnp.pad(b_fc.reshape(1, ncls), ((0, 0), (0, Np - ncls)))
    return fused_matmul(x.reshape(N, K), w_pool, b_pool, ncls, relu=False)


def jigresnet_forward(params, x):
    B, T, C, H, W = x.shape
    # Fold the 9 jigsaw tiles into the batch: the backbone (and every Pallas
    # matmul) runs once on B*9 rows instead of an unrolled 9x Python loop.
    xt = jnp.transpose(x, (0, 1, 3, 4, 2)).astype(jnp.bfloat16)   # -> NHWC
    xt = xt.reshape(B * T, H, W, C)
    feats = resnet_forward(params["resnet"], xt)          # (B*9, n_res)
    # Row b*T+t == resnet(tile t of sample b), so this reshape matches
    # torch.cat([...], 1).view(B, -1) ordering exactly.
    z = feats.reshape(B, T * feats.shape[-1])
    # fc7: Linear + ReLU (+ Dropout p=0.5 -> identity at eval time), fused.
    z = fused_matmul(z, params["fc7"]["w"], params["fc7"]["b"],
                     params["fc7"]["n"], relu=True)
    # classifier fc8
    z = fused_matmul(z, params["fc8"]["w"], params["fc8"]["b"],
                     params["fc8"]["n"], relu=False, out_dtype=jnp.float32)
    return z


# --------------------------- parameter creation -----------------------------

def make_conv_bn(key, cin, cout, k, stride, pad, eps=1e-5):
    kw_, kg_, kbeta, kmean, kvar = jax.random.split(key, 5)
    fan_in = cin * k * k
    w = jax.random.normal(kw_, (cout, cin, k, k), jnp.float32) / math.sqrt(fan_in)
    gamma = 1.0 + 0.1 * jax.random.normal(kg_, (cout,), jnp.float32)
    beta = 0.1 * jax.random.normal(kbeta, (cout,), jnp.float32)
    mean = 0.1 * jax.random.normal(kmean, (cout,), jnp.float32)
    var = 1.0 + 0.1 * jnp.abs(jax.random.normal(kvar, (cout,), jnp.float32))
    scale = gamma / jnp.sqrt(var + eps)                  # fold BN (eval mode)
    w_f = w * scale[:, None, None, None]
    b_f = beta - mean * scale
    # OIHW -> (kh, kw, Cin, Cout) -> (K, N), then pad K/N to 128 and cast bf16.
    w_f = jnp.transpose(w_f, (2, 3, 1, 0)).reshape(k * k * cin, cout)
    K = k * k * cin
    Kp, Np = _round_up(K, 128), _round_up(cout, 128)
    w_p = jnp.pad(w_f, ((0, Kp - K), (0, Np - cout))).astype(jnp.bfloat16)
    b_p = jnp.pad(b_f.reshape(1, cout), ((0, 0), (0, Np - cout)))   # f32
    return {"w": w_p, "b": b_p, "kh": k, "kw": k, "cin": cin, "cout": cout,
            "stride": stride, "pad": pad}


def make_linear(key, in_f, out_f, xavier=False, pad=True):
    kw_, kb_ = jax.random.split(key)
    wb = math.sqrt(6.0 / (in_f + out_f)) if xavier else 1.0 / math.sqrt(in_f)
    bb = 1.0 / math.sqrt(in_f)
    w = jax.random.uniform(kw_, (in_f, out_f), jnp.float32, -wb, wb)
    b = jax.random.uniform(kb_, (out_f,), jnp.float32, -bb, bb)
    if not pad:                       # kept raw for the avgpool+fc fusion
        return {"w": w, "b": b, "n": out_f, "k": in_f}
    Kp, Np = _round_up(in_f, 128), _round_up(out_f, 128)
    w_p = jnp.pad(w, ((0, Kp - in_f), (0, Np - out_f))).astype(jnp.bfloat16)
    b_p = jnp.pad(b.reshape(1, out_f), ((0, 0), (0, Np - out_f)))   # f32
    return {"w": w_p, "b": b_p, "n": out_f, "k": in_f}


def init_resnet(key, base=8, num_classes=16):
    keys = iter(jax.random.split(key, 32))
    p = {"conv1": make_conv_bn(next(keys), 3, base, 7, 2, 3)}
    channels = [base, base * 2, base * 4, base * 8]
    layers, in_ch = [], base
    for s, ch in enumerate(channels):
        blocks = []
        for bi in range(2):
            stride = 2 if (s > 0 and bi == 0) else 1
            blk = {"conv1": make_conv_bn(next(keys), in_ch, ch, 3, stride, 1),
                   "conv2": make_conv_bn(next(keys), ch, ch, 3, 1, 1)}
            if stride != 1 or in_ch != ch:
                blk["downsample"] = make_conv_bn(next(keys), in_ch, ch, 1, stride, 0)
            blocks.append(blk)
            in_ch = ch
        layers.append(blocks)
    p["layers"] = layers
    p["fc"] = make_linear(next(keys), channels[-1], num_classes, pad=False)
    return p


# --------------------------------- main --------------------------------------

if __name__ == "__main__":
    key = jax.random.PRNGKey(0)
    k_in, k_res, k7, k8 = jax.random.split(key, 4)

    # Scaled-down analog of (resnet18 -> 1000, fc7 9*1000 -> 4096, fc8 -> 1000).
    BASE, RES_CLASSES, FC7_DIM, CLASSES = 8, 16, 64, 10

    params = {
        "resnet": init_resnet(k_res, base=BASE, num_classes=RES_CLASSES),
        "fc7": make_linear(k7, 9 * RES_CLASSES, FC7_DIM, xavier=True),
        "fc8": make_linear(k8, FC7_DIM, CLASSES, xavier=True),
    }

    B, T, C, H, W = 2, 9, 3, 32, 32
    x = jax.random.normal(k_in, (B, T, C, H, W), jnp.float32)

    fwd = jax.jit(functools.partial(jigresnet_forward, params))
    out = jax.block_until_ready(fwd(x))
    assert out.shape == (B, CLASSES), out.shape
    assert jnp.all(jnp.isfinite(out))
    print("KERNEL_OK")
</pallas_src>

<mosaic_0001>
module attributes {stable_mosaic.version = 11 : i64} {
  func.func @_fused_matmul_kernel(%arg0: i32, %arg1: i32, %arg2: i32, %arg3: memref<512x256xbf16, #tpu.memory_space<vmem>>, %arg4: memref<256x128xbf16, #tpu.memory_space<vmem>>, %arg5: memref<1x128xf32, #tpu.memory_space<vmem>>, %arg6: memref<512x128xbf16, #tpu.memory_space<vmem>>, %arg7: memref<512x128xf32, #tpu.memory_space<vmem>>) attributes {dimension_semantics = [#tpu.dimension_semantics<parallel>, #tpu.dimension_semantics<parallel>, #tpu.dimension_semantics<arbitrary>], iteration_bounds = array<i64: 9, 1, 1>, scalar_prefetch = 0 : i64, scratch_operands = 1 : i64, tpu.core_type = #tpu.core_type<tc>, window_params = [{transform_indices = @transform_0, window_bounds = array<i64: 512, 256>}, {transform_indices = @transform_1, window_bounds = array<i64: 256, 128>}, {transform_indices = @transform_2, window_bounds = array<i64: 1, 128>}, {transform_indices = @transform_3, window_bounds = array<i64: 512, 128>}]} {
    %c0_i32 = arith.constant 0 : i32
    %0 = arith.cmpi eq, %arg2, %c0_i32 : i32
    %1 = arith.extui %0 : i1 to i32
    %c0_i32_0 = arith.constant 0 : i32
    %2 = arith.cmpi ne, %1, %c0_i32_0 : i32
    scf.if %2 {
      %cst_10 = arith.constant 0.000000e+00 : f32
      %12 = vector.broadcast %cst_10 : f32 to vector<512x128xf32>
      %c0_11 = arith.constant 0 : index
      %c0_12 = arith.constant 0 : index
      %13 = vector.load %arg7[%c0_11, %c0_12] : memref<512x128xf32, #tpu.memory_space<vmem>>, vector<512x128xf32>
      tpu.vector_store %arg7[%c0_11, %c0_12], %12 {strides = array<i32>} : memref<512x128xf32, #tpu.memory_space<vmem>>, vector<512x128xf32>,
    } else {
    }
    %c0 = arith.constant 0 : index
    %c0_1 = arith.constant 0 : index
    %3 = vector.load %arg7[%c0, %c0_1] : memref<512x128xf32, #tpu.memory_space<vmem>>, vector<512x128xf32>
    %c0_2 = arith.constant 0 : index
    %c0_3 = arith.constant 0 : index
    %4 = vector.load %arg3[%c0_2, %c0_3] : memref<512x256xbf16, #tpu.memory_space<vmem>>, vector<512x256xbf16>
    %c0_4 = arith.constant 0 : index
    %c0_5 = arith.constant 0 : index
    %5 = vector.load %arg4[%c0_4, %c0_5] : memref<256x128xbf16, #tpu.memory_space<vmem>>, vector<256x128xbf16>
    %cst = arith.constant dense<0.000000e+00> : vector<512x128xf32>
    %6 = tpu.matmul %4, %5, %cst {dimension_numbers = #tpu.dot_dimension_numbers<[1], [0], [0], [1], [0, 0, 1, 1], [], []>} : vector<512x256xbf16>, vector<256x128xbf16>, vector<512x128xf32> -> vector<512x128xf32>
    %7 = arith.addf %3, %6 : vector<512x128xf32>
    %c0_6 = arith.constant 0 : index
    %c0_7 = arith.constant 0 : index
    %8 = vector.load %arg7[%c0_6, %c0_7] : memref<512x128xf32, #tpu.memory_space<vmem>>, vector<512x128xf32>
    tpu.vector_store %arg7[%c0_6, %c0_7], %7 {strides = array<i32>} : memref<512x128xf32, #tpu.memory_space<vmem>>, vector<512x128xf32>,
    %c0_i32_8 = arith.constant 0 : i32
    %9 = arith.cmpi eq, %arg2, %c0_i32_8 : i32
    %10 = arith.extui %9 : i1 to i32
    %c0_i32_9 = arith.constant 0 : i32
    %11 = arith.cmpi ne, %10, %c0_i32_9 : i32
    scf.if %11 {
      %c0_10 = arith.constant 0 : index
      %c0_11 = arith.constant 0 : index
      %12 = vector.load %arg7[%c0_10, %c0_11] : memref<512x128xf32, #tpu.memory_space<vmem>>, vector<512x128xf32>
      %c0_12 = arith.constant 0 : index
      %c0_13 = arith.constant 0 : index
      %13 = vector.load %arg5[%c0_12, %c0_13] : memref<1x128xf32, #tpu.memory_space<vmem>>, vector<1x128xf32>
      %14 = vector.broadcast %13 : vector<1x128xf32> to vector<512x128xf32>
      %15 = arith.addf %12, %14 : vector<512x128xf32>
      %cst_14 = arith.constant 0.000000e+00 : f32
      %16 = vector.broadcast %cst_14 : f32 to vector<512x128xf32>
      %17 = arith.maximumf %15, %16 : vector<512x128xf32>
      %18 = arith.truncf %17 : vector<512x128xf32> to vector<512x128xbf16>
      %c0_15 = arith.constant 0 : index
      %c0_16 = arith.constant 0 : index
      %19 = vector.load %arg6[%c0_15, %c0_16] : memref<512x128xbf16, #tpu.memory_space<vmem>>, vector<512x128xbf16>
      tpu.vector_store %arg6[%c0_15, %c0_16], %18 {strides = array<i32>} : memref<512x128xbf16, #tpu.memory_space<vmem>>, vector<512x128xbf16>,
    } else {
    }
    return
  }
  func.func @transform_0(%arg0: i32, %arg1: i32, %arg2: i32) -> (i32, i32) {
    %c0_i32 = arith.constant 0 : i32
    return %arg0, %arg2 : i32, i32
  }
  func.func @transform_1(%arg0: i32, %arg1: i32, %arg2: i32) -> (i32, i32) {
    %c0_i32 = arith.constant 0 : i32
    return %arg2, %arg1 : i32, i32
  }
  func.func @transform_2(%arg0: i32, %arg1: i32, %arg2: i32) -> (i32, i32) {
    %c0_i32 = arith.constant 0 : i32
    %c0_i32_0 = arith.constant 0 : i32
    return %c0_i32, %arg1 : i32, i32
  }
  func.func @transform_3(%arg0: i32, %arg1: i32, %arg2: i32) -> (i32, i32) {
    %c0_i32 = arith.constant 0 : i32
    return %arg0, %arg1 : i32, i32
  }
}

module attributes {stable_mosaic.version = 11 : i64} {
  func.func @_fused_matmul_kernel(%arg0: i32, %arg1: i32, %arg2: i32, %arg3: memref<384x128xbf16, #tpu.memory_space<vmem>>, %arg4: memref<128x128xbf16, #tpu.memory_space<vmem>>, %arg5: memref<1x128xf32, #tpu.memory_space<vmem>>, %arg6: memref<384x128xbf16, #tpu.memory_space<vmem>>, %arg7: memref<384x128xf32, #tpu.memory_space<vmem>>) attributes {dimension_semantics = [#tpu.dimension_semantics<parallel>, #tpu.dimension_semantics<parallel>, #tpu.dimension_semantics<arbitrary>], iteration_bounds = array<i64: 3, 1, 1>, scalar_prefetch = 0 : i64, scratch_operands = 1 : i64, tpu.core_type = #tpu.core_type<tc>, window_params = [{transform_indices = @transform_0, window_bounds = array<i64: 384, 128>}, {transform_indices = @transform_1, window_bounds = array<i64: 128, 128>}, {transform_indices = @transform_2, window_bounds = array<i64: 1, 128>}, {transform_indices = @transform_3, window_bounds = array<i64: 384, 128>}]} {
    %c0_i32 = arith.constant 0 : i32
    %0 = arith.cmpi eq, %arg2, %c0_i32 : i32
    %1 = arith.extui %0 : i1 to i32
    %c0_i32_0 = arith.constant 0 : i32
    %2 = arith.cmpi ne, %1, %c0_i32_0 : i32
    scf.if %2 {
      %cst_10 = arith.constant 0.000000e+00 : f32
      %12 = vector.broadcast %cst_10 : f32 to vector<384x128xf32>
      %c0_11 = arith.constant 0 : index
      %c0_12 = arith.constant 0 : index
      %13 = vector.load %arg7[%c0_11, %c0_12] : memref<384x128xf32, #tpu.memory_space<vmem>>, vector<384x128xf32>
      tpu.vector_store %arg7[%c0_11, %c0_12], %12 {strides = array<i32>} : memref<384x128xf32, #tpu.memory_space<vmem>>, vector<384x128xf32>,
    } else {
    }
    %c0 = arith.constant 0 : index
    %c0_1 = arith.constant 0 : index
    %3 = vector.load %arg7[%c0, %c0_1] : memref<384x128xf32, #tpu.memory_space<vmem>>, vector<384x128xf32>
    %c0_2 = arith.constant 0 : index
    %c0_3 = arith.constant 0 : index
    %4 = vector.load %arg3[%c0_2, %c0_3] : memref<384x128xbf16, #tpu.memory_space<vmem>>, vector<384x128xbf16>
    %c0_4 = arith.constant 0 : index
    %c0_5 = arith.constant 0 : index
    %5 = vector.load %arg4[%c0_4, %c0_5] : memref<128x128xbf16, #tpu.memory_space<vmem>>, vector<128x128xbf16>
    %cst = arith.constant dense<0.000000e+00> : vector<384x128xf32>
    %6 = tpu.matmul %4, %5, %cst {dimension_numbers = #tpu.dot_dimension_numbers<[1], [0], [0], [1], [0, 0, 1, 1], [], []>} : vector<384x128xbf16>, vector<128x128xbf16>, vector<384x128xf32> -> vector<384x128xf32>
    %7 = arith.addf %3, %6 : vector<384x128xf32>
    %c0_6 = arith.constant 0 : index
    %c0_7 = arith.constant 0 : index
    %8 = vector.load %arg7[%c0_6, %c0_7] : memref<384x128xf32, #tpu.memory_space<vmem>>, vector<384x128xf32>
    tpu.vector_store %arg7[%c0_6, %c0_7], %7 {strides = array<i32>} : memref<384x128xf32, #tpu.memory_space<vmem>>, vector<384x128xf32>,
    %c0_i32_8 = arith.constant 0 : i32
    %9 = arith.cmpi eq, %arg2, %c0_i32_8 : i32
    %10 = arith.extui %9 : i1 to i32
    %c0_i32_9 = arith.constant 0 : i32
    %11 = arith.cmpi ne, %10, %c0_i32_9 : i32
    scf.if %11 {
      %c0_10 = arith.constant 0 : index
      %c0_11 = arith.constant 0 : index
      %12 = vector.load %arg7[%c0_10, %c0_11] : memref<384x128xf32, #tpu.memory_space<vmem>>, vector<384x128xf32>
      %c0_12 = arith.constant 0 : index
      %c0_13 = arith.constant 0 : index
      %13 = vector.load %arg5[%c0_12, %c0_13] : memref<1x128xf32, #tpu.memory_space<vmem>>, vector<1x128xf32>
      %14 = vector.broadcast %13 : vector<1x128xf32> to vector<384x128xf32>
      %15 = arith.addf %12, %14 : vector<384x128xf32>
      %cst_14 = arith.constant 0.000000e+00 : f32
      %16 = vector.broadcast %cst_14 : f32 to vector<384x128xf32>
      %17 = arith.maximumf %15, %16 : vector<384x128xf32>
      %18 = arith.truncf %17 : vector<384x128xf32> to vector<384x128xbf16>
      %c0_15 = arith.constant 0 : index
      %c0_16 = arith.constant 0 : index
      %19 = vector.load %arg6[%c0_15, %c0_16] : memref<384x128xbf16, #tpu.memory_space<vmem>>, vector<384x128xbf16>
      tpu.vector_store %arg6[%c0_15, %c0_16], %18 {strides = array<i32>} : memref<384x128xbf16, #tpu.memory_space<vmem>>, vector<384x128xbf16>,
    } else {
    }
    return
  }
  func.func @transform_0(%arg0: i32, %arg1: i32, %arg2: i32) -> (i32, i32) {
    %c0_i32 = arith.constant 0 : i32
    return %arg0, %arg2 : i32, i32
  }
  func.func @transform_1(%arg0: i32, %arg1: i32, %arg2: i32) -> (i32, i32) {
    %c0_i32 = arith.constant 0 : i32
    return %arg2, %arg1 : i32, i32
  }
  func.func @transform_2(%arg0: i32, %arg1: i32, %arg2: i32) -> (i32, i32) {
    %c0_i32 = arith.constant 0 : i32
    %c0_i32_0 = arith.constant 0 : i32
    return %c0_i32, %arg1 : i32, i32
  }
  func.func @transform_3(%arg0: i32, %arg1: i32, %arg2: i32) -> (i32, i32) {
    %c0_i32 = arith.constant 0 : i32
    return %arg0, %arg1 : i32, i32
  }
}

module attributes {stable_mosaic.version = 11 : i64} {
  func.func @_fused_matmul_kernel(%arg0: i32, %arg1: i32, %arg2: i32, %arg3: memref<384x128xbf16, #tpu.memory_space<vmem>>, %arg4: memref<128x128xbf16, #tpu.memory_space<vmem>>, %arg5: memref<1x128xf32, #tpu.memory_space<vmem>>, %arg6: memref<384x128xbf16, #tpu.memory_space<vmem>>, %arg7: memref<384x128xbf16, #tpu.memory_space<vmem>>, %arg8: memref<384x128xf32, #tpu.memory_space<vmem>>) attributes {dimension_semantics = [#tpu.dimension_semantics<parallel>, #tpu.dimension_semantics<parallel>, #tpu.dimension_semantics<arbitrary>], iteration_bounds = array<i64: 3, 1, 1>, scalar_prefetch = 0 : i64, scratch_operands = 1 : i64, tpu.core_type = #tpu.core_type<tc>, window_params = [{transform_indices = @transform_0, window_bounds = array<i64: 384, 128>}, {transform_indices = @transform_1, window_bounds = array<i64: 128, 128>}, {transform_indices = @transform_2, window_bounds = array<i64: 1, 128>}, {transform_indices = @transform_3, window_bounds = array<i64: 384, 128>}, {transform_indices = @transform_4, window_bounds = array<i64: 384, 128>}]} {
    %c0_i32 = arith.constant 0 : i32
    %0 = arith.cmpi eq, %arg2, %c0_i32 : i32
    %1 = arith.extui %0 : i1 to i32
    %c0_i32_0 = arith.constant 0 : i32
    %2 = arith.cmpi ne, %1, %c0_i32_0 : i32
    scf.if %2 {
      %cst_10 = arith.constant 0.000000e+00 : f32
      %12 = vector.broadcast %cst_10 : f32 to vector<384x128xf32>
      %c0_11 = arith.constant 0 : index
      %c0_12 = arith.constant 0 : index
      %13 = vector.load %arg8[%c0_11, %c0_12] : memref<384x128xf32, #tpu.memory_space<vmem>>, vector<384x128xf32>
      tpu.vector_store %arg8[%c0_11, %c0_12], %12 {strides = array<i32>} : memref<384x128xf32, #tpu.memory_space<vmem>>, vector<384x128xf32>,
    } else {
    }
    %c0 = arith.constant 0 : index
    %c0_1 = arith.constant 0 : index
    %3 = vector.load %arg8[%c0, %c0_1] : memref<384x128xf32, #tpu.memory_space<vmem>>, vector<384x128xf32>
    %c0_2 = arith.constant 0 : index
    %c0_3 = arith.constant 0 : index
    %4 = vector.load %arg3[%c0_2, %c0_3] : memref<384x128xbf16, #tpu.memory_space<vmem>>, vector<384x128xbf16>
    %c0_4 = arith.constant 0 : index
    %c0_5 = arith.constant 0 : index
    %5 = vector.load %arg4[%c0_4, %c0_5] : memref<128x128xbf16, #tpu.memory_space<vmem>>, vector<128x128xbf16>
    %cst = arith.constant dense<0.000000e+00> : vector<384x128xf32>
    %6 = tpu.matmul %4, %5, %cst {dimension_numbers = #tpu.dot_dimension_numbers<[1], [0], [0], [1], [0, 0, 1, 1], [], []>} : vector<384x128xbf16>, vector<128x128xbf16>, vector<384x128xf32> -> vector<384x128xf32>
    %7 = arith.addf %3, %6 : vector<384x128xf32>
    %c0_6 = arith.constant 0 : index
    %c0_7 = arith.constant 0 : index
    %8 = vector.load %arg8[%c0_6, %c0_7] : memref<384x128xf32, #tpu.memory_space<vmem>>, vector<384x128xf32>
    tpu.vector_store %arg8[%c0_6, %c0_7], %7 {strides = array<i32>} : memref<384x128xf32, #tpu.memory_space<vmem>>, vector<384x128xf32>,
    %c0_i32_8 = arith.constant 0 : i32
    %9 = arith.cmpi eq, %arg2, %c0_i32_8 : i32
    %10 = arith.extui %9 : i1 to i32
    %c0_i32_9 = arith.constant 0 : i32
    %11 = arith.cmpi ne, %10, %c0_i32_9 : i32
    scf.if %11 {
      %c0_10 = arith.constant 0 : index
      %c0_11 = arith.constant 0 : index
      %12 = vector.load %arg8[%c0_10, %c0_11] : memref<384x128xf32, #tpu.memory_space<vmem>>, vector<384x128xf32>
      %c0_12 = arith.constant 0 : index
      %c0_13 = arith.constant 0 : index
      %13 = vector.load %arg5[%c0_12, %c0_13] : memref<1x128xf32, #tpu.memory_space<vmem>>, vector<1x128xf32>
      %14 = vector.broadcast %13 : vector<1x128xf32> to vector<384x128xf32>
      %15 = arith.addf %12, %14 : vector<384x128xf32>
      %c0_14 = arith.constant 0 : index
      %c0_15 = arith.constant 0 : index
      %16 = vector.load %arg6[%c0_14, %c0_15] : memref<384x128xbf16, #tpu.memory_space<vmem>>, vector<384x128xbf16>
      %17 = arith.extf %16 : vector<384x128xbf16> to vector<384x128xf32>
      %18 = arith.addf %15, %17 : vector<384x128xf32>
      %cst_16 = arith.constant 0.000000e+00 : f32
      %19 = vector.broadcast %cst_16 : f32 to vector<384x128xf32>
      %20 = arith.maximumf %18, %19 : vector<384x128xf32>
      %21 = arith.truncf %20 : vector<384x128xf32> to vector<384x128xbf16>
      %c0_17 = arith.constant 0 : index
      %c0_18 = arith.constant 0 : index
      %22 = vector.load %arg7[%c0_17, %c0_18] : memref<384x128xbf16, #tpu.memory_space<vmem>>, vector<384x128xbf16>
      tpu.vector_store %arg7[%c0_17, %c0_18], %21 {strides = array<i32>} : memref<384x128xbf16, #tpu.memory_space<vmem>>, vector<384x128xbf16>,
    } else {
    }
    return
  }
  func.func @transform_0(%arg0: i32, %arg1: i32, %arg2: i32) -> (i32, i32) {
    %c0_i32 = arith.constant 0 : i32
    return %arg0, %arg2 : i32, i32
  }
  func.func @transform_1(%arg0: i32, %arg1: i32, %arg2: i32) -> (i32, i32) {
    %c0_i32 = arith.constant 0 : i32
    return %arg2, %arg1 : i32, i32
  }
  func.func @transform_2(%arg0: i32, %arg1: i32, %arg2: i32) -> (i32, i32) {
    %c0_i32 = arith.constant 0 : i32
    %c0_i32_0 = arith.constant 0 : i32
    return %c0_i32, %arg1 : i32, i32
  }
  func.func @transform_3(%arg0: i32, %arg1: i32, %arg2: i32) -> (i32, i32) {
    %c0_i32 = arith.constant 0 : i32
    return %arg0, %arg1 : i32, i32
  }
  func.func @transform_4(%arg0: i32, %arg1: i32, %arg2: i32) -> (i32, i32) {
    %c0_i32 = arith.constant 0 : i32
    return %arg0, %arg1 : i32, i32
  }
}

module attributes {stable_mosaic.version = 11 : i64} {
  func.func @_fused_matmul_kernel(%arg0: i32, %arg1: i32, %arg2: i32, %arg3: memref<128x128xbf16, #tpu.memory_space<vmem>>, %arg4: memref<128x128xbf16, #tpu.memory_space<vmem>>, %arg5: memref<1x128xf32, #tpu.memory_space<vmem>>, %arg6: memref<128x128xbf16, #tpu.memory_space<vmem>>, %arg7: memref<128x128xf32, #tpu.memory_space<vmem>>) attributes {dimension_semantics = [#tpu.dimension_semantics<parallel>, #tpu.dimension_semantics<parallel>, #tpu.dimension_semantics<arbitrary>], iteration_bounds = array<i64: 3, 1, 1>, scalar_prefetch = 0 : i64, scratch_operands = 1 : i64, tpu.core_type = #tpu.core_type<tc>, window_params = [{transform_indices = @transform_0, window_bounds = array<i64: 128, 128>}, {transform_indices = @transform_1, window_bounds = array<i64: 128, 128>}, {transform_indices = @transform_2, window_bounds = array<i64: 1, 128>}, {transform_indices = @transform_3, window_bounds = array<i64: 128, 128>}]} {
    %c0_i32 = arith.constant 0 : i32
    %0 = arith.cmpi eq, %arg2, %c0_i32 : i32
    %1 = arith.extui %0 : i1 to i32
    %c0_i32_0 = arith.constant 0 : i32
    %2 = arith.cmpi ne, %1, %c0_i32_0 : i32
    scf.if %2 {
      %cst_10 = arith.constant 0.000000e+00 : f32
      %12 = vector.broadcast %cst_10 : f32 to vector<128x128xf32>
      %c0_11 = arith.constant 0 : index
      %c0_12 = arith.constant 0 : index
      %13 = vector.load %arg7[%c0_11, %c0_12] : memref<128x128xf32, #tpu.memory_space<vmem>>, vector<128x128xf32>
      tpu.vector_store %arg7[%c0_11, %c0_12], %12 {strides = array<i32>} : memref<128x128xf32, #tpu.memory_space<vmem>>, vector<128x128xf32>,
    } else {
    }
    %c0 = arith.constant 0 : index
    %c0_1 = arith.constant 0 : index
    %3 = vector.load %arg7[%c0, %c0_1] : memref<128x128xf32, #tpu.memory_space<vmem>>, vector<128x128xf32>
    %c0_2 = arith.constant 0 : index
    %c0_3 = arith.constant 0 : index
    %4 = vector.load %arg3[%c0_2, %c0_3] : memref<128x128xbf16, #tpu.memory_space<vmem>>, vector<128x128xbf16>
    %c0_4 = arith.constant 0 : index
    %c0_5 = arith.constant 0 : index
    %5 = vector.load %arg4[%c0_4, %c0_5] : memref<128x128xbf16, #tpu.memory_space<vmem>>, vector<128x128xbf16>
    %cst = arith.constant dense<0.000000e+00> : vector<128x128xf32>
    %6 = tpu.matmul %4, %5, %cst {dimension_numbers = #tpu.dot_dimension_numbers<[1], [0], [0], [1], [0, 0, 1, 1], [], []>} : vector<128x128xbf16>, vector<128x128xbf16>, vector<128x128xf32> -> vector<128x128xf32>
    %7 = arith.addf %3, %6 : vector<128x128xf32>
    %c0_6 = arith.constant 0 : index
    %c0_7 = arith.constant 0 : index
    %8 = vector.load %arg7[%c0_6, %c0_7] : memref<128x128xf32, #tpu.memory_space<vmem>>, vector<128x128xf32>
    tpu.vector_store %arg7[%c0_6, %c0_7], %7 {strides = array<i32>} : memref<128x128xf32, #tpu.memory_space<vmem>>, vector<128x128xf32>,
    %c0_i32_8 = arith.constant 0 : i32
    %9 = arith.cmpi eq, %arg2, %c0_i32_8 : i32
    %10 = arith.extui %9 : i1 to i32
    %c0_i32_9 = arith.constant 0 : i32
    %11 = arith.cmpi ne, %10, %c0_i32_9 : i32
    scf.if %11 {
      %c0_10 = arith.constant 0 : index
      %c0_11 = arith.constant 0 : index
      %12 = vector.load %arg7[%c0_10, %c0_11] : memref<128x128xf32, #tpu.memory_space<vmem>>, vector<128x128xf32>
      %c0_12 = arith.constant 0 : index
      %c0_13 = arith.constant 0 : index
      %13 = vector.load %arg5[%c0_12, %c0_13] : memref<1x128xf32, #tpu.memory_space<vmem>>, vector<1x128xf32>
      %14 = vector.broadcast %13 : vector<1x128xf32> to vector<128x128xf32>
      %15 = arith.addf %12, %14 : vector<128x128xf32>
      %cst_14 = arith.constant 0.000000e+00 : f32
      %16 = vector.broadcast %cst_14 : f32 to vector<128x128xf32>
      %17 = arith.maximumf %15, %16 : vector<128x128xf32>
      %18 = arith.truncf %17 : vector<128x128xf32> to vector<128x128xbf16>
      %c0_15 = arith.constant 0 : index
      %c0_16 = arith.constant 0 : index
      %19 = vector.load %arg6[%c0_15, %c0_16] : memref<128x128xbf16, #tpu.memory_space<vmem>>, vector<128x128xbf16>
      tpu.vector_store %arg6[%c0_15, %c0_16], %18 {strides = array<i32>} : memref<128x128xbf16, #tpu.memory_space<vmem>>, vector<128x128xbf16>,
    } else {
    }
    return
  }
  func.func @transform_0(%arg0: i32, %arg1: i32, %arg2: i32) -> (i32, i32) {
    %c0_i32 = arith.constant 0 : i32
    return %arg0, %arg2 : i32, i32
  }
  func.func @transform_1(%arg0: i32, %arg1: i32, %arg2: i32) -> (i32, i32) {
    %c0_i32 = arith.constant 0 : i32
    return %arg2, %arg1 : i32, i32
  }
  func.func @transform_2(%arg0: i32, %arg1: i32, %arg2: i32) -> (i32, i32) {
    %c0_i32 = arith.constant 0 : i32
    %c0_i32_0 = arith.constant 0 : i32
    return %c0_i32, %arg1 : i32, i32
  }
  func.func @transform_3(%arg0: i32, %arg1: i32, %arg2: i32) -> (i32, i32) {
    %c0_i32 = arith.constant 0 : i32
    return %arg0, %arg1 : i32, i32
  }
}

module attributes {stable_mosaic.version = 11 : i64} {
  func.func @_fused_matmul_kernel(%arg0: i32, %arg1: i32, %arg2: i32, %arg3: memref<128x128xbf16, #tpu.memory_space<vmem>>, %arg4: memref<128x128xbf16, #tpu.memory_space<vmem>>, %arg5: memref<1x128xf32, #tpu.memory_space<vmem>>, %arg6: memref<128x128xbf16, #tpu.memory_space<vmem>>, %arg7: memref<128x128xf32, #tpu.memory_space<vmem>>) attributes {dimension_semantics = [#tpu.dimension_semantics<parallel>, #tpu.dimension_semantics<parallel>, #tpu.dimension_semantics<arbitrary>], iteration_bounds = array<i64: 3, 1, 1>, scalar_prefetch = 0 : i64, scratch_operands = 1 : i64, tpu.core_type = #tpu.core_type<tc>, window_params = [{transform_indices = @transform_0, window_bounds = array<i64: 128, 128>}, {transform_indices = @transform_1, window_bounds = array<i64: 128, 128>}, {transform_indices = @transform_2, window_bounds = array<i64: 1, 128>}, {transform_indices = @transform_3, window_bounds = array<i64: 128, 128>}]} {
    %c0_i32 = arith.constant 0 : i32
    %0 = arith.cmpi eq, %arg2, %c0_i32 : i32
    %1 = arith.extui %0 : i1 to i32
    %c0_i32_0 = arith.constant 0 : i32
    %2 = arith.cmpi ne, %1, %c0_i32_0 : i32
    scf.if %2 {
      %cst_10 = arith.constant 0.000000e+00 : f32
      %12 = vector.broadcast %cst_10 : f32 to vector<128x128xf32>
      %c0_11 = arith.constant 0 : index
      %c0_12 = arith.constant 0 : index
      %13 = vector.load %arg7[%c0_11, %c0_12] : memref<128x128xf32, #tpu.memory_space<vmem>>, vector<128x128xf32>
      tpu.vector_store %arg7[%c0_11, %c0_12], %12 {strides = array<i32>} : memref<128x128xf32, #tpu.memory_space<vmem>>, vector<128x128xf32>,
    } else {
    }
    %c0 = arith.constant 0 : index
    %c0_1 = arith.constant 0 : index
    %3 = vector.load %arg7[%c0, %c0_1] : memref<128x128xf32, #tpu.memory_space<vmem>>, vector<128x128xf32>
    %c0_2 = arith.constant 0 : index
    %c0_3 = arith.constant 0 : index
    %4 = vector.load %arg3[%c0_2, %c0_3] : memref<128x128xbf16, #tpu.memory_space<vmem>>, vector<128x128xbf16>
    %c0_4 = arith.constant 0 : index
    %c0_5 = arith.constant 0 : index
    %5 = vector.load %arg4[%c0_4, %c0_5] : memref<128x128xbf16, #tpu.memory_space<vmem>>, vector<128x128xbf16>
    %cst = arith.constant dense<0.000000e+00> : vector<128x128xf32>
    %6 = tpu.matmul %4, %5, %cst {dimension_numbers = #tpu.dot_dimension_numbers<[1], [0], [0], [1], [0, 0, 1, 1], [], []>} : vector<128x128xbf16>, vector<128x128xbf16>, vector<128x128xf32> -> vector<128x128xf32>
    %7 = arith.addf %3, %6 : vector<128x128xf32>
    %c0_6 = arith.constant 0 : index
    %c0_7 = arith.constant 0 : index
    %8 = vector.load %arg7[%c0_6, %c0_7] : memref<128x128xf32, #tpu.memory_space<vmem>>, vector<128x128xf32>
    tpu.vector_store %arg7[%c0_6, %c0_7], %7 {strides = array<i32>} : memref<128x128xf32, #tpu.memory_space<vmem>>, vector<128x128xf32>,
    %c0_i32_8 = arith.constant 0 : i32
    %9 = arith.cmpi eq, %arg2, %c0_i32_8 : i32
    %10 = arith.extui %9 : i1 to i32
    %c0_i32_9 = arith.constant 0 : i32
    %11 = arith.cmpi ne, %10, %c0_i32_9 : i32
    scf.if %11 {
      %c0_10 = arith.constant 0 : index
      %c0_11 = arith.constant 0 : index
      %12 = vector.load %arg7[%c0_10, %c0_11] : memref<128x128xf32, #tpu.memory_space<vmem>>, vector<128x128xf32>
      %c0_12 = arith.constant 0 : index
      %c0_13 = arith.constant 0 : index
      %13 = vector.load %arg5[%c0_12, %c0_13] : memref<1x128xf32, #tpu.memory_space<vmem>>, vector<1x128xf32>
      %14 = vector.broadcast %13 : vector<1x128xf32> to vector<128x128xf32>
      %15 = arith.addf %12, %14 : vector<128x128xf32>
      %16 = arith.truncf %15 : vector<128x128xf32> to vector<128x128xbf16>
      %c0_14 = arith.constant 0 : index
      %c0_15 = arith.constant 0 : index
      %17 = vector.load %arg6[%c0_14, %c0_15] : memref<128x128xbf16, #tpu.memory_space<vmem>>, vector<128x128xbf16>
      tpu.vector_store %arg6[%c0_14, %c0_15], %16 {strides = array<i32>} : memref<128x128xbf16, #tpu.memory_space<vmem>>, vector<128x128xbf16>,
    } else {
    }
    return
  }
  func.func @transform_0(%arg0: i32, %arg1: i32, %arg2: i32) -> (i32, i32) {
    %c0_i32 = arith.constant 0 : i32
    return %arg0, %arg2 : i32, i32
  }
  func.func @transform_1(%arg0: i32, %arg1: i32, %arg2: i32) -> (i32, i32) {
    %c0_i32 = arith.constant 0 : i32
    return %arg2, %arg1 : i32, i32
  }
  func.func @transform_2(%arg0: i32, %arg1: i32, %arg2: i32) -> (i32, i32) {
    %c0_i32 = arith.constant 0 : i32
    %c0_i32_0 = arith.constant 0 : i32
    return %c0_i32, %arg1 : i32, i32
  }
  func.func @transform_3(%arg0: i32, %arg1: i32, %arg2: i32) -> (i32, i32) {
    %c0_i32 = arith.constant 0 : i32
    return %arg0, %arg1 : i32, i32
  }
}

module attributes {stable_mosaic.version = 11 : i64} {
  func.func @_fused_matmul_kernel(%arg0: i32, %arg1: i32, %arg2: i32, %arg3: memref<128x256xbf16, #tpu.memory_space<vmem>>, %arg4: memref<256x128xbf16, #tpu.memory_space<vmem>>, %arg5: memref<1x128xf32, #tpu.memory_space<vmem>>, %arg6: memref<128x128xbf16, #tpu.memory_space<vmem>>, %arg7: memref<128x128xbf16, #tpu.memory_space<vmem>>, %arg8: memref<128x128xf32, #tpu.memory_space<vmem>>) attributes {dimension_semantics = [#tpu.dimension_semantics<parallel>, #tpu.dimension_semantics<parallel>, #tpu.dimension_semantics<arbitrary>], iteration_bounds = array<i64: 3, 1, 1>, scalar_prefetch = 0 : i64, scratch_operands = 1 : i64, tpu.core_type = #tpu.core_type<tc>, window_params = [{transform_indices = @transform_0, window_bounds = array<i64: 128, 256>}, {transform_indices = @transform_1, window_bounds = array<i64: 256, 128>}, {transform_indices = @transform_2, window_bounds = array<i64: 1, 128>}, {transform_indices = @transform_3, window_bounds = array<i64: 128, 128>}, {transform_indices = @transform_4, window_bounds = array<i64: 128, 128>}]} {
    %c0_i32 = arith.constant 0 : i32
    %0 = arith.cmpi eq, %arg2, %c0_i32 : i32
    %1 = arith.extui %0 : i1 to i32
    %c0_i32_0 = arith.constant 0 : i32
    %2 = arith.cmpi ne, %1, %c0_i32_0 : i32
    scf.if %2 {
      %cst_10 = arith.constant 0.000000e+00 : f32
      %12 = vector.broadcast %cst_10 : f32 to vector<128x128xf32>
      %c0_11 = arith.constant 0 : index
      %c0_12 = arith.constant 0 : index
      %13 = vector.load %arg8[%c0_11, %c0_12] : memref<128x128xf32, #tpu.memory_space<vmem>>, vector<128x128xf32>
      tpu.vector_store %arg8[%c0_11, %c0_12], %12 {strides = array<i32>} : memref<128x128xf32, #tpu.memory_space<vmem>>, vector<128x128xf32>,
    } else {
    }
    %c0 = arith.constant 0 : index
    %c0_1 = arith.constant 0 : index
    %3 = vector.load %arg8[%c0, %c0_1] : memref<128x128xf32, #tpu.memory_space<vmem>>, vector<128x128xf32>
    %c0_2 = arith.constant 0 : index
    %c0_3 = arith.constant 0 : index
    %4 = vector.load %arg3[%c0_2, %c0_3] : memref<128x256xbf16, #tpu.memory_space<vmem>>, vector<128x256xbf16>
    %c0_4 = arith.constant 0 : index
    %c0_5 = arith.constant 0 : index
    %5 = vector.load %arg4[%c0_4, %c0_5] : memref<256x128xbf16, #tpu.memory_space<vmem>>, vector<256x128xbf16>
    %cst = arith.constant dense<0.000000e+00> : vector<128x128xf32>
    %6 = tpu.matmul %4, %5, %cst {dimension_numbers = #tpu.dot_dimension_numbers<[1], [0], [0], [1], [0, 0, 1, 1], [], []>} : vector<128x256xbf16>, vector<256x128xbf16>, vector<128x128xf32> -> vector<128x128xf32>
    %7 = arith.addf %3, %6 : vector<128x128xf32>
    %c0_6 = arith.constant 0 : index
    %c0_7 = arith.constant 0 : index
    %8 = vector.load %arg8[%c0_6, %c0_7] : memref<128x128xf32, #tpu.memory_space<vmem>>, vector<128x128xf32>
    tpu.vector_store %arg8[%c0_6, %c0_7], %7 {strides = array<i32>} : memref<128x128xf32, #tpu.memory_space<vmem>>, vector<128x128xf32>,
    %c0_i32_8 = arith.constant 0 : i32
    %9 = arith.cmpi eq, %arg2, %c0_i32_8 : i32
    %10 = arith.extui %9 : i1 to i32
    %c0_i32_9 = arith.constant 0 : i32
    %11 = arith.cmpi ne, %10, %c0_i32_9 : i32
    scf.if %11 {
      %c0_10 = arith.constant 0 : index
      %c0_11 = arith.constant 0 : index
      %12 = vector.load %arg8[%c0_10, %c0_11] : memref<128x128xf32, #tpu.memory_space<vmem>>, vector<128x128xf32>
      %c0_12 = arith.constant 0 : index
      %c0_13 = arith.constant 0 : index
      %13 = vector.load %arg5[%c0_12, %c0_13] : memref<1x128xf32, #tpu.memory_space<vmem>>, vector<1x128xf32>
      %14 = vector.broadcast %13 : vector<1x128xf32> to vector<128x128xf32>
      %15 = arith.addf %12, %14 : vector<128x128xf32>
      %c0_14 = arith.constant 0 : index
      %c0_15 = arith.constant 0 : index
      %16 = vector.load %arg6[%c0_14, %c0_15] : memref<128x128xbf16, #tpu.memory_space<vmem>>, vector<128x128xbf16>
      %17 = arith.extf %16 : vector<128x128xbf16> to vector<128x128xf32>
      %18 = arith.addf %15, %17 : vector<128x128xf32>
      %cst_16 = arith.constant 0.000000e+00 : f32
      %19 = vector.broadcast %cst_16 : f32 to vector<128x128xf32>
      %20 = arith.maximumf %18, %19 : vector<128x128xf32>
      %21 = arith.truncf %20 : vector<128x128xf32> to vector<128x128xbf16>
      %c0_17 = arith.constant 0 : index
      %c0_18 = arith.constant 0 : index
      %22 = vector.load %arg7[%c0_17, %c0_18] : memref<128x128xbf16, #tpu.memory_space<vmem>>, vector<128x128xbf16>
      tpu.vector_store %arg7[%c0_17, %c0_18], %21 {strides = array<i32>} : memref<128x128xbf16, #tpu.memory_space<vmem>>, vector<128x128xbf16>,
    } else {
    }
    return
  }
  func.func @transform_0(%arg0: i32, %arg1: i32, %arg2: i32) -> (i32, i32) {
    %c0_i32 = arith.constant 0 : i32
    return %arg0, %arg2 : i32, i32
  }
  func.func @transform_1(%arg0: i32, %arg1: i32, %arg2: i32) -> (i32, i32) {
    %c0_i32 = arith.constant 0 : i32
    return %arg2, %arg1 : i32, i32
  }
  func.func @transform_2(%arg0: i32, %arg1: i32, %arg2: i32) -> (i32, i32) {
    %c0_i32 = arith.constant 0 : i32
    %c0_i32_0 = arith.constant 0 : i32
    return %c0_i32, %arg1 : i32, i32
  }
  func.func @transform_3(%arg0: i32, %arg1: i32, %arg2: i32) -> (i32, i32) {
    %c0_i32 = arith.constant 0 : i32
    return %arg0, %arg1 : i32, i32
  }
  func.func @transform_4(%arg0: i32, %arg1: i32, %arg2: i32) -> (i32, i32) {
    %c0_i32 = arith.constant 0 : i32
    return %arg0, %arg1 : i32, i32
  }
}

module attributes {stable_mosaic.version = 11 : i64} {
  func.func @_fused_matmul_kernel(%arg0: i32, %arg1: i32, %arg2: i32, %arg3: memref<128x256xbf16, #tpu.memory_space<vmem>>, %arg4: memref<256x128xbf16, #tpu.memory_space<vmem>>, %arg5: memref<1x128xf32, #tpu.memory_space<vmem>>, %arg6: memref<128x128xbf16, #tpu.memory_space<vmem>>, %arg7: memref<128x128xf32, #tpu.memory_space<vmem>>) attributes {dimension_semantics = [#tpu.dimension_semantics<parallel>, #tpu.dimension_semantics<parallel>, #tpu.dimension_semantics<arbitrary>], iteration_bounds = array<i64: 3, 1, 1>, scalar_prefetch = 0 : i64, scratch_operands = 1 : i64, tpu.core_type = #tpu.core_type<tc>, window_params = [{transform_indices = @transform_0, window_bounds = array<i64: 128, 256>}, {transform_indices = @transform_1, window_bounds = array<i64: 256, 128>}, {transform_indices = @transform_2, window_bounds = array<i64: 1, 128>}, {transform_indices = @transform_3, window_bounds = array<i64: 128, 128>}]} {
    %c0_i32 = arith.constant 0 : i32
    %0 = arith.cmpi eq, %arg2, %c0_i32 : i32
    %1 = arith.extui %0 : i1 to i32
    %c0_i32_0 = arith.constant 0 : i32
    %2 = arith.cmpi ne, %1, %c0_i32_0 : i32
    scf.if %2 {
      %cst_10 = arith.constant 0.000000e+00 : f32
      %12 = vector.broadcast %cst_10 : f32 to vector<128x128xf32>
      %c0_11 = arith.constant 0 : index
      %c0_12 = arith.constant 0 : index
      %13 = vector.load %arg7[%c0_11, %c0_12] : memref<128x128xf32, #tpu.memory_space<vmem>>, vector<128x128xf32>
      tpu.vector_store %arg7[%c0_11, %c0_12], %12 {strides = array<i32>} : memref<128x128xf32, #tpu.memory_space<vmem>>, vector<128x128xf32>,
    } else {
    }
    %c0 = arith.constant 0 : index
    %c0_1 = arith.constant 0 : index
    %3 = vector.load %arg7[%c0, %c0_1] : memref<128x128xf32, #tpu.memory_space<vmem>>, vector<128x128xf32>
    %c0_2 = arith.constant 0 : index
    %c0_3 = arith.constant 0 : index
    %4 = vector.load %arg3[%c0_2, %c0_3] : memref<128x256xbf16, #tpu.memory_space<vmem>>, vector<128x256xbf16>
    %c0_4 = arith.constant 0 : index
    %c0_5 = arith.constant 0 : index
    %5 = vector.load %arg4[%c0_4, %c0_5] : memref<256x128xbf16, #tpu.memory_space<vmem>>, vector<256x128xbf16>
    %cst = arith.constant dense<0.000000e+00> : vector<128x128xf32>
    %6 = tpu.matmul %4, %5, %cst {dimension_numbers = #tpu.dot_dimension_numbers<[1], [0], [0], [1], [0, 0, 1, 1], [], []>} : vector<128x256xbf16>, vector<256x128xbf16>, vector<128x128xf32> -> vector<128x128xf32>
    %7 = arith.addf %3, %6 : vector<128x128xf32>
    %c0_6 = arith.constant 0 : index
    %c0_7 = arith.constant 0 : index
    %8 = vector.load %arg7[%c0_6, %c0_7] : memref<128x128xf32, #tpu.memory_space<vmem>>, vector<128x128xf32>
    tpu.vector_store %arg7[%c0_6, %c0_7], %7 {strides = array<i32>} : memref<128x128xf32, #tpu.memory_space<vmem>>, vector<128x128xf32>,
    %c0_i32_8 = arith.constant 0 : i32
    %9 = arith.cmpi eq, %arg2, %c0_i32_8 : i32
    %10 = arith.extui %9 : i1 to i32
    %c0_i32_9 = arith.constant 0 : i32
    %11 = arith.cmpi ne, %10, %c0_i32_9 : i32
    scf.if %11 {
      %c0_10 = arith.constant 0 : index
      %c0_11 = arith.constant 0 : index
      %12 = vector.load %arg7[%c0_10, %c0_11] : memref<128x128xf32, #tpu.memory_space<vmem>>, vector<128x128xf32>
      %c0_12 = arith.constant 0 : index
      %c0_13 = arith.constant 0 : index
      %13 = vector.load %arg5[%c0_12, %c0_13] : memref<1x128xf32, #tpu.memory_space<vmem>>, vector<1x128xf32>
      %14 = vector.broadcast %13 : vector<1x128xf32> to vector<128x128xf32>
      %15 = arith.addf %12, %14 : vector<128x128xf32>
      %cst_14 = arith.constant 0.000000e+00 : f32
      %16 = vector.broadcast %cst_14 : f32 to vector<128x128xf32>
      %17 = arith.maximumf %15, %16 : vector<128x128xf32>
      %18 = arith.truncf %17 : vector<128x128xf32> to vector<128x128xbf16>
      %c0_15 = arith.constant 0 : index
      %c0_16 = arith.constant 0 : index
      %19 = vector.load %arg6[%c0_15, %c0_16] : memref<128x128xbf16, #tpu.memory_space<vmem>>, vector<128x128xbf16>
      tpu.vector_store %arg6[%c0_15, %c0_16], %18 {strides = array<i32>} : memref<128x128xbf16, #tpu.memory_space<vmem>>, vector<128x128xbf16>,
    } else {
    }
    return
  }
  func.func @transform_0(%arg0: i32, %arg1: i32, %arg2: i32) -> (i32, i32) {
    %c0_i32 = arith.constant 0 : i32
    return %arg0, %arg2 : i32, i32
  }
  func.func @transform_1(%arg0: i32, %arg1: i32, %arg2: i32) -> (i32, i32) {
    %c0_i32 = arith.constant 0 : i32
    return %arg2, %arg1 : i32, i32
  }
  func.func @transform_2(%arg0: i32, %arg1: i32, %arg2: i32) -> (i32, i32) {
    %c0_i32 = arith.constant 0 : i32
    %c0_i32_0 = arith.constant 0 : i32
    return %c0_i32, %arg1 : i32, i32
  }
  func.func @transform_3(%arg0: i32, %arg1: i32, %arg2: i32) -> (i32, i32) {
    %c0_i32 = arith.constant 0 : i32
    return %arg0, %arg1 : i32, i32
  }
}

module attributes {stable_mosaic.version = 11 : i64} {
  func.func @_fused_matmul_kernel(%arg0: i32, %arg1: i32, %arg2: i32, %arg3: memref<128x256xbf16, #tpu.memory_space<vmem>>, %arg4: memref<256x128xbf16, #tpu.memory_space<vmem>>, %arg5: memref<1x128xf32, #tpu.memory_space<vmem>>, %arg6: memref<128x128xbf16, #tpu.memory_space<vmem>>, %arg7: memref<128x128xf32, #tpu.memory_space<vmem>>) attributes {dimension_semantics = [#tpu.dimension_semantics<parallel>, #tpu.dimension_semantics<parallel>, #tpu.dimension_semantics<arbitrary>], iteration_bounds = array<i64: 1, 1, 1>, scalar_prefetch = 0 : i64, scratch_operands = 1 : i64, tpu.core_type = #tpu.core_type<tc>, window_params = [{transform_indices = @transform_0, window_bounds = array<i64: 128, 256>}, {transform_indices = @transform_1, window_bounds = array<i64: 256, 128>}, {transform_indices = @transform_2, window_bounds = array<i64: 1, 128>}, {transform_indices = @transform_3, window_bounds = array<i64: 128, 128>}]} {
    %c0_i32 = arith.constant 0 : i32
    %0 = arith.cmpi eq, %arg2, %c0_i32 : i32
    %1 = arith.extui %0 : i1 to i32
    %c0_i32_0 = arith.constant 0 : i32
    %2 = arith.cmpi ne, %1, %c0_i32_0 : i32
    scf.if %2 {
      %cst_10 = arith.constant 0.000000e+00 : f32
      %12 = vector.broadcast %cst_10 : f32 to vector<128x128xf32>
      %c0_11 = arith.constant 0 : index
      %c0_12 = arith.constant 0 : index
      %13 = vector.load %arg7[%c0_11, %c0_12] : memref<128x128xf32, #tpu.memory_space<vmem>>, vector<128x128xf32>
      tpu.vector_store %arg7[%c0_11, %c0_12], %12 {strides = array<i32>} : memref<128x128xf32, #tpu.memory_space<vmem>>, vector<128x128xf32>,
    } else {
    }
    %c0 = arith.constant 0 : index
    %c0_1 = arith.constant 0 : index
    %3 = vector.load %arg7[%c0, %c0_1] : memref<128x128xf32, #tpu.memory_space<vmem>>, vector<128x128xf32>
    %c0_2 = arith.constant 0 : index
    %c0_3 = arith.constant 0 : index
    %4 = vector.load %arg3[%c0_2, %c0_3] : memref<128x256xbf16, #tpu.memory_space<vmem>>, vector<128x256xbf16>
    %c0_4 = arith.constant 0 : index
    %c0_5 = arith.constant 0 : index
    %5 = vector.load %arg4[%c0_4, %c0_5] : memref<256x128xbf16, #tpu.memory_space<vmem>>, vector<256x128xbf16>
    %cst = arith.constant dense<0.000000e+00> : vector<128x128xf32>
    %6 = tpu.matmul %4, %5, %cst {dimension_numbers = #tpu.dot_dimension_numbers<[1], [0], [0], [1], [0, 0, 1, 1], [], []>} : vector<128x256xbf16>, vector<256x128xbf16>, vector<128x128xf32> -> vector<128x128xf32>
    %7 = arith.addf %3, %6 : vector<128x128xf32>
    %c0_6 = arith.constant 0 : index
    %c0_7 = arith.constant 0 : index
    %8 = vector.load %arg7[%c0_6, %c0_7] : memref<128x128xf32, #tpu.memory_space<vmem>>, vector<128x128xf32>
    tpu.vector_store %arg7[%c0_6, %c0_7], %7 {strides = array<i32>} : memref<128x128xf32, #tpu.memory_space<vmem>>, vector<128x128xf32>,
    %c0_i32_8 = arith.constant 0 : i32
    %9 = arith.cmpi eq, %arg2, %c0_i32_8 : i32
    %10 = arith.extui %9 : i1 to i32
    %c0_i32_9 = arith.constant 0 : i32
    %11 = arith.cmpi ne, %10, %c0_i32_9 : i32
    scf.if %11 {
      %c0_10 = arith.constant 0 : index
      %c0_11 = arith.constant 0 : index
      %12 = vector.load %arg7[%c0_10, %c0_11] : memref<128x128xf32, #tpu.memory_space<vmem>>, vector<128x128xf32>
      %c0_12 = arith.constant 0 : index
      %c0_13 = arith.constant 0 : index
      %13 = vector.load %arg5[%c0_12, %c0_13] : memref<1x128xf32, #tpu.memory_space<vmem>>, vector<1x128xf32>
      %14 = vector.broadcast %13 : vector<1x128xf32> to vector<128x128xf32>
      %15 = arith.addf %12, %14 : vector<128x128xf32>
      %cst_14 = arith.constant 0.000000e+00 : f32
      %16 = vector.broadcast %cst_14 : f32 to vector<128x128xf32>
      %17 = arith.maximumf %15, %16 : vector<128x128xf32>
      %18 = arith.truncf %17 : vector<128x128xf32> to vector<128x128xbf16>
      %c0_15 = arith.constant 0 : index
      %c0_16 = arith.constant 0 : index
      %19 = vector.load %arg6[%c0_15, %c0_16] : memref<128x128xbf16, #tpu.memory_space<vmem>>, vector<128x128xbf16>
      tpu.vector_store %arg6[%c0_15, %c0_16], %18 {strides = array<i32>} : memref<128x128xbf16, #tpu.memory_space<vmem>>, vector<128x128xbf16>,
    } else {
    }
    return
  }
  func.func @transform_0(%arg0: i32, %arg1: i32, %arg2: i32) -> (i32, i32) {
    %c0_i32 = arith.constant 0 : i32
    return %arg0, %arg2 : i32, i32
  }
  func.func @transform_1(%arg0: i32, %arg1: i32, %arg2: i32) -> (i32, i32) {
    %c0_i32 = arith.constant 0 : i32
    return %arg2, %arg1 : i32, i32
  }
  func.func @transform_2(%arg0: i32, %arg1: i32, %arg2: i32) -> (i32, i32) {
    %c0_i32 = arith.constant 0 : i32
    %c0_i32_0 = arith.constant 0 : i32
    return %c0_i32, %arg1 : i32, i32
  }
  func.func @transform_3(%arg0: i32, %arg1: i32, %arg2: i32) -> (i32, i32) {
    %c0_i32 = arith.constant 0 : i32
    return %arg0, %arg1 : i32, i32
  }
}

module attributes {stable_mosaic.version = 11 : i64} {
  func.func @_fused_matmul_kernel(%arg0: i32, %arg1: i32, %arg2: i32, %arg3: memref<128x128xbf16, #tpu.memory_space<vmem>>, %arg4: memref<128x128xbf16, #tpu.memory_space<vmem>>, %arg5: memref<1x128xf32, #tpu.memory_space<vmem>>, %arg6: memref<128x128xbf16, #tpu.memory_space<vmem>>, %arg7: memref<128x128xf32, #tpu.memory_space<vmem>>) attributes {dimension_semantics = [#tpu.dimension_semantics<parallel>, #tpu.dimension_semantics<parallel>, #tpu.dimension_semantics<arbitrary>], iteration_bounds = array<i64: 1, 1, 1>, scalar_prefetch = 0 : i64, scratch_operands = 1 : i64, tpu.core_type = #tpu.core_type<tc>, window_params = [{transform_indices = @transform_0, window_bounds = array<i64: 128, 128>}, {transform_indices = @transform_1, window_bounds = array<i64: 128, 128>}, {transform_indices = @transform_2, window_bounds = array<i64: 1, 128>}, {transform_indices = @transform_3, window_bounds = array<i64: 128, 128>}]} {
    %c0_i32 = arith.constant 0 : i32
    %0 = arith.cmpi eq, %arg2, %c0_i32 : i32
    %1 = arith.extui %0 : i1 to i32
    %c0_i32_0 = arith.constant 0 : i32
    %2 = arith.cmpi ne, %1, %c0_i32_0 : i32
    scf.if %2 {
      %cst_10 = arith.constant 0.000000e+00 : f32
      %12 = vector.broadcast %cst_10 : f32 to vector<128x128xf32>
      %c0_11 = arith.constant 0 : index
      %c0_12 = arith.constant 0 : index
      %13 = vector.load %arg7[%c0_11, %c0_12] : memref<128x128xf32, #tpu.memory_space<vmem>>, vector<128x128xf32>
      tpu.vector_store %arg7[%c0_11, %c0_12], %12 {strides = array<i32>} : memref<128x128xf32, #tpu.memory_space<vmem>>, vector<128x128xf32>,
    } else {
    }
    %c0 = arith.constant 0 : index
    %c0_1 = arith.constant 0 : index
    %3 = vector.load %arg7[%c0, %c0_1] : memref<128x128xf32, #tpu.memory_space<vmem>>, vector<128x128xf32>
    %c0_2 = arith.constant 0 : index
    %c0_3 = arith.constant 0 : index
    %4 = vector.load %arg3[%c0_2, %c0_3] : memref<128x128xbf16, #tpu.memory_space<vmem>>, vector<128x128xbf16>
    %c0_4 = arith.constant 0 : index
    %c0_5 = arith.constant 0 : index
    %5 = vector.load %arg4[%c0_4, %c0_5] : memref<128x128xbf16, #tpu.memory_space<vmem>>, vector<128x128xbf16>
    %cst = arith.constant dense<0.000000e+00> : vector<128x128xf32>
    %6 = tpu.matmul %4, %5, %cst {dimension_numbers = #tpu.dot_dimension_numbers<[1], [0], [0], [1], [0, 0, 1, 1], [], []>} : vector<128x128xbf16>, vector<128x128xbf16>, vector<128x128xf32> -> vector<128x128xf32>
    %7 = arith.addf %3, %6 : vector<128x128xf32>
    %c0_6 = arith.constant 0 : index
    %c0_7 = arith.constant 0 : index
    %8 = vector.load %arg7[%c0_6, %c0_7] : memref<128x128xf32, #tpu.memory_space<vmem>>, vector<128x128xf32>
    tpu.vector_store %arg7[%c0_6, %c0_7], %7 {strides = array<i32>} : memref<128x128xf32, #tpu.memory_space<vmem>>, vector<128x128xf32>,
    %c0_i32_8 = arith.constant 0 : i32
    %9 = arith.cmpi eq, %arg2, %c0_i32_8 : i32
    %10 = arith.extui %9 : i1 to i32
    %c0_i32_9 = arith.constant 0 : i32
    %11 = arith.cmpi ne, %10, %c0_i32_9 : i32
    scf.if %11 {
      %c0_10 = arith.constant 0 : index
      %c0_11 = arith.constant 0 : index
      %12 = vector.load %arg7[%c0_10, %c0_11] : memref<128x128xf32, #tpu.memory_space<vmem>>, vector<128x128xf32>
      %c0_12 = arith.constant 0 : index
      %c0_13 = arith.constant 0 : index
      %13 = vector.load %arg5[%c0_12, %c0_13] : memref<1x128xf32, #tpu.memory_space<vmem>>, vector<1x128xf32>
      %14 = vector.broadcast %13 : vector<1x128xf32> to vector<128x128xf32>
      %15 = arith.addf %12, %14 : vector<128x128xf32>
      %16 = arith.truncf %15 : vector<128x128xf32> to vector<128x128xbf16>
      %c0_14 = arith.constant 0 : index
      %c0_15 = arith.constant 0 : index
      %17 = vector.load %arg6[%c0_14, %c0_15] : memref<128x128xbf16, #tpu.memory_space<vmem>>, vector<128x128xbf16>
      tpu.vector_store %arg6[%c0_14, %c0_15], %16 {strides = array<i32>} : memref<128x128xbf16, #tpu.memory_space<vmem>>, vector<128x128xbf16>,
    } else {
    }
    return
  }
  func.func @transform_0(%arg0: i32, %arg1: i32, %arg2: i32) -> (i32, i32) {
    %c0_i32 = arith.constant 0 : i32
    return %arg0, %arg2 : i32, i32
  }
  func.func @transform_1(%arg0: i32, %arg1: i32, %arg2: i32) -> (i32, i32) {
    %c0_i32 = arith.constant 0 : i32
    return %arg2, %arg1 : i32, i32
  }
  func.func @transform_2(%arg0: i32, %arg1: i32, %arg2: i32) -> (i32, i32) {
    %c0_i32 = arith.constant 0 : i32
    %c0_i32_0 = arith.constant 0 : i32
    return %c0_i32, %arg1 : i32, i32
  }
  func.func @transform_3(%arg0: i32, %arg1: i32, %arg2: i32) -> (i32, i32) {
    %c0_i32 = arith.constant 0 : i32
    return %arg0, %arg1 : i32, i32
  }
}

module attributes {stable_mosaic.version = 11 : i64} {
  func.func @_fused_matmul_kernel(%arg0: i32, %arg1: i32, %arg2: i32, %arg3: memref<128x384xbf16, #tpu.memory_space<vmem>>, %arg4: memref<384x128xbf16, #tpu.memory_space<vmem>>, %arg5: memref<1x128xf32, #tpu.memory_space<vmem>>, %arg6: memref<128x128xbf16, #tpu.memory_space<vmem>>, %arg7: memref<128x128xbf16, #tpu.memory_space<vmem>>, %arg8: memref<128x128xf32, #tpu.memory_space<vmem>>) attributes {dimension_semantics = [#tpu.dimension_semantics<parallel>, #tpu.dimension_semantics<parallel>, #tpu.dimension_semantics<arbitrary>], iteration_bounds = array<i64: 1, 1, 1>, scalar_prefetch = 0 : i64, scratch_operands = 1 : i64, tpu.core_type = #tpu.core_type<tc>, window_params = [{transform_indices = @transform_0, window_bounds = array<i64: 128, 384>}, {transform_indices = @transform_1, window_bounds = array<i64: 384, 128>}, {transform_indices = @transform_2, window_bounds = array<i64: 1, 128>}, {transform_indices = @transform_3, window_bounds = array<i64: 128, 128>}, {transform_indices = @transform_4, window_bounds = array<i64: 128, 128>}]} {
    %c0_i32 = arith.constant 0 : i32
    %0 = arith.cmpi eq, %arg2, %c0_i32 : i32
    %1 = arith.extui %0 : i1 to i32
    %c0_i32_0 = arith.constant 0 : i32
    %2 = arith.cmpi ne, %1, %c0_i32_0 : i32
    scf.if %2 {
      %cst_10 = arith.constant 0.000000e+00 : f32
      %12 = vector.broadcast %cst_10 : f32 to vector<128x128xf32>
      %c0_11 = arith.constant 0 : index
      %c0_12 = arith.constant 0 : index
      %13 = vector.load %arg8[%c0_11, %c0_12] : memref<128x128xf32, #tpu.memory_space<vmem>>, vector<128x128xf32>
      tpu.vector_store %arg8[%c0_11, %c0_12], %12 {strides = array<i32>} : memref<128x128xf32, #tpu.memory_space<vmem>>, vector<128x128xf32>,
    } else {
    }
    %c0 = arith.constant 0 : index
    %c0_1 = arith.constant 0 : index
    %3 = vector.load %arg8[%c0, %c0_1] : memref<128x128xf32, #tpu.memory_space<vmem>>, vector<128x128xf32>
    %c0_2 = arith.constant 0 : index
    %c0_3 = arith.constant 0 : index
    %4 = vector.load %arg3[%c0_2, %c0_3] : memref<128x384xbf16, #tpu.memory_space<vmem>>, vector<128x384xbf16>
    %c0_4 = arith.constant 0 : index
    %c0_5 = arith.constant 0 : index
    %5 = vector.load %arg4[%c0_4, %c0_5] : memref<384x128xbf16, #tpu.memory_space<vmem>>, vector<384x128xbf16>
    %cst = arith.constant dense<0.000000e+00> : vector<128x128xf32>
    %6 = tpu.matmul %4, %5, %cst {dimension_numbers = #tpu.dot_dimension_numbers<[1], [0], [0], [1], [0, 0, 1, 1], [], []>} : vector<128x384xbf16>, vector<384x128xbf16>, vector<128x128xf32> -> vector<128x128xf32>
    %7 = arith.addf %3, %6 : vector<128x128xf32>
    %c0_6 = arith.constant 0 : index
    %c0_7 = arith.constant 0 : index
    %8 = vector.load %arg8[%c0_6, %c0_7] : memref<128x128xf32, #tpu.memory_space<vmem>>, vector<128x128xf32>
    tpu.vector_store %arg8[%c0_6, %c0_7], %7 {strides = array<i32>} : memref<128x128xf32, #tpu.memory_space<vmem>>, vector<128x128xf32>,
    %c0_i32_8 = arith.constant 0 : i32
    %9 = arith.cmpi eq, %arg2, %c0_i32_8 : i32
    %10 = arith.extui %9 : i1 to i32
    %c0_i32_9 = arith.constant 0 : i32
    %11 = arith.cmpi ne, %10, %c0_i32_9 : i32
    scf.if %11 {
      %c0_10 = arith.constant 0 : index
      %c0_11 = arith.constant 0 : index
      %12 = vector.load %arg8[%c0_10, %c0_11] : memref<128x128xf32, #tpu.memory_space<vmem>>, vector<128x128xf32>
      %c0_12 = arith.constant 0 : index
      %c0_13 = arith.constant 0 : index
      %13 = vector.load %arg5[%c0_12, %c0_13] : memref<1x128xf32, #tpu.memory_space<vmem>>, vector<1x128xf32>
      %14 = vector.broadcast %13 : vector<1x128xf32> to vector<128x128xf32>
      %15 = arith.addf %12, %14 : vector<128x128xf32>
      %c0_14 = arith.constant 0 : index
      %c0_15 = arith.constant 0 : index
      %16 = vector.load %arg6[%c0_14, %c0_15] : memref<128x128xbf16, #tpu.memory_space<vmem>>, vector<128x128xbf16>
      %17 = arith.extf %16 : vector<128x128xbf16> to vector<128x128xf32>
      %18 = arith.addf %15, %17 : vector<128x128xf32>
      %cst_16 = arith.constant 0.000000e+00 : f32
      %19 = vector.broadcast %cst_16 : f32 to vector<128x128xf32>
      %20 = arith.maximumf %18, %19 : vector<128x128xf32>
      %21 = arith.truncf %20 : vector<128x128xf32> to vector<128x128xbf16>
      %c0_17 = arith.constant 0 : index
      %c0_18 = arith.constant 0 : index
      %22 = vector.load %arg7[%c0_17, %c0_18] : memref<128x128xbf16, #tpu.memory_space<vmem>>, vector<128x128xbf16>
      tpu.vector_store %arg7[%c0_17, %c0_18], %21 {strides = array<i32>} : memref<128x128xbf16, #tpu.memory_space<vmem>>, vector<128x128xbf16>,
    } else {
    }
    return
  }
  func.func @transform_0(%arg0: i32, %arg1: i32, %arg2: i32) -> (i32, i32) {
    %c0_i32 = arith.constant 0 : i32
    return %arg0, %arg2 : i32, i32
  }
  func.func @transform_1(%arg0: i32, %arg1: i32, %arg2: i32) -> (i32, i32) {
    %c0_i32 = arith.constant 0 : i32
    return %arg2, %arg1 : i32, i32
  }
  func.func @transform_2(%arg0: i32, %arg1: i32, %arg2: i32) -> (i32, i32) {
    %c0_i32 = arith.constant 0 : i32
    %c0_i32_0 = arith.constant 0 : i32
    return %c0_i32, %arg1 : i32, i32
  }
  func.func @transform_3(%arg0: i32, %arg1: i32, %arg2: i32) -> (i32, i32) {
    %c0_i32 = arith.constant 0 : i32
    return %arg0, %arg1 : i32, i32
  }
  func.func @transform_4(%arg0: i32, %arg1: i32, %arg2: i32) -> (i32, i32) {
    %c0_i32 = arith.constant 0 : i32
    return %arg0, %arg1 : i32, i32
  }
}

module attributes {stable_mosaic.version = 11 : i64} {
  func.func @_fused_matmul_kernel(%arg0: i32, %arg1: i32, %arg2: i32, %arg3: memref<128x384xbf16, #tpu.memory_space<vmem>>, %arg4: memref<384x128xbf16, #tpu.memory_space<vmem>>, %arg5: memref<1x128xf32, #tpu.memory_space<vmem>>, %arg6: memref<128x128xbf16, #tpu.memory_space<vmem>>, %arg7: memref<128x128xf32, #tpu.memory_space<vmem>>) attributes {dimension_semantics = [#tpu.dimension_semantics<parallel>, #tpu.dimension_semantics<parallel>, #tpu.dimension_semantics<arbitrary>], iteration_bounds = array<i64: 1, 1, 1>, scalar_prefetch = 0 : i64, scratch_operands = 1 : i64, tpu.core_type = #tpu.core_type<tc>, window_params = [{transform_indices = @transform_0, window_bounds = array<i64: 128, 384>}, {transform_indices = @transform_1, window_bounds = array<i64: 384, 128>}, {transform_indices = @transform_2, window_bounds = array<i64: 1, 128>}, {transform_indices = @transform_3, window_bounds = array<i64: 128, 128>}]} {
    %c0_i32 = arith.constant 0 : i32
    %0 = arith.cmpi eq, %arg2, %c0_i32 : i32
    %1 = arith.extui %0 : i1 to i32
    %c0_i32_0 = arith.constant 0 : i32
    %2 = arith.cmpi ne, %1, %c0_i32_0 : i32
    scf.if %2 {
      %cst_10 = arith.constant 0.000000e+00 : f32
      %12 = vector.broadcast %cst_10 : f32 to vector<128x128xf32>
      %c0_11 = arith.constant 0 : index
      %c0_12 = arith.constant 0 : index
      %13 = vector.load %arg7[%c0_11, %c0_12] : memref<128x128xf32, #tpu.memory_space<vmem>>, vector<128x128xf32>
      tpu.vector_store %arg7[%c0_11, %c0_12], %12 {strides = array<i32>} : memref<128x128xf32, #tpu.memory_space<vmem>>, vector<128x128xf32>,
    } else {
    }
    %c0 = arith.constant 0 : index
    %c0_1 = arith.constant 0 : index
    %3 = vector.load %arg7[%c0, %c0_1] : memref<128x128xf32, #tpu.memory_space<vmem>>, vector<128x128xf32>
    %c0_2 = arith.constant 0 : index
    %c0_3 = arith.constant 0 : index
    %4 = vector.load %arg3[%c0_2, %c0_3] : memref<128x384xbf16, #tpu.memory_space<vmem>>, vector<128x384xbf16>
    %c0_4 = arith.constant 0 : index
    %c0_5 = arith.constant 0 : index
    %5 = vector.load %arg4[%c0_4, %c0_5] : memref<384x128xbf16, #tpu.memory_space<vmem>>, vector<384x128xbf16>
    %cst = arith.constant dense<0.000000e+00> : vector<128x128xf32>
    %6 = tpu.matmul %4, %5, %cst {dimension_numbers = #tpu.dot_dimension_numbers<[1], [0], [0], [1], [0, 0, 1, 1], [], []>} : vector<128x384xbf16>, vector<384x128xbf16>, vector<128x128xf32> -> vector<128x128xf32>
    %7 = arith.addf %3, %6 : vector<128x128xf32>
    %c0_6 = arith.constant 0 : index
    %c0_7 = arith.constant 0 : index
    %8 = vector.load %arg7[%c0_6, %c0_7] : memref<128x128xf32, #tpu.memory_space<vmem>>, vector<128x128xf32>
    tpu.vector_store %arg7[%c0_6, %c0_7], %7 {strides = array<i32>} : memref<128x128xf32, #tpu.memory_space<vmem>>, vector<128x128xf32>,
    %c0_i32_8 = arith.constant 0 : i32
    %9 = arith.cmpi eq, %arg2, %c0_i32_8 : i32
    %10 = arith.extui %9 : i1 to i32
    %c0_i32_9 = arith.constant 0 : i32
    %11 = arith.cmpi ne, %10, %c0_i32_9 : i32
    scf.if %11 {
      %c0_10 = arith.constant 0 : index
      %c0_11 = arith.constant 0 : index
      %12 = vector.load %arg7[%c0_10, %c0_11] : memref<128x128xf32, #tpu.memory_space<vmem>>, vector<128x128xf32>
      %c0_12 = arith.constant 0 : index
      %c0_13 = arith.constant 0 : index
      %13 = vector.load %arg5[%c0_12, %c0_13] : memref<1x128xf32, #tpu.memory_space<vmem>>, vector<1x128xf32>
      %14 = vector.broadcast %13 : vector<1x128xf32> to vector<128x128xf32>
      %15 = arith.addf %12, %14 : vector<128x128xf32>
      %cst_14 = arith.constant 0.000000e+00 : f32
      %16 = vector.broadcast %cst_14 : f32 to vector<128x128xf32>
      %17 = arith.maximumf %15, %16 : vector<128x128xf32>
      %18 = arith.truncf %17 : vector<128x128xf32> to vector<128x128xbf16>
      %c0_15 = arith.constant 0 : index
      %c0_16 = arith.constant 0 : index
      %19 = vector.load %arg6[%c0_15, %c0_16] : memref<128x128xbf16, #tpu.memory_space<vmem>>, vector<128x128xbf16>
      tpu.vector_store %arg6[%c0_15, %c0_16], %18 {strides = array<i32>} : memref<128x128xbf16, #tpu.memory_space<vmem>>, vector<128x128xbf16>,
    } else {
    }
    return
  }
  func.func @transform_0(%arg0: i32, %arg1: i32, %arg2: i32) -> (i32, i32) {
    %c0_i32 = arith.constant 0 : i32
    return %arg0, %arg2 : i32, i32
  }
  func.func @transform_1(%arg0: i32, %arg1: i32, %arg2: i32) -> (i32, i32) {
    %c0_i32 = arith.constant 0 : i32
    return %arg2, %arg1 : i32, i32
  }
  func.func @transform_2(%arg0: i32, %arg1: i32, %arg2: i32) -> (i32, i32) {
    %c0_i32 = arith.constant 0 : i32
    %c0_i32_0 = arith.constant 0 : i32
    return %c0_i32, %arg1 : i32, i32
  }
  func.func @transform_3(%arg0: i32, %arg1: i32, %arg2: i32) -> (i32, i32) {
    %c0_i32 = arith.constant 0 : i32
    return %arg0, %arg1 : i32, i32
  }
}

module attributes {stable_mosaic.version = 11 : i64} {
  func.func @_fused_matmul_kernel(%arg0: i32, %arg1: i32, %arg2: i32, %arg3: memref<128x640xbf16, #tpu.memory_space<vmem>>, %arg4: memref<640x128xbf16, #tpu.memory_space<vmem>>, %arg5: memref<1x128xf32, #tpu.memory_space<vmem>>, %arg6: memref<128x128xbf16, #tpu.memory_space<vmem>>, %arg7: memref<128x128xbf16, #tpu.memory_space<vmem>>, %arg8: memref<128x128xf32, #tpu.memory_space<vmem>>) attributes {dimension_semantics = [#tpu.dimension_semantics<parallel>, #tpu.dimension_semantics<parallel>, #tpu.dimension_semantics<arbitrary>], iteration_bounds = array<i64: 1, 1, 1>, scalar_prefetch = 0 : i64, scratch_operands = 1 : i64, tpu.core_type = #tpu.core_type<tc>, window_params = [{transform_indices = @transform_0, window_bounds = array<i64: 128, 640>}, {transform_indices = @transform_1, window_bounds = array<i64: 640, 128>}, {transform_indices = @transform_2, window_bounds = array<i64: 1, 128>}, {transform_indices = @transform_3, window_bounds = array<i64: 128, 128>}, {transform_indices = @transform_4, window_bounds = array<i64: 128, 128>}]} {
    %c0_i32 = arith.constant 0 : i32
    %0 = arith.cmpi eq, %arg2, %c0_i32 : i32
    %1 = arith.extui %0 : i1 to i32
    %c0_i32_0 = arith.constant 0 : i32
    %2 = arith.cmpi ne, %1, %c0_i32_0 : i32
    scf.if %2 {
      %cst_10 = arith.constant 0.000000e+00 : f32
      %12 = vector.broadcast %cst_10 : f32 to vector<128x128xf32>
      %c0_11 = arith.constant 0 : index
      %c0_12 = arith.constant 0 : index
      %13 = vector.load %arg8[%c0_11, %c0_12] : memref<128x128xf32, #tpu.memory_space<vmem>>, vector<128x128xf32>
      tpu.vector_store %arg8[%c0_11, %c0_12], %12 {strides = array<i32>} : memref<128x128xf32, #tpu.memory_space<vmem>>, vector<128x128xf32>,
    } else {
    }
    %c0 = arith.constant 0 : index
    %c0_1 = arith.constant 0 : index
    %3 = vector.load %arg8[%c0, %c0_1] : memref<128x128xf32, #tpu.memory_space<vmem>>, vector<128x128xf32>
    %c0_2 = arith.constant 0 : index
    %c0_3 = arith.constant 0 : index
    %4 = vector.load %arg3[%c0_2, %c0_3] : memref<128x640xbf16, #tpu.memory_space<vmem>>, vector<128x640xbf16>
    %c0_4 = arith.constant 0 : index
    %c0_5 = arith.constant 0 : index
    %5 = vector.load %arg4[%c0_4, %c0_5] : memref<640x128xbf16, #tpu.memory_space<vmem>>, vector<640x128xbf16>
    %cst = arith.constant dense<0.000000e+00> : vector<128x128xf32>
    %6 = tpu.matmul %4, %5, %cst {dimension_numbers = #tpu.dot_dimension_numbers<[1], [0], [0], [1], [0, 0, 1, 1], [], []>} : vector<128x640xbf16>, vector<640x128xbf16>, vector<128x128xf32> -> vector<128x128xf32>
    %7 = arith.addf %3, %6 : vector<128x128xf32>
    %c0_6 = arith.constant 0 : index
    %c0_7 = arith.constant 0 : index
    %8 = vector.load %arg8[%c0_6, %c0_7] : memref<128x128xf32, #tpu.memory_space<vmem>>, vector<128x128xf32>
    tpu.vector_store %arg8[%c0_6, %c0_7], %7 {strides = array<i32>} : memref<128x128xf32, #tpu.memory_space<vmem>>, vector<128x128xf32>,
    %c0_i32_8 = arith.constant 0 : i32
    %9 = arith.cmpi eq, %arg2, %c0_i32_8 : i32
    %10 = arith.extui %9 : i1 to i32
    %c0_i32_9 = arith.constant 0 : i32
    %11 = arith.cmpi ne, %10, %c0_i32_9 : i32
    scf.if %11 {
      %c0_10 = arith.constant 0 : index
      %c0_11 = arith.constant 0 : index
      %12 = vector.load %arg8[%c0_10, %c0_11] : memref<128x128xf32, #tpu.memory_space<vmem>>, vector<128x128xf32>
      %c0_12 = arith.constant 0 : index
      %c0_13 = arith.constant 0 : index
      %13 = vector.load %arg5[%c0_12, %c0_13] : memref<1x128xf32, #tpu.memory_space<vmem>>, vector<1x128xf32>
      %14 = vector.broadcast %13 : vector<1x128xf32> to vector<128x128xf32>
      %15 = arith.addf %12, %14 : vector<128x128xf32>
      %c0_14 = arith.constant 0 : index
      %c0_15 = arith.constant 0 : index
      %16 = vector.load %arg6[%c0_14, %c0_15] : memref<128x128xbf16, #tpu.memory_space<vmem>>, vector<128x128xbf16>
      %17 = arith.extf %16 : vector<128x128xbf16> to vector<128x128xf32>
      %18 = arith.addf %15, %17 : vector<128x128xf32>
      %cst_16 = arith.constant 0.000000e+00 : f32
      %19 = vector.broadcast %cst_16 : f32 to vector<128x128xf32>
      %20 = arith.maximumf %18, %19 : vector<128x128xf32>
      %21 = arith.truncf %20 : vector<128x128xf32> to vector<128x128xbf16>
      %c0_17 = arith.constant 0 : index
      %c0_18 = arith.constant 0 : index
      %22 = vector.load %arg7[%c0_17, %c0_18] : memref<128x128xbf16, #tpu.memory_space<vmem>>, vector<128x128xbf16>
      tpu.vector_store %arg7[%c0_17, %c0_18], %21 {strides = array<i32>} : memref<128x128xbf16, #tpu.memory_space<vmem>>, vector<128x128xbf16>,
    } else {
    }
    return
  }
  func.func @transform_0(%arg0: i32, %arg1: i32, %arg2: i32) -> (i32, i32) {
    %c0_i32 = arith.constant 0 : i32
    return %arg0, %arg2 : i32, i32
  }
  func.func @transform_1(%arg0: i32, %arg1: i32, %arg2: i32) -> (i32, i32) {
    %c0_i32 = arith.constant 0 : i32
    return %arg2, %arg1 : i32, i32
  }
  func.func @transform_2(%arg0: i32, %arg1: i32, %arg2: i32) -> (i32, i32) {
    %c0_i32 = arith.constant 0 : i32
    %c0_i32_0 = arith.constant 0 : i32
    return %c0_i32, %arg1 : i32, i32
  }
  func.func @transform_3(%arg0: i32, %arg1: i32, %arg2: i32) -> (i32, i32) {
    %c0_i32 = arith.constant 0 : i32
    return %arg0, %arg1 : i32, i32
  }
  func.func @transform_4(%arg0: i32, %arg1: i32, %arg2: i32) -> (i32, i32) {
    %c0_i32 = arith.constant 0 : i32
    return %arg0, %arg1 : i32, i32
  }
}

module attributes {stable_mosaic.version = 11 : i64} {
  func.func @_fused_matmul_kernel(%arg0: i32, %arg1: i32, %arg2: i32, %arg3: memref<128x640xbf16, #tpu.memory_space<vmem>>, %arg4: memref<640x128xbf16, #tpu.memory_space<vmem>>, %arg5: memref<1x128xf32, #tpu.memory_space<vmem>>, %arg6: memref<128x128xbf16, #tpu.memory_space<vmem>>, %arg7: memref<128x128xf32, #tpu.memory_space<vmem>>) attributes {dimension_semantics = [#tpu.dimension_semantics<parallel>, #tpu.dimension_semantics<parallel>, #tpu.dimension_semantics<arbitrary>], iteration_bounds = array<i64: 1, 1, 1>, scalar_prefetch = 0 : i64, scratch_operands = 1 : i64, tpu.core_type = #tpu.core_type<tc>, window_params = [{transform_indices = @transform_0, window_bounds = array<i64: 128, 640>}, {transform_indices = @transform_1, window_bounds = array<i64: 640, 128>}, {transform_indices = @transform_2, window_bounds = array<i64: 1, 128>}, {transform_indices = @transform_3, window_bounds = array<i64: 128, 128>}]} {
    %c0_i32 = arith.constant 0 : i32
    %0 = arith.cmpi eq, %arg2, %c0_i32 : i32
    %1 = arith.extui %0 : i1 to i32
    %c0_i32_0 = arith.constant 0 : i32
    %2 = arith.cmpi ne, %1, %c0_i32_0 : i32
    scf.if %2 {
      %cst_10 = arith.constant 0.000000e+00 : f32
      %12 = vector.broadcast %cst_10 : f32 to vector<128x128xf32>
      %c0_11 = arith.constant 0 : index
      %c0_12 = arith.constant 0 : index
      %13 = vector.load %arg7[%c0_11, %c0_12] : memref<128x128xf32, #tpu.memory_space<vmem>>, vector<128x128xf32>
      tpu.vector_store %arg7[%c0_11, %c0_12], %12 {strides = array<i32>} : memref<128x128xf32, #tpu.memory_space<vmem>>, vector<128x128xf32>,
    } else {
    }
    %c0 = arith.constant 0 : index
    %c0_1 = arith.constant 0 : index
    %3 = vector.load %arg7[%c0, %c0_1] : memref<128x128xf32, #tpu.memory_space<vmem>>, vector<128x128xf32>
    %c0_2 = arith.constant 0 : index
    %c0_3 = arith.constant 0 : index
    %4 = vector.load %arg3[%c0_2, %c0_3] : memref<128x640xbf16, #tpu.memory_space<vmem>>, vector<128x640xbf16>
    %c0_4 = arith.constant 0 : index
    %c0_5 = arith.constant 0 : index
    %5 = vector.load %arg4[%c0_4, %c0_5] : memref<640x128xbf16, #tpu.memory_space<vmem>>, vector<640x128xbf16>
    %cst = arith.constant dense<0.000000e+00> : vector<128x128xf32>
    %6 = tpu.matmul %4, %5, %cst {dimension_numbers = #tpu.dot_dimension_numbers<[1], [0], [0], [1], [0, 0, 1, 1], [], []>} : vector<128x640xbf16>, vector<640x128xbf16>, vector<128x128xf32> -> vector<128x128xf32>
    %7 = arith.addf %3, %6 : vector<128x128xf32>
    %c0_6 = arith.constant 0 : index
    %c0_7 = arith.constant 0 : index
    %8 = vector.load %arg7[%c0_6, %c0_7] : memref<128x128xf32, #tpu.memory_space<vmem>>, vector<128x128xf32>
    tpu.vector_store %arg7[%c0_6, %c0_7], %7 {strides = array<i32>} : memref<128x128xf32, #tpu.memory_space<vmem>>, vector<128x128xf32>,
    %c0_i32_8 = arith.constant 0 : i32
    %9 = arith.cmpi eq, %arg2, %c0_i32_8 : i32
    %10 = arith.extui %9 : i1 to i32
    %c0_i32_9 = arith.constant 0 : i32
    %11 = arith.cmpi ne, %10, %c0_i32_9 : i32
    scf.if %11 {
      %c0_10 = arith.constant 0 : index
      %c0_11 = arith.constant 0 : index
      %12 = vector.load %arg7[%c0_10, %c0_11] : memref<128x128xf32, #tpu.memory_space<vmem>>, vector<128x128xf32>
      %c0_12 = arith.constant 0 : index
      %c0_13 = arith.constant 0 : index
      %13 = vector.load %arg5[%c0_12, %c0_13] : memref<1x128xf32, #tpu.memory_space<vmem>>, vector<1x128xf32>
      %14 = vector.broadcast %13 : vector<1x128xf32> to vector<128x128xf32>
      %15 = arith.addf %12, %14 : vector<128x128xf32>
      %cst_14 = arith.constant 0.000000e+00 : f32
      %16 = vector.broadcast %cst_14 : f32 to vector<128x128xf32>
      %17 = arith.maximumf %15, %16 : vector<128x128xf32>
      %18 = arith.truncf %17 : vector<128x128xf32> to vector<128x128xbf16>
      %c0_15 = arith.constant 0 : index
      %c0_16 = arith.constant 0 : index
      %19 = vector.load %arg6[%c0_15, %c0_16] : memref<128x128xbf16, #tpu.memory_space<vmem>>, vector<128x128xbf16>
      tpu.vector_store %arg6[%c0_15, %c0_16], %18 {strides = array<i32>} : memref<128x128xbf16, #tpu.memory_space<vmem>>, vector<128x128xbf16>,
    } else {
    }
    return
  }
  func.func @transform_0(%arg0: i32, %arg1: i32, %arg2: i32) -> (i32, i32) {
    %c0_i32 = arith.constant 0 : i32
    return %arg0, %arg2 : i32, i32
  }
  func.func @transform_1(%arg0: i32, %arg1: i32, %arg2: i32) -> (i32, i32) {
    %c0_i32 = arith.constant 0 : i32
    return %arg2, %arg1 : i32, i32
  }
  func.func @transform_2(%arg0: i32, %arg1: i32, %arg2: i32) -> (i32, i32) {
    %c0_i32 = arith.constant 0 : i32
    %c0_i32_0 = arith.constant 0 : i32
    return %c0_i32, %arg1 : i32, i32
  }
  func.func @transform_3(%arg0: i32, %arg1: i32, %arg2: i32) -> (i32, i32) {
    %c0_i32 = arith.constant 0 : i32
    return %arg0, %arg1 : i32, i32
  }
}

module attributes {stable_mosaic.version = 11 : i64} {
  func.func @_fused_matmul_kernel(%arg0: i32, %arg1: i32, %arg2: i32, %arg3: memref<128x128xbf16, #tpu.memory_space<vmem>>, %arg4: memref<128x128xbf16, #tpu.memory_space<vmem>>, %arg5: memref<1x128xf32, #tpu.memory_space<vmem>>, %arg6: memref<128x128xf32, #tpu.memory_space<vmem>>, %arg7: memref<128x128xf32, #tpu.memory_space<vmem>>) attributes {dimension_semantics = [#tpu.dimension_semantics<parallel>, #tpu.dimension_semantics<parallel>, #tpu.dimension_semantics<arbitrary>], iteration_bounds = array<i64: 1, 1, 1>, scalar_prefetch = 0 : i64, scratch_operands = 1 : i64, tpu.core_type = #tpu.core_type<tc>, window_params = [{transform_indices = @transform_0, window_bounds = array<i64: 128, 128>}, {transform_indices = @transform_1, window_bounds = array<i64: 128, 128>}, {transform_indices = @transform_2, window_bounds = array<i64: 1, 128>}, {transform_indices = @transform_3, window_bounds = array<i64: 128, 128>}]} {
    %c0_i32 = arith.constant 0 : i32
    %0 = arith.cmpi eq, %arg2, %c0_i32 : i32
    %1 = arith.extui %0 : i1 to i32
    %c0_i32_0 = arith.constant 0 : i32
    %2 = arith.cmpi ne, %1, %c0_i32_0 : i32
    scf.if %2 {
      %cst_10 = arith.constant 0.000000e+00 : f32
      %12 = vector.broadcast %cst_10 : f32 to vector<128x128xf32>
      %c0_11 = arith.constant 0 : index
      %c0_12 = arith.constant 0 : index
      %13 = vector.load %arg7[%c0_11, %c0_12] : memref<128x128xf32, #tpu.memory_space<vmem>>, vector<128x128xf32>
      tpu.vector_store %arg7[%c0_11, %c0_12], %12 {strides = array<i32>} : memref<128x128xf32, #tpu.memory_space<vmem>>, vector<128x128xf32>,
    } else {
    }
    %c0 = arith.constant 0 : index
    %c0_1 = arith.constant 0 : index
    %3 = vector.load %arg7[%c0, %c0_1] : memref<128x128xf32, #tpu.memory_space<vmem>>, vector<128x128xf32>
    %c0_2 = arith.constant 0 : index
    %c0_3 = arith.constant 0 : index
    %4 = vector.load %arg3[%c0_2, %c0_3] : memref<128x128xbf16, #tpu.memory_space<vmem>>, vector<128x128xbf16>
    %c0_4 = arith.constant 0 : index
    %c0_5 = arith.constant 0 : index
    %5 = vector.load %arg4[%c0_4, %c0_5] : memref<128x128xbf16, #tpu.memory_space<vmem>>, vector<128x128xbf16>
    %cst = arith.constant dense<0.000000e+00> : vector<128x128xf32>
    %6 = tpu.matmul %4, %5, %cst {dimension_numbers = #tpu.dot_dimension_numbers<[1], [0], [0], [1], [0, 0, 1, 1], [], []>} : vector<128x128xbf16>, vector<128x128xbf16>, vector<128x128xf32> -> vector<128x128xf32>
    %7 = arith.addf %3, %6 : vector<128x128xf32>
    %c0_6 = arith.constant 0 : index
    %c0_7 = arith.constant 0 : index
    %8 = vector.load %arg7[%c0_6, %c0_7] : memref<128x128xf32, #tpu.memory_space<vmem>>, vector<128x128xf32>
    tpu.vector_store %arg7[%c0_6, %c0_7], %7 {strides = array<i32>} : memref<128x128xf32, #tpu.memory_space<vmem>>, vector<128x128xf32>,
    %c0_i32_8 = arith.constant 0 : i32
    %9 = arith.cmpi eq, %arg2, %c0_i32_8 : i32
    %10 = arith.extui %9 : i1 to i32
    %c0_i32_9 = arith.constant 0 : i32
    %11 = arith.cmpi ne, %10, %c0_i32_9 : i32
    scf.if %11 {
      %c0_10 = arith.constant 0 : index
      %c0_11 = arith.constant 0 : index
      %12 = vector.load %arg7[%c0_10, %c0_11] : memref<128x128xf32, #tpu.memory_space<vmem>>, vector<128x128xf32>
      %c0_12 = arith.constant 0 : index
      %c0_13 = arith.constant 0 : index
      %13 = vector.load %arg5[%c0_12, %c0_13] : memref<1x128xf32, #tpu.memory_space<vmem>>, vector<1x128xf32>
      %14 = vector.broadcast %13 : vector<1x128xf32> to vector<128x128xf32>
      %15 = arith.addf %12, %14 : vector<128x128xf32>
      %c0_14 = arith.constant 0 : index
      %c0_15 = arith.constant 0 : index
      %16 = vector.load %arg6[%c0_14, %c0_15] : memref<128x128xf32, #tpu.memory_space<vmem>>, vector<128x128xf32>
      tpu.vector_store %arg6[%c0_14, %c0_15], %15 {strides = array<i32>} : memref<128x128xf32, #tpu.memory_space<vmem>>, vector<128x128xf32>,
    } else {
    }
    return
  }
  func.func @transform_0(%arg0: i32, %arg1: i32, %arg2: i32) -> (i32, i32) {
    %c0_i32 = arith.constant 0 : i32
    return %arg0, %arg2 : i32, i32
  }
  func.func @transform_1(%arg0: i32, %arg1: i32, %arg2: i32) -> (i32, i32) {
    %c0_i32 = arith.constant 0 : i32
    return %arg2, %arg1 : i32, i32
  }
  func.func @transform_2(%arg0: i32, %arg1: i32, %arg2: i32) -> (i32, i32) {
    %c0_i32 = arith.constant 0 : i32
    %c0_i32_0 = arith.constant 0 : i32
    return %c0_i32, %arg1 : i32, i32
  }
  func.func @transform_3(%arg0: i32, %arg1: i32, %arg2: i32) -> (i32, i32) {
    %c0_i32 = arith.constant 0 : i32
    return %arg0, %arg1 : i32, i32
  }
}

</mosaic_0001>

<bundles_post_ra>
// kernel: jigresnet_forward.23
= control target key start
LH: loop header
LB: loop body
LE: loop exit
PB: predicated region body
PF: predicated region fallthrough
CT: control target
= control target key end

     0   :  { %s2594_s12 = smov 0   ;;  %s2596_s13 = smov 0   ;;  %s2880_s0 = inlined_call_operand.vmem [shape: bf16[4608,256], index: 0, kind: input, shape index: {}]   ;;  %s2881_s1 = inlined_call_operand.vmem [shape: bf16[256,128], index: 1, kind: input, shape index: {}]   ;;  %s2882_s2 = inlined_call_operand.vmem [shape: f32[1,128], index: 2, kind: input, shape index: {}]   ;;  %s2883_s3 = inlined_call_operand.vmem [shape: bf16[4608,128], index: 3, kind: output, shape index: {}]  }
   0x1   :  { %s2598_s14 = smov 0  }
   0x2 LB: > { %s32_s15 = sadd.s32 1, %s2567_s13  ;;  %p1971_p0 = scmp.ge.s32.totalorder %s2571_s14, 1  ;;  %s2571_s14 = sphi %s2598_s14, %s13_s14   ;;  %s2567_s13 = sphi %s2596_s13, %s2885_s13   ;;  %s2563_s12 = sphi %s2594_s12, %s2884_s12  }
   0x3   : > { %p34_p1 = scmp.ge.s32.totalorder %s32_s15, 9  ;;  %p191_p2 = scmp.lt.s32.totalorder %s2571_s14, 10 }
   0x5   : > { %s2887_s15 = smov (%p34_p1, %s32_s15), 0  ;;  %p192_p3 = pnand %p1971_p0, %p191_p2 }
   0x6   : > { %v2437_v0 = vld [vmem:[%s2881_s1] sm:$0xff] (!%p192_p3)   ;;  %v2573_v1 = vmov (!%p192_p3), 0   ;;  %s1972_s18 = sshll.u32 (!%p192_p3), %s2563_s12, 6  ;;  %v2438_v2 = vld [vmem:[%s2881_s1 + $0x8] sm:$0xff] (!%p192_p3)   ;;  %v2439_v3 = vld [vmem:[%s2881_s1 + $0x10] sm:$0xff] (!%p192_p3)  }
   0x7   : > { %195 = sbr.rel (%p192_p3) target bundleno = 412 (0x19c), region = 32  ;;  %912 = vmatprep.subr.bf16.mxu0 (!%p192_p3), %v2573_v1  ;;  %2380 = vmatprep.subr.bf16.mxu1 (!%p192_p3), %v2573_v1  ;;  %p236_p4 = scmp.lt.s32.totalorder (!%p192_p3), %s1972_s18, 575  ;;  %v2440_v4 = vld [vmem:[%s2881_s1 + $0x18] sm:$0xff] (!%p192_p3)   ;;  %v2441_v5 = vld [vmem:[%s2881_s1 + $0x20] sm:$0xff] (!%p192_p3)   ;;  %v2442_v7 = vld [vmem:[%s2881_s1 + $0x28] sm:$0xff] (!%p192_p3)  }
   0x8   : > { %913 = vmatpush1.bf16.msra.mxu0 (!%p192_p3), %v2437_v0  ;;  %2396 = vmatpush1.bf16.msra.mxu1 (!%p192_p3), %v2437_v0  ;;  %v2443_v9 = vld [vmem:[%s2881_s1 + $0x30] sm:$0xff] (!%p192_p3)   ;;  %v2444_v10 = vld [vmem:[%s2881_s1 + $0x38] sm:$0xff] (!%p192_p3)   ;;  %v2445_v11 = vld [vmem:[%s2881_s1 + $0x40] sm:$0xff] (!%p192_p3)  }
   0x9   : > { %914 = vmatprep.subr.bf16.mxu0 (!%p192_p3), %v2573_v1  ;;  %2381 = vmatprep.subr.bf16.mxu1 (!%p192_p3), %v2573_v1  ;;  %v2446_v12 = vld [vmem:[%s2881_s1 + $0x48] sm:$0xff] (!%p192_p3)   ;;  %v2447_v13 = vld [vmem:[%s2881_s1 + $0x50] sm:$0xff] (!%p192_p3)   ;;  %v2448_v14 = vld [vmem:[%s2881_s1 + $0x58] sm:$0xff] (!%p192_p3)  }
   0xa   : > { %v2449_v15 = vld [vmem:[%s2881_s1 + $0x60] sm:$0xff] (!%p192_p3)   ;;  %v2450_v16 = vld [vmem:[%s2881_s1 + $0x68] sm:$0xff] (!%p192_p3)   ;;  %v2451_v17 = vld [vmem:[%s2881_s1 + $0x70] sm:$0xff] (!%p192_p3)  }
   0xb   : > { %v2452_v18 = vld [vmem:[%s2881_s1 + $0x78] sm:$0xff] (!%p192_p3)  }
   0xc   : > { %915 = vmatpush1.bf16.msra.mxu0 (!%p192_p3), %v2438_v2  ;;  %2397 = vmatpush1.bf16.msra.mxu1 (!%p192_p3), %v2438_v2 }
   0xd   : > { %916 = vmatprep.subr.bf16.mxu0 (!%p192_p3), %v2573_v1  ;;  %2382 = vmatprep.subr.bf16.mxu1 (!%p192_p3), %v2573_v1 }
   0xe   : > { %s2889_s18 = smov (!%p236_p4, %s1972_s18), 575 }
   0xf   : > { %s2124_s25 = sshll.u32 %s2889_s18, 3  ;;  %s1976_s6 = sshll.u32 %s2889_s18, 2 }
  0x10   : > { %917 = vmatpush1.bf16.msra.mxu0 %v2439_v3  ;;  %2398 = vmatpush1.bf16.msra.mxu1 %v2439_v3  ;;  %s2641_s30 = scalar_lea.vmem %s2880_s0, %s2124_s25  ;;  %s2777_s8 = scalar_lea.vmem %s2883_s3, %s1976_s6 }
  0x11   : > { %918 = vmatprep.subr.bf16.mxu0 %v2573_v1  ;;  %2383 = vmatprep.subr.bf16.mxu1 %v2573_v1  ;;  %v2455_v6 = vld [vmem:[%s2641_s30 + $0x4] ss:$8 sps:$4 sm:$0xff]   ;;  %v2453_v19 = vld [vmem:[%s2641_s30] ss:$8 sps:$4 sm:$0xff]   ;;  %v2459_v21 = vld [vmem:[%s2641_s30 + $0x14] ss:$8 sps:$4 sm:$0xff]  }
  0x12   : > { %v2458_v8 = vld [vmem:[%s2641_s30 + $0x104] ss:$8 sps:$4 sm:$0xff]   ;;  %944 = vmatprep.mubr.bf16.mxu0 %v2455_v6  ;;  %v2456_v20 = vld [vmem:[%s2641_s30 + $0x100] ss:$8 sps:$4 sm:$0xff]   ;;  %v2461_v22 = vld [vmem:[%s2641_s30 + $0x114] ss:$8 sps:$4 sm:$0xff]  }
  0x13   : > { %1072 = vmatprep.mubr.bf16.mxu1 %v2458_v8  ;;  %v2463_v23 = vld [vmem:[%s2641_s30 + $0x10] ss:$8 sps:$4 sm:$0xff]   ;;  %v2465_v25 = vld [vmem:[%s2641_s30 + $0x24] ss:$8 sps:$4 sm:$0xff]   ;;  %v2469_v27 = vld [vmem:[%s2641_s30 + $0x20] ss:$8 sps:$4 sm:$0xff]  }
  0x14   : > { %919 = vmatpush1.bf16.msra.mxu0 %v2440_v4  ;;  %2399 = vmatpush1.bf16.msra.mxu1 %v2440_v4  ;;  %v2464_v24 = vld [vmem:[%s2641_s30 + $0x110] ss:$8 sps:$4 sm:$0xff]   ;;  %v2467_v26 = vld [vmem:[%s2641_s30 + $0x124] ss:$8 sps:$4 sm:$0xff]   ;;  %v2470_v28 = vld [vmem:[%s2641_s30 + $0x120] ss:$8 sps:$4 sm:$0xff]  }
  0x15   : > { %920 = vmatprep.subr.bf16.mxu0 %v2573_v1  ;;  %2384 = vmatprep.subr.bf16.mxu1 %v2573_v1  ;;  %v2471_v29 = vld [vmem:[%s2641_s30 + $0x34] ss:$8 sps:$4 sm:$0xff]   ;;  %v2475_v31 = vld [vmem:[%s2641_s30 + $0x30] ss:$8 sps:$4 sm:$0xff]   ;;  %v2477_v33 = vld [vmem:[%s2641_s30 + $0x44] ss:$8 sps:$4 sm:$0xff]  }
  0x16   : > { %v2473_v30 = vld [vmem:[%s2641_s30 + $0x134] ss:$8 sps:$4 sm:$0xff]   ;;  %v2476_v32 = vld [vmem:[%s2641_s30 + $0x130] ss:$8 sps:$4 sm:$0xff]   ;;  %v2479_v34 = vld [vmem:[%s2641_s30 + $0x144] ss:$8 sps:$4 sm:$0xff]  }
  0x17   : > { %v2481_v35 = vld [vmem:[%s2641_s30 + $0x40] ss:$8 sps:$4 sm:$0xff]   ;;  %v2483_v37 = vld [vmem:[%s2641_s30 + $0x54] ss:$8 sps:$4 sm:$0xff]   ;;  %v2487_v39 = vld [vmem:[%s2641_s30 + $0x50] ss:$8 sps:$4 sm:$0xff]  }
  0x18   : > { %921 = vmatpush1.bf16.msra.mxu0 %v2441_v5  ;;  %2400 = vmatpush1.bf16.msra.mxu1 %v2441_v5  ;;  %v2482_v36 = vld [vmem:[%s2641_s30 + $0x140] ss:$8 sps:$4 sm:$0xff]   ;;  %v2485_v38 = vld [vmem:[%s2641_s30 + $0x154] ss:$8 sps:$4 sm:$0xff]   ;;  %v2488_v40 = vld [vmem:[%s2641_s30 + $0x150] ss:$8 sps:$4 sm:$0xff]  }
  0x19   : > { %922 = vmatprep.subr.bf16.mxu0 %v2573_v1  ;;  %2385 = vmatprep.subr.bf16.mxu1 %v2573_v1  ;;  %v2489_v41 = vld [vmem:[%s2641_s30 + $0x64] ss:$8 sps:$4 sm:$0xff]   ;;  %v2493_v43 = vld [vmem:[%s2641_s30 + $0x60] ss:$8 sps:$4 sm:$0xff]   ;;  %v2495_v45 = vld [vmem:[%s2641_s30 + $0x74] ss:$8 sps:$4 sm:$0xff]  }
  0x1a   : > { %v2491_v42 = vld [vmem:[%s2641_s30 + $0x164] ss:$8 sps:$4 sm:$0xff]   ;;  %v2494_v44 = vld [vmem:[%s2641_s30 + $0x160] ss:$8 sps:$4 sm:$0xff]   ;;  %v2497_v46 = vld [vmem:[%s2641_s30 + $0x174] ss:$8 sps:$4 sm:$0xff]  }
  0x1b   : > { %v2499_v47 = vld [vmem:[%s2641_s30 + $0x70] ss:$8 sps:$4 sm:$0xff]   ;;  %v2501_v49 = vld [vmem:[%s2641_s30 + $0x84] ss:$8 sps:$4 sm:$0xff]   ;;  %v2505_v51 = vld [vmem:[%s2641_s30 + $0x80] ss:$8 sps:$4 sm:$0xff]  }
  0x1c   : > { %923 = vmatpush1.bf16.msra.mxu0 %v2442_v7  ;;  %2401 = vmatpush1.bf16.msra.mxu1 %v2442_v7  ;;  %v2500_v48 = vld [vmem:[%s2641_s30 + $0x170] ss:$8 sps:$4 sm:$0xff]   ;;  %v2503_v50 = vld [vmem:[%s2641_s30 + $0x184] ss:$8 sps:$4 sm:$0xff]   ;;  %v2506_v52 = vld [vmem:[%s2641_s30 + $0x180] ss:$8 sps:$4 sm:$0xff]  }
  0x1d   : > { %924 = vmatprep.subr.bf16.mxu0 %v2573_v1  ;;  %2386 = vmatprep.subr.bf16.mxu1 %v2573_v1  ;;  %v2507_v53 = vld [vmem:[%s2641_s30 + $0x94] ss:$8 sps:$4 sm:$0xff]   ;;  %v2511_v55 = vld [vmem:[%s2641_s30 + $0x90] ss:$8 sps:$4 sm:$0xff]   ;;  %v2513_v57 = vld [vmem:[%s2641_s30 + $0xa4] ss:$8 sps:$4 sm:$0xff]  }
  0x1e   : > { %v2509_v54 = vld [vmem:[%s2641_s30 + $0x194] ss:$8 sps:$4 sm:$0xff]   ;;  %v2512_v56 = vld [vmem:[%s2641_s30 + $0x190] ss:$8 sps:$4 sm:$0xff]   ;;  %v2515_v58 = vld [vmem:[%s2641_s30 + $0x1a4] ss:$8 sps:$4 sm:$0xff]  }
  0x1f   : > { %v2517_v59 = vld [vmem:[%s2641_s30 + $0xa0] ss:$8 sps:$4 sm:$0xff]   ;;  %v2519_v61 = vld [vmem:[%s2641_s30 + $0xb4] ss:$8 sps:$4 sm:$0xff]   ;;  %v2523_v63 = vld [vmem:[%s2641_s30 + $0xb0] ss:$8 sps:$4 sm:$0xff]  }
  0x20   : > { %925 = vmatpush1.bf16.msra.mxu0 %v2443_v9  ;;  %2402 = vmatpush1.bf16.msra.mxu1 %v2443_v9  ;;  %v2518_v60 = vld [vmem:[%s2641_s30 + $0x1a0] ss:$8 sps:$4 sm:$0xff]   ;;  %v2521_v62 = vld [vmem:[%s2641_s30 + $0x1b4] ss:$8 sps:$4 sm:$0xff]   ;;  %v2524_v0 = vld [vmem:[%s2641_s30 + $0x1b0] ss:$8 sps:$4 sm:$0xff]  }
  0x21   : > { %926 = vmatprep.subr.bf16.mxu0 %v2573_v1  ;;  %2387 = vmatprep.subr.bf16.mxu1 %v2573_v1  ;;  %v2527_v2 = vld [vmem:[%s2641_s30 + $0x1c4] ss:$8 sps:$4 sm:$0xff]   ;;  %v2529_v3 = vld [vmem:[%s2641_s30 + $0xc0] ss:$8 sps:$4 sm:$0xff]   ;;  %v2531_v5 = vld [vmem:[%s2641_s30 + $0xd4] ss:$8 sps:$4 sm:$0xff]  }
  0x22   : > { %v2530_v4 = vld [vmem:[%s2641_s30 + $0x1c0] ss:$8 sps:$4 sm:$0xff]   ;;  %v2533_v6 = vld [vmem:[%s2641_s30 + $0x1d4] ss:$8 sps:$4 sm:$0xff]   ;;  %v2535_v7 = vld [vmem:[%s2641_s30 + $0xd0] ss:$8 sps:$4 sm:$0xff]  }
  0x23   : > { %v2536_v8 = vld [vmem:[%s2641_s30 + $0x1d0] ss:$8 sps:$4 sm:$0xff]   ;;  %v2537_v9 = vld [vmem:[%s2641_s30 + $0xe4] ss:$8 sps:$4 sm:$0xff]  }
  0x24   : > { %927 = vmatpush1.bf16.msra.mxu0 %v2444_v10  ;;  %2403 = vmatpush1.bf16.msra.mxu1 %v2444_v10  ;;  %v2539_v10 = vld [vmem:[%s2641_s30 + $0x1e4] ss:$8 sps:$4 sm:$0xff]  }
  0x25   : > { %928 = vmatprep.subr.bf16.mxu0 %v2573_v1  ;;  %2388 = vmatprep.subr.bf16.mxu1 %v2573_v1 }
  0x28   : > { %929 = vmatpush1.bf16.msra.mxu0 %v2445_v11  ;;  %2404 = vmatpush1.bf16.msra.mxu1 %v2445_v11  ;;  %v2541_v11 = vld [vmem:[%s2641_s30 + $0xe0] ss:$8 sps:$4 sm:$0xff]  }
  0x29   : > { %930 = vmatprep.subr.bf16.mxu0 %v2573_v1  ;;  %2389 = vmatprep.subr.bf16.mxu1 %v2573_v1 }
  0x2c   : > { %931 = vmatpush1.bf16.msra.mxu0 %v2446_v12  ;;  %2405 = vmatpush1.bf16.msra.mxu1 %v2446_v12  ;;  %v2542_v12 = vld [vmem:[%s2641_s30 + $0x1e0] ss:$8 sps:$4 sm:$0xff]  }
  0x2d   : > { %932 = vmatprep.subr.bf16.mxu0 %v2573_v1  ;;  %2390 = vmatprep.subr.bf16.mxu1 %v2573_v1 }
  0x30   : > { %933 = vmatpush1.bf16.msra.mxu0 %v2447_v13  ;;  %2406 = vmatpush1.bf16.msra.mxu1 %v2447_v13  ;;  %v2543_v13 = vld [vmem:[%s2641_s30 + $0xf4] ss:$8 sps:$4 sm:$0xff]  }
  0x31   : > { %934 = vmatprep.subr.bf16.mxu0 %v2573_v1  ;;  %2391 = vmatprep.subr.bf16.mxu1 %v2573_v1 }
  0x34   : > { %935 = vmatpush1.bf16.msra.mxu0 %v2448_v14  ;;  %2407 = vmatpush1.bf16.msra.mxu1 %v2448_v14  ;;  %v2545_v14 = vld [vmem:[%s2641_s30 + $0x1f4] ss:$8 sps:$4 sm:$0xff]  }
  0x35   : > { %936 = vmatprep.subr.bf16.mxu0 %v2573_v1  ;;  %2392 = vmatprep.subr.bf16.mxu1 %v2573_v1 }
  0x38   : > { %937 = vmatpush1.bf16.msra.mxu0 %v2449_v15  ;;  %2408 = vmatpush1.bf16.msra.mxu1 %v2449_v15  ;;  %v2547_v15 = vld [vmem:[%s2641_s30 + $0xf0] ss:$8 sps:$4 sm:$0xff]  }
  0x39   : > { %938 = vmatprep.subr.bf16.mxu0 %v2573_v1  ;;  %2393 = vmatprep.subr.bf16.mxu1 %v2573_v1 }
  0x3c   : > { %939 = vmatpush1.bf16.msra.mxu0 %v2450_v16  ;;  %2409 = vmatpush1.bf16.msra.mxu1 %v2450_v16  ;;  %v2548_v16 = vld [vmem:[%s2641_s30 + $0x1f0] ss:$8 sps:$4 sm:$0xff]  }
  0x3d   : > { %940 = vmatprep.subr.bf16.mxu0 %v2573_v1  ;;  %2394 = vmatprep.subr.bf16.mxu1 %v2573_v1 }
  0x40   : > { %941 = vmatpush1.bf16.msra.mxu0 %v2451_v17  ;;  %2410 = vmatpush1.bf16.msra.mxu1 %v2451_v17  ;;  %v2767_v17 = vld [vmem:[%s2882_s2] ss:$0 sm:$0xff] }
  0x41   : > { %942 = vmatprep.subr.bf16.mxu0 %v2573_v1  ;;  %2395 = vmatprep.subr.bf16.mxu1 %v2573_v1  ;;  %v2525_v1 = vld [vmem:[%s2641_s30 + $0xc4] ss:$8 sps:$4 sm:$0xff]  }
  0x44   : > { %943 = vmatpush1.bf16.msra.mxu0 %v2452_v18  ;;  %2411 = vmatpush1.bf16.msra.mxu1 %v2452_v18 }
  0x47   : > { %945 = vmatmul.mubr.bf16.vlgmr.msra.gmra.mrb[0].mxu0 %v2453_v19  ;;  %1073 = vmatmul.mubr.bf16.vlgmr.msra.gmra.mrb[0].mxu1 %v2456_v20 }
  0x48   : > { %952 = vmatprep.mubr.bf16.mxu0 %v2459_v21  ;;  %1080 = vmatprep.mubr.bf16.mxu1 %v2461_v22 }
  0x4f   : > { %953 = vmatmul.mubr.bf16.gmra.mrb[4].mxu0 %v2463_v23  ;;  %1081 = vmatmul.mubr.bf16.gmra.mrb[4].mxu1 %v2464_v24 }
  0x50   : > { %960 = vmatprep.mubr.bf16.mxu0 %v2465_v25  ;;  %1088 = vmatprep.mubr.bf16.mxu1 %v2467_v26 }
  0x57   : > { %961 = vmatmul.mubr.bf16.gmra.mrb[8].mxu0 %v2469_v27  ;;  %1089 = vmatmul.mubr.bf16.gmra.mrb[8].mxu1 %v2470_v28 }
  0x58   : > { %968 = vmatprep.mubr.bf16.mxu0 %v2471_v29  ;;  %1096 = vmatprep.mubr.bf16.mxu1 %v2473_v30 }
  0x5f   : > { %969 = vmatmul.mubr.bf16.gmra.mrb[12].mxu0 %v2475_v31  ;;  %1097 = vmatmul.mubr.bf16.gmra.mrb[12].mxu1 %v2476_v32 }
  0x60   : > { %976 = vmatprep.mubr.bf16.mxu0 %v2477_v33  ;;  %1104 = vmatprep.mubr.bf16.mxu1 %v2479_v34 }
  0x67   : > { %977 = vmatmul.mubr.bf16.gmra.mrb[16].mxu0 %v2481_v35  ;;  %1105 = vmatmul.mubr.bf16.gmra.mrb[16].mxu1 %v2482_v36 }
  0x68   : > { %984 = vmatprep.mubr.bf16.mxu0 %v2483_v37  ;;  %1112 = vmatprep.mubr.bf16.mxu1 %v2485_v38 }
  0x6f   : > { %985 = vmatmul.mubr.bf16.gmra.mrb[20].mxu0 %v2487_v39  ;;  %1113 = vmatmul.mubr.bf16.gmra.mrb[20].mxu1 %v2488_v40 }
  0x70   : > { %992 = vmatprep.mubr.bf16.mxu0 %v2489_v41  ;;  %1120 = vmatprep.mubr.bf16.mxu1 %v2491_v42 }
  0x77   : > { %993 = vmatmul.mubr.bf16.gmra.mrb[24].mxu0 %v2493_v43  ;;  %1121 = vmatmul.mubr.bf16.gmra.mrb[24].mxu1 %v2494_v44 }
  0x78   : > { %1000 = vmatprep.mubr.bf16.mxu0 %v2495_v45  ;;  %1128 = vmatprep.mubr.bf16.mxu1 %v2497_v46 }
  0x7f   : > { %1001 = vmatmul.mubr.bf16.gmra.mrb[28].mxu0 %v2499_v47  ;;  %1129 = vmatmul.mubr.bf16.gmra.mrb[28].mxu1 %v2500_v48 }
  0x80   : > { %1008 = vmatprep.mubr.bf16.mxu0 %v2501_v49  ;;  %1136 = vmatprep.mubr.bf16.mxu1 %v2503_v50 }
  0x87   : > { %1009 = vmatmul.mubr.bf16.gmra.mrb[32].mxu0 %v2505_v51  ;;  %1137 = vmatmul.mubr.bf16.gmra.mrb[32].mxu1 %v2506_v52 }
  0x88   : > { %1016 = vmatprep.mubr.bf16.mxu0 %v2507_v53  ;;  %1144 = vmatprep.mubr.bf16.mxu1 %v2509_v54 }
  0x8f   : > { %1017 = vmatmul.mubr.bf16.gmra.mrb[36].mxu0 %v2511_v55  ;;  %1145 = vmatmul.mubr.bf16.gmra.mrb[36].mxu1 %v2512_v56 }
  0x90   : > { %1024 = vmatprep.mubr.bf16.mxu0 %v2513_v57  ;;  %1152 = vmatprep.mubr.bf16.mxu1 %v2515_v58 }
  0x97   : > { %1025 = vmatmul.mubr.bf16.gmra.mrb[40].mxu0 %v2517_v59  ;;  %1153 = vmatmul.mubr.bf16.gmra.mrb[40].mxu1 %v2518_v60 }
  0x98   : > { %1032 = vmatprep.mubr.bf16.mxu0 %v2519_v61  ;;  %1160 = vmatprep.mubr.bf16.mxu1 %v2521_v62 }
  0x9f   : > { %1033 = vmatmul.mubr.bf16.gmra.mrb[44].mxu0 %v2523_v63  ;;  %1161 = vmatmul.mubr.bf16.gmra.mrb[44].mxu1 %v2524_v0 }
  0xa0   : > { %1040 = vmatprep.mubr.bf16.mxu0 %v2525_v1  ;;  %1168 = vmatprep.mubr.bf16.mxu1 %v2527_v2 }
  0xa7   : > { %1041 = vmatmul.mubr.bf16.gmra.mrb[48].mxu0 %v2529_v3  ;;  %1169 = vmatmul.mubr.bf16.gmra.mrb[48].mxu1 %v2530_v4 }
  0xa8   : > { %1048 = vmatprep.mubr.bf16.mxu0 %v2531_v5  ;;  %1176 = vmatprep.mubr.bf16.mxu1 %v2533_v6 }
  0xaf   : > { %1049 = vmatmul.mubr.bf16.gmra.mrb[52].mxu0 %v2535_v7  ;;  %1177 = vmatmul.mubr.bf16.gmra.mrb[52].mxu1 %v2536_v8 }
  0xb0   : > { %1056 = vmatprep.mubr.bf16.mxu0 %v2537_v9  ;;  %1184 = vmatprep.mubr.bf16.mxu1 %v2539_v10 }
  0xb7   : > { %1057 = vmatmul.mubr.bf16.gmra.mrb[56].mxu0 %v2541_v11  ;;  %1185 = vmatmul.mubr.bf16.gmra.mrb[56].mxu1 %v2542_v12 }
  0xb8   : > { %1064 = vmatprep.mubr.bf16.mxu0 %v2543_v13  ;;  %1192 = vmatprep.mubr.bf16.mxu1 %v2545_v14 }
  0xbf   : > { %1065 = vmatmul.mubr.bf16.gmra.mrb[60].mxu0 %v2547_v15  ;;  %1193 = vmatmul.mubr.bf16.gmra.mrb[60].mxu1 %v2548_v16 }
 0x11a   : > { %v946_v18 = vpop.f32.mrb[0].mxu0  ;;  %v1074_v19 = vpop.f32.mrb[0].mxu1 }
 0x11b   : > { %v1403_v20 = vadd.f32 %v2767_v17, %v946_v18  ;;  %v1435_v21 = vadd.f32 %v2767_v17, %v1074_v19  ;;  %v948_v22 = vpop.f32.mrb[1].mxu0  ;;  %v1076_v23 = vpop.f32.mrb[1].mxu1 }
 0x11c   : > { %v949_v24 = vpop.f32.mrb[2].mxu0  ;;  %v1077_v25 = vpop.f32.mrb[2].mxu1 }
 0x11d   : > { %v1404_v26 = vadd.f32 %v2767_v17, %v949_v24  ;;  %v1436_v27 = vadd.f32 %v2767_v17, %v1077_v25  ;;  %v951_v28 = vpop.f32.mrb[3].mxu0  ;;  %v1079_v29 = vpop.f32.mrb[3].mxu1  ;;  %v1467_v30 = vmax.f32 %v1403_v20, 0.0  ;;  %v1499_v31 = vmax.f32 %v1435_v21, 0.0 }
 0x11f   : > { %v1468_v32 = vmax.f32 %v1404_v26, 0.0  ;;  %v1500_v33 = vmax.f32 %v1436_v27, 0.0 }
 0x121   : > { %v2192_v34 = vpack.c.bf16 %v1468_v32, %v1467_v30  ;;  %v2272_v35 = vpack.c.bf16 %v1500_v33, %v1499_v31 }
 0x122   : > { %v954_v36 = vpop.f32.mrb[4].mxu0  ;;  %v1082_v37 = vpop.f32.mrb[4].mxu1 }
 0x123   : > { %2193 = vst [vmem:[%s2777_s8] sm:$0xff] %v2192_v34   ;;  %2364 = vst [vmem:[%s2777_s8 + $0x80] sm:$0xff] %v2272_v35   ;;  %v1405_v38 = vadd.f32 %v2767_v17, %v954_v36  ;;  %v1437_v39 = vadd.f32 %v2767_v17, %v1082_v37  ;;  %v956_v40 = vpop.f32.mrb[5].mxu0  ;;  %v1084_v41 = vpop.f32.mrb[5].mxu1 }
 0x124   : > { %v957_v42 = vpop.f32.mrb[6].mxu0  ;;  %v1085_v43 = vpop.f32.mrb[6].mxu1 }
 0x125   : > { %v1406_v44 = vadd.f32 %v2767_v17, %v957_v42  ;;  %v1438_v45 = vadd.f32 %v2767_v17, %v1085_v43  ;;  %v959_v46 = vpop.f32.mrb[7].mxu0  ;;  %v1087_v47 = vpop.f32.mrb[7].mxu1  ;;  %v1469_v48 = vmax.f32 %v1405_v38, 0.0  ;;  %v1501_v49 = vmax.f32 %v1437_v39, 0.0 }
 0x127   : > { %v1470_v50 = vmax.f32 %v1406_v44, 0.0  ;;  %v1502_v51 = vmax.f32 %v1438_v45, 0.0 }
 0x129   : > { %v2197_v52 = vpack.c.bf16 %v1470_v50, %v1469_v48  ;;  %v2277_v53 = vpack.c.bf16 %v1502_v51, %v1501_v49 }
 0x12a   : > { %v962_v54 = vpop.f32.mrb[8].mxu0  ;;  %v1090_v55 = vpop.f32.mrb[8].mxu1 }
 0x12b   : > { %2349 = vst [vmem:[%s2777_s8 + $0x8] sm:$0xff] %v2197_v52   ;;  %2365 = vst [vmem:[%s2777_s8 + $0x88] sm:$0xff] %v2277_v53   ;;  %v1407_v56 = vadd.f32 %v2767_v17, %v962_v54  ;;  %v1439_v57 = vadd.f32 %v2767_v17, %v1090_v55  ;;  %v964_v58 = vpop.f32.mrb[9].mxu0  ;;  %v1092_v59 = vpop.f32.mrb[9].mxu1 }
 0x12c   : > { %v965_v60 = vpop.f32.mrb[10].mxu0  ;;  %v1093_v61 = vpop.f32.mrb[10].mxu1 }
 0x12d   : > { %v1408_v62 = vadd.f32 %v2767_v17, %v965_v60  ;;  %v1440_v63 = vadd.f32 %v2767_v17, %v1093_v61  ;;  %v967_v0 = vpop.f32.mrb[11].mxu0  ;;  %v1095_v1 = vpop.f32.mrb[11].mxu1  ;;  %v1471_v2 = vmax.f32 %v1407_v56, 0.0  ;;  %v1503_v3 = vmax.f32 %v1439_v57, 0.0 }
 0x12f   : > { %v1472_v4 = vmax.f32 %v1408_v62, 0.0  ;;  %v1504_v5 = vmax.f32 %v1440_v63, 0.0 }
 0x131   : > { %v2202_v6 = vpack.c.bf16 %v1472_v4, %v1471_v2  ;;  %v2282_v7 = vpack.c.bf16 %v1504_v5, %v1503_v3 }
 0x132   : > { %v970_v8 = vpop.f32.mrb[12].mxu0  ;;  %v1098_v9 = vpop.f32.mrb[12].mxu1 }
 0x133   : > { %2350 = vst [vmem:[%s2777_s8 + $0x10] sm:$0xff] %v2202_v6   ;;  %2366 = vst [vmem:[%s2777_s8 + $0x90] sm:$0xff] %v2282_v7   ;;  %v1409_v10 = vadd.f32 %v2767_v17, %v970_v8  ;;  %v1441_v11 = vadd.f32 %v2767_v17, %v1098_v9  ;;  %v972_v12 = vpop.f32.mrb[13].mxu0  ;;  %v1100_v13 = vpop.f32.mrb[13].mxu1 }
 0x134   : > { %v973_v14 = vpop.f32.mrb[14].mxu0  ;;  %v1101_v15 = vpop.f32.mrb[14].mxu1 }
 0x135   : > { %v1410_v16 = vadd.f32 %v2767_v17, %v973_v14  ;;  %v1442_v18 = vadd.f32 %v2767_v17, %v1101_v15  ;;  %v975_v19 = vpop.f32.mrb[15].mxu0  ;;  %v1103_v20 = vpop.f32.mrb[15].mxu1  ;;  %v1473_v21 = vmax.f32 %v1409_v10, 0.0  ;;  %v1505_v22 = vmax.f32 %v1441_v11, 0.0 }
 0x137   : > { %v1474_v23 = vmax.f32 %v1410_v16, 0.0  ;;  %v1506_v24 = vmax.f32 %v1442_v18, 0.0 }
 0x139   : > { %v2207_v25 = vpack.c.bf16 %v1474_v23, %v1473_v21  ;;  %v2287_v26 = vpack.c.bf16 %v1506_v24, %v1505_v22 }
 0x13a   : > { %v978_v27 = vpop.f32.mrb[16].mxu0  ;;  %v1106_v28 = vpop.f32.mrb[16].mxu1 }
 0x13b   : > { %2351 = vst [vmem:[%s2777_s8 + $0x18] sm:$0xff] %v2207_v25   ;;  %2367 = vst [vmem:[%s2777_s8 + $0x98] sm:$0xff] %v2287_v26   ;;  %v1411_v29 = vadd.f32 %v2767_v17, %v978_v27  ;;  %v1443_v30 = vadd.f32 %v2767_v17, %v1106_v28  ;;  %v980_v31 = vpop.f32.mrb[17].mxu0  ;;  %v1108_v32 = vpop.f32.mrb[17].mxu1 }
 0x13c   : > { %v981_v33 = vpop.f32.mrb[18].mxu0  ;;  %v1109_v34 = vpop.f32.mrb[18].mxu1 }
 0x13d   : > { %v1412_v35 = vadd.f32 %v2767_v17, %v981_v33  ;;  %v1444_v36 = vadd.f32 %v2767_v17, %v1109_v34  ;;  %v983_v37 = vpop.f32.mrb[19].mxu0  ;;  %v1111_v38 = vpop.f32.mrb[19].mxu1  ;;  %v1475_v39 = vmax.f32 %v1411_v29, 0.0  ;;  %v1507_v40 = vmax.f32 %v1443_v30, 0.0 }
 0x13f   : > { %v1476_v41 = vmax.f32 %v1412_v35, 0.0  ;;  %v1508_v42 = vmax.f32 %v1444_v36, 0.0 }
 0x141   : > { %v2212_v43 = vpack.c.bf16 %v1476_v41, %v1475_v39  ;;  %v2292_v44 = vpack.c.bf16 %v1508_v42, %v1507_v40 }
 0x142   : > { %v986_v45 = vpop.f32.mrb[20].mxu0  ;;  %v1114_v46 = vpop.f32.mrb[20].mxu1 }
 0x143   : > { %2352 = vst [vmem:[%s2777_s8 + $0x20] sm:$0xff] %v2212_v43   ;;  %2368 = vst [vmem:[%s2777_s8 + $0xa0] sm:$0xff] %v2292_v44   ;;  %v1413_v47 = vadd.f32 %v2767_v17, %v986_v45  ;;  %v1445_v48 = vadd.f32 %v2767_v17, %v1114_v46  ;;  %v988_v49 = vpop.f32.mrb[21].mxu0  ;;  %v1116_v50 = vpop.f32.mrb[21].mxu1 }
 0x144   : > { %v989_v51 = vpop.f32.mrb[22].mxu0  ;;  %v1117_v52 = vpop.f32.mrb[22].mxu1 }
 0x145   : > { %v1414_v53 = vadd.f32 %v2767_v17, %v989_v51  ;;  %v1446_v54 = vadd.f32 %v2767_v17, %v1117_v52  ;;  %v991_v55 = vpop.f32.mrb[23].mxu0  ;;  %v1119_v56 = vpop.f32.mrb[23].mxu1  ;;  %v1477_v57 = vmax.f32 %v1413_v47, 0.0  ;;  %v1509_v58 = vmax.f32 %v1445_v48, 0.0 }
 0x147   : > { %v1478_v59 = vmax.f32 %v1414_v53, 0.0  ;;  %v1510_v60 = vmax.f32 %v1446_v54, 0.0 }
 0x149   : > { %v2217_v61 = vpack.c.bf16 %v1478_v59, %v1477_v57  ;;  %v2297_v62 = vpack.c.bf16 %v1510_v60, %v1509_v58 }
 0x14a   : > { %v994_v63 = vpop.f32.mrb[24].mxu0  ;;  %v1122_v0 = vpop.f32.mrb[24].mxu1 }
 0x14b   : > { %2353 = vst [vmem:[%s2777_s8 + $0x28] sm:$0xff] %v2217_v61   ;;  %2369 = vst [vmem:[%s2777_s8 + $0xa8] sm:$0xff] %v2297_v62   ;;  %v1415_v1 = vadd.f32 %v2767_v17, %v994_v63  ;;  %v1447_v2 = vadd.f32 %v2767_v17, %v1122_v0  ;;  %v996_v3 = vpop.f32.mrb[25].mxu0  ;;  %v1124_v4 = vpop.f32.mrb[25].mxu1 }
 0x14c   : > { %v997_v5 = vpop.f32.mrb[26].mxu0  ;;  %v1125_v6 = vpop.f32.mrb[26].mxu1 }
 0x14d   : > { %v1416_v7 = vadd.f32 %v2767_v17, %v997_v5  ;;  %v1448_v8 = vadd.f32 %v2767_v17, %v1125_v6  ;;  %v999_v9 = vpop.f32.mrb[27].mxu0  ;;  %v1127_v10 = vpop.f32.mrb[27].mxu1  ;;  %v1479_v11 = vmax.f32 %v1415_v1, 0.0  ;;  %v1511_v12 = vmax.f32 %v1447_v2, 0.0 }
 0x14f   : > { %v1480_v13 = vmax.f32 %v1416_v7, 0.0  ;;  %v1512_v14 = vmax.f32 %v1448_v8, 0.0 }
 0x151   : > { %v2222_v15 = vpack.c.bf16 %v1480_v13, %v1479_v11  ;;  %v2302_v16 = vpack.c.bf16 %v1512_v14, %v1511_v12 }
 0x152   : > { %v1002_v18 = vpop.f32.mrb[28].mxu0  ;;  %v1130_v19 = vpop.f32.mrb[28].mxu1 }
 0x153   : > { %2354 = vst [vmem:[%s2777_s8 + $0x30] sm:$0xff] %v2222_v15   ;;  %2370 = vst [vmem:[%s2777_s8 + $0xb0] sm:$0xff] %v2302_v16   ;;  %v1417_v20 = vadd.f32 %v2767_v17, %v1002_v18  ;;  %v1449_v21 = vadd.f32 %v2767_v17, %v1130_v19  ;;  %v1004_v22 = vpop.f32.mrb[29].mxu0  ;;  %v1132_v23 = vpop.f32.mrb[29].mxu1 }
 0x154   : > { %v1005_v24 = vpop.f32.mrb[30].mxu0  ;;  %v1133_v25 = vpop.f32.mrb[30].mxu1 }
 0x155   : > { %v1418_v26 = vadd.f32 %v2767_v17, %v1005_v24  ;;  %v1450_v27 = vadd.f32 %v2767_v17, %v1133_v25  ;;  %v1007_v28 = vpop.f32.mrb[31].mxu0  ;;  %v1135_v29 = vpop.f32.mrb[31].mxu1  ;;  %v1481_v30 = vmax.f32 %v1417_v20, 0.0  ;;  %v1513_v31 = vmax.f32 %v1449_v21, 0.0 }
 0x157   : > { %v1482_v32 = vmax.f32 %v1418_v26, 0.0  ;;  %v1514_v33 = vmax.f32 %v1450_v27, 0.0 }
 0x159   : > { %v2227_v34 = vpack.c.bf16 %v1482_v32, %v1481_v30  ;;  %v2307_v35 = vpack.c.bf16 %v1514_v33, %v1513_v31 }
 0x15a   : > { %v1010_v36 = vpop.f32.mrb[32].mxu0  ;;  %v1138_v37 = vpop.f32.mrb[32].mxu1 }
 0x15b   : > { %2355 = vst [vmem:[%s2777_s8 + $0x38] sm:$0xff] %v2227_v34   ;;  %2371 = vst [vmem:[%s2777_s8 + $0xb8] sm:$0xff] %v2307_v35   ;;  %v1419_v38 = vadd.f32 %v2767_v17, %v1010_v36  ;;  %v1451_v39 = vadd.f32 %v2767_v17, %v1138_v37  ;;  %v1012_v40 = vpop.f32.mrb[33].mxu0  ;;  %v1140_v41 = vpop.f32.mrb[33].mxu1 }
 0x15c   : > { %v1013_v42 = vpop.f32.mrb[34].mxu0  ;;  %v1141_v43 = vpop.f32.mrb[34].mxu1 }
 0x15d   : > { %v1420_v44 = vadd.f32 %v2767_v17, %v1013_v42  ;;  %v1452_v45 = vadd.f32 %v2767_v17, %v1141_v43  ;;  %v1015_v46 = vpop.f32.mrb[35].mxu0  ;;  %v1143_v47 = vpop.f32.mrb[35].mxu1  ;;  %v1483_v48 = vmax.f32 %v1419_v38, 0.0  ;;  %v1515_v49 = vmax.f32 %v1451_v39, 0.0 }
 0x15f   : > { %v1484_v50 = vmax.f32 %v1420_v44, 0.0  ;;  %v1516_v51 = vmax.f32 %v1452_v45, 0.0 }
 0x161   : > { %v2232_v52 = vpack.c.bf16 %v1484_v50, %v1483_v48  ;;  %v2312_v53 = vpack.c.bf16 %v1516_v51, %v1515_v49 }
 0x162   : > { %v1018_v54 = vpop.f32.mrb[36].mxu0  ;;  %v1146_v55 = vpop.f32.mrb[36].mxu1 }
 0x163   : > { %2356 = vst [vmem:[%s2777_s8 + $0x40] sm:$0xff] %v2232_v52   ;;  %2372 = vst [vmem:[%s2777_s8 + $0xc0] sm:$0xff] %v2312_v53   ;;  %v1421_v56 = vadd.f32 %v2767_v17, %v1018_v54  ;;  %v1453_v57 = vadd.f32 %v2767_v17, %v1146_v55  ;;  %v1020_v58 = vpop.f32.mrb[37].mxu0  ;;  %v1148_v59 = vpop.f32.mrb[37].mxu1 }
 0x164   : > { %v1021_v60 = vpop.f32.mrb[38].mxu0  ;;  %v1149_v61 = vpop.f32.mrb[38].mxu1 }
 0x165   : > { %v1422_v62 = vadd.f32 %v2767_v17, %v1021_v60  ;;  %v1454_v63 = vadd.f32 %v2767_v17, %v1149_v61  ;;  %v1023_v0 = vpop.f32.mrb[39].mxu0  ;;  %v1151_v1 = vpop.f32.mrb[39].mxu1  ;;  %v1485_v2 = vmax.f32 %v1421_v56, 0.0  ;;  %v1517_v3 = vmax.f32 %v1453_v57, 0.0 }
 0x167   : > { %v1486_v4 = vmax.f32 %v1422_v62, 0.0  ;;  %v1518_v5 = vmax.f32 %v1454_v63, 0.0 }
 0x169   : > { %v2237_v6 = vpack.c.bf16 %v1486_v4, %v1485_v2  ;;  %v2317_v7 = vpack.c.bf16 %v1518_v5, %v1517_v3 }
 0x16a   : > { %v1026_v8 = vpop.f32.mrb[40].mxu0  ;;  %v1154_v9 = vpop.f32.mrb[40].mxu1 }
 0x16b   : > { %2357 = vst [vmem:[%s2777_s8 + $0x48] sm:$0xff] %v2237_v6   ;;  %2373 = vst [vmem:[%s2777_s8 + $0xc8] sm:$0xff] %v2317_v7   ;;  %v1423_v10 = vadd.f32 %v2767_v17, %v1026_v8  ;;  %v1455_v11 = vadd.f32 %v2767_v17, %v1154_v9  ;;  %v1028_v12 = vpop.f32.mrb[41].mxu0  ;;  %v1156_v13 = vpop.f32.mrb[41].mxu1 }
 0x16c   : > { %v1029_v14 = vpop.f32.mrb[42].mxu0  ;;  %v1157_v15 = vpop.f32.mrb[42].mxu1 }
 0x16d   : > { %v1424_v16 = vadd.f32 %v2767_v17, %v1029_v14  ;;  %v1456_v18 = vadd.f32 %v2767_v17, %v1157_v15  ;;  %v1031_v19 = vpop.f32.mrb[43].mxu0  ;;  %v1159_v20 = vpop.f32.mrb[43].mxu1  ;;  %v1487_v21 = vmax.f32 %v1423_v10, 0.0  ;;  %v1519_v22 = vmax.f32 %v1455_v11, 0.0 }
 0x16f   : > { %v1488_v23 = vmax.f32 %v1424_v16, 0.0  ;;  %v1520_v24 = vmax.f32 %v1456_v18, 0.0 }
 0x171   : > { %v2242_v25 = vpack.c.bf16 %v1488_v23, %v1487_v21  ;;  %v2322_v26 = vpack.c.bf16 %v1520_v24, %v1519_v22 }
 0x172   : > { %v1034_v27 = vpop.f32.mrb[44].mxu0  ;;  %v1162_v28 = vpop.f32.mrb[44].mxu1 }
 0x173   : > { %2358 = vst [vmem:[%s2777_s8 + $0x50] sm:$0xff] %v2242_v25   ;;  %2374 = vst [vmem:[%s2777_s8 + $0xd0] sm:$0xff] %v2322_v26   ;;  %v1425_v29 = vadd.f32 %v2767_v17, %v1034_v27  ;;  %v1457_v30 = vadd.f32 %v2767_v17, %v1162_v28  ;;  %v1036_v31 = vpop.f32.mrb[45].mxu0  ;;  %v1164_v32 = vpop.f32.mrb[45].mxu1 }
 0x174   : > { %v1037_v33 = vpop.f32.mrb[46].mxu0  ;;  %v1165_v34 = vpop.f32.mrb[46].mxu1 }
 0x175   : > { %v1426_v35 = vadd.f32 %v2767_v17, %v1037_v33  ;;  %v1458_v36 = vadd.f32 %v2767_v17, %v1165_v34  ;;  %v1039_v37 = vpop.f32.mrb[47].mxu0  ;;  %v1167_v38 = vpop.f32.mrb[47].mxu1  ;;  %v1489_v39 = vmax.f32 %v1425_v29, 0.0  ;;  %v1521_v40 = vmax.f32 %v1457_v30, 0.0 }
 0x177   : > { %v1490_v41 = vmax.f32 %v1426_v35, 0.0  ;;  %v1522_v42 = vmax.f32 %v1458_v36, 0.0 }
 0x179   : > { %v2247_v43 = vpack.c.bf16 %v1490_v41, %v1489_v39  ;;  %v2327_v44 = vpack.c.bf16 %v1522_v42, %v1521_v40 }
 0x17a   : > { %v1042_v45 = vpop.f32.mrb[48].mxu0  ;;  %v1170_v46 = vpop.f32.mrb[48].mxu1 }
 0x17b   : > { %2359 = vst [vmem:[%s2777_s8 + $0x58] sm:$0xff] %v2247_v43   ;;  %2375 = vst [vmem:[%s2777_s8 + $0xd8] sm:$0xff] %v2327_v44   ;;  %v1427_v47 = vadd.f32 %v2767_v17, %v1042_v45  ;;  %v1459_v48 = vadd.f32 %v2767_v17, %v1170_v46  ;;  %v1044_v49 = vpop.f32.mrb[49].mxu0  ;;  %v1172_v50 = vpop.f32.mrb[49].mxu1 }
 0x17c   : > { %v1045_v51 = vpop.f32.mrb[50].mxu0  ;;  %v1173_v52 = vpop.f32.mrb[50].mxu1 }
 0x17d   : > { %v1428_v53 = vadd.f32 %v2767_v17, %v1045_v51  ;;  %v1460_v54 = vadd.f32 %v2767_v17, %v1173_v52  ;;  %v1047_v55 = vpop.f32.mrb[51].mxu0  ;;  %v1175_v56 = vpop.f32.mrb[51].mxu1  ;;  %v1491_v57 = vmax.f32 %v1427_v47, 0.0  ;;  %v1523_v58 = vmax.f32 %v1459_v48, 0.0 }
 0x17f   : > { %v1492_v59 = vmax.f32 %v1428_v53, 0.0  ;;  %v1524_v60 = vmax.f32 %v1460_v54, 0.0 }
 0x181   : > { %v2252_v61 = vpack.c.bf16 %v1492_v59, %v1491_v57  ;;  %v2332_v62 = vpack.c.bf16 %v1524_v60, %v1523_v58 }
 0x182   : > { %v1050_v63 = vpop.f32.mrb[52].mxu0  ;;  %v1178_v0 = vpop.f32.mrb[52].mxu1 }
 0x183   : > { %2360 = vst [vmem:[%s2777_s8 + $0x60] sm:$0xff] %v2252_v61   ;;  %2376 = vst [vmem:[%s2777_s8 + $0xe0] sm:$0xff] %v2332_v62   ;;  %v1429_v1 = vadd.f32 %v2767_v17, %v1050_v63  ;;  %v1461_v2 = vadd.f32 %v2767_v17, %v1178_v0  ;;  %v1052_v3 = vpop.f32.mrb[53].mxu0  ;;  %v1180_v4 = vpop.f32.mrb[53].mxu1 }
 0x184   : > { %v1053_v5 = vpop.f32.mrb[54].mxu0  ;;  %v1181_v6 = vpop.f32.mrb[54].mxu1 }
 0x185   : > { %v1430_v7 = vadd.f32 %v2767_v17, %v1053_v5  ;;  %v1462_v8 = vadd.f32 %v2767_v17, %v1181_v6  ;;  %v1055_v9 = vpop.f32.mrb[55].mxu0  ;;  %v1183_v10 = vpop.f32.mrb[55].mxu1  ;;  %v1493_v11 = vmax.f32 %v1429_v1, 0.0  ;;  %v1525_v12 = vmax.f32 %v1461_v2, 0.0 }
 0x187   : > { %v1494_v13 = vmax.f32 %v1430_v7, 0.0  ;;  %v1526_v14 = vmax.f32 %v1462_v8, 0.0 }
 0x189   : > { %v2257_v15 = vpack.c.bf16 %v1494_v13, %v1493_v11  ;;  %v2337_v16 = vpack.c.bf16 %v1526_v14, %v1525_v12 }
 0x18a   : > { %v1058_v18 = vpop.f32.mrb[56].mxu0  ;;  %v1186_v19 = vpop.f32.mrb[56].mxu1 }
 0x18b   : > { %2361 = vst [vmem:[%s2777_s8 + $0x68] sm:$0xff] %v2257_v15   ;;  %2377 = vst [vmem:[%s2777_s8 + $0xe8] sm:$0xff] %v2337_v16   ;;  %v1431_v20 = vadd.f32 %v2767_v17, %v1058_v18  ;;  %v1463_v21 = vadd.f32 %v2767_v17, %v1186_v19  ;;  %v1060_v22 = vpop.f32.mrb[57].mxu0  ;;  %v1188_v23 = vpop.f32.mrb[57].mxu1 }
 0x18c   : > { %v1061_v24 = vpop.f32.mrb[58].mxu0  ;;  %v1189_v25 = vpop.f32.mrb[58].mxu1 }
 0x18d   : > { %v1432_v26 = vadd.f32 %v2767_v17, %v1061_v24  ;;  %v1464_v27 = vadd.f32 %v2767_v17, %v1189_v25  ;;  %v1063_v28 = vpop.f32.mrb[59].mxu0  ;;  %v1191_v29 = vpop.f32.mrb[59].mxu1  ;;  %v1495_v30 = vmax.f32 %v1431_v20, 0.0  ;;  %v1527_v31 = vmax.f32 %v1463_v21, 0.0 }
 0x18f   : > { %v1496_v32 = vmax.f32 %v1432_v26, 0.0  ;;  %v1528_v33 = vmax.f32 %v1464_v27, 0.0 }
 0x191   : > { %v2262_v34 = vpack.c.bf16 %v1496_v32, %v1495_v30  ;;  %v2342_v35 = vpack.c.bf16 %v1528_v33, %v1527_v31 }
 0x192   : > { %v1066_v36 = vpop.f32.mrb[60].mxu0  ;;  %v1194_v37 = vpop.f32.mrb[60].mxu1 }
 0x193   : > { %2362 = vst [vmem:[%s2777_s8 + $0x70] sm:$0xff] %v2262_v34   ;;  %2378 = vst [vmem:[%s2777_s8 + $0xf0] sm:$0xff] %v2342_v35   ;;  %v1433_v38 = vadd.f32 %v2767_v17, %v1066_v36  ;;  %v1465_v39 = vadd.f32 %v2767_v17, %v1194_v37  ;;  %v1068_v40 = vpop.f32.mrb[61].mxu0  ;;  %v1196_v41 = vpop.f32.mrb[61].mxu1 }
 0x194   : > { %v1069_v42 = vpop.f32.mrb[62].mxu0  ;;  %v1197_v43 = vpop.f32.mrb[62].mxu1 }
 0x195   : > { %v1434_v44 = vadd.f32 %v2767_v17, %v1069_v42  ;;  %v1466_v45 = vadd.f32 %v2767_v17, %v1197_v43  ;;  %v1071_v46 = vpop.f32.mrb[63].mxu0  ;;  %v1199_v47 = vpop.f32.mrb[63].mxu1  ;;  %v1497_v48 = vmax.f32 %v1433_v38, 0.0  ;;  %v1529_v49 = vmax.f32 %v1465_v39, 0.0 }
 0x197   : > { %v1498_v50 = vmax.f32 %v1434_v44, 0.0  ;;  %v1530_v51 = vmax.f32 %v1466_v45, 0.0 }
 0x199   : > { %v2267_v52 = vpack.c.bf16 %v1498_v50, %v1497_v48  ;;  %v2347_v53 = vpack.c.bf16 %v1530_v51, %v1529_v49 }
 0x19b   : > { %2363 = vst [vmem:[%s2777_s8 + $0x78] sm:$0xff] %v2267_v52   ;;  %2379 = vst [vmem:[%s2777_s8 + $0xf8] sm:$0xff] %v2347_v53  }
 0x19c PF: > { %s13_s14 = sadd.s32 1, %s2571_s14   ;;  %s2884_s12 = smov %s2567_s13 }
 0x19d   : > { %p10_p5 = scmp.ge.s32.totalorder %s13_s14, 11   ;;  %s2885_s13 = smov %s2887_s15 }
 0x19f   :  { %12 = sbr.rel (!%p10_p5) target bundleno = 2 (0x2), region = 76 }

// kernel: jigresnet_forward.24
= control target key start
LH: loop header
LB: loop body
LE: loop exit
PB: predicated region body
PF: predicated region fallthrough
CT: control target
= control target key end

     0   :  { %s1937_s12 = smov 0   ;;  %s1939_s13 = smov 0   ;;  %s2106_s0 = inlined_call_operand.vmem [shape: bf16[1152,128], index: 0, kind: input, shape index: {}]   ;;  %s2107_s1 = inlined_call_operand.vmem [shape: bf16[128,128], index: 1, kind: input, shape index: {}]   ;;  %s2108_s2 = inlined_call_operand.vmem [shape: f32[1,128], index: 2, kind: input, shape index: {}]   ;;  %s2109_s3 = inlined_call_operand.vmem [shape: bf16[1152,128], index: 3, kind: output, shape index: {}]  }
   0x1   :  { %s1941_s14 = smov 0  }
   0x2 LB: > { %s32_s15 = sadd.s32 1, %s1911_s13  ;;  %p1448_p0 = scmp.ge.s32.totalorder %s1915_s14, 1  ;;  %s1915_s14 = sphi %s1941_s14, %s13_s14   ;;  %s1911_s13 = sphi %s1939_s13, %s2111_s13   ;;  %s1907_s12 = sphi %s1937_s12, %s2110_s12  }
   0x3   : > { %p34_p1 = scmp.ge.s32.totalorder %s32_s15, 3  ;;  %p188_p2 = scmp.lt.s32.totalorder %s1915_s14, 4 }
   0x5   : > { %s2113_s15 = smov (%p34_p1, %s32_s15), 0  ;;  %p189_p3 = pnand %p1448_p0, %p188_p2 }
   0x6   : > { %v1861_v0 = vld [vmem:[%s2107_s1] sm:$0xff] (!%p189_p3)   ;;  %s229_s18 = smul.u32 (!%p189_p3), 48, %s1907_s12  ;;  %v1862_v1 = vld [vmem:[%s2107_s1 + $0x8] sm:$0xff] (!%p189_p3)   ;;  %v1863_v2 = vld [vmem:[%s2107_s1 + $0x10] sm:$0xff] (!%p189_p3)  }
   0x7   : > { %192 = sbr.rel (%p189_p3) target bundleno = 301 (0x12d), region = 32  ;;  %1757 = vmatprep.subr.bf16.mxu0 (!%p189_p3), %v1861_v0  ;;  %1821 = vmatprep.subr.bf16.mxu1 (!%p189_p3), %v1861_v0  ;;  %v1864_v3 = vld [vmem:[%s2107_s1 + $0x18] sm:$0xff] (!%p189_p3)   ;;  %v1865_v6 = vld [vmem:[%s2107_s1 + $0x20] sm:$0xff] (!%p189_p3)   ;;  %v1866_v7 = vld [vmem:[%s2107_s1 + $0x28] sm:$0xff] (!%p189_p3)  }
   0x8   : > { %p230_p4 = scmp.lt.s32.totalorder (!%p189_p3), %s229_s18, 143  ;;  %1758 = vmatpush3.bf16.msra.mxu0 (!%p189_p3), %v1861_v0  ;;  %1829 = vmatpush3.bf16.msra.mxu1 (!%p189_p3), %v1861_v0  ;;  %v1867_v8 = vld [vmem:[%s2107_s1 + $0x30] sm:$0xff] (!%p189_p3)   ;;  %v1868_v9 = vld [vmem:[%s2107_s1 + $0x38] sm:$0xff] (!%p189_p3)   ;;  %v2016_v32 = vld [vmem:[%s2108_s2] ss:$0 sm:$0xff] (!%p189_p3) }
   0x9   : > { %1759 = vmatprep.subr.bf16.mxu0 (!%p189_p3), %v1862_v1  ;;  %1822 = vmatprep.subr.bf16.mxu1 (!%p189_p3), %v1862_v1 }
   0xc   : > { %1760 = vmatpush3.bf16.msra.mxu0 (!%p189_p3), %v1862_v1  ;;  %1830 = vmatpush3.bf16.msra.mxu1 (!%p189_p3), %v1862_v1 }
   0xd   : > { %1761 = vmatprep.subr.bf16.mxu0 (!%p189_p3), %v1863_v2  ;;  %1823 = vmatprep.subr.bf16.mxu1 (!%p189_p3), %v1863_v2 }
   0xe   : > { %s2115_s18 = smov (!%p230_p4, %s229_s18), 143 }
   0xf   : > { %s1449_s23 = sshll.u32 %s2115_s18, 2 }
  0x10   : > { %s1975_s28 = scalar_lea.vmem %s2106_s0, %s1449_s23  ;;  %1762 = vmatpush3.bf16.msra.mxu0 %v1863_v2  ;;  %1831 = vmatpush3.bf16.msra.mxu1 %v1863_v2  ;;  %s2031_s17 = scalar_lea.vmem %s2109_s3, %s1449_s23 }
  0x11   : > { %v1869_v4 = vld [vmem:[%s1975_s28] sm:$0xff]   ;;  %1763 = vmatprep.subr.bf16.mxu0 %v1864_v3  ;;  %1824 = vmatprep.subr.bf16.mxu1 %v1864_v3  ;;  %v1871_v10 = vld [vmem:[%s1975_s28 + $0x8] sm:$0xff]   ;;  %v1873_v12 = vld [vmem:[%s1975_s28 + $0x10] sm:$0xff]  }
  0x12   : > { %v1870_v5 = vld [vmem:[%s1975_s28 + $0x60] sm:$0xff]   ;;  %1773 = vmatprep.mubr.bf16.mxu0 %v1869_v4  ;;  %v1872_v11 = vld [vmem:[%s1975_s28 + $0x68] sm:$0xff]   ;;  %v1874_v13 = vld [vmem:[%s1975_s28 + $0x70] sm:$0xff]  }
  0x13   : > { %1797 = vmatprep.mubr.bf16.mxu1 %v1870_v5  ;;  %v1875_v14 = vld [vmem:[%s1975_s28 + $0x18] sm:$0xff]   ;;  %v1877_v16 = vld [vmem:[%s1975_s28 + $0x20] sm:$0xff]   ;;  %v1879_v18 = vld [vmem:[%s1975_s28 + $0x28] sm:$0xff]  }
  0x14   : > { %1764 = vmatpush3.bf16.msra.mxu0 %v1864_v3  ;;  %1832 = vmatpush3.bf16.msra.mxu1 %v1864_v3  ;;  %v1876_v15 = vld [vmem:[%s1975_s28 + $0x78] sm:$0xff]   ;;  %v1878_v17 = vld [vmem:[%s1975_s28 + $0x80] sm:$0xff]   ;;  %v1880_v19 = vld [vmem:[%s1975_s28 + $0x88] sm:$0xff]  }
  0x15   : > { %1765 = vmatprep.subr.bf16.mxu0 %v1865_v6  ;;  %1825 = vmatprep.subr.bf16.mxu1 %v1865_v6  ;;  %v1881_v20 = vld [vmem:[%s1975_s28 + $0x30] sm:$0xff]   ;;  %v1883_v22 = vld [vmem:[%s1975_s28 + $0x38] sm:$0xff]   ;;  %v1885_v24 = vld [vmem:[%s1975_s28 + $0x40] sm:$0xff]  }
  0x16   : > { %v1882_v21 = vld [vmem:[%s1975_s28 + $0x90] sm:$0xff]   ;;  %v1884_v23 = vld [vmem:[%s1975_s28 + $0x98] sm:$0xff]   ;;  %v1886_v25 = vld [vmem:[%s1975_s28 + $0xa0] sm:$0xff]  }
  0x17   : > { %v1887_v26 = vld [vmem:[%s1975_s28 + $0x48] sm:$0xff]   ;;  %v1889_v28 = vld [vmem:[%s1975_s28 + $0x50] sm:$0xff]   ;;  %v1891_v30 = vld [vmem:[%s1975_s28 + $0x58] sm:$0xff]  }
  0x18   : > { %1766 = vmatpush3.bf16.msra.mxu0 %v1865_v6  ;;  %1833 = vmatpush3.bf16.msra.mxu1 %v1865_v6  ;;  %v1888_v27 = vld [vmem:[%s1975_s28 + $0xa8] sm:$0xff]   ;;  %v1890_v29 = vld [vmem:[%s1975_s28 + $0xb0] sm:$0xff]   ;;  %v1892_v31 = vld [vmem:[%s1975_s28 + $0xb8] sm:$0xff]  }
  0x19   : > { %1767 = vmatprep.subr.bf16.mxu0 %v1866_v7  ;;  %1826 = vmatprep.subr.bf16.mxu1 %v1866_v7 }
  0x1c   : > { %1768 = vmatpush3.bf16.msra.mxu0 %v1866_v7  ;;  %1834 = vmatpush3.bf16.msra.mxu1 %v1866_v7 }
  0x1d   : > { %1769 = vmatprep.subr.bf16.mxu0 %v1867_v8  ;;  %1827 = vmatprep.subr.bf16.mxu1 %v1867_v8 }
  0x20   : > { %1770 = vmatpush3.bf16.msra.mxu0 %v1867_v8  ;;  %1835 = vmatpush3.bf16.msra.mxu1 %v1867_v8 }
  0x21   : > { %1771 = vmatprep.subr.bf16.mxu0 %v1868_v9  ;;  %1828 = vmatprep.subr.bf16.mxu1 %v1868_v9 }
  0x24   : > { %1772 = vmatpush3.bf16.msra.mxu0 %v1868_v9  ;;  %1836 = vmatpush3.bf16.msra.mxu1 %v1868_v9 }
  0x27   : > { %1774 = vmatmul.mubr.bf16.vlgmr.msra.gmra.mrb[0].mxu0 %v1871_v10  ;;  %1798 = vmatmul.mubr.bf16.vlgmr.msra.gmra.mrb[0].mxu1 %v1872_v11 }
  0x28   : > { %1777 = vmatprep.mubr.bf16.mxu0 %v1873_v12  ;;  %1801 = vmatprep.mubr.bf16.mxu1 %v1874_v13 }
  0x2f   : > { %1778 = vmatmul.mubr.bf16.gmra.mrb[4].mxu0 %v1875_v14  ;;  %1802 = vmatmul.mubr.bf16.gmra.mrb[4].mxu1 %v1876_v15 }
  0x30   : > { %1781 = vmatprep.mubr.bf16.mxu0 %v1877_v16  ;;  %1805 = vmatprep.mubr.bf16.mxu1 %v1878_v17 }
  0x37   : > { %1782 = vmatmul.mubr.bf16.gmra.mrb[8].mxu0 %v1879_v18  ;;  %1806 = vmatmul.mubr.bf16.gmra.mrb[8].mxu1 %v1880_v19 }
  0x38   : > { %1785 = vmatprep.mubr.bf16.mxu0 %v1881_v20  ;;  %1809 = vmatprep.mubr.bf16.mxu1 %v1882_v21 }
  0x3f   : > { %1786 = vmatmul.mubr.bf16.gmra.mrb[12].mxu0 %v1883_v22  ;;  %1810 = vmatmul.mubr.bf16.gmra.mrb[12].mxu1 %v1884_v23 }
  0x40   : > { %1789 = vmatprep.mubr.bf16.mxu0 %v1885_v24  ;;  %1813 = vmatprep.mubr.bf16.mxu1 %v1886_v25 }
  0x47   : > { %1790 = vmatmul.mubr.bf16.gmra.mrb[16].mxu0 %v1887_v26  ;;  %1814 = vmatmul.mubr.bf16.gmra.mrb[16].mxu1 %v1888_v27 }
  0x48   : > { %1793 = vmatprep.mubr.bf16.mxu0 %v1889_v28  ;;  %1817 = vmatprep.mubr.bf16.mxu1 %v1890_v29 }
  0x4f   : > { %1794 = vmatmul.mubr.bf16.gmra.mrb[20].mxu0 %v1891_v30  ;;  %1818 = vmatmul.mubr.bf16.gmra.mrb[20].mxu1 %v1892_v31 }
  0xfa   : > { %v1775_v33 = vpop.f32.mrb[0].mxu0  ;;  %v1799_v34 = vpop.f32.mrb[0].mxu1 }
  0xfb   : > { %v997_v35 = vadd.f32 %v1775_v33, %v2016_v32  ;;  %v1021_v36 = vadd.f32 %v1799_v34, %v2016_v32  ;;  %v650_v37 = vpop.f32.mrb[1].mxu0  ;;  %v746_v38 = vpop.f32.mrb[1].mxu1 }
  0xfc   : > { %v995_v39 = vadd.f32 %v2016_v32, %v650_v37  ;;  %v1019_v40 = vadd.f32 %v2016_v32, %v746_v38  ;;  %v1776_v41 = vpop.f32.mrb[2].mxu0  ;;  %v1800_v42 = vpop.f32.mrb[2].mxu1 }
  0xfd   : > { %v998_v43 = vadd.f32 %v1776_v41, %v2016_v32  ;;  %v1022_v44 = vadd.f32 %v1800_v42, %v2016_v32  ;;  %v653_v45 = vpop.f32.mrb[3].mxu0  ;;  %v749_v46 = vpop.f32.mrb[3].mxu1  ;;  %v1045_v49 = vmax.f32 %v997_v35, 0.0  ;;  %v1069_v50 = vmax.f32 %v1021_v36, 0.0 }
  0xfe   : > { %v996_v47 = vadd.f32 %v2016_v32, %v653_v45  ;;  %v1020_v48 = vadd.f32 %v2016_v32, %v749_v46  ;;  %v1043_v53 = vmax.f32 %v995_v39, 0.0  ;;  %v1067_v54 = vmax.f32 %v1019_v40, 0.0 }
  0xff   : > { %v1046_v51 = vmax.f32 %v998_v43, 0.0  ;;  %v1070_v52 = vmax.f32 %v1022_v44, 0.0 }
 0x100   : > { %v1044_v55 = vmax.f32 %v996_v47, 0.0  ;;  %v1068_v56 = vmax.f32 %v1020_v48, 0.0 }
 0x101   : > { %v1590_v57 = vpack.c.bf16 %v1046_v51, %v1045_v49  ;;  %v1650_v58 = vpack.c.bf16 %v1070_v52, %v1069_v50 }
 0x102   : > { %v1585_v59 = vpack.c.bf16 %v1044_v55, %v1043_v53  ;;  %v1645_v60 = vpack.c.bf16 %v1068_v56, %v1067_v54  ;;  %v1779_v61 = vpop.f32.mrb[4].mxu0  ;;  %v1803_v62 = vpop.f32.mrb[4].mxu1 }
 0x103   : > { %1702 = vst [vmem:[%s2031_s17 + $0x8] sm:$0xff] %v1590_v57   ;;  %1714 = vst [vmem:[%s2031_s17 + $0x68] sm:$0xff] %v1650_v58   ;;  %v1001_v63 = vadd.f32 %v1779_v61, %v2016_v32  ;;  %v1025_v0 = vadd.f32 %v1803_v62, %v2016_v32  ;;  %v666_v1 = vpop.f32.mrb[5].mxu0  ;;  %v762_v2 = vpop.f32.mrb[5].mxu1 }
 0x104   : > { %1586 = vst [vmem:[%s2031_s17] sm:$0xff] %v1585_v59   ;;  %1713 = vst [vmem:[%s2031_s17 + $0x60] sm:$0xff] %v1645_v60   ;;  %v999_v3 = vadd.f32 %v2016_v32, %v666_v1  ;;  %v1023_v4 = vadd.f32 %v2016_v32, %v762_v2  ;;  %v1780_v5 = vpop.f32.mrb[6].mxu0  ;;  %v1804_v6 = vpop.f32.mrb[6].mxu1 }
 0x105   : > { %v1002_v7 = vadd.f32 %v1780_v5, %v2016_v32  ;;  %v1026_v8 = vadd.f32 %v1804_v6, %v2016_v32  ;;  %v669_v9 = vpop.f32.mrb[7].mxu0  ;;  %v765_v10 = vpop.f32.mrb[7].mxu1  ;;  %v1049_v13 = vmax.f32 %v1001_v63, 0.0  ;;  %v1073_v14 = vmax.f32 %v1025_v0, 0.0 }
 0x106   : > { %v1000_v11 = vadd.f32 %v2016_v32, %v669_v9  ;;  %v1024_v12 = vadd.f32 %v2016_v32, %v765_v10  ;;  %v1047_v17 = vmax.f32 %v999_v3, 0.0  ;;  %v1071_v18 = vmax.f32 %v1023_v4, 0.0 }
 0x107   : > { %v1050_v15 = vmax.f32 %v1002_v7, 0.0  ;;  %v1074_v16 = vmax.f32 %v1026_v8, 0.0 }
 0x108   : > { %v1048_v19 = vmax.f32 %v1000_v11, 0.0  ;;  %v1072_v20 = vmax.f32 %v1024_v12, 0.0 }
 0x109   : > { %v1600_v21 = vpack.c.bf16 %v1050_v15, %v1049_v13  ;;  %v1660_v22 = vpack.c.bf16 %v1074_v16, %v1073_v14 }
 0x10a   : > { %v1595_v23 = vpack.c.bf16 %v1048_v19, %v1047_v17  ;;  %v1655_v24 = vpack.c.bf16 %v1072_v20, %v1071_v18  ;;  %v1783_v25 = vpop.f32.mrb[8].mxu0  ;;  %v1807_v26 = vpop.f32.mrb[8].mxu1 }
 0x10b   : > { %1704 = vst [vmem:[%s2031_s17 + $0x18] sm:$0xff] %v1600_v21   ;;  %1716 = vst [vmem:[%s2031_s17 + $0x78] sm:$0xff] %v1660_v22   ;;  %v1005_v27 = vadd.f32 %v1783_v25, %v2016_v32  ;;  %v1029_v28 = vadd.f32 %v1807_v26, %v2016_v32  ;;  %v682_v29 = vpop.f32.mrb[9].mxu0  ;;  %v778_v30 = vpop.f32.mrb[9].mxu1 }
 0x10c   : > { %1703 = vst [vmem:[%s2031_s17 + $0x10] sm:$0xff] %v1595_v23   ;;  %1715 = vst [vmem:[%s2031_s17 + $0x70] sm:$0xff] %v1655_v24   ;;  %v1003_v31 = vadd.f32 %v2016_v32, %v682_v29  ;;  %v1027_v33 = vadd.f32 %v2016_v32, %v778_v30  ;;  %v1784_v34 = vpop.f32.mrb[10].mxu0  ;;  %v1808_v35 = vpop.f32.mrb[10].mxu1 }
 0x10d   : > { %v1006_v36 = vadd.f32 %v1784_v34, %v2016_v32  ;;  %v1030_v37 = vadd.f32 %v1808_v35, %v2016_v32  ;;  %v685_v38 = vpop.f32.mrb[11].mxu0  ;;  %v781_v39 = vpop.f32.mrb[11].mxu1  ;;  %v1053_v42 = vmax.f32 %v1005_v27, 0.0  ;;  %v1077_v43 = vmax.f32 %v1029_v28, 0.0 }
 0x10e   : > { %v1004_v40 = vadd.f32 %v2016_v32, %v685_v38  ;;  %v1028_v41 = vadd.f32 %v2016_v32, %v781_v39  ;;  %v1051_v46 = vmax.f32 %v1003_v31, 0.0  ;;  %v1075_v47 = vmax.f32 %v1027_v33, 0.0 }
 0x10f   : > { %v1054_v44 = vmax.f32 %v1006_v36, 0.0  ;;  %v1078_v45 = vmax.f32 %v1030_v37, 0.0 }
 0x110   : > { %v1052_v48 = vmax.f32 %v1004_v40, 0.0  ;;  %v1076_v49 = vmax.f32 %v1028_v41, 0.0 }
 0x111   : > { %v1610_v50 = vpack.c.bf16 %v1054_v44, %v1053_v42  ;;  %v1670_v51 = vpack.c.bf16 %v1078_v45, %v1077_v43 }
 0x112   : > { %v1605_v52 = vpack.c.bf16 %v1052_v48, %v1051_v46  ;;  %v1665_v53 = vpack.c.bf16 %v1076_v49, %v1075_v47  ;;  %v1787_v54 = vpop.f32.mrb[12].mxu0  ;;  %v1811_v55 = vpop.f32.mrb[12].mxu1 }
 0x113   : > { %1706 = vst [vmem:[%s2031_s17 + $0x28] sm:$0xff] %v1610_v50   ;;  %1718 = vst [vmem:[%s2031_s17 + $0x88] sm:$0xff] %v1670_v51   ;;  %v1009_v56 = vadd.f32 %v1787_v54, %v2016_v32  ;;  %v1033_v57 = vadd.f32 %v1811_v55, %v2016_v32  ;;  %v698_v58 = vpop.f32.mrb[13].mxu0  ;;  %v794_v59 = vpop.f32.mrb[13].mxu1 }
 0x114   : > { %1705 = vst [vmem:[%s2031_s17 + $0x20] sm:$0xff] %v1605_v52   ;;  %1717 = vst [vmem:[%s2031_s17 + $0x80] sm:$0xff] %v1665_v53   ;;  %v1007_v60 = vadd.f32 %v2016_v32, %v698_v58  ;;  %v1031_v61 = vadd.f32 %v2016_v32, %v794_v59  ;;  %v1788_v62 = vpop.f32.mrb[14].mxu0  ;;  %v1812_v63 = vpop.f32.mrb[14].mxu1 }
 0x115   : > { %v1010_v0 = vadd.f32 %v1788_v62, %v2016_v32  ;;  %v1034_v1 = vadd.f32 %v1812_v63, %v2016_v32  ;;  %v701_v2 = vpop.f32.mrb[15].mxu0  ;;  %v797_v3 = vpop.f32.mrb[15].mxu1  ;;  %v1057_v6 = vmax.f32 %v1009_v56, 0.0  ;;  %v1081_v7 = vmax.f32 %v1033_v57, 0.0 }
 0x116   : > { %v1008_v4 = vadd.f32 %v2016_v32, %v701_v2  ;;  %v1032_v5 = vadd.f32 %v2016_v32, %v797_v3  ;;  %v1055_v10 = vmax.f32 %v1007_v60, 0.0  ;;  %v1079_v11 = vmax.f32 %v1031_v61, 0.0 }
 0x117   : > { %v1058_v8 = vmax.f32 %v1010_v0, 0.0  ;;  %v1082_v9 = vmax.f32 %v1034_v1, 0.0 }
 0x118   : > { %v1056_v12 = vmax.f32 %v1008_v4, 0.0  ;;  %v1080_v13 = vmax.f32 %v1032_v5, 0.0 }
 0x119   : > { %v1620_v14 = vpack.c.bf16 %v1058_v8, %v1057_v6  ;;  %v1680_v15 = vpack.c.bf16 %v1082_v9, %v1081_v7 }
 0x11a   : > { %v1615_v16 = vpack.c.bf16 %v1056_v12, %v1055_v10  ;;  %v1675_v17 = vpack.c.bf16 %v1080_v13, %v1079_v11  ;;  %v1791_v18 = vpop.f32.mrb[16].mxu0  ;;  %v1815_v19 = vpop.f32.mrb[16].mxu1 }
 0x11b   : > { %1708 = vst [vmem:[%s2031_s17 + $0x38] sm:$0xff] %v1620_v14   ;;  %1720 = vst [vmem:[%s2031_s17 + $0x98] sm:$0xff] %v1680_v15   ;;  %v1013_v20 = vadd.f32 %v1791_v18, %v2016_v32  ;;  %v1037_v21 = vadd.f32 %v1815_v19, %v2016_v32  ;;  %v714_v22 = vpop.f32.mrb[17].mxu0  ;;  %v810_v23 = vpop.f32.mrb[17].mxu1 }
 0x11c   : > { %1707 = vst [vmem:[%s2031_s17 + $0x30] sm:$0xff] %v1615_v16   ;;  %1719 = vst [vmem:[%s2031_s17 + $0x90] sm:$0xff] %v1675_v17   ;;  %v1011_v24 = vadd.f32 %v2016_v32, %v714_v22  ;;  %v1035_v25 = vadd.f32 %v2016_v32, %v810_v23  ;;  %v1792_v26 = vpop.f32.mrb[18].mxu0  ;;  %v1816_v27 = vpop.f32.mrb[18].mxu1 }
 0x11d   : > { %v1014_v28 = vadd.f32 %v1792_v26, %v2016_v32  ;;  %v1038_v29 = vadd.f32 %v1816_v27, %v2016_v32  ;;  %v717_v30 = vpop.f32.mrb[19].mxu0  ;;  %v813_v31 = vpop.f32.mrb[19].mxu1  ;;  %v1061_v35 = vmax.f32 %v1013_v20, 0.0  ;;  %v1085_v36 = vmax.f32 %v1037_v21, 0.0 }
 0x11e   : > { %v1012_v33 = vadd.f32 %v2016_v32, %v717_v30  ;;  %v1036_v34 = vadd.f32 %v2016_v32, %v813_v31  ;;  %v1059_v39 = vmax.f32 %v1011_v24, 0.0  ;;  %v1083_v40 = vmax.f32 %v1035_v25, 0.0 }
 0x11f   : > { %v1062_v37 = vmax.f32 %v1014_v28, 0.0  ;;  %v1086_v38 = vmax.f32 %v1038_v29, 0.0 }
 0x120   : > { %v1060_v41 = vmax.f32 %v1012_v33, 0.0  ;;  %v1084_v42 = vmax.f32 %v1036_v34, 0.0 }
 0x121   : > { %v1630_v43 = vpack.c.bf16 %v1062_v37, %v1061_v35  ;;  %v1690_v44 = vpack.c.bf16 %v1086_v38, %v1085_v36 }
 0x122   : > { %v1625_v45 = vpack.c.bf16 %v1060_v41, %v1059_v39  ;;  %v1685_v46 = vpack.c.bf16 %v1084_v42, %v1083_v40  ;;  %v1795_v47 = vpop.f32.mrb[20].mxu0  ;;  %v1819_v48 = vpop.f32.mrb[20].mxu1 }
 0x123   : > { %1710 = vst [vmem:[%s2031_s17 + $0x48] sm:$0xff] %v1630_v43   ;;  %1722 = vst [vmem:[%s2031_s17 + $0xa8] sm:$0xff] %v1690_v44   ;;  %v1017_v49 = vadd.f32 %v1795_v47, %v2016_v32  ;;  %v1041_v50 = vadd.f32 %v1819_v48, %v2016_v32  ;;  %v730_v51 = vpop.f32.mrb[21].mxu0  ;;  %v826_v52 = vpop.f32.mrb[21].mxu1 }
 0x124   : > { %1709 = vst [vmem:[%s2031_s17 + $0x40] sm:$0xff] %v1625_v45   ;;  %1721 = vst [vmem:[%s2031_s17 + $0xa0] sm:$0xff] %v1685_v46   ;;  %v1015_v53 = vadd.f32 %v2016_v32, %v730_v51  ;;  %v1039_v54 = vadd.f32 %v2016_v32, %v826_v52  ;;  %v1796_v55 = vpop.f32.mrb[22].mxu0  ;;  %v1820_v56 = vpop.f32.mrb[22].mxu1 }
 0x125   : > { %v1018_v57 = vadd.f32 %v1796_v55, %v2016_v32  ;;  %v1042_v58 = vadd.f32 %v1820_v56, %v2016_v32  ;;  %v733_v59 = vpop.f32.mrb[23].mxu0  ;;  %v829_v60 = vpop.f32.mrb[23].mxu1  ;;  %v1065_v63 = vmax.f32 %v1017_v49, 0.0  ;;  %v1089_v0 = vmax.f32 %v1041_v50, 0.0 }
 0x126   : > { %v1016_v61 = vadd.f32 %v2016_v32, %v733_v59  ;;  %v1040_v62 = vadd.f32 %v2016_v32, %v829_v60  ;;  %v1063_v3 = vmax.f32 %v1015_v53, 0.0  ;;  %v1087_v4 = vmax.f32 %v1039_v54, 0.0 }
 0x127   : > { %v1066_v1 = vmax.f32 %v1018_v57, 0.0  ;;  %v1090_v2 = vmax.f32 %v1042_v58, 0.0 }
 0x128   : > { %v1064_v5 = vmax.f32 %v1016_v61, 0.0  ;;  %v1088_v6 = vmax.f32 %v1040_v62, 0.0 }
 0x129   : > { %v1640_v7 = vpack.c.bf16 %v1066_v1, %v1065_v63  ;;  %v1700_v8 = vpack.c.bf16 %v1090_v2, %v1089_v0 }
 0x12a   : > { %v1635_v9 = vpack.c.bf16 %v1064_v5, %v1063_v3  ;;  %v1695_v10 = vpack.c.bf16 %v1088_v6, %v1087_v4 }
 0x12b   : > { %1712 = vst [vmem:[%s2031_s17 + $0x58] sm:$0xff] %v1640_v7   ;;  %1724 = vst [vmem:[%s2031_s17 + $0xb8] sm:$0xff] %v1700_v8  }
 0x12c   : > { %1711 = vst [vmem:[%s2031_s17 + $0x50] sm:$0xff] %v1635_v9   ;;  %1723 = vst [vmem:[%s2031_s17 + $0xb0] sm:$0xff] %v1695_v10  }
 0x12d PF: > { %s13_s14 = sadd.s32 1, %s1915_s14   ;;  %s2110_s12 = smov %s1911_s13 }
 0x12e   : > { %p10_p5 = scmp.ge.s32.totalorder %s13_s14, 5   ;;  %s2111_s13 = smov %s2113_s15 }
 0x130   :  { %12 = sbr.rel (!%p10_p5) target bundleno = 2 (0x2), region = 76 }

// kernel: jigresnet_forward.25
= control target key start
LH: loop header
LB: loop body
LE: loop exit
PB: predicated region body
PF: predicated region fallthrough
CT: control target
= control target key end

     0   :  { %s2281_s15 = smov 0   ;;  %s2283_s16 = smov 0   ;;  %s2645_s0 = inlined_call_operand.vmem [shape: bf16[1152,128], index: 0, kind: input, shape index: {}]   ;;  %s2646_s1 = inlined_call_operand.vmem [shape: bf16[128,128], index: 1, kind: input, shape index: {}]   ;;  %s2647_s2 = inlined_call_operand.vmem [shape: f32[1,128], index: 2, kind: input, shape index: {}]   ;;  %s2648_s3 = inlined_call_operand.vmem [shape: bf16[1152,128], index: 3, kind: input, shape index: {}]   ;;  %s2649_s4 = inlined_call_operand.vmem [shape: bf16[1152,128], index: 4, kind: output, shape index: {}]  }
   0x1   :  { %s2285_s17 = smov 0  }
   0x2 LB: > { %s33_s18 = sadd.s32 1, %s2250_s16  ;;  %p1667_p0 = scmp.ge.s32.totalorder %s2254_s17, 1  ;;  %s2254_s17 = sphi %s2285_s17, %s14_s17   ;;  %s2250_s16 = sphi %s2283_s16, %s2651_s16   ;;  %s2246_s15 = sphi %s2281_s15, %s2650_s15  }
   0x3   : > { %p35_p1 = scmp.ge.s32.totalorder %s33_s18, 3  ;;  %p229_p2 = scmp.lt.s32.totalorder %s2254_s17, 4 }
   0x5   : > { %s2653_s18 = smov (%p35_p1, %s33_s18), 0  ;;  %p230_p3 = pnand %p1667_p0, %p229_p2 }
   0x6   : > { %v2200_v0 = vld [vmem:[%s2646_s1] sm:$0xff] (!%p230_p3)   ;;  %s280_s21 = smul.u32 (!%p230_p3), 48, %s2246_s15  ;;  %v2201_v1 = vld [vmem:[%s2646_s1 + $0x8] sm:$0xff] (!%p230_p3)   ;;  %v2202_v2 = vld [vmem:[%s2646_s1 + $0x10] sm:$0xff] (!%p230_p3)  }
   0x7   : > { %233 = sbr.rel (%p230_p3) target bundleno = 304 (0x130), region = 36  ;;  %2096 = vmatprep.subr.bf16.mxu0 (!%p230_p3), %v2200_v0  ;;  %2160 = vmatprep.subr.bf16.mxu1 (!%p230_p3), %v2200_v0  ;;  %v2203_v3 = vld [vmem:[%s2646_s1 + $0x18] sm:$0xff] (!%p230_p3)   ;;  %v2204_v6 = vld [vmem:[%s2646_s1 + $0x20] sm:$0xff] (!%p230_p3)   ;;  %v2205_v7 = vld [vmem:[%s2646_s1 + $0x28] sm:$0xff] (!%p230_p3)  }
   0x8   : > { %p281_p4 = scmp.lt.s32.totalorder (!%p230_p3), %s280_s21, 143  ;;  %2097 = vmatpush3.bf16.msra.mxu0 (!%p230_p3), %v2200_v0  ;;  %2168 = vmatpush3.bf16.msra.mxu1 (!%p230_p3), %v2200_v0  ;;  %v2206_v8 = vld [vmem:[%s2646_s1 + $0x30] sm:$0xff] (!%p230_p3)   ;;  %v2207_v9 = vld [vmem:[%s2646_s1 + $0x38] sm:$0xff] (!%p230_p3)   ;;  %v2412_v56 = vld [vmem:[%s2647_s2] ss:$0 sm:$0xff] (!%p230_p3) }
   0x9   : > { %2098 = vmatprep.subr.bf16.mxu0 (!%p230_p3), %v2201_v1  ;;  %2161 = vmatprep.subr.bf16.mxu1 (!%p230_p3), %v2201_v1 }
   0xc   : > { %2099 = vmatpush3.bf16.msra.mxu0 (!%p230_p3), %v2201_v1  ;;  %2169 = vmatpush3.bf16.msra.mxu1 (!%p230_p3), %v2201_v1 }
   0xd   : > { %2100 = vmatprep.subr.bf16.mxu0 (!%p230_p3), %v2202_v2  ;;  %2162 = vmatprep.subr.bf16.mxu1 (!%p230_p3), %v2202_v2 }
   0xe   : > { %s2655_s21 = smov (!%p281_p4, %s280_s21), 143 }
   0xf   : > { %s2308_s26 = sshll.u32 %s2655_s21, 2 }
  0x10   : > { %s2317_s5 = scalar_lea.vmem %s2645_s0, %s2308_s26  ;;  %2101 = vmatpush3.bf16.msra.mxu0 %v2202_v2  ;;  %2170 = vmatpush3.bf16.msra.mxu1 %v2202_v2  ;;  %s2359_s19 = scalar_lea.vmem %s2648_s3, %s2308_s26 }
  0x11   : > { %v2208_v4 = vld [vmem:[%s2317_s5] sm:$0xff]   ;;  %2102 = vmatprep.subr.bf16.mxu0 %v2203_v3  ;;  %2163 = vmatprep.subr.bf16.mxu1 %v2203_v3  ;;  %v2210_v10 = vld [vmem:[%s2317_s5 + $0x8] sm:$0xff]   ;;  %v2212_v12 = vld [vmem:[%s2317_s5 + $0x10] sm:$0xff]   ;;  %s2458_s24 = scalar_lea.vmem %s2649_s4, %s2308_s26 }
  0x12   : > { %v2209_v5 = vld [vmem:[%s2317_s5 + $0x60] sm:$0xff]   ;;  %2112 = vmatprep.mubr.bf16.mxu0 %v2208_v4  ;;  %v2211_v11 = vld [vmem:[%s2317_s5 + $0x68] sm:$0xff]   ;;  %v2213_v13 = vld [vmem:[%s2317_s5 + $0x70] sm:$0xff]  }
  0x13   : > { %2136 = vmatprep.mubr.bf16.mxu1 %v2209_v5  ;;  %v2214_v14 = vld [vmem:[%s2317_s5 + $0x18] sm:$0xff]   ;;  %v2216_v16 = vld [vmem:[%s2317_s5 + $0x20] sm:$0xff]   ;;  %v2218_v18 = vld [vmem:[%s2317_s5 + $0x28] sm:$0xff]  }
  0x14   : > { %2103 = vmatpush3.bf16.msra.mxu0 %v2203_v3  ;;  %2171 = vmatpush3.bf16.msra.mxu1 %v2203_v3  ;;  %v2215_v15 = vld [vmem:[%s2317_s5 + $0x78] sm:$0xff]   ;;  %v2217_v17 = vld [vmem:[%s2317_s5 + $0x80] sm:$0xff]   ;;  %v2219_v19 = vld [vmem:[%s2317_s5 + $0x88] sm:$0xff]  }
  0x15   : > { %2104 = vmatprep.subr.bf16.mxu0 %v2204_v6  ;;  %2164 = vmatprep.subr.bf16.mxu1 %v2204_v6  ;;  %v2220_v20 = vld [vmem:[%s2317_s5 + $0x30] sm:$0xff]   ;;  %v2222_v22 = vld [vmem:[%s2317_s5 + $0x38] sm:$0xff]   ;;  %v2224_v24 = vld [vmem:[%s2317_s5 + $0x40] sm:$0xff]  }
  0x16   : > { %v2221_v21 = vld [vmem:[%s2317_s5 + $0x90] sm:$0xff]   ;;  %v2223_v23 = vld [vmem:[%s2317_s5 + $0x98] sm:$0xff]   ;;  %v2225_v25 = vld [vmem:[%s2317_s5 + $0xa0] sm:$0xff]  }
  0x17   : > { %v2226_v26 = vld [vmem:[%s2317_s5 + $0x48] sm:$0xff]   ;;  %v2228_v28 = vld [vmem:[%s2317_s5 + $0x50] sm:$0xff]   ;;  %v2230_v30 = vld [vmem:[%s2317_s5 + $0x58] sm:$0xff]  }
  0x18   : > { %2105 = vmatpush3.bf16.msra.mxu0 %v2204_v6  ;;  %2172 = vmatpush3.bf16.msra.mxu1 %v2204_v6  ;;  %v2227_v27 = vld [vmem:[%s2317_s5 + $0xa8] sm:$0xff]   ;;  %v2229_v29 = vld [vmem:[%s2317_s5 + $0xb0] sm:$0xff]   ;;  %v2231_v31 = vld [vmem:[%s2317_s5 + $0xb8] sm:$0xff]  }
  0x19   : > { %2106 = vmatprep.subr.bf16.mxu0 %v2205_v7  ;;  %2165 = vmatprep.subr.bf16.mxu1 %v2205_v7  ;;  %v2362_v32 = vld [vmem:[%s2359_s19 + $0x8] sm:$0xff]   ;;  %v2368_v34 = vld [vmem:[%s2359_s19] sm:$0xff]   ;;  %v2374_v36 = vld [vmem:[%s2359_s19 + $0x18] sm:$0xff]  }
  0x1a   : > { %v2365_v33 = vld [vmem:[%s2359_s19 + $0x68] sm:$0xff]   ;;  %v2371_v35 = vld [vmem:[%s2359_s19 + $0x60] sm:$0xff]   ;;  %v2377_v37 = vld [vmem:[%s2359_s19 + $0x78] sm:$0xff]   ;;  %v1808_v40 = vunpack.c.l.bf16 %v2362_v32  ;;  %v1804_v42 = vunpack.c.l.bf16 %v2368_v34  ;;  %v1809_v45 = vunpack.c.h.bf16 %v2362_v32  ;;  %v1805_v47 = vunpack.c.h.bf16 %v2368_v34 }
  0x1b   : > { %v2380_v38 = vld [vmem:[%s2359_s19 + $0x10] sm:$0xff]   ;;  %v1856_v41 = vunpack.c.l.bf16 %v2365_v33  ;;  %v1852_v43 = vunpack.c.l.bf16 %v2371_v35  ;;  %v2390_v44 = vld [vmem:[%s2359_s19 + $0x28] sm:$0xff]   ;;  %v1857_v46 = vunpack.c.h.bf16 %v2365_v33  ;;  %v1853_v48 = vunpack.c.h.bf16 %v2371_v35  ;;  %v2400_v50 = vld [vmem:[%s2359_s19 + $0x20] sm:$0xff]  }
  0x1c   : > { %2107 = vmatpush3.bf16.msra.mxu0 %v2205_v7  ;;  %2173 = vmatpush3.bf16.msra.mxu1 %v2205_v7  ;;  %v2383_v39 = vld [vmem:[%s2359_s19 + $0x70] sm:$0xff]   ;;  %v2397_v49 = vld [vmem:[%s2359_s19 + $0x88] sm:$0xff]   ;;  %v2403_v51 = vld [vmem:[%s2359_s19 + $0x80] sm:$0xff]   ;;  %v1816_v52 = vunpack.c.l.bf16 %v2374_v36  ;;  %v1864_v53 = vunpack.c.l.bf16 %v2377_v37  ;;  %v1812_v54 = vunpack.c.l.bf16 %v2380_v38  ;;  %v1817_v57 = vunpack.c.h.bf16 %v2374_v36 }
  0x1d   : > { %2108 = vmatprep.subr.bf16.mxu0 %v2206_v8  ;;  %2166 = vmatprep.subr.bf16.mxu1 %v2206_v8  ;;  %v1860_v55 = vunpack.c.l.bf16 %v2383_v39  ;;  %v1865_v58 = vunpack.c.h.bf16 %v2377_v37  ;;  %v1813_v59 = vunpack.c.h.bf16 %v2380_v38  ;;  %v1861_v60 = vunpack.c.h.bf16 %v2383_v39  ;;  %v2419_v61 = vld [vmem:[%s2359_s19 + $0x38] sm:$0xff]   ;;  %v2429_v3 = vld [vmem:[%s2359_s19 + $0x30] sm:$0xff]  }
  0x1e   : > { %v2422_v62 = vld [vmem:[%s2359_s19 + $0x98] sm:$0xff]   ;;  %v1824_v63 = vunpack.c.l.bf16 %v2390_v44  ;;  %v1872_v0 = vunpack.c.l.bf16 %v2397_v49  ;;  %v1820_v1 = vunpack.c.l.bf16 %v2400_v50  ;;  %v1868_v2 = vunpack.c.l.bf16 %v2403_v51  ;;  %v2432_v4 = vld [vmem:[%s2359_s19 + $0x90] sm:$0xff]  }
  0x1f   : > { %v1825_v7 = vunpack.c.h.bf16 %v2390_v44  ;;  %v1833_v35 = vunpack.c.h.bf16 %v2419_v61 }
  0x20   : > { %2109 = vmatpush3.bf16.msra.mxu0 %v2206_v8  ;;  %2174 = vmatpush3.bf16.msra.mxu1 %v2206_v8  ;;  %v1873_v8 = vunpack.c.h.bf16 %v2397_v49 }
  0x21   : > { %2110 = vmatprep.subr.bf16.mxu0 %v2207_v9  ;;  %2167 = vmatprep.subr.bf16.mxu1 %v2207_v9 }
  0x24   : > { %2111 = vmatpush3.bf16.msra.mxu0 %v2207_v9  ;;  %2175 = vmatpush3.bf16.msra.mxu1 %v2207_v9  ;;  %v1821_v9 = vunpack.c.h.bf16 %v2400_v50 }
  0x27   : > { %2113 = vmatmul.mubr.bf16.vlgmr.msra.gmra.mrb[0].mxu0 %v2210_v10  ;;  %2137 = vmatmul.mubr.bf16.vlgmr.msra.gmra.mrb[0].mxu1 %v2211_v11  ;;  %v1869_v10 = vunpack.c.h.bf16 %v2403_v51 }
  0x28   : > { %2116 = vmatprep.mubr.bf16.mxu0 %v2212_v12  ;;  %2140 = vmatprep.mubr.bf16.mxu1 %v2213_v13 }
  0x2f   : > { %2117 = vmatmul.mubr.bf16.gmra.mrb[4].mxu0 %v2214_v14  ;;  %2141 = vmatmul.mubr.bf16.gmra.mrb[4].mxu1 %v2215_v15  ;;  %v1832_v15 = vunpack.c.l.bf16 %v2419_v61 }
  0x30   : > { %2120 = vmatprep.mubr.bf16.mxu0 %v2216_v16  ;;  %2144 = vmatprep.mubr.bf16.mxu1 %v2217_v17  ;;  %v1880_v16 = vunpack.c.l.bf16 %v2422_v62 }
  0x37   : > { %2121 = vmatmul.mubr.bf16.gmra.mrb[8].mxu0 %v2218_v18  ;;  %2145 = vmatmul.mubr.bf16.gmra.mrb[8].mxu1 %v2219_v19 }
  0x38   : > { %2124 = vmatprep.mubr.bf16.mxu0 %v2220_v20  ;;  %2148 = vmatprep.mubr.bf16.mxu1 %v2221_v21  ;;  %v1828_v21 = vunpack.c.l.bf16 %v2429_v3 }
  0x3f   : > { %2125 = vmatmul.mubr.bf16.gmra.mrb[12].mxu0 %v2222_v22  ;;  %2149 = vmatmul.mubr.bf16.gmra.mrb[12].mxu1 %v2223_v23  ;;  %v1876_v22 = vunpack.c.l.bf16 %v2432_v4 }
  0x40   : > { %2128 = vmatprep.mubr.bf16.mxu0 %v2224_v24  ;;  %2152 = vmatprep.mubr.bf16.mxu1 %v2225_v25 }
  0x47   : > { %2129 = vmatmul.mubr.bf16.gmra.mrb[16].mxu0 %v2226_v26  ;;  %2153 = vmatmul.mubr.bf16.gmra.mrb[16].mxu1 %v2227_v27 }
  0x48   : > { %2132 = vmatprep.mubr.bf16.mxu0 %v2228_v28  ;;  %2156 = vmatprep.mubr.bf16.mxu1 %v2229_v29 }
  0x4f   : > { %2133 = vmatmul.mubr.bf16.gmra.mrb[20].mxu0 %v2230_v30  ;;  %2157 = vmatmul.mubr.bf16.gmra.mrb[20].mxu1 %v2231_v31 }
  0xfa   : > { %v2114_v5 = vpop.f32.mrb[0].mxu0  ;;  %v2138_v6 = vpop.f32.mrb[0].mxu1 }
  0xfb   : > { %v1057_v11 = vadd.f32 %v2114_v5, %v2412_v56  ;;  %v1081_v12 = vadd.f32 %v2138_v6, %v2412_v56  ;;  %v710_v13 = vpop.f32.mrb[1].mxu0  ;;  %v806_v14 = vpop.f32.mrb[1].mxu1  ;;  %v1829_v6 = vunpack.c.h.bf16 %v2429_v3 }
  0xfc   : > { %v1055_v17 = vadd.f32 %v2412_v56, %v710_v13  ;;  %v1079_v18 = vadd.f32 %v2412_v56, %v806_v14  ;;  %v2115_v19 = vpop.f32.mrb[2].mxu0  ;;  %v2139_v20 = vpop.f32.mrb[2].mxu1 }
  0xfd   : > { %v1201_v23 = vadd.f32 %v1808_v40, %v1057_v11  ;;  %v1225_v24 = vadd.f32 %v1856_v41, %v1081_v12  ;;  %v1058_v25 = vadd.f32 %v2115_v19, %v2412_v56  ;;  %v1082_v26 = vadd.f32 %v2139_v20, %v2412_v56  ;;  %v713_v27 = vpop.f32.mrb[3].mxu0  ;;  %v809_v28 = vpop.f32.mrb[3].mxu1 }
  0xfe   : > { %v1199_v29 = vadd.f32 %v1804_v42, %v1055_v17  ;;  %v1223_v30 = vadd.f32 %v1852_v43, %v1079_v18  ;;  %v1056_v31 = vadd.f32 %v2412_v56, %v713_v27  ;;  %v1080_v32 = vadd.f32 %v2412_v56, %v809_v28 }
  0xff   : > { %v1202_v33 = vadd.f32 %v1809_v45, %v1058_v25  ;;  %v1226_v34 = vadd.f32 %v1857_v46, %v1082_v26  ;;  %v1881_v40 = vunpack.c.h.bf16 %v2422_v62  ;;  %v1877_v11 = vunpack.c.h.bf16 %v2432_v4 }
 0x100   : > { %v1200_v41 = vadd.f32 %v1805_v47, %v1056_v31  ;;  %v1224_v5 = vadd.f32 %v1853_v48, %v1080_v32  ;;  %v1249_v12 = vmax.f32 %v1201_v23, 0.0  ;;  %v1273_v42 = vmax.f32 %v1225_v24, 0.0  ;;  %v2465_v32 = vld [vmem:[%s2359_s19 + $0x48] sm:$0xff]  }
 0x101   : > { %v1250_v43 = vmax.f32 %v1202_v33, 0.0  ;;  %v1274_v13 = vmax.f32 %v1226_v34, 0.0  ;;  %v1247_v14 = vmax.f32 %v1199_v29, 0.0  ;;  %v1271_v17 = vmax.f32 %v1223_v30, 0.0  ;;  %v2468_v33 = vld [vmem:[%s2359_s19 + $0xa8] sm:$0xff]  }
 0x102   : > { %v1248_v45 = vmax.f32 %v1200_v41, 0.0  ;;  %v1272_v46 = vmax.f32 %v1224_v5, 0.0  ;;  %v2118_v47 = vpop.f32.mrb[4].mxu0  ;;  %v2142_v48 = vpop.f32.mrb[4].mxu1 }
 0x103   : > { %v1906_v18 = vpack.c.bf16 %v1250_v43, %v1249_v12  ;;  %v1966_v19 = vpack.c.bf16 %v1274_v13, %v1273_v42  ;;  %v1061_v20 = vadd.f32 %v2118_v47, %v2412_v56  ;;  %v1085_v23 = vadd.f32 %v2142_v48, %v2412_v56  ;;  %v726_v24 = vpop.f32.mrb[5].mxu0  ;;  %v822_v25 = vpop.f32.mrb[5].mxu1  ;;  %v2479_v13 = vld [vmem:[%s2359_s19 + $0x40] sm:$0xff]  }
 0x104   : > { %v1901_v26 = vpack.c.bf16 %v1248_v45, %v1247_v14  ;;  %v1961_v27 = vpack.c.bf16 %v1272_v46, %v1271_v17  ;;  %v1059_v28 = vadd.f32 %v2412_v56, %v726_v24  ;;  %v1083_v29 = vadd.f32 %v2412_v56, %v822_v25  ;;  %v2119_v30 = vpop.f32.mrb[6].mxu0  ;;  %v2143_v31 = vpop.f32.mrb[6].mxu1  ;;  %v2482_v14 = vld [vmem:[%s2359_s19 + $0xa0] sm:$0xff]  }
 0x105   : > { %2041 = vst [vmem:[%s2458_s24 + $0x8] sm:$0xff] %v1906_v18   ;;  %2053 = vst [vmem:[%s2458_s24 + $0x68] sm:$0xff] %v1966_v19   ;;  %v1205_v34 = vadd.f32 %v1816_v52, %v1061_v20  ;;  %v1229_v41 = vadd.f32 %v1864_v53, %v1085_v23  ;;  %v1062_v5 = vadd.f32 %v2119_v30, %v2412_v56  ;;  %v729_v42 = vpop.f32.mrb[7].mxu0  ;;  %v825_v43 = vpop.f32.mrb[7].mxu1  ;;  %v1840_v48 = vunpack.c.l.bf16 %v2465_v32 }
 0x106   : > { %v1086_v12 = vadd.f32 %v2143_v31, %v2412_v56  ;;  %1902 = vst [vmem:[%s2458_s24] sm:$0xff] %v1901_v26   ;;  %2052 = vst [vmem:[%s2458_s24 + $0x60] sm:$0xff] %v1961_v27   ;;  %v1203_v17 = vadd.f32 %v1812_v54, %v1059_v28  ;;  %v1227_v52 = vadd.f32 %v1860_v55, %v1083_v29  ;;  %v1888_v18 = vunpack.c.l.bf16 %v2468_v33 }
 0x107   : > { %v1060_v53 = vadd.f32 %v2412_v56, %v729_v42  ;;  %v1084_v45 = vadd.f32 %v2412_v56, %v825_v43  ;;  %v1206_v46 = vadd.f32 %v1817_v57, %v1062_v5  ;;  %v1836_v19 = vunpack.c.l.bf16 %v2479_v13 }
 0x108   : > { %v1230_v47 = vadd.f32 %v1865_v58, %v1086_v12  ;;  %v1884_v20 = vunpack.c.l.bf16 %v2482_v14  ;;  %v1253_v23 = vmax.f32 %v1205_v34, 0.0  ;;  %v1277_v36 = vmax.f32 %v1229_v41, 0.0 }
 0x109   : > { %v1204_v54 = vadd.f32 %v1813_v59, %v1060_v53  ;;  %v1228_v55 = vadd.f32 %v1861_v60, %v1084_v45  ;;  %v1254_v57 = vmax.f32 %v1206_v46, 0.0  ;;  %v1251_v37 = vmax.f32 %v1203_v17, 0.0 }
 0x10a   : > { %v1278_v24 = vmax.f32 %v1230_v47, 0.0  ;;  %v1275_v58 = vmax.f32 %v1227_v52, 0.0  ;;  %v2122_v27 = vpop.f32.mrb[8].mxu0  ;;  %v2146_v38 = vpop.f32.mrb[8].mxu1 }
 0x10b   : > { %v1252_v25 = vmax.f32 %v1204_v54, 0.0  ;;  %v1276_v26 = vmax.f32 %v1228_v55, 0.0  ;;  %v1916_v59 = vpack.c.bf16 %v1254_v57, %v1253_v23  ;;  %v1065_v39 = vadd.f32 %v2122_v27, %v2412_v56  ;;  %v742_v29 = vpop.f32.mrb[9].mxu0  ;;  %v838_v30 = vpop.f32.mrb[9].mxu1 }
 0x10c   : > { %v1976_v28 = vpack.c.bf16 %v1278_v24, %v1277_v36  ;;  %v1089_v60 = vadd.f32 %v2146_v38, %v2412_v56  ;;  %v1063_v41 = vadd.f32 %v2412_v56, %v742_v29  ;;  %v1087_v5 = vadd.f32 %v2412_v56, %v838_v30  ;;  %v2123_v12 = vpop.f32.mrb[10].mxu0  ;;  %v2147_v42 = vpop.f32.mrb[10].mxu1 }
 0x10d   : > { %v1911_v31 = vpack.c.bf16 %v1252_v25, %v1251_v37  ;;  %v1971_v34 = vpack.c.bf16 %v1276_v26, %v1275_v58  ;;  %2043 = vst [vmem:[%s2458_s24 + $0x18] sm:$0xff] %v1916_v59   ;;  %v1209_v43 = vadd.f32 %v1824_v63, %v1065_v39  ;;  %v1066_v52 = vadd.f32 %v2123_v12, %v2412_v56  ;;  %v745_v45 = vpop.f32.mrb[11].mxu0  ;;  %v841_v46 = vpop.f32.mrb[11].mxu1  ;;  %v2544_v12 = vld [vmem:[%s2359_s19 + $0xb8] sm:$0xff]  }
 0x10e   : > { %2055 = vst [vmem:[%s2458_s24 + $0x78] sm:$0xff] %v1976_v28   ;;  %v1233_v17 = vadd.f32 %v1872_v0, %v1089_v60  ;;  %v1090_v53 = vadd.f32 %v2147_v42, %v2412_v56  ;;  %v1207_v47 = vadd.f32 %v1820_v1, %v1063_v41  ;;  %v1231_v54 = vadd.f32 %v1868_v2, %v1087_v5  ;;  %v2541_v5 = vld [vmem:[%s2359_s19 + $0x58] sm:$0xff]  }
 0x10f   : > { %2042 = vst [vmem:[%s2458_s24 + $0x10] sm:$0xff] %v1911_v31   ;;  %2054 = vst [vmem:[%s2458_s24 + $0x70] sm:$0xff] %v1971_v34   ;;  %v1064_v55 = vadd.f32 %v2412_v56, %v745_v45  ;;  %v1088_v63 = vadd.f32 %v2412_v56, %v841_v46  ;;  %v1210_v0 = vadd.f32 %v1825_v7, %v1066_v52  ;;  %v1841_v36 = vunpack.c.h.bf16 %v2465_v32  ;;  %v2555_v46 = vld [vmem:[%s2359_s19 + $0x50] sm:$0xff]  }
 0x110   : > { %v1234_v23 = vadd.f32 %v1873_v8, %v1090_v53  ;;  %v1889_v57 = vunpack.c.h.bf16 %v2468_v33  ;;  %v1837_v24 = vunpack.c.h.bf16 %v2479_v13  ;;  %v1885_v37 = vunpack.c.h.bf16 %v2482_v14 }
 0x111   : > { %v1208_v1 = vadd.f32 %v1821_v9, %v1064_v55  ;;  %v1232_v2 = vadd.f32 %v1869_v10, %v1088_v63  ;;  %v1257_v58 = vmax.f32 %v1209_v43, 0.0  ;;  %v1281_v44 = vmax.f32 %v1233_v17, 0.0 }
 0x112   : > { %v1258_v7 = vmax.f32 %v1210_v0, 0.0  ;;  %v1282_v25 = vmax.f32 %v1234_v23, 0.0  ;;  %v1255_v49 = vmax.f32 %v1207_v47, 0.0  ;;  %v1279_v8 = vmax.f32 %v1231_v54, 0.0  ;;  %v2126_v38 = vpop.f32.mrb[12].mxu0  ;;  %v2150_v50 = vpop.f32.mrb[12].mxu1 }
 0x113   : > { %v1256_v26 = vmax.f32 %v1208_v1, 0.0  ;;  %v1280_v27 = vmax.f32 %v1232_v2, 0.0  ;;  %v1069_v10 = vadd.f32 %v2126_v38, %v2412_v56  ;;  %v1093_v59 = vadd.f32 %v2150_v50, %v2412_v56  ;;  %v758_v28 = vpop.f32.mrb[13].mxu0  ;;  %v854_v39 = vpop.f32.mrb[13].mxu1  ;;  %v2558_v47 = vld [vmem:[%s2359_s19 + $0xb0] sm:$0xff]  }
 0x114   : > { %v1926_v51 = vpack.c.bf16 %v1258_v7, %v1257_v58  ;;  %v1986_v9 = vpack.c.bf16 %v1282_v25, %v1281_v44  ;;  %v1067_v30 = vadd.f32 %v2412_v56, %v758_v28  ;;  %v1091_v31 = vadd.f32 %v2412_v56, %v854_v39  ;;  %v2127_v34 = vpop.f32.mrb[14].mxu0  ;;  %v2151_v41 = vpop.f32.mrb[14].mxu1 }
 0x115   : > { %v1921_v60 = vpack.c.bf16 %v1256_v26, %v1255_v49  ;;  %v1981_v29 = vpack.c.bf16 %v1280_v27, %v1279_v8  ;;  %v1213_v42 = vadd.f32 %v1832_v15, %v1069_v10  ;;  %v1237_v43 = vadd.f32 %v1880_v16, %v1093_v59  ;;  %v761_v53 = vpop.f32.mrb[15].mxu0  ;;  %v857_v45 = vpop.f32.mrb[15].mxu1 }
 0x116   : > { %2045 = vst [vmem:[%s2458_s24 + $0x28] sm:$0xff] %v1926_v51   ;;  %2057 = vst [vmem:[%s2458_s24 + $0x88] sm:$0xff] %v1986_v9   ;;  %v1070_v17 = vadd.f32 %v2127_v34, %v2412_v56  ;;  %v1094_v52 = vadd.f32 %v2151_v41, %v2412_v56  ;;  %v1211_v54 = vadd.f32 %v1828_v21, %v1067_v30  ;;  %v1848_v23 = vunpack.c.l.bf16 %v2541_v5 }
 0x117   : > { %2044 = vst [vmem:[%s2458_s24 + $0x20] sm:$0xff] %v1921_v60   ;;  %2056 = vst [vmem:[%s2458_s24 + $0x80] sm:$0xff] %v1981_v29   ;;  %v1235_v15 = vadd.f32 %v1876_v22, %v1091_v31  ;;  %v1068_v16 = vadd.f32 %v2412_v56, %v761_v53  ;;  %v1092_v55 = vadd.f32 %v2412_v56, %v857_v45  ;;  %v1896_v1 = vunpack.c.l.bf16 %v2544_v12 }
 0x118   : > { %v1214_v63 = vadd.f32 %v1833_v35, %v1070_v17  ;;  %v1238_v0 = vadd.f32 %v1881_v40, %v1094_v52  ;;  %v1844_v2 = vunpack.c.l.bf16 %v2555_v46  ;;  %v1892_v58 = vunpack.c.l.bf16 %v2558_v47 }
 0x119   : > { %v1212_v21 = vadd.f32 %v1829_v6, %v1068_v16  ;;  %v1236_v22 = vadd.f32 %v1877_v11, %v1092_v55  ;;  %v1261_v44 = vmax.f32 %v1213_v42, 0.0  ;;  %v1285_v61 = vmax.f32 %v1237_v43, 0.0 }
 0x11a   : > { %v1262_v35 = vmax.f32 %v1214_v63, 0.0  ;;  %v1286_v7 = vmax.f32 %v1238_v0, 0.0  ;;  %v1259_v62 = vmax.f32 %v1211_v54, 0.0  ;;  %v1283_v40 = vmax.f32 %v1235_v15, 0.0  ;;  %v2130_v8 = vpop.f32.mrb[16].mxu0  ;;  %v2154_v3 = vpop.f32.mrb[16].mxu1 }
 0x11b   : > { %v1260_v25 = vmax.f32 %v1212_v21, 0.0  ;;  %v1284_v49 = vmax.f32 %v1236_v22, 0.0  ;;  %v1073_v4 = vadd.f32 %v2130_v8, %v2412_v56  ;;  %v1097_v11 = vadd.f32 %v2154_v3, %v2412_v56  ;;  %v774_v27 = vpop.f32.mrb[17].mxu0  ;;  %v870_v38 = vpop.f32.mrb[17].mxu1 }
 0x11c   : > { %v1936_v6 = vpack.c.bf16 %v1262_v35, %v1261_v44  ;;  %v1996_v26 = vpack.c.bf16 %v1286_v7, %v1285_v61  ;;  %v1071_v9 = vadd.f32 %v2412_v56, %v774_v27  ;;  %v1095_v10 = vadd.f32 %v2412_v56, %v870_v38  ;;  %v2131_v59 = vpop.f32.mrb[18].mxu0  ;;  %v2155_v28 = vpop.f32.mrb[18].mxu1 }
 0x11d   : > { %v1931_v50 = vpack.c.bf16 %v1260_v25, %v1259_v62  ;;  %v1991_v51 = vpack.c.bf16 %v1284_v49, %v1283_v40  ;;  %v1217_v39 = vadd.f32 %v1840_v48, %v1073_v4  ;;  %v1241_v60 = vadd.f32 %v1888_v18, %v1097_v11  ;;  %v777_v31 = vpop.f32.mrb[19].mxu0  ;;  %v873_v34 = vpop.f32.mrb[19].mxu1 }
 0x11e   : > { %2047 = vst [vmem:[%s2458_s24 + $0x38] sm:$0xff] %v1936_v6   ;;  %2059 = vst [vmem:[%s2458_s24 + $0x98] sm:$0xff] %v1996_v26   ;;  %v1074_v29 = vadd.f32 %v2131_v59, %v2412_v56  ;;  %v1098_v30 = vadd.f32 %v2155_v28, %v2412_v56  ;;  %v1215_v41 = vadd.f32 %v1836_v19, %v1071_v9  ;;  %v1849_v52 = vunpack.c.h.bf16 %v2541_v5 }
 0x11f   : > { %2046 = vst [vmem:[%s2458_s24 + $0x30] sm:$0xff] %v1931_v50   ;;  %2058 = vst [vmem:[%s2458_s24 + $0x90] sm:$0xff] %v1991_v51   ;;  %v1239_v42 = vadd.f32 %v1884_v20, %v1095_v10  ;;  %v1072_v43 = vadd.f32 %v2412_v56, %v777_v31  ;;  %v1096_v48 = vadd.f32 %v2412_v56, %v873_v34  ;;  %v1897_v53 = vunpack.c.h.bf16 %v2544_v12 }
 0x120   : > { %v1218_v18 = vadd.f32 %v1841_v36, %v1074_v29  ;;  %v1242_v17 = vadd.f32 %v1889_v57, %v1098_v30  ;;  %v1845_v45 = vunpack.c.h.bf16 %v2555_v46  ;;  %v1893_v54 = vunpack.c.h.bf16 %v2558_v47 }
 0x121   : > { %v1216_v19 = vadd.f32 %v1837_v24, %v1072_v43  ;;  %v1240_v20 = vadd.f32 %v1885_v37, %v1096_v48  ;;  %v1265_v15 = vmax.f32 %v1217_v39, 0.0  ;;  %v1289_v32 = vmax.f32 %v1241_v60, 0.0 }
 0x122   : > { %v1266_v36 = vmax.f32 %v1218_v18, 0.0  ;;  %v1290_v16 = vmax.f32 %v1242_v17, 0.0  ;;  %v1263_v33 = vmax.f32 %v1215_v41, 0.0  ;;  %v1287_v57 = vmax.f32 %v1239_v42, 0.0  ;;  %v2134_v0 = vpop.f32.mrb[20].mxu0  ;;  %v2158_v13 = vpop.f32.mrb[20].mxu1 }
 0x123   : > { %v1264_v55 = vmax.f32 %v1216_v19, 0.0  ;;  %v1288_v63 = vmax.f32 %v1240_v20, 0.0  ;;  %v1077_v14 = vadd.f32 %v2134_v0, %v2412_v56  ;;  %v1101_v37 = vadd.f32 %v2158_v13, %v2412_v56  ;;  %v790_v22 = vpop.f32.mrb[21].mxu0  ;;  %v886_v44 = vpop.f32.mrb[21].mxu1 }
 0x124   : > { %v1946_v24 = vpack.c.bf16 %v1266_v36, %v1265_v15  ;;  %v2006_v21 = vpack.c.bf16 %v1290_v16, %v1289_v32  ;;  %v1075_v7 = vadd.f32 %v2412_v56, %v790_v22  ;;  %v1099_v62 = vadd.f32 %v2412_v56, %v886_v44  ;;  %v2135_v40 = vpop.f32.mrb[22].mxu0  ;;  %v2159_v25 = vpop.f32.mrb[22].mxu1 }
 0x125   : > { %v1941_v61 = vpack.c.bf16 %v1264_v55, %v1263_v33  ;;  %v2001_v35 = vpack.c.bf16 %v1288_v63, %v1287_v57  ;;  %v1221_v49 = vadd.f32 %v1848_v23, %v1077_v14  ;;  %v1245_v8 = vadd.f32 %v1896_v1, %v1101_v37  ;;  %v793_v26 = vpop.f32.mrb[23].mxu0  ;;  %v889_v4 = vpop.f32.mrb[23].mxu1 }
 0x126   : > { %2049 = vst [vmem:[%s2458_s24 + $0x48] sm:$0xff] %v1946_v24   ;;  %2061 = vst [vmem:[%s2458_s24 + $0xa8] sm:$0xff] %v2006_v21   ;;  %v1078_v3 = vadd.f32 %v2135_v40, %v2412_v56  ;;  %v1102_v6 = vadd.f32 %v2159_v25, %v2412_v56  ;;  %v1219_v11 = vadd.f32 %v1844_v2, %v1075_v7 }
 0x127   : > { %2048 = vst [vmem:[%s2458_s24 + $0x40] sm:$0xff] %v1941_v61   ;;  %2060 = vst [vmem:[%s2458_s24 + $0xa0] sm:$0xff] %v2001_v35   ;;  %v1243_v27 = vadd.f32 %v1892_v58, %v1099_v62  ;;  %v1076_v5 = vadd.f32 %v2412_v56, %v793_v26  ;;  %v1100_v23 = vadd.f32 %v2412_v56, %v889_v4  ;;  %v1269_v51 = vmax.f32 %v1221_v49, 0.0 }
 0x128   : > { %v1222_v12 = vadd.f32 %v1849_v52, %v1078_v3  ;;  %v1246_v1 = vadd.f32 %v1897_v53, %v1102_v6  ;;  %v1293_v9 = vmax.f32 %v1245_v8, 0.0  ;;  %v1267_v2 = vmax.f32 %v1219_v11, 0.0 }
 0x129   : > { %v1220_v38 = vadd.f32 %v1845_v45, %v1076_v5  ;;  %v1244_v50 = vadd.f32 %v1893_v54, %v1100_v23  ;;  %v1291_v59 = vmax.f32 %v1243_v27, 0.0 }
 0x12a   : > { %v1270_v10 = vmax.f32 %v1222_v12, 0.0  ;;  %v1294_v46 = vmax.f32 %v1246_v1, 0.0 }
 0x12b   : > { %v1268_v47 = vmax.f32 %v1220_v38, 0.0  ;;  %v1292_v58 = vmax.f32 %v1244_v50, 0.0 }
 0x12c   : > { %v1956_v28 = vpack.c.bf16 %v1270_v10, %v1269_v51  ;;  %v2016_v39 = vpack.c.bf16 %v1294_v46, %v1293_v9 }
 0x12d   : > { %v1951_v60 = vpack.c.bf16 %v1268_v47, %v1267_v2  ;;  %v2011_v56 = vpack.c.bf16 %v1292_v58, %v1291_v59 }
 0x12e   : > { %2051 = vst [vmem:[%s2458_s24 + $0x58] sm:$0xff] %v1956_v28   ;;  %2063 = vst [vmem:[%s2458_s24 + $0xb8] sm:$0xff] %v2016_v39  }
 0x12f   : > { %2050 = vst [vmem:[%s2458_s24 + $0x50] sm:$0xff] %v1951_v60   ;;  %2062 = vst [vmem:[%s2458_s24 + $0xb0] sm:$0xff] %v2011_v56  }
 0x130 PF: > { %s14_s17 = sadd.s32 1, %s2254_s17   ;;  %s2650_s15 = smov %s2250_s16 }
 0x131   : > { %p11_p5 = scmp.ge.s32.totalorder %s14_s17, 5   ;;  %s2651_s16 = smov %s2653_s18 }
 0x133   :  { %13 = sbr.rel (!%p11_p5) target bundleno = 2 (0x2), region = 83 }

// kernel: jigresnet_forward.28
= control target key start
LH: loop header
LB: loop body
LE: loop exit
PB: predicated region body
PF: predicated region fallthrough
CT: control target
= control target key end

     0   :  { %s1059_s12 = smov 0   ;;  %s1061_s13 = smov 0   ;;  %s1146_s0 = inlined_call_operand.vmem [shape: bf16[384,128], index: 0, kind: input, shape index: {}]   ;;  %s1147_s1 = inlined_call_operand.vmem [shape: bf16[128,128], index: 1, kind: input, shape index: {}]   ;;  %s1148_s2 = inlined_call_operand.vmem [shape: f32[1,128], index: 2, kind: input, shape index: {}]   ;;  %s1149_s3 = inlined_call_operand.vmem [shape: bf16[384,128], index: 3, kind: output, shape index: {}]  }
   0x1   :  { %s1063_s14 = smov 0  }
   0x2 LB: > { %s32_s15 = sadd.s32 1, %s1033_s13  ;;  %p808_p0 = scmp.ge.s32.totalorder %s1037_s14, 1  ;;  %s1037_s14 = sphi %s1063_s14, %s13_s14   ;;  %s1033_s13 = sphi %s1061_s13, %s1151_s13   ;;  %s1029_s12 = sphi %s1059_s12, %s1150_s12  }
   0x3   : > { %p34_p1 = scmp.ge.s32.totalorder %s32_s15, 3  ;;  %p188_p2 = scmp.lt.s32.totalorder %s1037_s14, 4 }
   0x5   : > { %s1153_s15 = smov (%p34_p1, %s32_s15), 0  ;;  %p189_p3 = pnand %p808_p0, %p188_p2 }
   0x6   : > { %v999_v0 = vld [vmem:[%s1147_s1] sm:$0xff] (!%p189_p3)   ;;  %s809_s18 = sshll.u32 (!%p189_p3), %s1029_s12, 4  ;;  %v1000_v1 = vld [vmem:[%s1147_s1 + $0x8] sm:$0xff] (!%p189_p3)   ;;  %v1001_v2 = vld [vmem:[%s1147_s1 + $0x10] sm:$0xff] (!%p189_p3)  }
   0x7   : > { %192 = sbr.rel (%p189_p3) target bundleno = 269 (0x10d), region = 32  ;;  %p230_p4 = scmp.lt.s32.totalorder (!%p189_p3), %s809_s18, 47  ;;  %927 = vmatprep.subr.bf16.mxu0 (!%p189_p3), %v999_v0  ;;  %959 = vmatprep.subr.bf16.mxu1 (!%p189_p3), %v999_v0  ;;  %v1002_v3 = vld [vmem:[%s1147_s1 + $0x18] sm:$0xff] (!%p189_p3)   ;;  %v1003_v6 = vld [vmem:[%s1147_s1 + $0x20] sm:$0xff] (!%p189_p3)   ;;  %v1004_v7 = vld [vmem:[%s1147_s1 + $0x28] sm:$0xff] (!%p189_p3)  }
   0x8   : > { %928 = vmatpush3.bf16.msra.mxu0 (!%p189_p3), %v999_v0  ;;  %967 = vmatpush3.bf16.msra.mxu1 (!%p189_p3), %v999_v0  ;;  %v1005_v8 = vld [vmem:[%s1147_s1 + $0x30] sm:$0xff] (!%p189_p3)   ;;  %v1006_v9 = vld [vmem:[%s1147_s1 + $0x38] sm:$0xff] (!%p189_p3)   ;;  %v829_v16 = vld [vmem:[%s1148_s2] ss:$0 sm:$0xff] (!%p189_p3) }
   0x9   : > { %929 = vmatprep.subr.bf16.mxu0 (!%p189_p3), %v1000_v1  ;;  %960 = vmatprep.subr.bf16.mxu1 (!%p189_p3), %v1000_v1 }
   0xc   : > { %930 = vmatpush3.bf16.msra.mxu0 (!%p189_p3), %v1000_v1  ;;  %968 = vmatpush3.bf16.msra.mxu1 (!%p189_p3), %v1000_v1 }
   0xd   : > { %931 = vmatprep.subr.bf16.mxu0 (!%p189_p3), %v1001_v2  ;;  %961 = vmatprep.subr.bf16.mxu1 (!%p189_p3), %v1001_v2 }
   0xe   : > { %s1155_s18 = smov (!%p230_p4, %s809_s18), 47 }
   0xf   : > { %s810_s23 = sshll.u32 %s1155_s18, 2 }
  0x10   : > { %s1094_s26 = scalar_lea.vmem %s1146_s0, %s810_s23  ;;  %932 = vmatpush3.bf16.msra.mxu0 %v1001_v2  ;;  %969 = vmatpush3.bf16.msra.mxu1 %v1001_v2  ;;  %s1127_s17 = scalar_lea.vmem %s1149_s3, %s810_s23 }
  0x11   : > { %v1007_v4 = vld [vmem:[%s1094_s26] sm:$0xff]   ;;  %933 = vmatprep.subr.bf16.mxu0 %v1002_v3  ;;  %962 = vmatprep.subr.bf16.mxu1 %v1002_v3  ;;  %v1009_v10 = vld [vmem:[%s1094_s26 + $0x8] sm:$0xff]   ;;  %v1011_v12 = vld [vmem:[%s1094_s26 + $0x10] sm:$0xff]  }
  0x12   : > { %v1008_v5 = vld [vmem:[%s1094_s26 + $0x20] sm:$0xff]   ;;  %943 = vmatprep.mubr.bf16.mxu0 %v1007_v4  ;;  %v1010_v11 = vld [vmem:[%s1094_s26 + $0x28] sm:$0xff]   ;;  %v1012_v13 = vld [vmem:[%s1094_s26 + $0x30] sm:$0xff]  }
  0x13   : > { %951 = vmatprep.mubr.bf16.mxu1 %v1008_v5  ;;  %v1013_v14 = vld [vmem:[%s1094_s26 + $0x18] sm:$0xff]  }
  0x14   : > { %934 = vmatpush3.bf16.msra.mxu0 %v1002_v3  ;;  %970 = vmatpush3.bf16.msra.mxu1 %v1002_v3  ;;  %v1014_v15 = vld [vmem:[%s1094_s26 + $0x38] sm:$0xff]  }
  0x15   : > { %935 = vmatprep.subr.bf16.mxu0 %v1003_v6  ;;  %963 = vmatprep.subr.bf16.mxu1 %v1003_v6 }
  0x18   : > { %936 = vmatpush3.bf16.msra.mxu0 %v1003_v6  ;;  %971 = vmatpush3.bf16.msra.mxu1 %v1003_v6 }
  0x19   : > { %937 = vmatprep.subr.bf16.mxu0 %v1004_v7  ;;  %964 = vmatprep.subr.bf16.mxu1 %v1004_v7 }
  0x1c   : > { %938 = vmatpush3.bf16.msra.mxu0 %v1004_v7  ;;  %972 = vmatpush3.bf16.msra.mxu1 %v1004_v7 }
  0x1d   : > { %939 = vmatprep.subr.bf16.mxu0 %v1005_v8  ;;  %965 = vmatprep.subr.bf16.mxu1 %v1005_v8 }
  0x20   : > { %940 = vmatpush3.bf16.msra.mxu0 %v1005_v8  ;;  %973 = vmatpush3.bf16.msra.mxu1 %v1005_v8 }
  0x21   : > { %941 = vmatprep.subr.bf16.mxu0 %v1006_v9  ;;  %966 = vmatprep.subr.bf16.mxu1 %v1006_v9 }
  0x24   : > { %942 = vmatpush3.bf16.msra.mxu0 %v1006_v9  ;;  %974 = vmatpush3.bf16.msra.mxu1 %v1006_v9 }
  0x27   : > { %944 = vmatmul.mubr.bf16.vlgmr.msra.gmra.mrb[0].mxu0 %v1009_v10  ;;  %952 = vmatmul.mubr.bf16.vlgmr.msra.gmra.mrb[0].mxu1 %v1010_v11 }
  0x28   : > { %947 = vmatprep.mubr.bf16.mxu0 %v1011_v12  ;;  %955 = vmatprep.mubr.bf16.mxu1 %v1012_v13 }
  0x2f   : > { %948 = vmatmul.mubr.bf16.gmra.mrb[4].mxu0 %v1013_v14  ;;  %956 = vmatmul.mubr.bf16.gmra.mrb[4].mxu1 %v1014_v15 }
  0xfa   : > { %v945_v17 = vpop.f32.mrb[0].mxu0  ;;  %v953_v18 = vpop.f32.mrb[0].mxu1 }
  0xfb   : > { %v581_v19 = vadd.f32 %v945_v17, %v829_v16  ;;  %v589_v20 = vadd.f32 %v953_v18, %v829_v16  ;;  %v458_v21 = vpop.f32.mrb[1].mxu0  ;;  %v490_v22 = vpop.f32.mrb[1].mxu1 }
  0xfc   : > { %v579_v23 = vadd.f32 %v829_v16, %v458_v21  ;;  %v587_v24 = vadd.f32 %v829_v16, %v490_v22  ;;  %v946_v25 = vpop.f32.mrb[2].mxu0  ;;  %v954_v26 = vpop.f32.mrb[2].mxu1 }
  0xfd   : > { %v582_v27 = vadd.f32 %v946_v25, %v829_v16  ;;  %v590_v28 = vadd.f32 %v954_v26, %v829_v16  ;;  %v461_v29 = vpop.f32.mrb[3].mxu0  ;;  %v493_v30 = vpop.f32.mrb[3].mxu1  ;;  %v597_v33 = vmax.f32 %v581_v19, 0.0  ;;  %v605_v34 = vmax.f32 %v589_v20, 0.0 }
  0xfe   : > { %v580_v31 = vadd.f32 %v829_v16, %v461_v29  ;;  %v588_v32 = vadd.f32 %v829_v16, %v493_v30  ;;  %v595_v37 = vmax.f32 %v579_v23, 0.0  ;;  %v603_v38 = vmax.f32 %v587_v24, 0.0 }
  0xff   : > { %v598_v35 = vmax.f32 %v582_v27, 0.0  ;;  %v606_v36 = vmax.f32 %v590_v28, 0.0 }
 0x100   : > { %v596_v39 = vmax.f32 %v580_v31, 0.0  ;;  %v604_v40 = vmax.f32 %v588_v32, 0.0 }
 0x101   : > { %v872_v41 = vpack.c.bf16 %v598_v35, %v597_v33  ;;  %v892_v42 = vpack.c.bf16 %v606_v36, %v605_v34 }
 0x102   : > { %v867_v43 = vpack.c.bf16 %v596_v39, %v595_v37  ;;  %v887_v44 = vpack.c.bf16 %v604_v40, %v603_v38  ;;  %v949_v45 = vpop.f32.mrb[4].mxu0  ;;  %v957_v46 = vpop.f32.mrb[4].mxu1 }
 0x103   : > { %904 = vst [vmem:[%s1127_s17 + $0x8] sm:$0xff] %v872_v41   ;;  %908 = vst [vmem:[%s1127_s17 + $0x28] sm:$0xff] %v892_v42   ;;  %v585_v47 = vadd.f32 %v949_v45, %v829_v16  ;;  %v593_v48 = vadd.f32 %v957_v46, %v829_v16  ;;  %v474_v49 = vpop.f32.mrb[5].mxu0  ;;  %v506_v50 = vpop.f32.mrb[5].mxu1 }
 0x104   : > { %868 = vst [vmem:[%s1127_s17] sm:$0xff] %v867_v43   ;;  %907 = vst [vmem:[%s1127_s17 + $0x20] sm:$0xff] %v887_v44   ;;  %v583_v51 = vadd.f32 %v829_v16, %v474_v49  ;;  %v591_v52 = vadd.f32 %v829_v16, %v506_v50  ;;  %v950_v53 = vpop.f32.mrb[6].mxu0  ;;  %v958_v54 = vpop.f32.mrb[6].mxu1 }
 0x105   : > { %v586_v55 = vadd.f32 %v950_v53, %v829_v16  ;;  %v594_v56 = vadd.f32 %v958_v54, %v829_v16  ;;  %v477_v57 = vpop.f32.mrb[7].mxu0  ;;  %v509_v58 = vpop.f32.mrb[7].mxu1  ;;  %v601_v61 = vmax.f32 %v585_v47, 0.0  ;;  %v609_v62 = vmax.f32 %v593_v48, 0.0 }
 0x106   : > { %v584_v59 = vadd.f32 %v829_v16, %v477_v57  ;;  %v592_v60 = vadd.f32 %v829_v16, %v509_v58  ;;  %v599_v1 = vmax.f32 %v583_v51, 0.0  ;;  %v607_v2 = vmax.f32 %v591_v52, 0.0 }
 0x107   : > { %v602_v63 = vmax.f32 %v586_v55, 0.0  ;;  %v610_v0 = vmax.f32 %v594_v56, 0.0 }
 0x108   : > { %v600_v3 = vmax.f32 %v584_v59, 0.0  ;;  %v608_v4 = vmax.f32 %v592_v60, 0.0 }
 0x109   : > { %v882_v5 = vpack.c.bf16 %v602_v63, %v601_v61  ;;  %v902_v6 = vpack.c.bf16 %v610_v0, %v609_v62 }
 0x10a   : > { %v877_v7 = vpack.c.bf16 %v600_v3, %v599_v1  ;;  %v897_v8 = vpack.c.bf16 %v608_v4, %v607_v2 }
 0x10b   : > { %906 = vst [vmem:[%s1127_s17 + $0x18] sm:$0xff] %v882_v5   ;;  %910 = vst [vmem:[%s1127_s17 + $0x38] sm:$0xff] %v902_v6  }
 0x10c   : > { %905 = vst [vmem:[%s1127_s17 + $0x10] sm:$0xff] %v877_v7   ;;  %909 = vst [vmem:[%s1127_s17 + $0x30] sm:$0xff] %v897_v8  }
 0x10d PF: > { %s13_s14 = sadd.s32 1, %s1037_s14   ;;  %s1150_s12 = smov %s1033_s13 }
 0x10e   : > { %p10_p5 = scmp.ge.s32.totalorder %s13_s14, 5   ;;  %s1151_s13 = smov %s1153_s15 }
 0x110   :  { %12 = sbr.rel (!%p10_p5) target bundleno = 2 (0x2), region = 76 }

// kernel: jigresnet_forward.29
= control target key start
LH: loop header
LB: loop body
LE: loop exit
PB: predicated region body
PF: predicated region fallthrough
CT: control target
= control target key end

     0   :  { %s1043_s12 = smov 0   ;;  %s1045_s13 = smov 0   ;;  %s1130_s0 = inlined_call_operand.vmem [shape: bf16[384,128], index: 0, kind: input, shape index: {}]   ;;  %s1131_s1 = inlined_call_operand.vmem [shape: bf16[128,128], index: 1, kind: input, shape index: {}]   ;;  %s1132_s2 = inlined_call_operand.vmem [shape: f32[1,128], index: 2, kind: input, shape index: {}]   ;;  %s1133_s3 = inlined_call_operand.vmem [shape: bf16[384,128], index: 3, kind: output, shape index: {}]  }
   0x1   :  { %s1047_s14 = smov 0  }
   0x2 LB: > { %s32_s15 = sadd.s32 1, %s1017_s13  ;;  %p792_p0 = scmp.ge.s32.totalorder %s1021_s14, 1  ;;  %s1021_s14 = sphi %s1047_s14, %s13_s14   ;;  %s1017_s13 = sphi %s1045_s13, %s1135_s13   ;;  %s1013_s12 = sphi %s1043_s12, %s1134_s12  }
   0x3   : > { %p34_p1 = scmp.ge.s32.totalorder %s32_s15, 3  ;;  %p188_p2 = scmp.lt.s32.totalorder %s1021_s14, 4 }
   0x5   : > { %s1137_s15 = smov (%p34_p1, %s32_s15), 0  ;;  %p189_p3 = pnand %p792_p0, %p188_p2 }
   0x6   : > { %v983_v0 = vld [vmem:[%s1131_s1] sm:$0xff] (!%p189_p3)   ;;  %s793_s18 = sshll.u32 (!%p189_p3), %s1013_s12, 4  ;;  %v984_v1 = vld [vmem:[%s1131_s1 + $0x8] sm:$0xff] (!%p189_p3)   ;;  %v985_v2 = vld [vmem:[%s1131_s1 + $0x10] sm:$0xff] (!%p189_p3)  }
   0x7   : > { %192 = sbr.rel (%p189_p3) target bundleno = 267 (0x10b), region = 32  ;;  %p230_p4 = scmp.lt.s32.totalorder (!%p189_p3), %s793_s18, 47  ;;  %911 = vmatprep.subr.bf16.mxu0 (!%p189_p3), %v983_v0  ;;  %943 = vmatprep.subr.bf16.mxu1 (!%p189_p3), %v983_v0  ;;  %v986_v3 = vld [vmem:[%s1131_s1 + $0x18] sm:$0xff] (!%p189_p3)   ;;  %v987_v6 = vld [vmem:[%s1131_s1 + $0x20] sm:$0xff] (!%p189_p3)   ;;  %v988_v7 = vld [vmem:[%s1131_s1 + $0x28] sm:$0xff] (!%p189_p3)  }
   0x8   : > { %912 = vmatpush3.bf16.msra.mxu0 (!%p189_p3), %v983_v0  ;;  %951 = vmatpush3.bf16.msra.mxu1 (!%p189_p3), %v983_v0  ;;  %v989_v8 = vld [vmem:[%s1131_s1 + $0x30] sm:$0xff] (!%p189_p3)   ;;  %v990_v9 = vld [vmem:[%s1131_s1 + $0x38] sm:$0xff] (!%p189_p3)   ;;  %v813_v17 = vld [vmem:[%s1132_s2] ss:$0 sm:$0xff] (!%p189_p3) }
   0x9   : > { %913 = vmatprep.subr.bf16.mxu0 (!%p189_p3), %v984_v1  ;;  %944 = vmatprep.subr.bf16.mxu1 (!%p189_p3), %v984_v1 }
   0xc   : > { %914 = vmatpush3.bf16.msra.mxu0 (!%p189_p3), %v984_v1  ;;  %952 = vmatpush3.bf16.msra.mxu1 (!%p189_p3), %v984_v1 }
   0xd   : > { %915 = vmatprep.subr.bf16.mxu0 (!%p189_p3), %v985_v2  ;;  %945 = vmatprep.subr.bf16.mxu1 (!%p189_p3), %v985_v2 }
   0xe   : > { %s1139_s18 = smov (!%p230_p4, %s793_s18), 47 }
   0xf   : > { %s794_s23 = sshll.u32 %s1139_s18, 2 }
  0x10   : > { %s1078_s26 = scalar_lea.vmem %s1130_s0, %s794_s23  ;;  %916 = vmatpush3.bf16.msra.mxu0 %v985_v2  ;;  %953 = vmatpush3.bf16.msra.mxu1 %v985_v2  ;;  %s1111_s17 = scalar_lea.vmem %s1133_s3, %s794_s23 }
  0x11   : > { %v991_v4 = vld [vmem:[%s1078_s26] sm:$0xff]   ;;  %917 = vmatprep.subr.bf16.mxu0 %v986_v3  ;;  %946 = vmatprep.subr.bf16.mxu1 %v986_v3  ;;  %v993_v10 = vld [vmem:[%s1078_s26 + $0x8] sm:$0xff]   ;;  %v995_v12 = vld [vmem:[%s1078_s26 + $0x10] sm:$0xff]  }
  0x12   : > { %v992_v5 = vld [vmem:[%s1078_s26 + $0x20] sm:$0xff]   ;;  %927 = vmatprep.mubr.bf16.mxu0 %v991_v4  ;;  %v994_v11 = vld [vmem:[%s1078_s26 + $0x28] sm:$0xff]   ;;  %v996_v13 = vld [vmem:[%s1078_s26 + $0x30] sm:$0xff]  }
  0x13   : > { %935 = vmatprep.mubr.bf16.mxu1 %v992_v5  ;;  %v997_v14 = vld [vmem:[%s1078_s26 + $0x18] sm:$0xff]  }
  0x14   : > { %918 = vmatpush3.bf16.msra.mxu0 %v986_v3  ;;  %954 = vmatpush3.bf16.msra.mxu1 %v986_v3  ;;  %v998_v15 = vld [vmem:[%s1078_s26 + $0x38] sm:$0xff]  }
  0x15   : > { %919 = vmatprep.subr.bf16.mxu0 %v987_v6  ;;  %947 = vmatprep.subr.bf16.mxu1 %v987_v6 }
  0x18   : > { %920 = vmatpush3.bf16.msra.mxu0 %v987_v6  ;;  %955 = vmatpush3.bf16.msra.mxu1 %v987_v6 }
  0x19   : > { %921 = vmatprep.subr.bf16.mxu0 %v988_v7  ;;  %948 = vmatprep.subr.bf16.mxu1 %v988_v7 }
  0x1c   : > { %922 = vmatpush3.bf16.msra.mxu0 %v988_v7  ;;  %956 = vmatpush3.bf16.msra.mxu1 %v988_v7 }
  0x1d   : > { %923 = vmatprep.subr.bf16.mxu0 %v989_v8  ;;  %949 = vmatprep.subr.bf16.mxu1 %v989_v8 }
  0x20   : > { %924 = vmatpush3.bf16.msra.mxu0 %v989_v8  ;;  %957 = vmatpush3.bf16.msra.mxu1 %v989_v8 }
  0x21   : > { %925 = vmatprep.subr.bf16.mxu0 %v990_v9  ;;  %950 = vmatprep.subr.bf16.mxu1 %v990_v9 }
  0x24   : > { %926 = vmatpush3.bf16.msra.mxu0 %v990_v9  ;;  %958 = vmatpush3.bf16.msra.mxu1 %v990_v9 }
  0x27   : > { %928 = vmatmul.mubr.bf16.vlgmr.msra.gmra.mrb[0].mxu0 %v993_v10  ;;  %936 = vmatmul.mubr.bf16.vlgmr.msra.gmra.mrb[0].mxu1 %v994_v11 }
  0x28   : > { %931 = vmatprep.mubr.bf16.mxu0 %v995_v12  ;;  %939 = vmatprep.mubr.bf16.mxu1 %v996_v13 }
  0x2f   : > { %932 = vmatmul.mubr.bf16.gmra.mrb[4].mxu0 %v997_v14  ;;  %940 = vmatmul.mubr.bf16.gmra.mrb[4].mxu1 %v998_v15 }
  0xfa   : > { %v929_v16 = vpop.f32.mrb[0].mxu0  ;;  %v937_v18 = vpop.f32.mrb[0].mxu1 }
  0xfb   : > { %v458_v19 = vpop.f32.mrb[1].mxu0  ;;  %v490_v20 = vpop.f32.mrb[1].mxu1  ;;  %v581_v23 = vadd.f32 %v929_v16, %v813_v17  ;;  %v589_v24 = vadd.f32 %v937_v18, %v813_v17 }
  0xfc   : > { %v930_v21 = vpop.f32.mrb[2].mxu0  ;;  %v938_v22 = vpop.f32.mrb[2].mxu1  ;;  %v579_v29 = vadd.f32 %v813_v17, %v458_v19  ;;  %v587_v30 = vadd.f32 %v813_v17, %v490_v20 }
  0xfd   : > { %v582_v25 = vadd.f32 %v930_v21, %v813_v17  ;;  %v590_v26 = vadd.f32 %v938_v22, %v813_v17  ;;  %v461_v27 = vpop.f32.mrb[3].mxu0  ;;  %v493_v28 = vpop.f32.mrb[3].mxu1 }
  0xfe   : > { %v580_v31 = vadd.f32 %v813_v17, %v461_v27  ;;  %v588_v32 = vadd.f32 %v813_v17, %v493_v28 }
  0xff   : > { %v856_v33 = vpack.c.bf16 %v582_v25, %v581_v23  ;;  %v876_v34 = vpack.c.bf16 %v590_v26, %v589_v24 }
 0x100   : > { %v851_v35 = vpack.c.bf16 %v580_v31, %v579_v29  ;;  %v871_v36 = vpack.c.bf16 %v588_v32, %v587_v30 }
 0x101   : > { %888 = vst [vmem:[%s1111_s17 + $0x8] sm:$0xff] %v856_v33   ;;  %892 = vst [vmem:[%s1111_s17 + $0x28] sm:$0xff] %v876_v34  }
 0x102   : > { %852 = vst [vmem:[%s1111_s17] sm:$0xff] %v851_v35   ;;  %891 = vst [vmem:[%s1111_s17 + $0x20] sm:$0xff] %v871_v36   ;;  %v933_v37 = vpop.f32.mrb[4].mxu0  ;;  %v941_v38 = vpop.f32.mrb[4].mxu1 }
 0x103   : > { %v474_v39 = vpop.f32.mrb[5].mxu0  ;;  %v506_v40 = vpop.f32.mrb[5].mxu1  ;;  %v585_v43 = vadd.f32 %v933_v37, %v813_v17  ;;  %v593_v44 = vadd.f32 %v941_v38, %v813_v17 }
 0x104   : > { %v934_v41 = vpop.f32.mrb[6].mxu0  ;;  %v942_v42 = vpop.f32.mrb[6].mxu1  ;;  %v583_v49 = vadd.f32 %v813_v17, %v474_v39  ;;  %v591_v50 = vadd.f32 %v813_v17, %v506_v40 }
 0x105   : > { %v586_v45 = vadd.f32 %v934_v41, %v813_v17  ;;  %v594_v46 = vadd.f32 %v942_v42, %v813_v17  ;;  %v477_v47 = vpop.f32.mrb[7].mxu0  ;;  %v509_v48 = vpop.f32.mrb[7].mxu1 }
 0x106   : > { %v584_v51 = vadd.f32 %v813_v17, %v477_v47  ;;  %v592_v52 = vadd.f32 %v813_v17, %v509_v48 }
 0x107   : > { %v866_v53 = vpack.c.bf16 %v586_v45, %v585_v43  ;;  %v886_v54 = vpack.c.bf16 %v594_v46, %v593_v44 }
 0x108   : > { %v861_v55 = vpack.c.bf16 %v584_v51, %v583_v49  ;;  %v881_v56 = vpack.c.bf16 %v592_v52, %v591_v50 }
 0x109   : > { %890 = vst [vmem:[%s1111_s17 + $0x18] sm:$0xff] %v866_v53   ;;  %894 = vst [vmem:[%s1111_s17 + $0x38] sm:$0xff] %v886_v54  }
 0x10a   : > { %889 = vst [vmem:[%s1111_s17 + $0x10] sm:$0xff] %v861_v55   ;;  %893 = vst [vmem:[%s1111_s17 + $0x30] sm:$0xff] %v881_v56  }
 0x10b PF: > { %s13_s14 = sadd.s32 1, %s1021_s14   ;;  %s1134_s12 = smov %s1017_s13 }
 0x10c   : > { %p10_p5 = scmp.ge.s32.totalorder %s13_s14, 5   ;;  %s1135_s13 = smov %s1137_s15 }
 0x10e   :  { %12 = sbr.rel (!%p10_p5) target bundleno = 2 (0x2), region = 76 }

// kernel: jigresnet_forward.30
= control target key start
LH: loop header
LB: loop body
LE: loop exit
PB: predicated region body
PF: predicated region fallthrough
CT: control target
= control target key end

     0   :  { %s1393_s15 = smov 0   ;;  %s1395_s16 = smov 0   ;;  %s1544_s0 = inlined_call_operand.vmem [shape: bf16[384,256], index: 0, kind: input, shape index: {}]   ;;  %s1545_s1 = inlined_call_operand.vmem [shape: bf16[256,128], index: 1, kind: input, shape index: {}]   ;;  %s1546_s2 = inlined_call_operand.vmem [shape: f32[1,128], index: 2, kind: input, shape index: {}]   ;;  %s1547_s3 = inlined_call_operand.vmem [shape: bf16[384,128], index: 3, kind: input, shape index: {}]   ;;  %s1548_s4 = inlined_call_operand.vmem [shape: bf16[384,128], index: 4, kind: output, shape index: {}]  }
   0x1   :  { %s1397_s17 = smov 0  }
   0x2 LB: > { %s33_s18 = sadd.s32 1, %s1362_s16  ;;  %p1038_p0 = scmp.ge.s32.totalorder %s1366_s17, 1  ;;  %s1366_s17 = sphi %s1397_s17, %s14_s17   ;;  %s1362_s16 = sphi %s1395_s16, %s1550_s16   ;;  %s1358_s15 = sphi %s1393_s15, %s1549_s15  }
   0x3   : > { %p35_p1 = scmp.ge.s32.totalorder %s33_s18, 3  ;;  %p232_p2 = scmp.lt.s32.totalorder %s1366_s17, 4 }
   0x5   : > { %s1552_s18 = smov (%p35_p1, %s33_s18), 0  ;;  %p233_p3 = pnand %p1038_p0, %p232_p2 }
   0x6   : > { %v1304_v0 = vld [vmem:[%s1545_s1 + $0x40] sm:$0xff] (!%p233_p3)   ;;  %s1039_s21 = sshll.u32 (!%p233_p3), %s1358_s15, 4  ;;  %v1306_v2 = vld [vmem:[%s1545_s1 + $0x48] sm:$0xff] (!%p233_p3)   ;;  %v1308_v4 = vld [vmem:[%s1545_s1 + $0x50] sm:$0xff] (!%p233_p3)  }
   0x7   : > { %236 = sbr.rel (%p233_p3) target bundleno = 290 (0x122), region = 36  ;;  %v1305_v1 = vld [vmem:[%s1545_s1] sm:$0xff] (!%p233_p3)   ;;  %1200 = vmatprep.subr.bf16.mxu0 (!%p233_p3), %v1304_v0  ;;  %1264 = vmatprep.subr.bf16.mxu1 (!%p233_p3), %v1304_v0  ;;  %v1307_v3 = vld [vmem:[%s1545_s1 + $0x8] sm:$0xff] (!%p233_p3)   ;;  %p287_p4 = scmp.lt.s32.totalorder (!%p233_p3), %s1039_s21, 47  ;;  %v1309_v5 = vld [vmem:[%s1545_s1 + $0x10] sm:$0xff] (!%p233_p3)  }
   0x8   : > { %1201 = vmatpush3.bf16.msra.mxu0 (!%p233_p3), %v1305_v1  ;;  %1272 = vmatpush3.bf16.msra.mxu1 (!%p233_p3), %v1305_v1  ;;  %v1310_v6 = vld [vmem:[%s1545_s1 + $0x58] sm:$0xff] (!%p233_p3)   ;;  %v1312_v8 = vld [vmem:[%s1545_s1 + $0x60] sm:$0xff] (!%p233_p3)   ;;  %v1314_v10 = vld [vmem:[%s1545_s1 + $0x68] sm:$0xff] (!%p233_p3)  }
   0x9   : > { %1202 = vmatprep.subr.bf16.mxu0 (!%p233_p3), %v1306_v2  ;;  %1265 = vmatprep.subr.bf16.mxu1 (!%p233_p3), %v1306_v2  ;;  %v1311_v7 = vld [vmem:[%s1545_s1 + $0x18] sm:$0xff] (!%p233_p3)   ;;  %v1313_v9 = vld [vmem:[%s1545_s1 + $0x20] sm:$0xff] (!%p233_p3)   ;;  %v1315_v13 = vld [vmem:[%s1545_s1 + $0x28] sm:$0xff] (!%p233_p3)  }
   0xa   : > { %v1316_v14 = vld [vmem:[%s1545_s1 + $0x70] sm:$0xff] (!%p233_p3)   ;;  %v1318_v16 = vld [vmem:[%s1545_s1 + $0x78] sm:$0xff] (!%p233_p3)   ;;  %v1496_v37 = vld [vmem:[%s1546_s2] ss:$0 sm:$0xff] (!%p233_p3) }
   0xb   : > { %v1317_v15 = vld [vmem:[%s1545_s1 + $0x30] sm:$0xff] (!%p233_p3)   ;;  %v1319_v17 = vld [vmem:[%s1545_s1 + $0x38] sm:$0xff] (!%p233_p3)  }
   0xc   : > { %1203 = vmatpush3.bf16.msra.mxu0 (!%p233_p3), %v1307_v3  ;;  %1273 = vmatpush3.bf16.msra.mxu1 (!%p233_p3), %v1307_v3 }
   0xd   : > { %1204 = vmatprep.subr.bf16.mxu0 (!%p233_p3), %v1308_v4  ;;  %1266 = vmatprep.subr.bf16.mxu1 (!%p233_p3), %v1308_v4 }
   0xe   : > { %s1554_s21 = smov (!%p287_p4, %s1039_s21), 47 }
   0xf   : > { %s1097_s10 = sshll.u32 %s1554_s21, 3  ;;  %s1043_s8 = sshll.u32 %s1554_s21, 2 }
  0x10   : > { %1205 = vmatpush3.bf16.msra.mxu0 %v1309_v5  ;;  %1274 = vmatpush3.bf16.msra.mxu1 %v1309_v5  ;;  %s1444_s15 = scalar_lea.vmem %s1544_s0, %s1097_s10  ;;  %s1489_s11 = scalar_lea.vmem %s1547_s3, %s1043_s8 }
  0x11   : > { %1206 = vmatprep.subr.bf16.mxu0 %v1310_v6  ;;  %1267 = vmatprep.subr.bf16.mxu1 %v1310_v6  ;;  %v1322_v11 = vld [vmem:[%s1444_s15 + $0x4] ss:$8 sps:$4 sm:$0xff]   ;;  %v1320_v18 = vld [vmem:[%s1444_s15] ss:$8 sps:$4 sm:$0xff]   ;;  %v1326_v20 = vld [vmem:[%s1444_s15 + $0x14] ss:$8 sps:$4 sm:$0xff]   ;;  %s1509_s19 = scalar_lea.vmem %s1548_s4, %s1043_s8 }
  0x12   : > { %v1325_v12 = vld [vmem:[%s1444_s15 + $0x44] ss:$8 sps:$4 sm:$0xff]   ;;  %620 = vmatprep.mubr.bf16.mxu0 %v1322_v11  ;;  %v1323_v19 = vld [vmem:[%s1444_s15 + $0x40] ss:$8 sps:$4 sm:$0xff]   ;;  %v1328_v21 = vld [vmem:[%s1444_s15 + $0x54] ss:$8 sps:$4 sm:$0xff]  }
  0x13   : > { %652 = vmatprep.mubr.bf16.mxu1 %v1325_v12  ;;  %v1330_v22 = vld [vmem:[%s1444_s15 + $0x10] ss:$8 sps:$4 sm:$0xff]   ;;  %v1332_v24 = vld [vmem:[%s1444_s15 + $0x24] ss:$8 sps:$4 sm:$0xff]   ;;  %v1336_v26 = vld [vmem:[%s1444_s15 + $0x20] ss:$8 sps:$4 sm:$0xff]  }
  0x14   : > { %1207 = vmatpush3.bf16.msra.mxu0 %v1311_v7  ;;  %1275 = vmatpush3.bf16.msra.mxu1 %v1311_v7  ;;  %v1331_v23 = vld [vmem:[%s1444_s15 + $0x50] ss:$8 sps:$4 sm:$0xff]   ;;  %v1334_v25 = vld [vmem:[%s1444_s15 + $0x64] ss:$8 sps:$4 sm:$0xff]   ;;  %v1337_v27 = vld [vmem:[%s1444_s15 + $0x60] ss:$8 sps:$4 sm:$0xff]  }
  0x15   : > { %1208 = vmatprep.subr.bf16.mxu0 %v1312_v8  ;;  %1268 = vmatprep.subr.bf16.mxu1 %v1312_v8  ;;  %v1338_v28 = vld [vmem:[%s1444_s15 + $0x34] ss:$8 sps:$4 sm:$0xff]   ;;  %v1342_v30 = vld [vmem:[%s1444_s15 + $0x30] ss:$8 sps:$4 sm:$0xff]   ;;  %v1115_v32 = vld [vmem:[%s1489_s11] sm:$0xff]  }
  0x16   : > { %v1340_v29 = vld [vmem:[%s1444_s15 + $0x74] ss:$8 sps:$4 sm:$0xff]   ;;  %v1343_v31 = vld [vmem:[%s1444_s15 + $0x70] ss:$8 sps:$4 sm:$0xff]   ;;  %v1189_v33 = vld [vmem:[%s1489_s11 + $0x20] sm:$0xff]   ;;  %v1116_v40 = vunpack.c.l.bf16 %v1115_v32  ;;  %v1117_v46 = vunpack.c.h.bf16 %v1115_v32 }
  0x17   : > { %v1132_v42 = vunpack.c.l.bf16 %v1189_v33  ;;  %v1133_v48 = vunpack.c.h.bf16 %v1189_v33  ;;  %v1186_v61 = vld [vmem:[%s1489_s11 + $0x8] sm:$0xff]  }
  0x18   : > { %1209 = vmatpush3.bf16.msra.mxu0 %v1313_v9  ;;  %1276 = vmatpush3.bf16.msra.mxu1 %v1313_v9  ;;  %v1190_v62 = vld [vmem:[%s1489_s11 + $0x28] sm:$0xff]   ;;  %v1120_v9 = vunpack.c.l.bf16 %v1186_v61 }
  0x19   : > { %1210 = vmatprep.subr.bf16.mxu0 %v1314_v10  ;;  %1269 = vmatprep.subr.bf16.mxu1 %v1314_v10  ;;  %v1136_v10 = vunpack.c.l.bf16 %v1190_v62 }
  0x1c   : > { %1211 = vmatpush3.bf16.msra.mxu0 %v1315_v13  ;;  %1277 = vmatpush3.bf16.msra.mxu1 %v1315_v13 }
  0x1d   : > { %1212 = vmatprep.subr.bf16.mxu0 %v1316_v14  ;;  %1270 = vmatprep.subr.bf16.mxu1 %v1316_v14 }
  0x20   : > { %1213 = vmatpush3.bf16.msra.mxu0 %v1317_v15  ;;  %1278 = vmatpush3.bf16.msra.mxu1 %v1317_v15 }
  0x21   : > { %1214 = vmatprep.subr.bf16.mxu0 %v1318_v16  ;;  %1271 = vmatprep.subr.bf16.mxu1 %v1318_v16 }
  0x24   : > { %1215 = vmatpush3.bf16.msra.mxu0 %v1319_v17  ;;  %1279 = vmatpush3.bf16.msra.mxu1 %v1319_v17 }
  0x27   : > { %621 = vmatmul.mubr.bf16.vlgmr.msra.gmra.mrb[0].mxu0 %v1320_v18  ;;  %653 = vmatmul.mubr.bf16.vlgmr.msra.gmra.mrb[0].mxu1 %v1323_v19  ;;  %v1121_v18 = vunpack.c.h.bf16 %v1186_v61 }
  0x28   : > { %628 = vmatprep.mubr.bf16.mxu0 %v1326_v20  ;;  %660 = vmatprep.mubr.bf16.mxu1 %v1328_v21  ;;  %v1137_v20 = vunpack.c.h.bf16 %v1190_v62  ;;  %v1187_v21 = vld [vmem:[%s1489_s11 + $0x10] sm:$0xff]   ;;  %v1188_v62 = vld [vmem:[%s1489_s11 + $0x18] sm:$0xff]  }
  0x29   : > { %v1124_v32 = vunpack.c.l.bf16 %v1187_v21 }
  0x2f   : > { %629 = vmatmul.mubr.bf16.gmra.mrb[4].mxu0 %v1330_v22  ;;  %661 = vmatmul.mubr.bf16.gmra.mrb[4].mxu1 %v1331_v23  ;;  %v1191_v22 = vld [vmem:[%s1489_s11 + $0x30] sm:$0xff]  }
  0x30   : > { %636 = vmatprep.mubr.bf16.mxu0 %v1332_v24  ;;  %668 = vmatprep.mubr.bf16.mxu1 %v1334_v25 }
  0x37   : > { %637 = vmatmul.mubr.bf16.gmra.mrb[8].mxu0 %v1336_v26  ;;  %669 = vmatmul.mubr.bf16.gmra.mrb[8].mxu1 %v1337_v27 }
  0x38   : > { %644 = vmatprep.mubr.bf16.mxu0 %v1338_v28  ;;  %676 = vmatprep.mubr.bf16.mxu1 %v1340_v29 }
  0x3f   : > { %645 = vmatmul.mubr.bf16.gmra.mrb[12].mxu0 %v1342_v30  ;;  %677 = vmatmul.mubr.bf16.gmra.mrb[12].mxu1 %v1343_v31 }
  0xfa   : > { %v1216_v34 = vpop.f32.mrb[0].mxu0  ;;  %v1240_v35 = vpop.f32.mrb[0].mxu1 }
  0xfb   : > { %v1217_v36 = vpop.f32.mrb[1].mxu0  ;;  %v1241_v38 = vpop.f32.mrb[1].mxu1 }
  0xfc   : > { %v1218_v39 = vadd.f32 %v1217_v36, %v1216_v34  ;;  %v1242_v41 = vadd.f32 %v1241_v38, %v1240_v35  ;;  %v1219_v43 = vpop.f32.mrb[2].mxu0  ;;  %v1243_v44 = vpop.f32.mrb[2].mxu1  ;;  %v1140_v34 = vunpack.c.l.bf16 %v1191_v22 }
  0xfd   : > { %v1220_v45 = vpop.f32.mrb[3].mxu0  ;;  %v1244_v47 = vpop.f32.mrb[3].mxu1 }
  0xfe   : > { %v743_v49 = vadd.f32 %v1218_v39, %v1496_v37  ;;  %v751_v50 = vadd.f32 %v1242_v41, %v1496_v37  ;;  %v1221_v51 = vadd.f32 %v1220_v45, %v1219_v43  ;;  %v1245_v52 = vadd.f32 %v1244_v47, %v1243_v44 }
  0xff   : > { %v1141_v41 = vunpack.c.h.bf16 %v1191_v22 }
 0x100   : > { %v791_v53 = vadd.f32 %v1116_v40, %v743_v49  ;;  %v799_v54 = vadd.f32 %v1132_v42, %v751_v50  ;;  %v744_v55 = vadd.f32 %v1221_v51, %v1496_v37  ;;  %v752_v56 = vadd.f32 %v1245_v52, %v1496_v37 }
 0x101   : > { %v1125_v40 = vunpack.c.h.bf16 %v1187_v21 }
 0x102   : > { %v792_v57 = vadd.f32 %v1117_v46, %v744_v55  ;;  %v800_v58 = vadd.f32 %v1133_v48, %v752_v56  ;;  %v1222_v59 = vpop.f32.mrb[4].mxu0  ;;  %v1246_v60 = vpop.f32.mrb[4].mxu1  ;;  %v807_v63 = vmax.f32 %v791_v53, 0.0  ;;  %v815_v0 = vmax.f32 %v799_v54, 0.0 }
 0x103   : > { %v1223_v1 = vpop.f32.mrb[5].mxu0  ;;  %v1247_v2 = vpop.f32.mrb[5].mxu1 }
 0x104   : > { %v808_v3 = vmax.f32 %v792_v57, 0.0  ;;  %v816_v4 = vmax.f32 %v800_v58, 0.0  ;;  %v1224_v5 = vadd.f32 %v1223_v1, %v1222_v59  ;;  %v1248_v6 = vadd.f32 %v1247_v2, %v1246_v60  ;;  %v1225_v7 = vpop.f32.mrb[6].mxu0  ;;  %v1249_v8 = vpop.f32.mrb[6].mxu1 }
 0x105   : > { %v1226_v11 = vpop.f32.mrb[7].mxu0  ;;  %v1250_v12 = vpop.f32.mrb[7].mxu1 }
 0x106   : > { %v1149_v13 = vpack.c.bf16 %v808_v3, %v807_v63  ;;  %v1169_v14 = vpack.c.bf16 %v816_v4, %v815_v0  ;;  %v745_v15 = vadd.f32 %v1224_v5, %v1496_v37  ;;  %v753_v16 = vadd.f32 %v1248_v6, %v1496_v37  ;;  %v1192_v63 = vld [vmem:[%s1489_s11 + $0x38] sm:$0xff]  }
 0x107   : > { %v1227_v17 = vadd.f32 %v1226_v11, %v1225_v7  ;;  %v1251_v19 = vadd.f32 %v1250_v12, %v1249_v8  ;;  %v1144_v11 = vunpack.c.l.bf16 %v1192_v63  ;;  %v1145_v21 = vunpack.c.h.bf16 %v1192_v63 }
 0x108   : > { %1150 = vst [vmem:[%s1509_s19] sm:$0xff] %v1149_v13   ;;  %1196 = vst [vmem:[%s1509_s19 + $0x20] sm:$0xff] %v1169_v14   ;;  %v793_v23 = vadd.f32 %v1120_v9, %v745_v15  ;;  %v801_v24 = vadd.f32 %v1136_v10, %v753_v16  ;;  %v1128_v10 = vunpack.c.l.bf16 %v1188_v62 }
 0x109   : > { %v746_v25 = vadd.f32 %v1227_v17, %v1496_v37  ;;  %v754_v26 = vadd.f32 %v1251_v19, %v1496_v37  ;;  %v1129_v19 = vunpack.c.h.bf16 %v1188_v62 }
 0x10a   : > { %v1228_v27 = vpop.f32.mrb[8].mxu0  ;;  %v1252_v28 = vpop.f32.mrb[8].mxu1  ;;  %v809_v42 = vmax.f32 %v793_v23, 0.0  ;;  %v817_v43 = vmax.f32 %v801_v24, 0.0 }
 0x10b   : > { %v794_v29 = vadd.f32 %v1121_v18, %v746_v25  ;;  %v802_v30 = vadd.f32 %v1137_v20, %v754_v26  ;;  %v1229_v31 = vpop.f32.mrb[9].mxu0  ;;  %v1253_v33 = vpop.f32.mrb[9].mxu1 }
 0x10c   : > { %v1230_v35 = vadd.f32 %v1229_v31, %v1228_v27  ;;  %v1254_v36 = vadd.f32 %v1253_v33, %v1252_v28  ;;  %v1231_v38 = vpop.f32.mrb[10].mxu0  ;;  %v1255_v39 = vpop.f32.mrb[10].mxu1 }
 0x10d   : > { %v810_v44 = vmax.f32 %v794_v29, 0.0  ;;  %v818_v45 = vmax.f32 %v802_v30, 0.0  ;;  %v1232_v46 = vpop.f32.mrb[11].mxu0  ;;  %v1256_v47 = vpop.f32.mrb[11].mxu1 }
 0x10e   : > { %v747_v48 = vadd.f32 %v1230_v35, %v1496_v37  ;;  %v755_v49 = vadd.f32 %v1254_v36, %v1496_v37  ;;  %v1233_v50 = vadd.f32 %v1232_v46, %v1231_v38  ;;  %v1257_v51 = vadd.f32 %v1256_v47, %v1255_v39 }
 0x10f   : > { %v1154_v52 = vpack.c.bf16 %v810_v44, %v809_v42  ;;  %v1174_v53 = vpack.c.bf16 %v818_v45, %v817_v43 }
 0x110   : > { %v795_v54 = vadd.f32 %v1124_v32, %v747_v48  ;;  %v803_v55 = vadd.f32 %v1140_v34, %v755_v49  ;;  %v748_v56 = vadd.f32 %v1233_v50, %v1496_v37  ;;  %v756_v57 = vadd.f32 %v1257_v51, %v1496_v37 }
 0x111   : > { %1193 = vst [vmem:[%s1509_s19 + $0x8] sm:$0xff] %v1154_v52   ;;  %1197 = vst [vmem:[%s1509_s19 + $0x28] sm:$0xff] %v1174_v53  }
 0x112   : > { %v796_v58 = vadd.f32 %v1125_v40, %v748_v56  ;;  %v804_v59 = vadd.f32 %v1141_v41, %v756_v57  ;;  %v1234_v60 = vpop.f32.mrb[12].mxu0  ;;  %v1258_v61 = vpop.f32.mrb[12].mxu1  ;;  %v811_v0 = vmax.f32 %v795_v54, 0.0  ;;  %v819_v1 = vmax.f32 %v803_v55, 0.0 }
 0x113   : > { %v1235_v2 = vpop.f32.mrb[13].mxu0  ;;  %v1259_v3 = vpop.f32.mrb[13].mxu1 }
 0x114   : > { %v812_v4 = vmax.f32 %v796_v58, 0.0  ;;  %v820_v5 = vmax.f32 %v804_v59, 0.0  ;;  %v1236_v6 = vadd.f32 %v1235_v2, %v1234_v60  ;;  %v1260_v7 = vadd.f32 %v1259_v3, %v1258_v61  ;;  %v1237_v8 = vpop.f32.mrb[14].mxu0  ;;  %v1261_v9 = vpop.f32.mrb[14].mxu1 }
 0x115   : > { %v1238_v12 = vpop.f32.mrb[15].mxu0  ;;  %v1262_v13 = vpop.f32.mrb[15].mxu1 }
 0x116   : > { %v1159_v14 = vpack.c.bf16 %v812_v4, %v811_v0  ;;  %v1179_v15 = vpack.c.bf16 %v820_v5, %v819_v1  ;;  %v749_v16 = vadd.f32 %v1236_v6, %v1496_v37  ;;  %v757_v17 = vadd.f32 %v1260_v7, %v1496_v37 }
 0x117   : > { %v1239_v18 = vadd.f32 %v1238_v12, %v1237_v8  ;;  %v1263_v20 = vadd.f32 %v1262_v13, %v1261_v9 }
 0x118   : > { %1194 = vst [vmem:[%s1509_s19 + $0x10] sm:$0xff] %v1159_v14   ;;  %1198 = vst [vmem:[%s1509_s19 + $0x30] sm:$0xff] %v1179_v15   ;;  %v797_v22 = vadd.f32 %v1128_v10, %v749_v16  ;;  %v805_v23 = vadd.f32 %v1144_v11, %v757_v17 }
 0x119   : > { %v750_v24 = vadd.f32 %v1239_v18, %v1496_v37  ;;  %v758_v25 = vadd.f32 %v1263_v20, %v1496_v37 }
 0x11a   : > { %v813_v28 = vmax.f32 %v797_v22, 0.0  ;;  %v821_v29 = vmax.f32 %v805_v23, 0.0 }
 0x11b   : > { %v798_v26 = vadd.f32 %v1129_v19, %v750_v24  ;;  %v806_v27 = vadd.f32 %v1145_v21, %v758_v25 }
 0x11d   : > { %v814_v30 = vmax.f32 %v798_v26, 0.0  ;;  %v822_v31 = vmax.f32 %v806_v27, 0.0 }
 0x11f   : > { %v1164_v32 = vpack.c.bf16 %v814_v30, %v813_v28  ;;  %v1184_v33 = vpack.c.bf16 %v822_v31, %v821_v29 }
 0x121   : > { %1195 = vst [vmem:[%s1509_s19 + $0x18] sm:$0xff] %v1164_v32   ;;  %1199 = vst [vmem:[%s1509_s19 + $0x38] sm:$0xff] %v1184_v33  }
 0x122 PF: > { %s14_s17 = sadd.s32 1, %s1366_s17   ;;  %s1549_s15 = smov %s1362_s16 }
 0x123   : > { %p11_p5 = scmp.ge.s32.totalorder %s14_s17, 5   ;;  %s1550_s16 = smov %s1552_s18 }
 0x125   :  { %13 = sbr.rel (!%p11_p5) target bundleno = 2 (0x2), region = 83 }

// kernel: jigresnet_forward.31
= control target key start
LH: loop header
LB: loop body
LE: loop exit
PB: predicated region body
PF: predicated region fallthrough
CT: control target
= control target key end

     0   :  { %s1224_s12 = smov 0   ;;  %s1226_s13 = smov 0   ;;  %s1358_s0 = inlined_call_operand.vmem [shape: bf16[384,256], index: 0, kind: input, shape index: {}]   ;;  %s1359_s1 = inlined_call_operand.vmem [shape: bf16[256,128], index: 1, kind: input, shape index: {}]   ;;  %s1360_s2 = inlined_call_operand.vmem [shape: f32[1,128], index: 2, kind: input, shape index: {}]   ;;  %s1361_s3 = inlined_call_operand.vmem [shape: bf16[384,128], index: 3, kind: output, shape index: {}]  }
   0x1   :  { %s1228_s14 = smov 0  }
   0x2 LB: > { %s32_s15 = sadd.s32 1, %s1198_s13  ;;  %p915_p0 = scmp.ge.s32.totalorder %s1202_s14, 1  ;;  %s1202_s14 = sphi %s1228_s14, %s13_s14   ;;  %s1198_s13 = sphi %s1226_s13, %s1363_s13   ;;  %s1194_s12 = sphi %s1224_s12, %s1362_s12  }
   0x3   : > { %p34_p1 = scmp.ge.s32.totalorder %s32_s15, 3  ;;  %p191_p2 = scmp.lt.s32.totalorder %s1202_s14, 4 }
   0x5   : > { %s1365_s15 = smov (%p34_p1, %s32_s15), 0  ;;  %p192_p3 = pnand %p915_p0, %p191_p2 }
   0x6   : > { %v1140_v0 = vld [vmem:[%s1359_s1 + $0x40] sm:$0xff] (!%p192_p3)   ;;  %s916_s18 = sshll.u32 (!%p192_p3), %s1194_s12, 4  ;;  %v1142_v2 = vld [vmem:[%s1359_s1 + $0x48] sm:$0xff] (!%p192_p3)   ;;  %v1144_v4 = vld [vmem:[%s1359_s1 + $0x50] sm:$0xff] (!%p192_p3)  }
   0x7   : > { %195 = sbr.rel (%p192_p3) target bundleno = 288 (0x120), region = 32  ;;  %v1141_v1 = vld [vmem:[%s1359_s1] sm:$0xff] (!%p192_p3)   ;;  %1036 = vmatprep.subr.bf16.mxu0 (!%p192_p3), %v1140_v0  ;;  %1100 = vmatprep.subr.bf16.mxu1 (!%p192_p3), %v1140_v0  ;;  %v1143_v3 = vld [vmem:[%s1359_s1 + $0x8] sm:$0xff] (!%p192_p3)   ;;  %p236_p4 = scmp.lt.s32.totalorder (!%p192_p3), %s916_s18, 47  ;;  %v1145_v5 = vld [vmem:[%s1359_s1 + $0x10] sm:$0xff] (!%p192_p3)  }
   0x8   : > { %1037 = vmatpush3.bf16.msra.mxu0 (!%p192_p3), %v1141_v1  ;;  %1108 = vmatpush3.bf16.msra.mxu1 (!%p192_p3), %v1141_v1  ;;  %v1146_v6 = vld [vmem:[%s1359_s1 + $0x58] sm:$0xff] (!%p192_p3)   ;;  %v1148_v8 = vld [vmem:[%s1359_s1 + $0x60] sm:$0xff] (!%p192_p3)   ;;  %v1150_v10 = vld [vmem:[%s1359_s1 + $0x68] sm:$0xff] (!%p192_p3)  }
   0x9   : > { %1038 = vmatprep.subr.bf16.mxu0 (!%p192_p3), %v1142_v2  ;;  %1101 = vmatprep.subr.bf16.mxu1 (!%p192_p3), %v1142_v2  ;;  %v1147_v7 = vld [vmem:[%s1359_s1 + $0x18] sm:$0xff] (!%p192_p3)   ;;  %v1149_v9 = vld [vmem:[%s1359_s1 + $0x20] sm:$0xff] (!%p192_p3)   ;;  %v1151_v13 = vld [vmem:[%s1359_s1 + $0x28] sm:$0xff] (!%p192_p3)  }
   0xa   : > { %v1152_v14 = vld [vmem:[%s1359_s1 + $0x70] sm:$0xff] (!%p192_p3)   ;;  %v1154_v16 = vld [vmem:[%s1359_s1 + $0x78] sm:$0xff] (!%p192_p3)   ;;  %v1317_v35 = vld [vmem:[%s1360_s2] ss:$0 sm:$0xff] (!%p192_p3) }
   0xb   : > { %v1153_v15 = vld [vmem:[%s1359_s1 + $0x30] sm:$0xff] (!%p192_p3)   ;;  %v1155_v17 = vld [vmem:[%s1359_s1 + $0x38] sm:$0xff] (!%p192_p3)  }
   0xc   : > { %1039 = vmatpush3.bf16.msra.mxu0 (!%p192_p3), %v1143_v3  ;;  %1109 = vmatpush3.bf16.msra.mxu1 (!%p192_p3), %v1143_v3 }
   0xd   : > { %1040 = vmatprep.subr.bf16.mxu0 (!%p192_p3), %v1144_v4  ;;  %1102 = vmatprep.subr.bf16.mxu1 (!%p192_p3), %v1144_v4 }
   0xe   : > { %s1367_s18 = smov (!%p236_p4, %s916_s18), 47 }
   0xf   : > { %s972_s6 = sshll.u32 %s1367_s18, 3  ;;  %s920_s5 = sshll.u32 %s1367_s18, 2 }
  0x10   : > { %1041 = vmatpush3.bf16.msra.mxu0 %v1145_v5  ;;  %1110 = vmatpush3.bf16.msra.mxu1 %v1145_v5  ;;  %s1275_s11 = scalar_lea.vmem %s1358_s0, %s972_s6  ;;  %s1327_s8 = scalar_lea.vmem %s1361_s3, %s920_s5 }
  0x11   : > { %1042 = vmatprep.subr.bf16.mxu0 %v1146_v6  ;;  %1103 = vmatprep.subr.bf16.mxu1 %v1146_v6  ;;  %v1158_v11 = vld [vmem:[%s1275_s11 + $0x4] ss:$8 sps:$4 sm:$0xff]   ;;  %v1156_v18 = vld [vmem:[%s1275_s11] ss:$8 sps:$4 sm:$0xff]   ;;  %v1162_v20 = vld [vmem:[%s1275_s11 + $0x14] ss:$8 sps:$4 sm:$0xff]  }
  0x12   : > { %v1161_v12 = vld [vmem:[%s1275_s11 + $0x44] ss:$8 sps:$4 sm:$0xff]   ;;  %560 = vmatprep.mubr.bf16.mxu0 %v1158_v11  ;;  %v1159_v19 = vld [vmem:[%s1275_s11 + $0x40] ss:$8 sps:$4 sm:$0xff]   ;;  %v1164_v21 = vld [vmem:[%s1275_s11 + $0x54] ss:$8 sps:$4 sm:$0xff]  }
  0x13   : > { %592 = vmatprep.mubr.bf16.mxu1 %v1161_v12  ;;  %v1166_v22 = vld [vmem:[%s1275_s11 + $0x10] ss:$8 sps:$4 sm:$0xff]   ;;  %v1168_v24 = vld [vmem:[%s1275_s11 + $0x24] ss:$8 sps:$4 sm:$0xff]   ;;  %v1172_v26 = vld [vmem:[%s1275_s11 + $0x20] ss:$8 sps:$4 sm:$0xff]  }
  0x14   : > { %1043 = vmatpush3.bf16.msra.mxu0 %v1147_v7  ;;  %1111 = vmatpush3.bf16.msra.mxu1 %v1147_v7  ;;  %v1167_v23 = vld [vmem:[%s1275_s11 + $0x50] ss:$8 sps:$4 sm:$0xff]   ;;  %v1170_v25 = vld [vmem:[%s1275_s11 + $0x64] ss:$8 sps:$4 sm:$0xff]   ;;  %v1173_v27 = vld [vmem:[%s1275_s11 + $0x60] ss:$8 sps:$4 sm:$0xff]  }
  0x15   : > { %1044 = vmatprep.subr.bf16.mxu0 %v1148_v8  ;;  %1104 = vmatprep.subr.bf16.mxu1 %v1148_v8  ;;  %v1174_v28 = vld [vmem:[%s1275_s11 + $0x34] ss:$8 sps:$4 sm:$0xff]   ;;  %v1178_v30 = vld [vmem:[%s1275_s11 + $0x30] ss:$8 sps:$4 sm:$0xff]  }
  0x16   : > { %v1176_v29 = vld [vmem:[%s1275_s11 + $0x74] ss:$8 sps:$4 sm:$0xff]   ;;  %v1179_v31 = vld [vmem:[%s1275_s11 + $0x70] ss:$8 sps:$4 sm:$0xff]  }
  0x18   : > { %1045 = vmatpush3.bf16.msra.mxu0 %v1149_v9  ;;  %1112 = vmatpush3.bf16.msra.mxu1 %v1149_v9 }
  0x19   : > { %1046 = vmatprep.subr.bf16.mxu0 %v1150_v10  ;;  %1105 = vmatprep.subr.bf16.mxu1 %v1150_v10 }
  0x1c   : > { %1047 = vmatpush3.bf16.msra.mxu0 %v1151_v13  ;;  %1113 = vmatpush3.bf16.msra.mxu1 %v1151_v13 }
  0x1d   : > { %1048 = vmatprep.subr.bf16.mxu0 %v1152_v14  ;;  %1106 = vmatprep.subr.bf16.mxu1 %v1152_v14 }
  0x20   : > { %1049 = vmatpush3.bf16.msra.mxu0 %v1153_v15  ;;  %1114 = vmatpush3.bf16.msra.mxu1 %v1153_v15 }
  0x21   : > { %1050 = vmatprep.subr.bf16.mxu0 %v1154_v16  ;;  %1107 = vmatprep.subr.bf16.mxu1 %v1154_v16 }
  0x24   : > { %1051 = vmatpush3.bf16.msra.mxu0 %v1155_v17  ;;  %1115 = vmatpush3.bf16.msra.mxu1 %v1155_v17 }
  0x27   : > { %561 = vmatmul.mubr.bf16.vlgmr.msra.gmra.mrb[0].mxu0 %v1156_v18  ;;  %593 = vmatmul.mubr.bf16.vlgmr.msra.gmra.mrb[0].mxu1 %v1159_v19 }
  0x28   : > { %568 = vmatprep.mubr.bf16.mxu0 %v1162_v20  ;;  %600 = vmatprep.mubr.bf16.mxu1 %v1164_v21 }
  0x2f   : > { %569 = vmatmul.mubr.bf16.gmra.mrb[4].mxu0 %v1166_v22  ;;  %601 = vmatmul.mubr.bf16.gmra.mrb[4].mxu1 %v1167_v23 }
  0x30   : > { %576 = vmatprep.mubr.bf16.mxu0 %v1168_v24  ;;  %608 = vmatprep.mubr.bf16.mxu1 %v1170_v25 }
  0x37   : > { %577 = vmatmul.mubr.bf16.gmra.mrb[8].mxu0 %v1172_v26  ;;  %609 = vmatmul.mubr.bf16.gmra.mrb[8].mxu1 %v1173_v27 }
  0x38   : > { %584 = vmatprep.mubr.bf16.mxu0 %v1174_v28  ;;  %616 = vmatprep.mubr.bf16.mxu1 %v1176_v29 }
  0x3f   : > { %585 = vmatmul.mubr.bf16.gmra.mrb[12].mxu0 %v1178_v30  ;;  %617 = vmatmul.mubr.bf16.gmra.mrb[12].mxu1 %v1179_v31 }
  0xfa   : > { %v1052_v32 = vpop.f32.mrb[0].mxu0  ;;  %v1076_v33 = vpop.f32.mrb[0].mxu1 }
  0xfb   : > { %v1053_v34 = vpop.f32.mrb[1].mxu0  ;;  %v1077_v36 = vpop.f32.mrb[1].mxu1 }
  0xfc   : > { %v1054_v37 = vadd.f32 %v1053_v34, %v1052_v32  ;;  %v1078_v38 = vadd.f32 %v1077_v36, %v1076_v33  ;;  %v1055_v39 = vpop.f32.mrb[2].mxu0  ;;  %v1079_v40 = vpop.f32.mrb[2].mxu1 }
  0xfd   : > { %v1056_v41 = vpop.f32.mrb[3].mxu0  ;;  %v1080_v42 = vpop.f32.mrb[3].mxu1 }
  0xfe   : > { %v683_v43 = vadd.f32 %v1054_v37, %v1317_v35  ;;  %v691_v44 = vadd.f32 %v1078_v38, %v1317_v35  ;;  %v1057_v45 = vadd.f32 %v1056_v41, %v1055_v39  ;;  %v1081_v46 = vadd.f32 %v1080_v42, %v1079_v40 }
 0x100   : > { %v684_v47 = vadd.f32 %v1057_v45, %v1317_v35  ;;  %v692_v48 = vadd.f32 %v1081_v46, %v1317_v35  ;;  %v699_v49 = vmax.f32 %v683_v43, 0.0  ;;  %v707_v50 = vmax.f32 %v691_v44, 0.0 }
 0x102   : > { %v700_v51 = vmax.f32 %v684_v47, 0.0  ;;  %v708_v52 = vmax.f32 %v692_v48, 0.0  ;;  %v1058_v53 = vpop.f32.mrb[4].mxu0  ;;  %v1082_v54 = vpop.f32.mrb[4].mxu1 }
 0x103   : > { %v1059_v55 = vpop.f32.mrb[5].mxu0  ;;  %v1083_v56 = vpop.f32.mrb[5].mxu1 }
 0x104   : > { %v992_v57 = vpack.c.bf16 %v700_v51, %v699_v49  ;;  %v1012_v58 = vpack.c.bf16 %v708_v52, %v707_v50  ;;  %v1060_v59 = vadd.f32 %v1059_v55, %v1058_v53  ;;  %v1084_v60 = vadd.f32 %v1083_v56, %v1082_v54  ;;  %v1061_v61 = vpop.f32.mrb[6].mxu0  ;;  %v1085_v62 = vpop.f32.mrb[6].mxu1 }
 0x105   : > { %v1062_v63 = vpop.f32.mrb[7].mxu0  ;;  %v1086_v0 = vpop.f32.mrb[7].mxu1 }
 0x106   : > { %993 = vst [vmem:[%s1327_s8] sm:$0xff] %v992_v57   ;;  %1032 = vst [vmem:[%s1327_s8 + $0x20] sm:$0xff] %v1012_v58   ;;  %v685_v1 = vadd.f32 %v1060_v59, %v1317_v35  ;;  %v693_v2 = vadd.f32 %v1084_v60, %v1317_v35  ;;  %v1063_v3 = vadd.f32 %v1062_v63, %v1061_v61 }
 0x107   : > { %v1087_v4 = vadd.f32 %v1086_v0, %v1085_v62 }
 0x108   : > { %v686_v5 = vadd.f32 %v1063_v3, %v1317_v35  ;;  %v701_v7 = vmax.f32 %v685_v1, 0.0  ;;  %v709_v8 = vmax.f32 %v693_v2, 0.0 }
 0x109   : > { %v694_v6 = vadd.f32 %v1087_v4, %v1317_v35 }
 0x10a   : > { %v702_v9 = vmax.f32 %v686_v5, 0.0  ;;  %v1064_v11 = vpop.f32.mrb[8].mxu0  ;;  %v1088_v12 = vpop.f32.mrb[8].mxu1 }
 0x10b   : > { %v710_v10 = vmax.f32 %v694_v6, 0.0  ;;  %v1065_v13 = vpop.f32.mrb[9].mxu0  ;;  %v1089_v14 = vpop.f32.mrb[9].mxu1 }
 0x10c   : > { %v997_v15 = vpack.c.bf16 %v702_v9, %v701_v7  ;;  %v1066_v17 = vadd.f32 %v1065_v13, %v1064_v11  ;;  %v1090_v18 = vadd.f32 %v1089_v14, %v1088_v12  ;;  %v1067_v19 = vpop.f32.mrb[10].mxu0  ;;  %v1091_v20 = vpop.f32.mrb[10].mxu1 }
 0x10d   : > { %v1017_v16 = vpack.c.bf16 %v710_v10, %v709_v8  ;;  %v1068_v21 = vpop.f32.mrb[11].mxu0  ;;  %v1092_v22 = vpop.f32.mrb[11].mxu1 }
 0x10e   : > { %1029 = vst [vmem:[%s1327_s8 + $0x8] sm:$0xff] %v997_v15   ;;  %v687_v23 = vadd.f32 %v1066_v17, %v1317_v35  ;;  %v695_v24 = vadd.f32 %v1090_v18, %v1317_v35  ;;  %v1069_v25 = vadd.f32 %v1068_v21, %v1067_v19  ;;  %v1093_v26 = vadd.f32 %v1092_v22, %v1091_v20 }
 0x10f   : > { %1033 = vst [vmem:[%s1327_s8 + $0x28] sm:$0xff] %v1017_v16  }
 0x110   : > { %v688_v27 = vadd.f32 %v1069_v25, %v1317_v35  ;;  %v696_v28 = vadd.f32 %v1093_v26, %v1317_v35  ;;  %v703_v29 = vmax.f32 %v687_v23, 0.0  ;;  %v711_v30 = vmax.f32 %v695_v24, 0.0 }
 0x112   : > { %v704_v31 = vmax.f32 %v688_v27, 0.0  ;;  %v712_v32 = vmax.f32 %v696_v28, 0.0  ;;  %v1070_v33 = vpop.f32.mrb[12].mxu0  ;;  %v1094_v34 = vpop.f32.mrb[12].mxu1 }
 0x113   : > { %v1071_v36 = vpop.f32.mrb[13].mxu0  ;;  %v1095_v37 = vpop.f32.mrb[13].mxu1 }
 0x114   : > { %v1002_v38 = vpack.c.bf16 %v704_v31, %v703_v29  ;;  %v1022_v39 = vpack.c.bf16 %v712_v32, %v711_v30  ;;  %v1072_v40 = vadd.f32 %v1071_v36, %v1070_v33  ;;  %v1096_v41 = vadd.f32 %v1095_v37, %v1094_v34  ;;  %v1073_v42 = vpop.f32.mrb[14].mxu0  ;;  %v1097_v43 = vpop.f32.mrb[14].mxu1 }
 0x115   : > { %v1074_v44 = vpop.f32.mrb[15].mxu0  ;;  %v1098_v45 = vpop.f32.mrb[15].mxu1 }
 0x116   : > { %1030 = vst [vmem:[%s1327_s8 + $0x10] sm:$0xff] %v1002_v38   ;;  %1034 = vst [vmem:[%s1327_s8 + $0x30] sm:$0xff] %v1022_v39   ;;  %v689_v46 = vadd.f32 %v1072_v40, %v1317_v35  ;;  %v697_v47 = vadd.f32 %v1096_v41, %v1317_v35  ;;  %v1075_v48 = vadd.f32 %v1074_v44, %v1073_v42 }
 0x117   : > { %v1099_v49 = vadd.f32 %v1098_v45, %v1097_v43 }
 0x118   : > { %v690_v50 = vadd.f32 %v1075_v48, %v1317_v35  ;;  %v705_v52 = vmax.f32 %v689_v46, 0.0  ;;  %v713_v53 = vmax.f32 %v697_v47, 0.0 }
 0x119   : > { %v698_v51 = vadd.f32 %v1099_v49, %v1317_v35 }
 0x11a   : > { %v706_v54 = vmax.f32 %v690_v50, 0.0 }
 0x11b   : > { %v714_v55 = vmax.f32 %v698_v51, 0.0 }
 0x11c   : > { %v1007_v56 = vpack.c.bf16 %v706_v54, %v705_v52 }
 0x11d   : > { %v1027_v57 = vpack.c.bf16 %v714_v55, %v713_v53 }
 0x11e   : > { %1031 = vst [vmem:[%s1327_s8 + $0x18] sm:$0xff] %v1007_v56  }
 0x11f   : > { %1035 = vst [vmem:[%s1327_s8 + $0x38] sm:$0xff] %v1027_v57  }
 0x120 PF: > { %s13_s14 = sadd.s32 1, %s1202_s14   ;;  %s1362_s12 = smov %s1198_s13 }
 0x121   : > { %p10_p5 = scmp.ge.s32.totalorder %s13_s14, 5   ;;  %s1363_s13 = smov %s1365_s15 }
 0x123   :  { %12 = sbr.rel (!%p10_p5) target bundleno = 2 (0x2), region = 76 }

// kernel: jigresnet_forward.33
= control target key start
LH: loop header
LB: loop body
LE: loop exit
PB: predicated region body
PF: predicated region fallthrough
CT: control target
= control target key end

     0   :  { %s939_s1 = inlined_call_operand.vmem [shape: bf16[256,128], index: 1, kind: input, shape index: {}]   ;;  %s940_s0 = inlined_call_operand.vmem [shape: bf16[128,256], index: 0, kind: input, shape index: {}]   ;;  %s941_s2 = inlined_call_operand.vmem [shape: f32[1,128], index: 2, kind: input, shape index: {}]   ;;  %s942_s3 = inlined_call_operand.vmem [shape: bf16[128,128], index: 3, kind: output, shape index: {}]  }
   0x1   :  { %v738_v0 = vld [vmem:[%s939_s1 + $0x40] sm:$0xff]   ;;  %v740_v2 = vld [vmem:[%s939_s1 + $0x48] sm:$0xff]   ;;  %v742_v4 = vld [vmem:[%s939_s1 + $0x50] sm:$0xff]  }
   0x2   :  { %v739_v1 = vld [vmem:[%s939_s1] sm:$0xff]   ;;  %658 = vmatprep.subr.bf16.mxu0 %v738_v0  ;;  %722 = vmatprep.subr.bf16.mxu1 %v738_v0  ;;  %v741_v3 = vld [vmem:[%s939_s1 + $0x8] sm:$0xff]   ;;  %v743_v5 = vld [vmem:[%s939_s1 + $0x10] sm:$0xff]  }
   0x3   :  { %659 = vmatpush3.bf16.msra.mxu0 %v739_v1  ;;  %730 = vmatpush3.bf16.msra.mxu1 %v739_v1  ;;  %v744_v6 = vld [vmem:[%s939_s1 + $0x58] sm:$0xff]   ;;  %v746_v8 = vld [vmem:[%s939_s1 + $0x60] sm:$0xff]   ;;  %v748_v10 = vld [vmem:[%s939_s1 + $0x68] sm:$0xff]  }
   0x4   :  { %660 = vmatprep.subr.bf16.mxu0 %v740_v2  ;;  %723 = vmatprep.subr.bf16.mxu1 %v740_v2  ;;  %v745_v7 = vld [vmem:[%s939_s1 + $0x18] sm:$0xff]   ;;  %v747_v9 = vld [vmem:[%s939_s1 + $0x20] sm:$0xff]   ;;  %v749_v13 = vld [vmem:[%s939_s1 + $0x28] sm:$0xff]  }
   0x5   :  { %v756_v11 = vld [vmem:[%s940_s0 + $0x4] ss:$8 sps:$4 sm:$0xff]   ;;  %v750_v14 = vld [vmem:[%s939_s1 + $0x70] sm:$0xff]   ;;  %v752_v16 = vld [vmem:[%s939_s1 + $0x78] sm:$0xff]  }
   0x6   :  { %v759_v12 = vld [vmem:[%s940_s0 + $0x44] ss:$8 sps:$4 sm:$0xff]   ;;  %307 = vmatprep.mubr.bf16.mxu0 %v756_v11  ;;  %v751_v15 = vld [vmem:[%s939_s1 + $0x30] sm:$0xff]   ;;  %v753_v17 = vld [vmem:[%s939_s1 + $0x38] sm:$0xff]  }
   0x7   :  { %661 = vmatpush3.bf16.msra.mxu0 %v741_v3  ;;  %731 = vmatpush3.bf16.msra.mxu1 %v741_v3  ;;  %v754_v18 = vld [vmem:[%s940_s0] ss:$8 sps:$4 sm:$0xff]   ;;  %v760_v20 = vld [vmem:[%s940_s0 + $0x14] ss:$8 sps:$4 sm:$0xff]   ;;  %v764_v22 = vld [vmem:[%s940_s0 + $0x10] ss:$8 sps:$4 sm:$0xff]  }
   0x8   :  { %662 = vmatprep.subr.bf16.mxu0 %v742_v4  ;;  %724 = vmatprep.subr.bf16.mxu1 %v742_v4  ;;  %v757_v19 = vld [vmem:[%s940_s0 + $0x40] ss:$8 sps:$4 sm:$0xff]   ;;  %v762_v21 = vld [vmem:[%s940_s0 + $0x54] ss:$8 sps:$4 sm:$0xff]   ;;  %v765_v23 = vld [vmem:[%s940_s0 + $0x50] ss:$8 sps:$4 sm:$0xff]  }
   0x9   :  { %339 = vmatprep.mubr.bf16.mxu1 %v759_v12  ;;  %v766_v24 = vld [vmem:[%s940_s0 + $0x24] ss:$8 sps:$4 sm:$0xff]   ;;  %v770_v26 = vld [vmem:[%s940_s0 + $0x20] ss:$8 sps:$4 sm:$0xff]   ;;  %v772_v28 = vld [vmem:[%s940_s0 + $0x34] ss:$8 sps:$4 sm:$0xff]  }
   0xa   :  { %v768_v25 = vld [vmem:[%s940_s0 + $0x64] ss:$8 sps:$4 sm:$0xff]   ;;  %v771_v27 = vld [vmem:[%s940_s0 + $0x60] ss:$8 sps:$4 sm:$0xff]   ;;  %v774_v29 = vld [vmem:[%s940_s0 + $0x74] ss:$8 sps:$4 sm:$0xff]  }
   0xb   :  { %663 = vmatpush3.bf16.msra.mxu0 %v743_v5  ;;  %732 = vmatpush3.bf16.msra.mxu1 %v743_v5  ;;  %v776_v30 = vld [vmem:[%s940_s0 + $0x30] ss:$8 sps:$4 sm:$0xff]   ;;  %v897_v35 = vld [vmem:[%s941_s2] ss:$0 sm:$0xff] }
   0xc   :  { %664 = vmatprep.subr.bf16.mxu0 %v744_v6  ;;  %725 = vmatprep.subr.bf16.mxu1 %v744_v6  ;;  %v777_v31 = vld [vmem:[%s940_s0 + $0x70] ss:$8 sps:$4 sm:$0xff]  }
   0xf   :  { %665 = vmatpush3.bf16.msra.mxu0 %v745_v7  ;;  %733 = vmatpush3.bf16.msra.mxu1 %v745_v7 }
  0x10   :  { %666 = vmatprep.subr.bf16.mxu0 %v746_v8  ;;  %726 = vmatprep.subr.bf16.mxu1 %v746_v8 }
  0x13   :  { %667 = vmatpush3.bf16.msra.mxu0 %v747_v9  ;;  %734 = vmatpush3.bf16.msra.mxu1 %v747_v9 }
  0x14   :  { %668 = vmatprep.subr.bf16.mxu0 %v748_v10  ;;  %727 = vmatprep.subr.bf16.mxu1 %v748_v10 }
  0x17   :  { %669 = vmatpush3.bf16.msra.mxu0 %v749_v13  ;;  %735 = vmatpush3.bf16.msra.mxu1 %v749_v13 }
  0x18   :  { %670 = vmatprep.subr.bf16.mxu0 %v750_v14  ;;  %728 = vmatprep.subr.bf16.mxu1 %v750_v14 }
  0x1b   :  { %671 = vmatpush3.bf16.msra.mxu0 %v751_v15  ;;  %736 = vmatpush3.bf16.msra.mxu1 %v751_v15 }
  0x1c   :  { %672 = vmatprep.subr.bf16.mxu0 %v752_v16  ;;  %729 = vmatprep.subr.bf16.mxu1 %v752_v16 }
  0x1f   :  { %673 = vmatpush3.bf16.msra.mxu0 %v753_v17  ;;  %737 = vmatpush3.bf16.msra.mxu1 %v753_v17 }
  0x22   :  { %308 = vmatmul.mubr.bf16.vlgmr.msra.gmra.mrb[0].mxu0 %v754_v18  ;;  %340 = vmatmul.mubr.bf16.vlgmr.msra.gmra.mrb[0].mxu1 %v757_v19 }
  0x23   :  { %315 = vmatprep.mubr.bf16.mxu0 %v760_v20  ;;  %347 = vmatprep.mubr.bf16.mxu1 %v762_v21 }
  0x2a   :  { %316 = vmatmul.mubr.bf16.gmra.mrb[4].mxu0 %v764_v22  ;;  %348 = vmatmul.mubr.bf16.gmra.mrb[4].mxu1 %v765_v23 }
  0x2b   :  { %323 = vmatprep.mubr.bf16.mxu0 %v766_v24  ;;  %355 = vmatprep.mubr.bf16.mxu1 %v768_v25 }
  0x32   :  { %324 = vmatmul.mubr.bf16.gmra.mrb[8].mxu0 %v770_v26  ;;  %356 = vmatmul.mubr.bf16.gmra.mrb[8].mxu1 %v771_v27 }
  0x33   :  { %331 = vmatprep.mubr.bf16.mxu0 %v772_v28  ;;  %363 = vmatprep.mubr.bf16.mxu1 %v774_v29 }
  0x3a   :  { %332 = vmatmul.mubr.bf16.gmra.mrb[12].mxu0 %v776_v30  ;;  %364 = vmatmul.mubr.bf16.gmra.mrb[12].mxu1 %v777_v31 }
  0xf5   :  { %v674_v32 = vpop.f32.mrb[0].mxu0  ;;  %v698_v33 = vpop.f32.mrb[0].mxu1 }
  0xf6   :  { %v675_v34 = vpop.f32.mrb[1].mxu0  ;;  %v699_v36 = vpop.f32.mrb[1].mxu1 }
  0xf7   :  { %v676_v37 = vadd.f32 %v675_v34, %v674_v32  ;;  %v700_v38 = vadd.f32 %v699_v36, %v698_v33  ;;  %v677_v39 = vpop.f32.mrb[2].mxu0  ;;  %v701_v40 = vpop.f32.mrb[2].mxu1 }
  0xf8   :  { %v678_v41 = vpop.f32.mrb[3].mxu0  ;;  %v702_v42 = vpop.f32.mrb[3].mxu1 }
  0xf9   :  { %v430_v43 = vadd.f32 %v676_v37, %v897_v35  ;;  %v438_v44 = vadd.f32 %v700_v38, %v897_v35  ;;  %v679_v45 = vadd.f32 %v678_v41, %v677_v39  ;;  %v703_v46 = vadd.f32 %v702_v42, %v701_v40 }
  0xfb   :  { %v431_v47 = vadd.f32 %v679_v45, %v897_v35  ;;  %v439_v48 = vadd.f32 %v703_v46, %v897_v35  ;;  %v446_v49 = vmax.f32 %v430_v43, 0.0  ;;  %v454_v50 = vmax.f32 %v438_v44, 0.0 }
  0xfd   :  { %v447_v51 = vmax.f32 %v431_v47, 0.0  ;;  %v455_v52 = vmax.f32 %v439_v48, 0.0  ;;  %v680_v53 = vpop.f32.mrb[4].mxu0  ;;  %v704_v54 = vpop.f32.mrb[4].mxu1 }
  0xfe   :  { %v681_v55 = vpop.f32.mrb[5].mxu0  ;;  %v705_v56 = vpop.f32.mrb[5].mxu1 }
  0xff   :  { %v614_v57 = vpack.c.bf16 %v447_v51, %v446_v49  ;;  %v634_v58 = vpack.c.bf16 %v455_v52, %v454_v50  ;;  %v682_v59 = vadd.f32 %v681_v55, %v680_v53  ;;  %v706_v60 = vadd.f32 %v705_v56, %v704_v54  ;;  %v683_v61 = vpop.f32.mrb[6].mxu0  ;;  %v707_v62 = vpop.f32.mrb[6].mxu1 }
 0x100   :  { %v684_v63 = vpop.f32.mrb[7].mxu0  ;;  %v708_v0 = vpop.f32.mrb[7].mxu1 }
 0x101   :  { %615 = vst [vmem:[%s942_s3] sm:$0xff] %v614_v57   ;;  %654 = vst [vmem:[%s942_s3 + $0x20] sm:$0xff] %v634_v58   ;;  %v432_v1 = vadd.f32 %v682_v59, %v897_v35  ;;  %v440_v2 = vadd.f32 %v706_v60, %v897_v35  ;;  %v685_v3 = vadd.f32 %v684_v63, %v683_v61 }
 0x102   :  { %v709_v4 = vadd.f32 %v708_v0, %v707_v62 }
 0x103   :  { %v433_v5 = vadd.f32 %v685_v3, %v897_v35  ;;  %v448_v7 = vmax.f32 %v432_v1, 0.0  ;;  %v456_v8 = vmax.f32 %v440_v2, 0.0 }
 0x104   :  { %v441_v6 = vadd.f32 %v709_v4, %v897_v35 }
 0x105   :  { %v449_v9 = vmax.f32 %v433_v5, 0.0  ;;  %v686_v11 = vpop.f32.mrb[8].mxu0  ;;  %v710_v12 = vpop.f32.mrb[8].mxu1 }
 0x106   :  { %v457_v10 = vmax.f32 %v441_v6, 0.0  ;;  %v687_v13 = vpop.f32.mrb[9].mxu0  ;;  %v711_v14 = vpop.f32.mrb[9].mxu1 }
 0x107   :  { %v619_v15 = vpack.c.bf16 %v449_v9, %v448_v7  ;;  %v688_v17 = vadd.f32 %v687_v13, %v686_v11  ;;  %v712_v18 = vadd.f32 %v711_v14, %v710_v12  ;;  %v689_v19 = vpop.f32.mrb[10].mxu0  ;;  %v713_v20 = vpop.f32.mrb[10].mxu1 }
 0x108   :  { %v639_v16 = vpack.c.bf16 %v457_v10, %v456_v8  ;;  %v690_v21 = vpop.f32.mrb[11].mxu0  ;;  %v714_v22 = vpop.f32.mrb[11].mxu1 }
 0x109   :  { %651 = vst [vmem:[%s942_s3 + $0x8] sm:$0xff] %v619_v15   ;;  %v434_v23 = vadd.f32 %v688_v17, %v897_v35  ;;  %v442_v24 = vadd.f32 %v712_v18, %v897_v35  ;;  %v691_v25 = vadd.f32 %v690_v21, %v689_v19  ;;  %v715_v26 = vadd.f32 %v714_v22, %v713_v20 }
 0x10a   :  { %655 = vst [vmem:[%s942_s3 + $0x28] sm:$0xff] %v639_v16  }
 0x10b   :  { %v435_v27 = vadd.f32 %v691_v25, %v897_v35  ;;  %v443_v28 = vadd.f32 %v715_v26, %v897_v35  ;;  %v450_v29 = vmax.f32 %v434_v23, 0.0  ;;  %v458_v30 = vmax.f32 %v442_v24, 0.0 }
 0x10d   :  { %v451_v31 = vmax.f32 %v435_v27, 0.0  ;;  %v459_v32 = vmax.f32 %v443_v28, 0.0  ;;  %v692_v33 = vpop.f32.mrb[12].mxu0  ;;  %v716_v34 = vpop.f32.mrb[12].mxu1 }
 0x10e   :  { %v693_v36 = vpop.f32.mrb[13].mxu0  ;;  %v717_v37 = vpop.f32.mrb[13].mxu1 }
 0x10f   :  { %v624_v38 = vpack.c.bf16 %v451_v31, %v450_v29  ;;  %v644_v39 = vpack.c.bf16 %v459_v32, %v458_v30  ;;  %v694_v40 = vadd.f32 %v693_v36, %v692_v33  ;;  %v718_v41 = vadd.f32 %v717_v37, %v716_v34  ;;  %v695_v42 = vpop.f32.mrb[14].mxu0  ;;  %v719_v43 = vpop.f32.mrb[14].mxu1 }
 0x110   :  { %v696_v44 = vpop.f32.mrb[15].mxu0  ;;  %v720_v45 = vpop.f32.mrb[15].mxu1 }
 0x111   :  { %652 = vst [vmem:[%s942_s3 + $0x10] sm:$0xff] %v624_v38   ;;  %656 = vst [vmem:[%s942_s3 + $0x30] sm:$0xff] %v644_v39   ;;  %v436_v46 = vadd.f32 %v694_v40, %v897_v35  ;;  %v444_v47 = vadd.f32 %v718_v41, %v897_v35  ;;  %v697_v48 = vadd.f32 %v696_v44, %v695_v42 }
 0x112   :  { %v721_v49 = vadd.f32 %v720_v45, %v719_v43 }
 0x113   :  { %v437_v50 = vadd.f32 %v697_v48, %v897_v35  ;;  %v452_v52 = vmax.f32 %v436_v46, 0.0  ;;  %v460_v53 = vmax.f32 %v444_v47, 0.0 }
 0x114   :  { %v445_v51 = vadd.f32 %v721_v49, %v897_v35 }
 0x115   :  { %v453_v54 = vmax.f32 %v437_v50, 0.0 }
 0x116   :  { %v461_v55 = vmax.f32 %v445_v51, 0.0 }
 0x117   :  { %v629_v56 = vpack.c.bf16 %v453_v54, %v452_v52 }
 0x118   :  { %v649_v57 = vpack.c.bf16 %v461_v55, %v460_v53 }
 0x119   :  { %653 = vst [vmem:[%s942_s3 + $0x18] sm:$0xff] %v629_v56  }
 0x11a   :  { %657 = vst [vmem:[%s942_s3 + $0x38] sm:$0xff] %v649_v57  }

// kernel: jigresnet_forward.34
= control target key start
LH: loop header
LB: loop body
LE: loop exit
PB: predicated region body
PF: predicated region fallthrough
CT: control target
= control target key end

     0   :  { %s705_s1 = inlined_call_operand.vmem [shape: bf16[128,128], index: 1, kind: input, shape index: {}]   ;;  %s706_s0 = inlined_call_operand.vmem [shape: bf16[128,128], index: 0, kind: input, shape index: {}]   ;;  %s707_s2 = inlined_call_operand.vmem [shape: f32[1,128], index: 2, kind: input, shape index: {}]   ;;  %s708_s3 = inlined_call_operand.vmem [shape: bf16[128,128], index: 3, kind: output, shape index: {}]  }
   0x1   :  { %v594_v0 = vld [vmem:[%s705_s1] sm:$0xff]   ;;  %v595_v1 = vld [vmem:[%s705_s1 + $0x8] sm:$0xff]   ;;  %v596_v2 = vld [vmem:[%s705_s1 + $0x10] sm:$0xff]  }
   0x2   :  { %546 = vmatprep.subr.bf16.mxu0 %v594_v0  ;;  %578 = vmatprep.subr.bf16.mxu1 %v594_v0  ;;  %v597_v3 = vld [vmem:[%s705_s1 + $0x18] sm:$0xff]   ;;  %v602_v4 = vld [vmem:[%s706_s0] sm:$0xff]   ;;  %v599_v7 = vld [vmem:[%s705_s1 + $0x28] sm:$0xff]  }
   0x3   :  { %547 = vmatpush3.bf16.msra.mxu0 %v594_v0  ;;  %586 = vmatpush3.bf16.msra.mxu1 %v594_v0  ;;  %v603_v5 = vld [vmem:[%s706_s0 + $0x20] sm:$0xff]   ;;  %v600_v8 = vld [vmem:[%s705_s1 + $0x30] sm:$0xff]   ;;  %v601_v9 = vld [vmem:[%s705_s1 + $0x38] sm:$0xff]  }
   0x4   :  { %548 = vmatprep.subr.bf16.mxu0 %v595_v1  ;;  %579 = vmatprep.subr.bf16.mxu1 %v595_v1  ;;  %v598_v6 = vld [vmem:[%s705_s1 + $0x20] sm:$0xff]   ;;  %v604_v10 = vld [vmem:[%s706_s0 + $0x8] sm:$0xff]   ;;  %v606_v12 = vld [vmem:[%s706_s0 + $0x10] sm:$0xff]  }
   0x5   :  { %562 = vmatprep.mubr.bf16.mxu0 %v602_v4  ;;  %570 = vmatprep.mubr.bf16.mxu1 %v603_v5  ;;  %v605_v11 = vld [vmem:[%s706_s0 + $0x28] sm:$0xff]   ;;  %v607_v13 = vld [vmem:[%s706_s0 + $0x30] sm:$0xff]   ;;  %v608_v14 = vld [vmem:[%s706_s0 + $0x18] sm:$0xff]  }
   0x6   :  { %v609_v15 = vld [vmem:[%s706_s0 + $0x38] sm:$0xff]   ;;  %v450_v17 = vld [vmem:[%s707_s2] ss:$0 sm:$0xff] }
   0x7   :  { %549 = vmatpush3.bf16.msra.mxu0 %v595_v1  ;;  %587 = vmatpush3.bf16.msra.mxu1 %v595_v1 }
   0x8   :  { %550 = vmatprep.subr.bf16.mxu0 %v596_v2  ;;  %580 = vmatprep.subr.bf16.mxu1 %v596_v2 }
   0xb   :  { %551 = vmatpush3.bf16.msra.mxu0 %v596_v2  ;;  %588 = vmatpush3.bf16.msra.mxu1 %v596_v2 }
   0xc   :  { %552 = vmatprep.subr.bf16.mxu0 %v597_v3  ;;  %581 = vmatprep.subr.bf16.mxu1 %v597_v3 }
   0xf   :  { %553 = vmatpush3.bf16.msra.mxu0 %v597_v3  ;;  %589 = vmatpush3.bf16.msra.mxu1 %v597_v3 }
  0x10   :  { %554 = vmatprep.subr.bf16.mxu0 %v598_v6  ;;  %582 = vmatprep.subr.bf16.mxu1 %v598_v6 }
  0x13   :  { %555 = vmatpush3.bf16.msra.mxu0 %v598_v6  ;;  %590 = vmatpush3.bf16.msra.mxu1 %v598_v6 }
  0x14   :  { %556 = vmatprep.subr.bf16.mxu0 %v599_v7  ;;  %583 = vmatprep.subr.bf16.mxu1 %v599_v7 }
  0x17   :  { %557 = vmatpush3.bf16.msra.mxu0 %v599_v7  ;;  %591 = vmatpush3.bf16.msra.mxu1 %v599_v7 }
  0x18   :  { %558 = vmatprep.subr.bf16.mxu0 %v600_v8  ;;  %584 = vmatprep.subr.bf16.mxu1 %v600_v8 }
  0x1b   :  { %559 = vmatpush3.bf16.msra.mxu0 %v600_v8  ;;  %592 = vmatpush3.bf16.msra.mxu1 %v600_v8 }
  0x1c   :  { %560 = vmatprep.subr.bf16.mxu0 %v601_v9  ;;  %585 = vmatprep.subr.bf16.mxu1 %v601_v9 }
  0x1f   :  { %561 = vmatpush3.bf16.msra.mxu0 %v601_v9  ;;  %593 = vmatpush3.bf16.msra.mxu1 %v601_v9 }
  0x22   :  { %563 = vmatmul.mubr.bf16.vlgmr.msra.gmra.mrb[0].mxu0 %v604_v10  ;;  %571 = vmatmul.mubr.bf16.vlgmr.msra.gmra.mrb[0].mxu1 %v605_v11 }
  0x23   :  { %566 = vmatprep.mubr.bf16.mxu0 %v606_v12  ;;  %574 = vmatprep.mubr.bf16.mxu1 %v607_v13 }
  0x2a   :  { %567 = vmatmul.mubr.bf16.gmra.mrb[4].mxu0 %v608_v14  ;;  %575 = vmatmul.mubr.bf16.gmra.mrb[4].mxu1 %v609_v15 }
  0xf5   :  { %v564_v16 = vpop.f32.mrb[0].mxu0  ;;  %v572_v18 = vpop.f32.mrb[0].mxu1 }
  0xf6   :  { %v213_v19 = vpop.f32.mrb[1].mxu0  ;;  %v245_v20 = vpop.f32.mrb[1].mxu1  ;;  %v336_v23 = vadd.f32 %v564_v16, %v450_v17  ;;  %v344_v24 = vadd.f32 %v572_v18, %v450_v17 }
  0xf7   :  { %v565_v21 = vpop.f32.mrb[2].mxu0  ;;  %v573_v22 = vpop.f32.mrb[2].mxu1  ;;  %v334_v29 = vadd.f32 %v450_v17, %v213_v19  ;;  %v342_v30 = vadd.f32 %v450_v17, %v245_v20 }
  0xf8   :  { %v337_v25 = vadd.f32 %v565_v21, %v450_v17  ;;  %v345_v26 = vadd.f32 %v573_v22, %v450_v17  ;;  %v216_v27 = vpop.f32.mrb[3].mxu0  ;;  %v248_v28 = vpop.f32.mrb[3].mxu1 }
  0xf9   :  { %v335_v31 = vadd.f32 %v450_v17, %v216_v27  ;;  %v343_v32 = vadd.f32 %v450_v17, %v248_v28 }
  0xfa   :  { %v491_v33 = vpack.c.bf16 %v337_v25, %v336_v23  ;;  %v511_v34 = vpack.c.bf16 %v345_v26, %v344_v24 }
  0xfb   :  { %v486_v35 = vpack.c.bf16 %v335_v31, %v334_v29  ;;  %v506_v36 = vpack.c.bf16 %v343_v32, %v342_v30 }
  0xfc   :  { %523 = vst [vmem:[%s708_s3 + $0x8] sm:$0xff] %v491_v33   ;;  %527 = vst [vmem:[%s708_s3 + $0x28] sm:$0xff] %v511_v34  }
  0xfd   :  { %487 = vst [vmem:[%s708_s3] sm:$0xff] %v486_v35   ;;  %526 = vst [vmem:[%s708_s3 + $0x20] sm:$0xff] %v506_v36   ;;  %v568_v37 = vpop.f32.mrb[4].mxu0  ;;  %v576_v38 = vpop.f32.mrb[4].mxu1 }
  0xfe   :  { %v229_v39 = vpop.f32.mrb[5].mxu0  ;;  %v261_v40 = vpop.f32.mrb[5].mxu1  ;;  %v340_v43 = vadd.f32 %v568_v37, %v450_v17  ;;  %v348_v44 = vadd.f32 %v576_v38, %v450_v17 }
  0xff   :  { %v569_v41 = vpop.f32.mrb[6].mxu0  ;;  %v577_v42 = vpop.f32.mrb[6].mxu1  ;;  %v338_v49 = vadd.f32 %v450_v17, %v229_v39  ;;  %v346_v50 = vadd.f32 %v450_v17, %v261_v40 }
 0x100   :  { %v341_v45 = vadd.f32 %v569_v41, %v450_v17  ;;  %v349_v46 = vadd.f32 %v577_v42, %v450_v17  ;;  %v232_v47 = vpop.f32.mrb[7].mxu0  ;;  %v264_v48 = vpop.f32.mrb[7].mxu1 }
 0x101   :  { %v339_v51 = vadd.f32 %v450_v17, %v232_v47  ;;  %v347_v52 = vadd.f32 %v450_v17, %v264_v48 }
 0x102   :  { %v501_v53 = vpack.c.bf16 %v341_v45, %v340_v43  ;;  %v521_v54 = vpack.c.bf16 %v349_v46, %v348_v44 }
 0x103   :  { %v496_v55 = vpack.c.bf16 %v339_v51, %v338_v49  ;;  %v516_v56 = vpack.c.bf16 %v347_v52, %v346_v50 }
 0x104   :  { %525 = vst [vmem:[%s708_s3 + $0x18] sm:$0xff] %v501_v53   ;;  %529 = vst [vmem:[%s708_s3 + $0x38] sm:$0xff] %v521_v54  }
 0x105   :  { %524 = vst [vmem:[%s708_s3 + $0x10] sm:$0xff] %v496_v55   ;;  %528 = vst [vmem:[%s708_s3 + $0x30] sm:$0xff] %v516_v56  }

// kernel: jigresnet_forward.35
= control target key start
LH: loop header
LB: loop body
LE: loop exit
PB: predicated region body
PF: predicated region fallthrough
CT: control target
= control target key end

     0   :  { %s1410_s1 = inlined_call_operand.vmem [shape: bf16[384,128], index: 1, kind: input, shape index: {}]   ;;  %s1411_s0 = inlined_call_operand.vmem [shape: bf16[128,384], index: 0, kind: input, shape index: {}]   ;;  %s1412_s3 = inlined_call_operand.vmem [shape: bf16[128,128], index: 3, kind: input, shape index: {}]   ;;  %s1413_s2 = inlined_call_operand.vmem [shape: f32[1,128], index: 2, kind: input, shape index: {}]   ;;  %s1414_s4 = inlined_call_operand.vmem [shape: bf16[128,128], index: 4, kind: output, shape index: {}]  }
   0x1   :  { %v1101_v0 = vld [vmem:[%s1410_s1 + $0x40] sm:$0xff]   ;;  %v1104_v3 = vld [vmem:[%s1410_s1 + $0x48] sm:$0xff]   ;;  %v1107_v6 = vld [vmem:[%s1410_s1 + $0x50] sm:$0xff]  }
   0x2   :  { %v1102_v1 = vld [vmem:[%s1410_s1] sm:$0xff]   ;;  %989 = vmatprep.subr.bf16.mxu0 %v1101_v0  ;;  %v1105_v4 = vld [vmem:[%s1410_s1 + $0x8] sm:$0xff]   ;;  %v1108_v7 = vld [vmem:[%s1410_s1 + $0x10] sm:$0xff]  }
   0x3   :  { %v1103_v2 = vld [vmem:[%s1410_s1 + $0x80] sm:$0xff]   ;;  %990 = vmatpush3.bf16.msra.mxu0 %v1102_v1  ;;  %v1106_v5 = vld [vmem:[%s1410_s1 + $0x88] sm:$0xff]   ;;  %v1109_v8 = vld [vmem:[%s1410_s1 + $0x90] sm:$0xff]  }
   0x4   :  { %1069 = vmatprep.subr.bf16.mxu1 %v1103_v2  ;;  %991 = vmatprep.subr.bf16.mxu0 %v1104_v3  ;;  %v1110_v9 = vld [vmem:[%s1410_s1 + $0x58] sm:$0xff]   ;;  %v1113_v12 = vld [vmem:[%s1410_s1 + $0x60] sm:$0xff]   ;;  %v1116_v15 = vld [vmem:[%s1410_s1 + $0x68] sm:$0xff]  }
   0x5   :  { %1070 = vmatpush3.bf16.msra.mxu1 %v1103_v2  ;;  %v1111_v10 = vld [vmem:[%s1410_s1 + $0x18] sm:$0xff]   ;;  %v1115_v13 = vld [vmem:[%s1410_s1 + $0xa0] sm:$0xff]   ;;  %v1118_v16 = vld [vmem:[%s1410_s1 + $0xa8] sm:$0xff]  }
   0x6   :  { %1071 = vmatprep.subr.bf16.mxu1 %v1106_v5  ;;  %v1112_v11 = vld [vmem:[%s1410_s1 + $0x98] sm:$0xff]   ;;  %v1114_v14 = vld [vmem:[%s1410_s1 + $0x20] sm:$0xff]   ;;  %v1117_v17 = vld [vmem:[%s1410_s1 + $0x28] sm:$0xff]  }
   0x7   :  { %992 = vmatpush3.bf16.msra.mxu0 %v1105_v4  ;;  %v1119_v18 = vld [vmem:[%s1410_s1 + $0x70] sm:$0xff]   ;;  %v1122_v21 = vld [vmem:[%s1410_s1 + $0x78] sm:$0xff]   ;;  %v1125_v26 = vld [vmem:[%s1411_s0] ss:$12 sps:$4 sm:$0xff]  }
   0x8   :  { %993 = vmatprep.subr.bf16.mxu0 %v1107_v6  ;;  %v1120_v19 = vld [vmem:[%s1410_s1 + $0x30] sm:$0xff]   ;;  %v1124_v22 = vld [vmem:[%s1410_s1 + $0xb8] sm:$0xff]   ;;  %v1129_v28 = vld [vmem:[%s1411_s0 + $0x20] ss:$12 sps:$4 sm:$0xff]  }
   0x9   :  { %1072 = vmatpush3.bf16.msra.mxu1 %v1106_v5  ;;  %v1121_v20 = vld [vmem:[%s1410_s1 + $0xb0] sm:$0xff]   ;;  %v1123_v25 = vld [vmem:[%s1410_s1 + $0x38] sm:$0xff]   ;;  %v1145_v36 = vld [vmem:[%s1411_s0 + $0x80] ss:$12 sps:$4 sm:$0xff]  }
   0xa   :  { %1073 = vmatprep.subr.bf16.mxu1 %v1109_v8  ;;  %v1127_v23 = vld [vmem:[%s1411_s0 + $0x4] ss:$12 sps:$4 sm:$0xff]   ;;  %v1128_v24 = vld [vmem:[%s1411_s0 + $0x8] ss:$12 sps:$4 sm:$0xff]   ;;  %v1138_v35 = vld [vmem:[%s1411_s0 + $0x4c] ss:$12 sps:$4 sm:$0xff]  }
   0xb   :  { %994 = vmatpush3.bf16.msra.mxu0 %v1108_v7  ;;  %438 = vmatprep.mubr.bf16.mxu0 %v1127_v23  ;;  %v1130_v27 = vld [vmem:[%s1411_s0 + $0x1c] ss:$12 sps:$4 sm:$0xff]   ;;  %v1136_v29 = vld [vmem:[%s1411_s0 + $0x38] ss:$12 sps:$4 sm:$0xff]   ;;  %v1133_v31 = vld [vmem:[%s1411_s0 + $0x34] ss:$12 sps:$4 sm:$0xff]  }
   0xc   :  { %995 = vmatprep.subr.bf16.mxu0 %v1110_v9  ;;  %1085 = vmatprep.mubr.bf16.mxu1 %v1128_v24  ;;  %v1132_v30 = vld [vmem:[%s1411_s0 + $0x18] ss:$12 sps:$4 sm:$0xff]   ;;  %v1137_v32 = vld [vmem:[%s1411_s0 + $0x50] ss:$12 sps:$4 sm:$0xff]   ;;  %v1144_v33 = vld [vmem:[%s1411_s0 + $0x68] ss:$12 sps:$4 sm:$0xff]  }
   0xd   :  { %1074 = vmatpush3.bf16.msra.mxu1 %v1109_v8  ;;  %v1135_v34 = vld [vmem:[%s1411_s0 + $0x30] ss:$12 sps:$4 sm:$0xff]   ;;  %v1152_v37 = vld [vmem:[%s1411_s0 + $0x98] ss:$12 sps:$4 sm:$0xff]   ;;  %v1140_v38 = vld [vmem:[%s1411_s0 + $0x48] ss:$12 sps:$4 sm:$0xff]  }
   0xe   :  { %1075 = vmatprep.subr.bf16.mxu1 %v1112_v11  ;;  %v1141_v39 = vld [vmem:[%s1411_s0 + $0x64] ss:$12 sps:$4 sm:$0xff]   ;;  %v1143_v41 = vld [vmem:[%s1411_s0 + $0x60] ss:$12 sps:$4 sm:$0xff]   ;;  %v1146_v42 = vld [vmem:[%s1411_s0 + $0x7c] ss:$12 sps:$4 sm:$0xff]  }
   0xf   :  { %996 = vmatpush3.bf16.msra.mxu0 %v1111_v10  ;;  %v1153_v40 = vld [vmem:[%s1411_s0 + $0xb0] ss:$12 sps:$4 sm:$0xff]   ;;  %v1148_v43 = vld [vmem:[%s1411_s0 + $0x78] ss:$12 sps:$4 sm:$0xff]   ;;  %v1149_v44 = vld [vmem:[%s1411_s0 + $0x94] ss:$12 sps:$4 sm:$0xff]  }
  0x10   :  { %997 = vmatprep.subr.bf16.mxu0 %v1113_v12  ;;  %v1151_v45 = vld [vmem:[%s1411_s0 + $0x90] ss:$12 sps:$4 sm:$0xff]   ;;  %v1154_v46 = vld [vmem:[%s1411_s0 + $0xac] ss:$12 sps:$4 sm:$0xff]   ;;  %v1156_v47 = vld [vmem:[%s1411_s0 + $0xa8] ss:$12 sps:$4 sm:$0xff]  }
  0x11   :  { %1076 = vmatpush3.bf16.msra.mxu1 %v1112_v11  ;;  %v904_v50 = vld [vmem:[%s1412_s3] sm:$0xff]   ;;  %v975_v4 = vld [vmem:[%s1412_s3 + $0x8] sm:$0xff]  }
  0x12   :  { %1077 = vmatprep.subr.bf16.mxu1 %v1115_v13  ;;  %v1332_v56 = vld [vmem:[%s1413_s2] ss:$0 sm:$0xff]  ;;  %v905_v59 = vunpack.c.l.bf16 %v904_v50  ;;  %v906_v0 = vunpack.c.h.bf16 %v904_v50  ;;  %v909_v10 = vunpack.c.l.bf16 %v975_v4 }
  0x13   :  { %998 = vmatpush3.bf16.msra.mxu0 %v1114_v14 }
  0x14   :  { %999 = vmatprep.subr.bf16.mxu0 %v1116_v15 }
  0x15   :  { %1078 = vmatpush3.bf16.msra.mxu1 %v1115_v13 }
  0x16   :  { %1079 = vmatprep.subr.bf16.mxu1 %v1118_v16 }
  0x17   :  { %1000 = vmatpush3.bf16.msra.mxu0 %v1117_v17 }
  0x18   :  { %1001 = vmatprep.subr.bf16.mxu0 %v1119_v18 }
  0x19   :  { %1080 = vmatpush3.bf16.msra.mxu1 %v1118_v16 }
  0x1a   :  { %1081 = vmatprep.subr.bf16.mxu1 %v1121_v20 }
  0x1b   :  { %1002 = vmatpush3.bf16.msra.mxu0 %v1120_v19 }
  0x1c   :  { %1003 = vmatprep.subr.bf16.mxu0 %v1122_v21 }
  0x1d   :  { %1082 = vmatpush3.bf16.msra.mxu1 %v1121_v20 }
  0x1e   :  { %1083 = vmatprep.subr.bf16.mxu1 %v1124_v22 }
  0x1f   :  { %1004 = vmatpush3.bf16.msra.mxu0 %v1123_v25 }
  0x21   :  { %1084 = vmatpush3.bf16.msra.mxu1 %v1124_v22  ;;  %v910_v22 = vunpack.c.h.bf16 %v975_v4 }
  0x22   :  { %439 = vmatmul.mubr.bf16.vlgmr.msra.gmra.mrb[0].mxu0 %v1125_v26  ;;  %v976_v26 = vld [vmem:[%s1412_s3 + $0x10] sm:$0xff]  }
  0x23   :  { %446 = vmatprep.mubr.bf16.mxu0 %v1130_v27 }
  0x24   :  { %1086 = vmatmul.mubr.bf16.vlgmr.msra.gmra.mrb[0].mxu1 %v1129_v28 }
  0x25   :  { %1089 = vmatprep.mubr.bf16.mxu1 %v1136_v29 }
  0x2a   :  { %447 = vmatmul.mubr.bf16.gmra.mrb[4].mxu0 %v1132_v30 }
  0x2b   :  { %454 = vmatprep.mubr.bf16.mxu0 %v1133_v31 }
  0x2c   :  { %1090 = vmatmul.mubr.bf16.gmra.mrb[4].mxu1 %v1137_v32 }
  0x2d   :  { %1093 = vmatprep.mubr.bf16.mxu1 %v1144_v33  ;;  %v913_v33 = vunpack.c.l.bf16 %v976_v26 }
  0x32   :  { %455 = vmatmul.mubr.bf16.gmra.mrb[8].mxu0 %v1135_v34 }
  0x33   :  { %462 = vmatprep.mubr.bf16.mxu0 %v1138_v35 }
  0x34   :  { %1094 = vmatmul.mubr.bf16.gmra.mrb[8].mxu1 %v1145_v36 }
  0x35   :  { %1097 = vmatprep.mubr.bf16.mxu1 %v1152_v37 }
  0x3a   :  { %463 = vmatmul.mubr.bf16.gmra.mrb[12].mxu0 %v1140_v38 }
  0x3b   :  { %470 = vmatprep.mubr.bf16.mxu0 %v1141_v39 }
  0x3c   :  { %1098 = vmatmul.mubr.bf16.gmra.mrb[12].mxu1 %v1153_v40 }
  0x42   :  { %471 = vmatmul.mubr.bf16.gmra.mrb[16].mxu0 %v1143_v41 }
  0x43   :  { %478 = vmatprep.mubr.bf16.mxu0 %v1146_v42 }
  0x4a   :  { %479 = vmatmul.mubr.bf16.gmra.mrb[20].mxu0 %v1148_v43 }
  0x4b   :  { %486 = vmatprep.mubr.bf16.mxu0 %v1149_v44  ;;  %v914_v44 = vunpack.c.h.bf16 %v976_v26 }
  0x52   :  { %487 = vmatmul.mubr.bf16.gmra.mrb[24].mxu0 %v1151_v45 }
  0x53   :  { %494 = vmatprep.mubr.bf16.mxu0 %v1154_v46 }
  0x5a   :  { %495 = vmatmul.mubr.bf16.gmra.mrb[28].mxu0 %v1156_v47 }
  0xf5   :  { %v1005_v48 = vpop.f32.mrb[0].mxu0 }
  0xf6   :  { %v1006_v49 = vpop.f32.mrb[1].mxu0 }
  0xf7   :  { %v1007_v51 = vadd.f32 %v1006_v49, %v1005_v48  ;;  %v1008_v52 = vpop.f32.mrb[2].mxu0  ;;  %v1087_v53 = vpop.f32.mrb[0].mxu1  ;;  %v977_v48 = vld [vmem:[%s1412_s3 + $0x18] sm:$0xff]  }
  0xf8   :  { %v1009_v54 = vpop.f32.mrb[3].mxu0  ;;  %v537_v55 = vpop.f32.mrb[1].mxu1 }
  0xf9   :  { %v1010_v57 = vadd.f32 %v1009_v54, %v1008_v52  ;;  %v538_v58 = vadd.f32 %v1007_v51, %v537_v55  ;;  %v1088_v60 = vpop.f32.mrb[2].mxu1  ;;  %v917_v54 = vunpack.c.l.bf16 %v977_v48 }
  0xfa   :  { %v540_v61 = vpop.f32.mrb[3].mxu1 }
  0xfb   :  { %v658_v62 = vadd.f32 %v1332_v56, %v538_v58  ;;  %v541_v63 = vadd.f32 %v1010_v57, %v540_v61 }
  0xfd   :  { %v706_v1 = vadd.f32 %v905_v59, %v658_v62  ;;  %v659_v2 = vadd.f32 %v1332_v56, %v541_v63  ;;  %v1011_v3 = vpop.f32.mrb[4].mxu0 }
  0xfe   :  { %v1012_v5 = vpop.f32.mrb[5].mxu0 }
  0xff   :  { %v707_v6 = vadd.f32 %v906_v0, %v659_v2  ;;  %v1013_v7 = vadd.f32 %v1012_v5, %v1011_v3  ;;  %v1014_v8 = vpop.f32.mrb[6].mxu0  ;;  %v1091_v9 = vpop.f32.mrb[4].mxu1  ;;  %v722_v13 = vmax.f32 %v706_v1, 0.0  ;;  %v918_v3 = vunpack.c.h.bf16 %v977_v48 }
 0x100   :  { %v1015_v11 = vpop.f32.mrb[7].mxu0  ;;  %v553_v12 = vpop.f32.mrb[5].mxu1 }
 0x101   :  { %v723_v14 = vmax.f32 %v707_v6, 0.0  ;;  %v546_v15 = vadd.f32 %v1087_v53, %v1013_v7  ;;  %v1016_v16 = vadd.f32 %v1015_v11, %v1014_v8  ;;  %v1092_v17 = vpop.f32.mrb[6].mxu1  ;;  %v978_v7 = vld [vmem:[%s1412_s3 + $0x20] sm:$0xff]  }
 0x102   :  { %v556_v18 = vpop.f32.mrb[7].mxu1 }
 0x103   :  { %v938_v19 = vpack.c.bf16 %v723_v14, %v722_v13  ;;  %v660_v20 = vadd.f32 %v1332_v56, %v546_v15  ;;  %v549_v21 = vadd.f32 %v1088_v60, %v1016_v16  ;;  %v921_v13 = vunpack.c.l.bf16 %v978_v7 }
 0x105   :  { %939 = vst [vmem:[%s1414_s4] sm:$0xff] %v938_v19   ;;  %v708_v23 = vadd.f32 %v909_v10, %v660_v20  ;;  %v661_v24 = vadd.f32 %v1332_v56, %v549_v21  ;;  %v1017_v25 = vpop.f32.mrb[8].mxu0  ;;  %v922_v21 = vunpack.c.h.bf16 %v978_v7 }
 0x106   :  { %v1018_v27 = vpop.f32.mrb[9].mxu0 }
 0x107   :  { %v709_v28 = vadd.f32 %v910_v22, %v661_v24  ;;  %v1019_v29 = vadd.f32 %v1018_v27, %v1017_v25  ;;  %v1020_v30 = vpop.f32.mrb[10].mxu0  ;;  %v1347_v31 = vpop.f32.mrb[8].mxu1  ;;  %v724_v35 = vmax.f32 %v708_v23, 0.0  ;;  %v979_v25 = vld [vmem:[%s1412_s3 + $0x28] sm:$0xff]  }
 0x108   :  { %v1021_v32 = vpop.f32.mrb[11].mxu0  ;;  %v569_v34 = vpop.f32.mrb[9].mxu1 }
 0x109   :  { %v725_v36 = vmax.f32 %v709_v28, 0.0  ;;  %v1022_v37 = vadd.f32 %v1021_v32, %v1020_v30  ;;  %v554_v38 = vadd.f32 %v1019_v29, %v553_v12  ;;  %v1349_v39 = vpop.f32.mrb[10].mxu1  ;;  %v925_v30 = vunpack.c.l.bf16 %v979_v25 }
 0x10a   :  { %v572_v40 = vpop.f32.mrb[11].mxu1 }
 0x10b   :  { %v943_v41 = vpack.c.bf16 %v725_v36, %v724_v35  ;;  %v662_v42 = vadd.f32 %v1332_v56, %v554_v38  ;;  %v557_v43 = vadd.f32 %v1022_v37, %v556_v18 }
 0x10d   :  { %982 = vst [vmem:[%s1414_s4 + $0x8] sm:$0xff] %v943_v41   ;;  %v710_v45 = vadd.f32 %v913_v33, %v662_v42  ;;  %v663_v46 = vadd.f32 %v1332_v56, %v557_v43  ;;  %v1023_v47 = vpop.f32.mrb[12].mxu0  ;;  %v926_v41 = vunpack.c.h.bf16 %v979_v25 }
 0x10e   :  { %v1024_v49 = vpop.f32.mrb[13].mxu0 }
 0x10f   :  { %v711_v50 = vadd.f32 %v914_v44, %v663_v46  ;;  %v1025_v51 = vadd.f32 %v1024_v49, %v1023_v47  ;;  %v1026_v52 = vpop.f32.mrb[14].mxu0  ;;  %v1359_v53 = vpop.f32.mrb[12].mxu1  ;;  %v726_v58 = vmax.f32 %v710_v45, 0.0  ;;  %v980_v45 = vld [vmem:[%s1412_s3 + $0x30] sm:$0xff]  }
 0x110   :  { %v1027_v55 = vpop.f32.mrb[15].mxu0  ;;  %v1361_v57 = vpop.f32.mrb[13].mxu1 }
 0x111   :  { %v727_v59 = vmax.f32 %v711_v50, 0.0  ;;  %v562_v60 = vadd.f32 %v1091_v9, %v1025_v51  ;;  %v1028_v61 = vadd.f32 %v1027_v55, %v1026_v52  ;;  %v1363_v62 = vpop.f32.mrb[14].mxu1  ;;  %v929_v50 = vunpack.c.l.bf16 %v980_v45 }
 0x112   :  { %v588_v63 = vpop.f32.mrb[15].mxu1 }
 0x113   :  { %v948_v0 = vpack.c.bf16 %v727_v59, %v726_v58  ;;  %v664_v1 = vadd.f32 %v1332_v56, %v562_v60  ;;  %v565_v2 = vadd.f32 %v1092_v17, %v1028_v61  ;;  %v930_v60 = vunpack.c.h.bf16 %v980_v45 }
 0x115   :  { %983 = vst [vmem:[%s1414_s4 + $0x10] sm:$0xff] %v948_v0   ;;  %v712_v4 = vadd.f32 %v917_v54, %v664_v1  ;;  %v665_v5 = vadd.f32 %v1332_v56, %v565_v2  ;;  %v1029_v6 = vpop.f32.mrb[16].mxu0  ;;  %v981_v2 = vld [vmem:[%s1412_s3 + $0x38] sm:$0xff]  }
 0x116   :  { %v1030_v8 = vpop.f32.mrb[17].mxu0 }
 0x117   :  { %v713_v9 = vadd.f32 %v918_v3, %v665_v5  ;;  %v1031_v10 = vadd.f32 %v1030_v8, %v1029_v6  ;;  %v1032_v11 = vpop.f32.mrb[18].mxu0  ;;  %v728_v14 = vmax.f32 %v712_v4, 0.0  ;;  %v933_v6 = vunpack.c.l.bf16 %v981_v2 }
 0x118   :  { %v1033_v12 = vpop.f32.mrb[19].mxu0 }
 0x119   :  { %v729_v15 = vmax.f32 %v713_v9, 0.0  ;;  %v1034_v16 = vadd.f32 %v1033_v12, %v1032_v11  ;;  %v570_v17 = vadd.f32 %v1031_v10, %v569_v34 }
 0x11b   :  { %v953_v18 = vpack.c.bf16 %v729_v15, %v728_v14  ;;  %v666_v19 = vadd.f32 %v1332_v56, %v570_v17  ;;  %v573_v20 = vadd.f32 %v1034_v16, %v572_v40  ;;  %v934_v14 = vunpack.c.h.bf16 %v981_v2 }
 0x11d   :  { %984 = vst [vmem:[%s1414_s4 + $0x18] sm:$0xff] %v953_v18   ;;  %v714_v22 = vadd.f32 %v921_v13, %v666_v19  ;;  %v667_v23 = vadd.f32 %v1332_v56, %v573_v20  ;;  %v1035_v24 = vpop.f32.mrb[20].mxu0 }
 0x11e   :  { %v1036_v26 = vpop.f32.mrb[21].mxu0 }
 0x11f   :  { %v715_v27 = vadd.f32 %v922_v21, %v667_v23  ;;  %v1037_v28 = vadd.f32 %v1036_v26, %v1035_v24  ;;  %v1038_v29 = vpop.f32.mrb[22].mxu0  ;;  %v730_v33 = vmax.f32 %v714_v22, 0.0 }
 0x120   :  { %v1039_v32 = vpop.f32.mrb[23].mxu0 }
 0x121   :  { %v731_v34 = vmax.f32 %v715_v27, 0.0  ;;  %v578_v35 = vadd.f32 %v1347_v31, %v1037_v28  ;;  %v1040_v36 = vadd.f32 %v1039_v32, %v1038_v29 }
 0x123   :  { %v958_v37 = vpack.c.bf16 %v731_v34, %v730_v33  ;;  %v668_v38 = vadd.f32 %v1332_v56, %v578_v35  ;;  %v581_v40 = vadd.f32 %v1349_v39, %v1040_v36 }
 0x125   :  { %985 = vst [vmem:[%s1414_s4 + $0x20] sm:$0xff] %v958_v37   ;;  %v716_v42 = vadd.f32 %v925_v30, %v668_v38  ;;  %v669_v43 = vadd.f32 %v1332_v56, %v581_v40  ;;  %v1041_v44 = vpop.f32.mrb[24].mxu0 }
 0x126   :  { %v1042_v31 = vpop.f32.mrb[25].mxu0 }
 0x127   :  { %v717_v46 = vadd.f32 %v926_v41, %v669_v43  ;;  %v1043_v47 = vadd.f32 %v1042_v31, %v1041_v44  ;;  %v1044_v48 = vpop.f32.mrb[26].mxu0  ;;  %v732_v39 = vmax.f32 %v716_v42, 0.0 }
 0x128   :  { %v1045_v49 = vpop.f32.mrb[27].mxu0 }
 0x129   :  { %v733_v51 = vmax.f32 %v717_v46, 0.0  ;;  %v1046_v52 = vadd.f32 %v1045_v49, %v1044_v48  ;;  %v586_v54 = vadd.f32 %v1043_v47, %v1361_v57 }
 0x12b   :  { %v963_v55 = vpack.c.bf16 %v733_v51, %v732_v39  ;;  %v670_v58 = vadd.f32 %v1332_v56, %v586_v54  ;;  %v589_v59 = vadd.f32 %v1046_v52, %v588_v63 }
 0x12d   :  { %986 = vst [vmem:[%s1414_s4 + $0x28] sm:$0xff] %v963_v55   ;;  %v718_v61 = vadd.f32 %v929_v50, %v670_v58  ;;  %v671_v0 = vadd.f32 %v1332_v56, %v589_v59  ;;  %v1047_v1 = vpop.f32.mrb[28].mxu0 }
 0x12e   :  { %v1048_v3 = vpop.f32.mrb[29].mxu0 }
 0x12f   :  { %v719_v4 = vadd.f32 %v930_v60, %v671_v0  ;;  %v1049_v57 = vadd.f32 %v1048_v3, %v1047_v1  ;;  %v1050_v5 = vpop.f32.mrb[30].mxu0  ;;  %v734_v63 = vmax.f32 %v718_v61, 0.0 }
 0x130   :  { %v1051_v7 = vpop.f32.mrb[31].mxu0 }
 0x131   :  { %v735_v8 = vmax.f32 %v719_v4, 0.0  ;;  %v594_v9 = vadd.f32 %v1359_v53, %v1049_v57  ;;  %v1052_v10 = vadd.f32 %v1051_v7, %v1050_v5 }
 0x133   :  { %v968_v11 = vpack.c.bf16 %v735_v8, %v734_v63  ;;  %v672_v12 = vadd.f32 %v1332_v56, %v594_v9  ;;  %v597_v13 = vadd.f32 %v1363_v62, %v1052_v10 }
 0x135   :  { %987 = vst [vmem:[%s1414_s4 + $0x30] sm:$0xff] %v968_v11   ;;  %v720_v15 = vadd.f32 %v933_v6, %v672_v12  ;;  %v673_v16 = vadd.f32 %v1332_v56, %v597_v13 }
 0x137   :  { %v721_v17 = vadd.f32 %v934_v14, %v673_v16  ;;  %v736_v18 = vmax.f32 %v720_v15, 0.0 }
 0x139   :  { %v737_v19 = vmax.f32 %v721_v17, 0.0 }
 0x13b   :  { %v973_v20 = vpack.c.bf16 %v737_v19, %v736_v18 }
 0x13d   :  { %988 = vst [vmem:[%s1414_s4 + $0x38] sm:$0xff] %v973_v20  }

// kernel: jigresnet_forward.36
= control target key start
LH: loop header
LB: loop body
LE: loop exit
PB: predicated region body
PF: predicated region fallthrough
CT: control target
= control target key end

     0   :  { %s1276_s1 = inlined_call_operand.vmem [shape: bf16[384,128], index: 1, kind: input, shape index: {}]   ;;  %s1277_s0 = inlined_call_operand.vmem [shape: bf16[128,384], index: 0, kind: input, shape index: {}]   ;;  %s1278_s2 = inlined_call_operand.vmem [shape: f32[1,128], index: 2, kind: input, shape index: {}]   ;;  %s1279_s3 = inlined_call_operand.vmem [shape: bf16[128,128], index: 3, kind: output, shape index: {}]  }
   0x1   :  { %v1011_v0 = vld [vmem:[%s1276_s1 + $0x40] sm:$0xff]   ;;  %v1014_v3 = vld [vmem:[%s1276_s1 + $0x48] sm:$0xff]   ;;  %v1017_v6 = vld [vmem:[%s1276_s1 + $0x50] sm:$0xff]  }
   0x2   :  { %v1012_v1 = vld [vmem:[%s1276_s1] sm:$0xff]   ;;  %899 = vmatprep.subr.bf16.mxu0 %v1011_v0  ;;  %v1015_v4 = vld [vmem:[%s1276_s1 + $0x8] sm:$0xff]   ;;  %v1018_v7 = vld [vmem:[%s1276_s1 + $0x10] sm:$0xff]  }
   0x3   :  { %v1013_v2 = vld [vmem:[%s1276_s1 + $0x80] sm:$0xff]   ;;  %900 = vmatpush3.bf16.msra.mxu0 %v1012_v1  ;;  %v1016_v5 = vld [vmem:[%s1276_s1 + $0x88] sm:$0xff]   ;;  %v1019_v8 = vld [vmem:[%s1276_s1 + $0x90] sm:$0xff]  }
   0x4   :  { %979 = vmatprep.subr.bf16.mxu1 %v1013_v2  ;;  %901 = vmatprep.subr.bf16.mxu0 %v1014_v3  ;;  %v1020_v9 = vld [vmem:[%s1276_s1 + $0x58] sm:$0xff]   ;;  %v1023_v12 = vld [vmem:[%s1276_s1 + $0x60] sm:$0xff]   ;;  %v1026_v15 = vld [vmem:[%s1276_s1 + $0x68] sm:$0xff]  }
   0x5   :  { %980 = vmatpush3.bf16.msra.mxu1 %v1013_v2  ;;  %v1021_v10 = vld [vmem:[%s1276_s1 + $0x18] sm:$0xff]   ;;  %v1025_v13 = vld [vmem:[%s1276_s1 + $0xa0] sm:$0xff]   ;;  %v1028_v16 = vld [vmem:[%s1276_s1 + $0xa8] sm:$0xff]  }
   0x6   :  { %981 = vmatprep.subr.bf16.mxu1 %v1016_v5  ;;  %v1022_v11 = vld [vmem:[%s1276_s1 + $0x98] sm:$0xff]   ;;  %v1024_v14 = vld [vmem:[%s1276_s1 + $0x20] sm:$0xff]   ;;  %v1027_v17 = vld [vmem:[%s1276_s1 + $0x28] sm:$0xff]  }
   0x7   :  { %902 = vmatpush3.bf16.msra.mxu0 %v1015_v4  ;;  %v1029_v18 = vld [vmem:[%s1276_s1 + $0x70] sm:$0xff]   ;;  %v1032_v21 = vld [vmem:[%s1276_s1 + $0x78] sm:$0xff]   ;;  %v1035_v26 = vld [vmem:[%s1277_s0] ss:$12 sps:$4 sm:$0xff]  }
   0x8   :  { %903 = vmatprep.subr.bf16.mxu0 %v1017_v6  ;;  %v1030_v19 = vld [vmem:[%s1276_s1 + $0x30] sm:$0xff]   ;;  %v1034_v22 = vld [vmem:[%s1276_s1 + $0xb8] sm:$0xff]   ;;  %v1039_v28 = vld [vmem:[%s1277_s0 + $0x20] ss:$12 sps:$4 sm:$0xff]  }
   0x9   :  { %982 = vmatpush3.bf16.msra.mxu1 %v1016_v5  ;;  %v1031_v20 = vld [vmem:[%s1276_s1 + $0xb0] sm:$0xff]   ;;  %v1033_v25 = vld [vmem:[%s1276_s1 + $0x38] sm:$0xff]   ;;  %v1055_v36 = vld [vmem:[%s1277_s0 + $0x80] ss:$12 sps:$4 sm:$0xff]  }
   0xa   :  { %983 = vmatprep.subr.bf16.mxu1 %v1019_v8  ;;  %v1037_v23 = vld [vmem:[%s1277_s0 + $0x4] ss:$12 sps:$4 sm:$0xff]   ;;  %v1038_v24 = vld [vmem:[%s1277_s0 + $0x8] ss:$12 sps:$4 sm:$0xff]   ;;  %v1048_v35 = vld [vmem:[%s1277_s0 + $0x4c] ss:$12 sps:$4 sm:$0xff]  }
   0xb   :  { %904 = vmatpush3.bf16.msra.mxu0 %v1018_v7  ;;  %435 = vmatprep.mubr.bf16.mxu0 %v1037_v23  ;;  %v1040_v27 = vld [vmem:[%s1277_s0 + $0x1c] ss:$12 sps:$4 sm:$0xff]   ;;  %v1046_v29 = vld [vmem:[%s1277_s0 + $0x38] ss:$12 sps:$4 sm:$0xff]   ;;  %v1043_v31 = vld [vmem:[%s1277_s0 + $0x34] ss:$12 sps:$4 sm:$0xff]  }
   0xc   :  { %905 = vmatprep.subr.bf16.mxu0 %v1020_v9  ;;  %995 = vmatprep.mubr.bf16.mxu1 %v1038_v24  ;;  %v1042_v30 = vld [vmem:[%s1277_s0 + $0x18] ss:$12 sps:$4 sm:$0xff]   ;;  %v1047_v32 = vld [vmem:[%s1277_s0 + $0x50] ss:$12 sps:$4 sm:$0xff]   ;;  %v1054_v33 = vld [vmem:[%s1277_s0 + $0x68] ss:$12 sps:$4 sm:$0xff]  }
   0xd   :  { %984 = vmatpush3.bf16.msra.mxu1 %v1019_v8  ;;  %v1045_v34 = vld [vmem:[%s1277_s0 + $0x30] ss:$12 sps:$4 sm:$0xff]   ;;  %v1062_v37 = vld [vmem:[%s1277_s0 + $0x98] ss:$12 sps:$4 sm:$0xff]   ;;  %v1050_v38 = vld [vmem:[%s1277_s0 + $0x48] ss:$12 sps:$4 sm:$0xff]  }
   0xe   :  { %985 = vmatprep.subr.bf16.mxu1 %v1022_v11  ;;  %v1051_v39 = vld [vmem:[%s1277_s0 + $0x64] ss:$12 sps:$4 sm:$0xff]   ;;  %v1053_v41 = vld [vmem:[%s1277_s0 + $0x60] ss:$12 sps:$4 sm:$0xff]   ;;  %v1056_v42 = vld [vmem:[%s1277_s0 + $0x7c] ss:$12 sps:$4 sm:$0xff]  }
   0xf   :  { %906 = vmatpush3.bf16.msra.mxu0 %v1021_v10  ;;  %v1063_v40 = vld [vmem:[%s1277_s0 + $0xb0] ss:$12 sps:$4 sm:$0xff]   ;;  %v1058_v43 = vld [vmem:[%s1277_s0 + $0x78] ss:$12 sps:$4 sm:$0xff]   ;;  %v1059_v44 = vld [vmem:[%s1277_s0 + $0x94] ss:$12 sps:$4 sm:$0xff]  }
  0x10   :  { %907 = vmatprep.subr.bf16.mxu0 %v1023_v12  ;;  %v1061_v45 = vld [vmem:[%s1277_s0 + $0x90] ss:$12 sps:$4 sm:$0xff]   ;;  %v1064_v46 = vld [vmem:[%s1277_s0 + $0xac] ss:$12 sps:$4 sm:$0xff]   ;;  %v1066_v47 = vld [vmem:[%s1277_s0 + $0xa8] ss:$12 sps:$4 sm:$0xff]  }
  0x11   :  { %986 = vmatpush3.bf16.msra.mxu1 %v1022_v11  ;;  %v1234_v55 = vld [vmem:[%s1278_s2] ss:$0 sm:$0xff] }
  0x12   :  { %987 = vmatprep.subr.bf16.mxu1 %v1025_v13 }
  0x13   :  { %908 = vmatpush3.bf16.msra.mxu0 %v1024_v14 }
  0x14   :  { %909 = vmatprep.subr.bf16.mxu0 %v1026_v15 }
  0x15   :  { %988 = vmatpush3.bf16.msra.mxu1 %v1025_v13 }
  0x16   :  { %989 = vmatprep.subr.bf16.mxu1 %v1028_v16 }
  0x17   :  { %910 = vmatpush3.bf16.msra.mxu0 %v1027_v17 }
  0x18   :  { %911 = vmatprep.subr.bf16.mxu0 %v1029_v18 }
  0x19   :  { %990 = vmatpush3.bf16.msra.mxu1 %v1028_v16 }
  0x1a   :  { %991 = vmatprep.subr.bf16.mxu1 %v1031_v20 }
  0x1b   :  { %912 = vmatpush3.bf16.msra.mxu0 %v1030_v19 }
  0x1c   :  { %913 = vmatprep.subr.bf16.mxu0 %v1032_v21 }
  0x1d   :  { %992 = vmatpush3.bf16.msra.mxu1 %v1031_v20 }
  0x1e   :  { %993 = vmatprep.subr.bf16.mxu1 %v1034_v22 }
  0x1f   :  { %914 = vmatpush3.bf16.msra.mxu0 %v1033_v25 }
  0x21   :  { %994 = vmatpush3.bf16.msra.mxu1 %v1034_v22 }
  0x22   :  { %436 = vmatmul.mubr.bf16.vlgmr.msra.gmra.mrb[0].mxu0 %v1035_v26 }
  0x23   :  { %443 = vmatprep.mubr.bf16.mxu0 %v1040_v27 }
  0x24   :  { %996 = vmatmul.mubr.bf16.vlgmr.msra.gmra.mrb[0].mxu1 %v1039_v28 }
  0x25   :  { %999 = vmatprep.mubr.bf16.mxu1 %v1046_v29 }
  0x2a   :  { %444 = vmatmul.mubr.bf16.gmra.mrb[4].mxu0 %v1042_v30 }
  0x2b   :  { %451 = vmatprep.mubr.bf16.mxu0 %v1043_v31 }
  0x2c   :  { %1000 = vmatmul.mubr.bf16.gmra.mrb[4].mxu1 %v1047_v32 }
  0x2d   :  { %1003 = vmatprep.mubr.bf16.mxu1 %v1054_v33 }
  0x32   :  { %452 = vmatmul.mubr.bf16.gmra.mrb[8].mxu0 %v1045_v34 }
  0x33   :  { %459 = vmatprep.mubr.bf16.mxu0 %v1048_v35 }
  0x34   :  { %1004 = vmatmul.mubr.bf16.gmra.mrb[8].mxu1 %v1055_v36 }
  0x35   :  { %1007 = vmatprep.mubr.bf16.mxu1 %v1062_v37 }
  0x3a   :  { %460 = vmatmul.mubr.bf16.gmra.mrb[12].mxu0 %v1050_v38 }
  0x3b   :  { %467 = vmatprep.mubr.bf16.mxu0 %v1051_v39 }
  0x3c   :  { %1008 = vmatmul.mubr.bf16.gmra.mrb[12].mxu1 %v1063_v40 }
  0x42   :  { %468 = vmatmul.mubr.bf16.gmra.mrb[16].mxu0 %v1053_v41 }
  0x43   :  { %475 = vmatprep.mubr.bf16.mxu0 %v1056_v42 }
  0x4a   :  { %476 = vmatmul.mubr.bf16.gmra.mrb[20].mxu0 %v1058_v43 }
  0x4b   :  { %483 = vmatprep.mubr.bf16.mxu0 %v1059_v44 }
  0x52   :  { %484 = vmatmul.mubr.bf16.gmra.mrb[24].mxu0 %v1061_v45 }
  0x53   :  { %491 = vmatprep.mubr.bf16.mxu0 %v1064_v46 }
  0x5a   :  { %492 = vmatmul.mubr.bf16.gmra.mrb[28].mxu0 %v1066_v47 }
  0xf5   :  { %v915_v48 = vpop.f32.mrb[0].mxu0 }
  0xf6   :  { %v916_v49 = vpop.f32.mrb[1].mxu0 }
  0xf7   :  { %v917_v50 = vadd.f32 %v916_v49, %v915_v48  ;;  %v918_v51 = vpop.f32.mrb[2].mxu0  ;;  %v997_v52 = vpop.f32.mrb[0].mxu1 }
  0xf8   :  { %v919_v53 = vpop.f32.mrb[3].mxu0  ;;  %v534_v54 = vpop.f32.mrb[1].mxu1 }
  0xf9   :  { %v920_v56 = vadd.f32 %v919_v53, %v918_v51  ;;  %v535_v57 = vadd.f32 %v917_v50, %v534_v54  ;;  %v998_v58 = vpop.f32.mrb[2].mxu1 }
  0xfa   :  { %v537_v59 = vpop.f32.mrb[3].mxu1 }
  0xfb   :  { %v655_v60 = vadd.f32 %v1234_v55, %v535_v57  ;;  %v538_v61 = vadd.f32 %v920_v56, %v537_v59 }
  0xfd   :  { %v656_v62 = vadd.f32 %v1234_v55, %v538_v61  ;;  %v921_v63 = vpop.f32.mrb[4].mxu0  ;;  %v671_v1 = vmax.f32 %v655_v60, 0.0 }
  0xfe   :  { %v922_v0 = vpop.f32.mrb[5].mxu0 }
  0xff   :  { %v672_v2 = vmax.f32 %v656_v62, 0.0  ;;  %v923_v3 = vadd.f32 %v922_v0, %v921_v63  ;;  %v924_v4 = vpop.f32.mrb[6].mxu0  ;;  %v1001_v5 = vpop.f32.mrb[4].mxu1 }
 0x100   :  { %v925_v6 = vpop.f32.mrb[7].mxu0  ;;  %v550_v7 = vpop.f32.mrb[5].mxu1 }
 0x101   :  { %v855_v8 = vpack.c.bf16 %v672_v2, %v671_v1  ;;  %v543_v9 = vadd.f32 %v997_v52, %v923_v3  ;;  %v926_v10 = vadd.f32 %v925_v6, %v924_v4  ;;  %v1002_v11 = vpop.f32.mrb[6].mxu1 }
 0x102   :  { %v553_v12 = vpop.f32.mrb[7].mxu1 }
 0x103   :  { %856 = vst [vmem:[%s1279_s3] sm:$0xff] %v855_v8   ;;  %v657_v13 = vadd.f32 %v1234_v55, %v543_v9  ;;  %v546_v14 = vadd.f32 %v998_v58, %v926_v10 }
 0x105   :  { %v658_v15 = vadd.f32 %v1234_v55, %v546_v14  ;;  %v927_v16 = vpop.f32.mrb[8].mxu0  ;;  %v673_v18 = vmax.f32 %v657_v13, 0.0 }
 0x106   :  { %v928_v17 = vpop.f32.mrb[9].mxu0 }
 0x107   :  { %v674_v19 = vmax.f32 %v658_v15, 0.0  ;;  %v929_v20 = vadd.f32 %v928_v17, %v927_v16  ;;  %v930_v21 = vpop.f32.mrb[10].mxu0  ;;  %v1005_v22 = vpop.f32.mrb[8].mxu1 }
 0x108   :  { %v931_v23 = vpop.f32.mrb[11].mxu0  ;;  %v566_v24 = vpop.f32.mrb[9].mxu1 }
 0x109   :  { %v860_v25 = vpack.c.bf16 %v674_v19, %v673_v18  ;;  %v932_v26 = vadd.f32 %v931_v23, %v930_v21  ;;  %v551_v27 = vadd.f32 %v929_v20, %v550_v7  ;;  %v1006_v28 = vpop.f32.mrb[10].mxu1 }
 0x10a   :  { %v569_v29 = vpop.f32.mrb[11].mxu1 }
 0x10b   :  { %892 = vst [vmem:[%s1279_s3 + $0x8] sm:$0xff] %v860_v25   ;;  %v659_v30 = vadd.f32 %v1234_v55, %v551_v27  ;;  %v554_v31 = vadd.f32 %v932_v26, %v553_v12 }
 0x10d   :  { %v660_v32 = vadd.f32 %v1234_v55, %v554_v31  ;;  %v933_v33 = vpop.f32.mrb[12].mxu0  ;;  %v675_v35 = vmax.f32 %v659_v30, 0.0 }
 0x10e   :  { %v934_v34 = vpop.f32.mrb[13].mxu0 }
 0x10f   :  { %v676_v36 = vmax.f32 %v660_v32, 0.0  ;;  %v935_v37 = vadd.f32 %v934_v34, %v933_v33  ;;  %v936_v38 = vpop.f32.mrb[14].mxu0  ;;  %v1009_v39 = vpop.f32.mrb[12].mxu1 }
 0x110   :  { %v937_v40 = vpop.f32.mrb[15].mxu0  ;;  %v582_v41 = vpop.f32.mrb[13].mxu1 }
 0x111   :  { %v865_v42 = vpack.c.bf16 %v676_v36, %v675_v35  ;;  %v559_v43 = vadd.f32 %v1001_v5, %v935_v37  ;;  %v938_v44 = vadd.f32 %v937_v40, %v936_v38  ;;  %v1010_v45 = vpop.f32.mrb[14].mxu1 }
 0x112   :  { %v585_v46 = vpop.f32.mrb[15].mxu1 }
 0x113   :  { %893 = vst [vmem:[%s1279_s3 + $0x10] sm:$0xff] %v865_v42   ;;  %v661_v47 = vadd.f32 %v1234_v55, %v559_v43  ;;  %v562_v48 = vadd.f32 %v1002_v11, %v938_v44 }
 0x115   :  { %v662_v49 = vadd.f32 %v1234_v55, %v562_v48  ;;  %v939_v50 = vpop.f32.mrb[16].mxu0  ;;  %v677_v52 = vmax.f32 %v661_v47, 0.0 }
 0x116   :  { %v940_v51 = vpop.f32.mrb[17].mxu0 }
 0x117   :  { %v678_v53 = vmax.f32 %v662_v49, 0.0  ;;  %v941_v54 = vadd.f32 %v940_v51, %v939_v50  ;;  %v942_v56 = vpop.f32.mrb[18].mxu0 }
 0x118   :  { %v943_v57 = vpop.f32.mrb[19].mxu0 }
 0x119   :  { %v870_v58 = vpack.c.bf16 %v678_v53, %v677_v52  ;;  %v944_v59 = vadd.f32 %v943_v57, %v942_v56  ;;  %v567_v60 = vadd.f32 %v941_v54, %v566_v24 }
 0x11b   :  { %894 = vst [vmem:[%s1279_s3 + $0x18] sm:$0xff] %v870_v58   ;;  %v663_v61 = vadd.f32 %v1234_v55, %v567_v60  ;;  %v570_v62 = vadd.f32 %v944_v59, %v569_v29 }
 0x11d   :  { %v664_v63 = vadd.f32 %v1234_v55, %v570_v62  ;;  %v945_v0 = vpop.f32.mrb[20].mxu0  ;;  %v679_v2 = vmax.f32 %v663_v61, 0.0 }
 0x11e   :  { %v946_v1 = vpop.f32.mrb[21].mxu0 }
 0x11f   :  { %v680_v3 = vmax.f32 %v664_v63, 0.0  ;;  %v947_v4 = vadd.f32 %v946_v1, %v945_v0  ;;  %v948_v5 = vpop.f32.mrb[22].mxu0 }
 0x120   :  { %v949_v6 = vpop.f32.mrb[23].mxu0 }
 0x121   :  { %v875_v7 = vpack.c.bf16 %v680_v3, %v679_v2  ;;  %v575_v8 = vadd.f32 %v1005_v22, %v947_v4  ;;  %v950_v9 = vadd.f32 %v949_v6, %v948_v5 }
 0x123   :  { %895 = vst [vmem:[%s1279_s3 + $0x20] sm:$0xff] %v875_v7   ;;  %v665_v10 = vadd.f32 %v1234_v55, %v575_v8  ;;  %v578_v11 = vadd.f32 %v1006_v28, %v950_v9 }
 0x125   :  { %v666_v12 = vadd.f32 %v1234_v55, %v578_v11  ;;  %v951_v13 = vpop.f32.mrb[24].mxu0  ;;  %v681_v15 = vmax.f32 %v665_v10, 0.0 }
 0x126   :  { %v952_v14 = vpop.f32.mrb[25].mxu0 }
 0x127   :  { %v682_v16 = vmax.f32 %v666_v12, 0.0  ;;  %v953_v17 = vadd.f32 %v952_v14, %v951_v13  ;;  %v954_v18 = vpop.f32.mrb[26].mxu0 }
 0x128   :  { %v955_v19 = vpop.f32.mrb[27].mxu0 }
 0x129   :  { %v880_v20 = vpack.c.bf16 %v682_v16, %v681_v15  ;;  %v956_v21 = vadd.f32 %v955_v19, %v954_v18  ;;  %v583_v22 = vadd.f32 %v953_v17, %v582_v41 }
 0x12b   :  { %896 = vst [vmem:[%s1279_s3 + $0x28] sm:$0xff] %v880_v20   ;;  %v667_v23 = vadd.f32 %v1234_v55, %v583_v22  ;;  %v586_v24 = vadd.f32 %v956_v21, %v585_v46 }
 0x12d   :  { %v668_v25 = vadd.f32 %v1234_v55, %v586_v24  ;;  %v957_v26 = vpop.f32.mrb[28].mxu0  ;;  %v683_v28 = vmax.f32 %v667_v23, 0.0 }
 0x12e   :  { %v958_v27 = vpop.f32.mrb[29].mxu0 }
 0x12f   :  { %v684_v29 = vmax.f32 %v668_v25, 0.0  ;;  %v959_v30 = vadd.f32 %v958_v27, %v957_v26  ;;  %v960_v31 = vpop.f32.mrb[30].mxu0 }
 0x130   :  { %v961_v32 = vpop.f32.mrb[31].mxu0 }
 0x131   :  { %v885_v33 = vpack.c.bf16 %v684_v29, %v683_v28  ;;  %v591_v34 = vadd.f32 %v1009_v39, %v959_v30  ;;  %v962_v35 = vadd.f32 %v961_v32, %v960_v31 }
 0x133   :  { %897 = vst [vmem:[%s1279_s3 + $0x30] sm:$0xff] %v885_v33   ;;  %v669_v36 = vadd.f32 %v1234_v55, %v591_v34  ;;  %v594_v37 = vadd.f32 %v1010_v45, %v962_v35 }
 0x135   :  { %v670_v38 = vadd.f32 %v1234_v55, %v594_v37  ;;  %v685_v40 = vmax.f32 %v669_v36, 0.0 }
 0x137   :  { %v686_v41 = vmax.f32 %v670_v38, 0.0 }
 0x139   :  { %v890_v42 = vpack.c.bf16 %v686_v41, %v685_v40 }
 0x13b   :  { %898 = vst [vmem:[%s1279_s3 + $0x38] sm:$0xff] %v890_v42  }

// kernel: jigresnet_forward.45
= control target key start
LH: loop header
LB: loop body
LE: loop exit
PB: predicated region body
PF: predicated region fallthrough
CT: control target
= control target key end

     0   :  { %s586_s1 = inlined_call_operand.vmem [shape: bf16[128,128], index: 1, kind: input, shape index: {}]   ;;  %s587_s0 = inlined_call_operand.vmem [shape: bf16[128,128], index: 0, kind: input, shape index: {}]   ;;  %s588_s2 = inlined_call_operand.vmem [shape: f32[1,128], index: 2, kind: input, shape index: {}]   ;;  %s589_s3 = inlined_call_operand.vmem [shape: f32[128,128], index: 3, kind: output, shape index: {}]  }
   0x1   :  { %v451_v0 = vld [vmem:[%s586_s1] sm:$0xff]   ;;  %v452_v1 = vld [vmem:[%s586_s1 + $0x8] sm:$0xff]   ;;  %v453_v2 = vld [vmem:[%s586_s1 + $0x10] sm:$0xff]  }
   0x2   :  { %403 = vmatprep.subr.bf16.mxu0 %v451_v0  ;;  %435 = vmatprep.subr.bf16.mxu1 %v451_v0  ;;  %v454_v3 = vld [vmem:[%s586_s1 + $0x18] sm:$0xff]   ;;  %v459_v4 = vld [vmem:[%s587_s0] sm:$0xff]   ;;  %v456_v7 = vld [vmem:[%s586_s1 + $0x28] sm:$0xff]  }
   0x3   :  { %404 = vmatpush3.bf16.msra.mxu0 %v451_v0  ;;  %443 = vmatpush3.bf16.msra.mxu1 %v451_v0  ;;  %v460_v5 = vld [vmem:[%s587_s0 + $0x20] sm:$0xff]   ;;  %v457_v8 = vld [vmem:[%s586_s1 + $0x30] sm:$0xff]   ;;  %v458_v9 = vld [vmem:[%s586_s1 + $0x38] sm:$0xff]  }
   0x4   :  { %405 = vmatprep.subr.bf16.mxu0 %v452_v1  ;;  %436 = vmatprep.subr.bf16.mxu1 %v452_v1  ;;  %v455_v6 = vld [vmem:[%s586_s1 + $0x20] sm:$0xff]   ;;  %v461_v10 = vld [vmem:[%s587_s0 + $0x8] sm:$0xff]   ;;  %v463_v12 = vld [vmem:[%s587_s0 + $0x10] sm:$0xff]  }
   0x5   :  { %419 = vmatprep.mubr.bf16.mxu0 %v459_v4  ;;  %427 = vmatprep.mubr.bf16.mxu1 %v460_v5  ;;  %v462_v11 = vld [vmem:[%s587_s0 + $0x28] sm:$0xff]   ;;  %v464_v13 = vld [vmem:[%s587_s0 + $0x30] sm:$0xff]   ;;  %v465_v14 = vld [vmem:[%s587_s0 + $0x18] sm:$0xff]  }
   0x6   :  { %v466_v15 = vld [vmem:[%s587_s0 + $0x38] sm:$0xff]   ;;  %v386_v16 = vld [vmem:[%s588_s2] ss:$0 sm:$0xff] }
   0x7   :  { %406 = vmatpush3.bf16.msra.mxu0 %v452_v1  ;;  %444 = vmatpush3.bf16.msra.mxu1 %v452_v1 }
   0x8   :  { %407 = vmatprep.subr.bf16.mxu0 %v453_v2  ;;  %437 = vmatprep.subr.bf16.mxu1 %v453_v2 }
   0xb   :  { %408 = vmatpush3.bf16.msra.mxu0 %v453_v2  ;;  %445 = vmatpush3.bf16.msra.mxu1 %v453_v2 }
   0xc   :  { %409 = vmatprep.subr.bf16.mxu0 %v454_v3  ;;  %438 = vmatprep.subr.bf16.mxu1 %v454_v3 }
   0xf   :  { %410 = vmatpush3.bf16.msra.mxu0 %v454_v3  ;;  %446 = vmatpush3.bf16.msra.mxu1 %v454_v3 }
  0x10   :  { %411 = vmatprep.subr.bf16.mxu0 %v455_v6  ;;  %439 = vmatprep.subr.bf16.mxu1 %v455_v6 }
  0x13   :  { %412 = vmatpush3.bf16.msra.mxu0 %v455_v6  ;;  %447 = vmatpush3.bf16.msra.mxu1 %v455_v6 }
  0x14   :  { %413 = vmatprep.subr.bf16.mxu0 %v456_v7  ;;  %440 = vmatprep.subr.bf16.mxu1 %v456_v7 }
  0x17   :  { %414 = vmatpush3.bf16.msra.mxu0 %v456_v7  ;;  %448 = vmatpush3.bf16.msra.mxu1 %v456_v7 }
  0x18   :  { %415 = vmatprep.subr.bf16.mxu0 %v457_v8  ;;  %441 = vmatprep.subr.bf16.mxu1 %v457_v8 }
  0x1b   :  { %416 = vmatpush3.bf16.msra.mxu0 %v457_v8  ;;  %449 = vmatpush3.bf16.msra.mxu1 %v457_v8 }
  0x1c   :  { %417 = vmatprep.subr.bf16.mxu0 %v458_v9  ;;  %442 = vmatprep.subr.bf16.mxu1 %v458_v9 }
  0x1f   :  { %418 = vmatpush3.bf16.msra.mxu0 %v458_v9  ;;  %450 = vmatpush3.bf16.msra.mxu1 %v458_v9 }
  0x22   :  { %420 = vmatmul.mubr.bf16.vlgmr.msra.gmra.mrb[0].mxu0 %v461_v10  ;;  %428 = vmatmul.mubr.bf16.vlgmr.msra.gmra.mrb[0].mxu1 %v462_v11 }
  0x23   :  { %423 = vmatprep.mubr.bf16.mxu0 %v463_v12  ;;  %431 = vmatprep.mubr.bf16.mxu1 %v464_v13 }
  0x2a   :  { %424 = vmatmul.mubr.bf16.gmra.mrb[4].mxu0 %v465_v14  ;;  %432 = vmatmul.mubr.bf16.gmra.mrb[4].mxu1 %v466_v15 }
  0xf5   :  { %v421_v17 = vpop.f32.mrb[0].mxu0  ;;  %v429_v18 = vpop.f32.mrb[0].mxu1 }
  0xf6   :  { %v336_v19 = vadd.f32 %v421_v17, %v386_v16  ;;  %v344_v20 = vadd.f32 %v429_v18, %v386_v16  ;;  %v213_v21 = vpop.f32.mrb[1].mxu0  ;;  %v245_v22 = vpop.f32.mrb[1].mxu1 }
  0xf7   :  { %v334_v23 = vadd.f32 %v386_v16, %v213_v21  ;;  %v342_v24 = vadd.f32 %v386_v16, %v245_v22  ;;  %v422_v25 = vpop.f32.mrb[2].mxu0  ;;  %v430_v26 = vpop.f32.mrb[2].mxu1 }
  0xf8   :  { %352 = vst [vmem:[%s589_s3 + $0x10] sm:$0xff] %v336_v19  ;;  %360 = vst [vmem:[%s589_s3 + $0x50] sm:$0xff] %v344_v20  ;;  %v337_v27 = vadd.f32 %v422_v25, %v386_v16  ;;  %v345_v28 = vadd.f32 %v430_v26, %v386_v16  ;;  %v216_v29 = vpop.f32.mrb[3].mxu0  ;;  %v248_v30 = vpop.f32.mrb[3].mxu1 }
  0xf9   :  { %350 = vst [vmem:[%s589_s3] sm:$0xff] %v334_v23  ;;  %358 = vst [vmem:[%s589_s3 + $0x40] sm:$0xff] %v342_v24  ;;  %v335_v31 = vadd.f32 %v386_v16, %v216_v29  ;;  %v343_v32 = vadd.f32 %v386_v16, %v248_v30 }
  0xfa   :  { %353 = vst [vmem:[%s589_s3 + $0x18] sm:$0xff] %v337_v27  ;;  %361 = vst [vmem:[%s589_s3 + $0x58] sm:$0xff] %v345_v28 }
  0xfb   :  { %351 = vst [vmem:[%s589_s3 + $0x8] sm:$0xff] %v335_v31  ;;  %359 = vst [vmem:[%s589_s3 + $0x48] sm:$0xff] %v343_v32 }
  0xfd   :  { %v425_v33 = vpop.f32.mrb[4].mxu0  ;;  %v433_v34 = vpop.f32.mrb[4].mxu1 }
  0xfe   :  { %v340_v35 = vadd.f32 %v425_v33, %v386_v16  ;;  %v348_v36 = vadd.f32 %v433_v34, %v386_v16  ;;  %v229_v37 = vpop.f32.mrb[5].mxu0  ;;  %v261_v38 = vpop.f32.mrb[5].mxu1 }
  0xff   :  { %v338_v39 = vadd.f32 %v386_v16, %v229_v37  ;;  %v346_v40 = vadd.f32 %v386_v16, %v261_v38  ;;  %v426_v41 = vpop.f32.mrb[6].mxu0  ;;  %v434_v42 = vpop.f32.mrb[6].mxu1 }
 0x100   :  { %356 = vst [vmem:[%s589_s3 + $0x30] sm:$0xff] %v340_v35  ;;  %364 = vst [vmem:[%s589_s3 + $0x70] sm:$0xff] %v348_v36  ;;  %v341_v43 = vadd.f32 %v426_v41, %v386_v16  ;;  %v349_v44 = vadd.f32 %v434_v42, %v386_v16  ;;  %v232_v45 = vpop.f32.mrb[7].mxu0  ;;  %v264_v46 = vpop.f32.mrb[7].mxu1 }
 0x101   :  { %354 = vst [vmem:[%s589_s3 + $0x20] sm:$0xff] %v338_v39  ;;  %362 = vst [vmem:[%s589_s3 + $0x60] sm:$0xff] %v346_v40  ;;  %v339_v47 = vadd.f32 %v386_v16, %v232_v45  ;;  %v347_v48 = vadd.f32 %v386_v16, %v264_v46 }
 0x102   :  { %357 = vst [vmem:[%s589_s3 + $0x38] sm:$0xff] %v341_v43  ;;  %365 = vst [vmem:[%s589_s3 + $0x78] sm:$0xff] %v349_v44 }
 0x103   :  { %355 = vst [vmem:[%s589_s3 + $0x28] sm:$0xff] %v339_v47  ;;  %363 = vst [vmem:[%s589_s3 + $0x68] sm:$0xff] %v347_v48 }

// kernel: jigresnet_forward.40
= control target key start
LH: loop header
LB: loop body
LE: loop exit
PB: predicated region body
PF: predicated region fallthrough
CT: control target
= control target key end

     0   :  { %s2033_s1 = inlined_call_operand.vmem [shape: bf16[640,128], index: 1, kind: input, shape index: {}]   ;;  %s2034_s0 = inlined_call_operand.vmem [shape: bf16[128,640], index: 0, kind: input, shape index: {}]   ;;  %s2035_s3 = inlined_call_operand.vmem [shape: bf16[128,128], index: 3, kind: input, shape index: {}]   ;;  %s2036_s2 = inlined_call_operand.vmem [shape: f32[1,128], index: 2, kind: input, shape index: {}]   ;;  %s2037_s4 = inlined_call_operand.vmem [shape: bf16[128,128], index: 4, kind: output, shape index: {}]  }
   0x1   :  { %v1534_v0 = vld [vmem:[%s2033_s1 + $0x40] sm:$0xff]   ;;  %v1538_v4 = vld [vmem:[%s2033_s1 + $0x48] sm:$0xff]   ;;  %v1542_v8 = vld [vmem:[%s2033_s1 + $0x50] sm:$0xff]  }
   0x2   :  { %v1535_v1 = vld [vmem:[%s2033_s1 + $0xc0] sm:$0xff]   ;;  %1342 = vmatprep.subr.bf16.mxu0 %v1534_v0  ;;  %v1539_v5 = vld [vmem:[%s2033_s1 + $0xc8] sm:$0xff]   ;;  %v1543_v9 = vld [vmem:[%s2033_s1 + $0xd0] sm:$0xff]  }
   0x3   :  { %v1536_v2 = vld [vmem:[%s2033_s1] sm:$0xff]   ;;  %1406 = vmatprep.subr.bf16.mxu1 %v1535_v1  ;;  %v1540_v6 = vld [vmem:[%s2033_s1 + $0x8] sm:$0xff]   ;;  %v1544_v10 = vld [vmem:[%s2033_s1 + $0x10] sm:$0xff]  }
   0x4   :  { %v1537_v3 = vld [vmem:[%s2033_s1 + $0x80] sm:$0xff]   ;;  %1343 = vmatpush3.bf16.msra.mxu0 %v1536_v2  ;;  %v1541_v7 = vld [vmem:[%s2033_s1 + $0x88] sm:$0xff]   ;;  %v1545_v11 = vld [vmem:[%s2033_s1 + $0x90] sm:$0xff]  }
   0x5   :  { %1407 = vmatpush3.bf16.msra.mxu1 %v1537_v3  ;;  %1344 = vmatprep.subr.bf16.mxu0 %v1538_v4  ;;  %v1546_v12 = vld [vmem:[%s2033_s1 + $0x58] sm:$0xff]   ;;  %v1550_v16 = vld [vmem:[%s2033_s1 + $0x60] sm:$0xff]   ;;  %v1554_v20 = vld [vmem:[%s2033_s1 + $0x68] sm:$0xff]  }
   0x6   :  { %1408 = vmatprep.subr.bf16.mxu1 %v1539_v5  ;;  %v1547_v13 = vld [vmem:[%s2033_s1 + $0xd8] sm:$0xff]   ;;  %v1551_v17 = vld [vmem:[%s2033_s1 + $0xe0] sm:$0xff]   ;;  %v1555_v21 = vld [vmem:[%s2033_s1 + $0xe8] sm:$0xff]  }
   0x7   :  { %v1548_v14 = vld [vmem:[%s2033_s1 + $0x18] sm:$0xff]   ;;  %v1552_v18 = vld [vmem:[%s2033_s1 + $0x20] sm:$0xff]   ;;  %v1556_v22 = vld [vmem:[%s2033_s1 + $0x28] sm:$0xff]  }
   0x8   :  { %1345 = vmatpush3.bf16.msra.mxu0 %v1540_v6  ;;  %v1549_v15 = vld [vmem:[%s2033_s1 + $0x98] sm:$0xff]   ;;  %v1553_v19 = vld [vmem:[%s2033_s1 + $0xa0] sm:$0xff]   ;;  %v1557_v23 = vld [vmem:[%s2033_s1 + $0xa8] sm:$0xff]  }
   0x9   :  { %1409 = vmatpush3.bf16.msra.mxu1 %v1541_v7  ;;  %1346 = vmatprep.subr.bf16.mxu0 %v1542_v8  ;;  %v1558_v24 = vld [vmem:[%s2033_s1 + $0x70] sm:$0xff]   ;;  %v1562_v28 = vld [vmem:[%s2033_s1 + $0x78] sm:$0xff]   ;;  %v1571_v35 = vld [vmem:[%s2034_s0 + $0xc] ss:$20 sps:$4 sm:$0xff]  }
   0xa   :  { %1410 = vmatprep.subr.bf16.mxu1 %v1543_v9  ;;  %v1559_v25 = vld [vmem:[%s2033_s1 + $0xf0] sm:$0xff]   ;;  %v1563_v29 = vld [vmem:[%s2033_s1 + $0xf8] sm:$0xff]   ;;  %v1572_v36 = vld [vmem:[%s2033_s1 + $0x100] sm:$0xff]   ;;  %759 = vmatprep.mubr.bf16.mxu1 %v1571_v35 }
   0xb   :  { %v1560_v26 = vld [vmem:[%s2033_s1 + $0x30] sm:$0xff]   ;;  %v1564_v30 = vld [vmem:[%s2033_s1 + $0x38] sm:$0xff]   ;;  %v1573_v37 = vld [vmem:[%s2034_s0 + $0x2c] ss:$20 sps:$4 sm:$0xff]  }
   0xc   :  { %1347 = vmatpush3.bf16.msra.mxu0 %v1544_v10  ;;  %v1561_v27 = vld [vmem:[%s2033_s1 + $0xb0] sm:$0xff]   ;;  %v1565_v31 = vld [vmem:[%s2033_s1 + $0xb8] sm:$0xff]   ;;  %v1579_v39 = vld [vmem:[%s2033_s1 + $0x108] sm:$0xff]  }
   0xd   :  { %1411 = vmatpush3.bf16.msra.mxu1 %v1545_v11  ;;  %1348 = vmatprep.subr.bf16.mxu0 %v1546_v12  ;;  %v1566_v32 = vld [vmem:[%s2034_s0] ss:$20 sps:$4 sm:$0xff]   ;;  %v1568_v33 = vld [vmem:[%s2034_s0 + $0x4] ss:$20 sps:$4 sm:$0xff]   ;;  %v1569_v34 = vld [vmem:[%s2034_s0 + $0x8] ss:$20 sps:$4 sm:$0xff]  }
   0xe   :  { %1412 = vmatprep.subr.bf16.mxu1 %v1547_v13  ;;  %662 = vmatprep.mubr.bf16.mxu0 %v1568_v33  ;;  %v1575_v38 = vld [vmem:[%s2034_s0 + $0x34] ss:$20 sps:$4 sm:$0xff]   ;;  %v1578_v41 = vld [vmem:[%s2034_s0 + $0x30] ss:$20 sps:$4 sm:$0xff]   ;;  %v1593_v45 = vld [vmem:[%s2033_s1 + $0x118] sm:$0xff]  }
   0xf   :  { %v1577_v40 = vld [vmem:[%s2034_s0 + $0x28] ss:$20 sps:$4 sm:$0xff]   ;;  %v1586_v44 = vld [vmem:[%s2033_s1 + $0x110] sm:$0xff]   ;;  %v1585_v47 = vld [vmem:[%s2034_s0 + $0x58] ss:$20 sps:$4 sm:$0xff]  }
  0x10   :  { %1349 = vmatpush3.bf16.msra.mxu0 %v1548_v14  ;;  %v1580_v42 = vld [vmem:[%s2034_s0 + $0x54] ss:$20 sps:$4 sm:$0xff]   ;;  %v1582_v43 = vld [vmem:[%s2034_s0 + $0x5c] ss:$20 sps:$4 sm:$0xff]   ;;  %v1589_v49 = vld [vmem:[%s2034_s0 + $0x84] ss:$20 sps:$4 sm:$0xff]  }
  0x11   :  { %1413 = vmatpush3.bf16.msra.mxu1 %v1549_v15  ;;  %1350 = vmatprep.subr.bf16.mxu0 %v1550_v16  ;;  %v1584_v46 = vld [vmem:[%s2034_s0 + $0x50] ss:$20 sps:$4 sm:$0xff]   ;;  %v1607_v51 = vld [vmem:[%s2033_s1 + $0x128] sm:$0xff]   ;;  %v1592_v53 = vld [vmem:[%s2034_s0 + $0x80] ss:$20 sps:$4 sm:$0xff]  }
  0x12   :  { %1414 = vmatprep.subr.bf16.mxu1 %v1551_v17  ;;  %v1587_v48 = vld [vmem:[%s2034_s0 + $0x7c] ss:$20 sps:$4 sm:$0xff]   ;;  %v1600_v50 = vld [vmem:[%s2033_s1 + $0x120] sm:$0xff]   ;;  %v1591_v52 = vld [vmem:[%s2034_s0 + $0x78] ss:$20 sps:$4 sm:$0xff]  }
  0x13   :  { %v1594_v54 = vld [vmem:[%s2034_s0 + $0xa4] ss:$20 sps:$4 sm:$0xff]   ;;  %v1614_v55 = vld [vmem:[%s2033_s1 + $0x130] sm:$0xff]   ;;  %v1596_v56 = vld [vmem:[%s2034_s0 + $0xac] ss:$20 sps:$4 sm:$0xff]  }
  0x14   :  { %1351 = vmatpush3.bf16.msra.mxu0 %v1552_v18  ;;  %v1621_v57 = vld [vmem:[%s2033_s1 + $0x138] sm:$0xff]   ;;  %v1598_v58 = vld [vmem:[%s2034_s0 + $0xa0] ss:$20 sps:$4 sm:$0xff]   ;;  %v1606_v63 = vld [vmem:[%s2034_s0 + $0xd0] ss:$20 sps:$4 sm:$0xff]  }
  0x15   :  { %1415 = vmatpush3.bf16.msra.mxu1 %v1553_v19  ;;  %1352 = vmatprep.subr.bf16.mxu0 %v1554_v20  ;;  %v1599_v59 = vld [vmem:[%s2034_s0 + $0xa8] ss:$20 sps:$4 sm:$0xff]   ;;  %v1601_v60 = vld [vmem:[%s2034_s0 + $0xcc] ss:$20 sps:$4 sm:$0xff]   ;;  %v1612_v2 = vld [vmem:[%s2034_s0 + $0xf0] ss:$20 sps:$4 sm:$0xff]  }
  0x16   :  { %1416 = vmatprep.subr.bf16.mxu1 %v1555_v21  ;;  %v1603_v61 = vld [vmem:[%s2034_s0 + $0xd4] ss:$20 sps:$4 sm:$0xff]   ;;  %v1610_v1 = vld [vmem:[%s2034_s0 + $0xfc] ss:$20 sps:$4 sm:$0xff]   ;;  %v1613_v3 = vld [vmem:[%s2034_s0 + $0xf8] ss:$20 sps:$4 sm:$0xff]  }
  0x17   :  { %v1605_v62 = vld [vmem:[%s2034_s0 + $0xc8] ss:$20 sps:$4 sm:$0xff]   ;;  %v1617_v5 = vld [vmem:[%s2034_s0 + $0x124] ss:$20 sps:$4 sm:$0xff]   ;;  %v1620_v7 = vld [vmem:[%s2034_s0 + $0x120] ss:$20 sps:$4 sm:$0xff]  }
  0x18   :  { %1353 = vmatpush3.bf16.msra.mxu0 %v1556_v22  ;;  %v1608_v0 = vld [vmem:[%s2034_s0 + $0xf4] ss:$20 sps:$4 sm:$0xff]   ;;  %v1615_v4 = vld [vmem:[%s2034_s0 + $0x11c] ss:$20 sps:$4 sm:$0xff]   ;;  %v1619_v6 = vld [vmem:[%s2034_s0 + $0x118] ss:$20 sps:$4 sm:$0xff]  }
  0x19   :  { %1417 = vmatpush3.bf16.msra.mxu1 %v1557_v23  ;;  %1354 = vmatprep.subr.bf16.mxu0 %v1558_v24  ;;  %v1622_v8 = vld [vmem:[%s2034_s0 + $0x10] ss:$20 sps:$4 sm:$0xff]   ;;  %v1624_v10 = vld [vmem:[%s2034_s0 + $0x38] ss:$20 sps:$4 sm:$0xff]   ;;  %v1626_v12 = vld [vmem:[%s2034_s0 + $0x60] ss:$20 sps:$4 sm:$0xff]  }
  0x1a   :  { %1418 = vmatprep.subr.bf16.mxu1 %v1559_v25  ;;  %v1623_v9 = vld [vmem:[%s2034_s0 + $0xb0] ss:$20 sps:$4 sm:$0xff]   ;;  %v1625_v11 = vld [vmem:[%s2034_s0 + $0xd8] ss:$20 sps:$4 sm:$0xff]   ;;  %v1627_v13 = vld [vmem:[%s2034_s0 + $0x100] ss:$20 sps:$4 sm:$0xff]  }
  0x1b   :  { %v1628_v14 = vld [vmem:[%s2034_s0 + $0x88] ss:$20 sps:$4 sm:$0xff]  }
  0x1c   :  { %1355 = vmatpush3.bf16.msra.mxu0 %v1560_v26  ;;  %v1629_v15 = vld [vmem:[%s2034_s0 + $0x128] ss:$20 sps:$4 sm:$0xff]  }
  0x1d   :  { %1419 = vmatpush3.bf16.msra.mxu1 %v1561_v27  ;;  %1356 = vmatprep.subr.bf16.mxu0 %v1562_v28 }
  0x1e   :  { %1420 = vmatprep.subr.bf16.mxu1 %v1563_v29 }
  0x20   :  { %1357 = vmatpush3.bf16.msra.mxu0 %v1564_v30 }
  0x21   :  { %1421 = vmatpush3.bf16.msra.mxu1 %v1565_v31  ;;  %1486 = vmatprep.subr.bf16.mxu0 %v1572_v36 }
  0x22   :  { %1518 = vmatprep.subr.bf16.mxu1 %v1572_v36 }
  0x23   :  { %663 = vmatmul.mubr.bf16.vlgmr.msra.gmra.mrb[0].mxu0 %v1566_v32 }
  0x24   :  { %760 = vmatmul.mubr.bf16.vlgmr.msra.gmra.mrb[0].mxu1 %v1569_v34  ;;  %1487 = vmatpush3.bf16.msra.mxu0 %v1572_v36 }
  0x25   :  { %1526 = vmatpush3.bf16.msra.mxu1 %v1572_v36  ;;  %670 = vmatprep.mubr.bf16.mxu0 %v1573_v37 }
  0x26   :  { %767 = vmatprep.mubr.bf16.mxu1 %v1575_v38  ;;  %1488 = vmatprep.subr.bf16.mxu0 %v1579_v39 }
  0x27   :  { %1519 = vmatprep.subr.bf16.mxu1 %v1579_v39 }
  0x28   :  { %1489 = vmatpush3.bf16.msra.mxu0 %v1579_v39 }
  0x29   :  { %1527 = vmatpush3.bf16.msra.mxu1 %v1579_v39  ;;  %1490 = vmatprep.subr.bf16.mxu0 %v1586_v44 }
  0x2a   :  { %1520 = vmatprep.subr.bf16.mxu1 %v1586_v44 }
  0x2b   :  { %671 = vmatmul.mubr.bf16.gmra.mrb[4].mxu0 %v1577_v40 }
  0x2c   :  { %768 = vmatmul.mubr.bf16.gmra.mrb[4].mxu1 %v1578_v41  ;;  %678 = vmatprep.mubr.bf16.mxu0 %v1580_v42 }
  0x2d   :  { %775 = vmatprep.mubr.bf16.mxu1 %v1582_v43  ;;  %1491 = vmatpush3.bf16.msra.mxu0 %v1586_v44 }
  0x2e   :  { %1528 = vmatpush3.bf16.msra.mxu1 %v1586_v44  ;;  %1492 = vmatprep.subr.bf16.mxu0 %v1593_v45 }
  0x2f   :  { %1521 = vmatprep.subr.bf16.mxu1 %v1593_v45 }
  0x31   :  { %1493 = vmatpush3.bf16.msra.mxu0 %v1593_v45 }
  0x32   :  { %1529 = vmatpush3.bf16.msra.mxu1 %v1593_v45  ;;  %1494 = vmatprep.subr.bf16.mxu0 %v1600_v50 }
  0x33   :  { %679 = vmatmul.mubr.bf16.gmra.mrb[8].mxu0 %v1584_v46  ;;  %1522 = vmatprep.subr.bf16.mxu1 %v1600_v50 }
  0x34   :  { %776 = vmatmul.mubr.bf16.gmra.mrb[8].mxu1 %v1585_v47  ;;  %686 = vmatprep.mubr.bf16.mxu0 %v1587_v48 }
  0x35   :  { %783 = vmatprep.mubr.bf16.mxu1 %v1589_v49  ;;  %1495 = vmatpush3.bf16.msra.mxu0 %v1600_v50 }
  0x36   :  { %1530 = vmatpush3.bf16.msra.mxu1 %v1600_v50  ;;  %1496 = vmatprep.subr.bf16.mxu0 %v1607_v51 }
  0x37   :  { %1523 = vmatprep.subr.bf16.mxu1 %v1607_v51 }
  0x39   :  { %1497 = vmatpush3.bf16.msra.mxu0 %v1607_v51 }
  0x3a   :  { %1531 = vmatpush3.bf16.msra.mxu1 %v1607_v51  ;;  %1498 = vmatprep.subr.bf16.mxu0 %v1614_v55 }
  0x3b   :  { %687 = vmatmul.mubr.bf16.gmra.mrb[12].mxu0 %v1591_v52  ;;  %1524 = vmatprep.subr.bf16.mxu1 %v1614_v55 }
  0x3c   :  { %784 = vmatmul.mubr.bf16.gmra.mrb[12].mxu1 %v1592_v53  ;;  %694 = vmatprep.mubr.bf16.mxu0 %v1594_v54 }
  0x3d   :  { %791 = vmatprep.mubr.bf16.mxu1 %v1596_v56  ;;  %1499 = vmatpush3.bf16.msra.mxu0 %v1614_v55 }
  0x3e   :  { %1532 = vmatpush3.bf16.msra.mxu1 %v1614_v55  ;;  %1500 = vmatprep.subr.bf16.mxu0 %v1621_v57 }
  0x3f   :  { %1525 = vmatprep.subr.bf16.mxu1 %v1621_v57 }
  0x41   :  { %1501 = vmatpush3.bf16.msra.mxu0 %v1621_v57 }
  0x42   :  { %1533 = vmatpush3.bf16.msra.mxu1 %v1621_v57 }
  0x43   :  { %695 = vmatmul.mubr.bf16.gmra.mrb[16].mxu0 %v1598_v58 }
  0x44   :  { %792 = vmatmul.mubr.bf16.gmra.mrb[16].mxu1 %v1599_v59  ;;  %702 = vmatprep.mubr.bf16.mxu0 %v1601_v60 }
  0x45   :  { %799 = vmatprep.mubr.bf16.mxu1 %v1603_v61 }
  0x4b   :  { %703 = vmatmul.mubr.bf16.gmra.mrb[20].mxu0 %v1605_v62 }
  0x4c   :  { %800 = vmatmul.mubr.bf16.gmra.mrb[20].mxu1 %v1606_v63  ;;  %710 = vmatprep.mubr.bf16.mxu0 %v1608_v0 }
  0x4d   :  { %807 = vmatprep.mubr.bf16.mxu1 %v1610_v1 }
  0x53   :  { %711 = vmatmul.mubr.bf16.gmra.mrb[24].mxu0 %v1612_v2 }
  0x54   :  { %808 = vmatmul.mubr.bf16.gmra.mrb[24].mxu1 %v1613_v3  ;;  %718 = vmatprep.mubr.bf16.mxu0 %v1615_v4 }
  0x55   :  { %815 = vmatprep.mubr.bf16.mxu1 %v1617_v5 }
  0x5b   :  { %719 = vmatmul.mubr.bf16.gmra.mrb[28].mxu0 %v1619_v6 }
  0x5c   :  { %816 = vmatmul.mubr.bf16.gmra.mrb[28].mxu1 %v1620_v7  ;;  %1502 = vmatprep.mubr.bf16.mxu0 %v1622_v8 }
  0x5d   :  { %1510 = vmatprep.mubr.bf16.mxu1 %v1623_v9 }
  0x63   :  { %1503 = vmatmul.mubr.bf16.vlgmr.msra.gmra.mrb[32].mxu0 %v1624_v10 }
  0x64   :  { %1511 = vmatmul.mubr.bf16.vlgmr.msra.gmra.mrb[32].mxu1 %v1625_v11  ;;  %1506 = vmatprep.mubr.bf16.mxu0 %v1626_v12 }
  0x65   :  { %1514 = vmatprep.mubr.bf16.mxu1 %v1627_v13 }
  0x6b   :  { %1507 = vmatmul.mubr.bf16.gmra.mrb[36].mxu0 %v1628_v14 }
  0x6c   :  { %1515 = vmatmul.mubr.bf16.gmra.mrb[36].mxu1 %v1629_v15 }
  0xf6   :  { %v1358_v16 = vpop.f32.mrb[0].mxu0 }
  0xf7   :  { %v1422_v17 = vpop.f32.mrb[0].mxu1  ;;  %v1359_v18 = vpop.f32.mrb[1].mxu0 }
  0xf8   :  { %v1360_v19 = vadd.f32 %v1359_v18, %v1358_v16  ;;  %v1423_v20 = vpop.f32.mrb[1].mxu1  ;;  %v1361_v21 = vpop.f32.mrb[2].mxu0 }
  0xf9   :  { %v1424_v22 = vadd.f32 %v1423_v20, %v1422_v17  ;;  %v1425_v23 = vpop.f32.mrb[2].mxu1  ;;  %v1362_v24 = vpop.f32.mrb[3].mxu0 }
  0xfa   :  { %v1363_v25 = vadd.f32 %v1362_v24, %v1361_v21  ;;  %v1426_v26 = vpop.f32.mrb[3].mxu1 }
  0xfb   :  { %v1427_v27 = vadd.f32 %v1426_v26, %v1425_v23  ;;  %v1895_v28 = vadd.f32 %v1424_v22, %v1360_v19 }
  0xfd   :  { %v1897_v29 = vadd.f32 %v1427_v27, %v1363_v25 }
  0xfe   :  { %v1364_v30 = vpop.f32.mrb[4].mxu0 }
  0xff   :  { %v1428_v31 = vpop.f32.mrb[4].mxu1  ;;  %v1365_v32 = vpop.f32.mrb[5].mxu0 }
 0x100   :  { %v1366_v33 = vadd.f32 %v1365_v32, %v1364_v30  ;;  %v1429_v34 = vpop.f32.mrb[5].mxu1  ;;  %v1367_v35 = vpop.f32.mrb[6].mxu0 }
 0x101   :  { %v1430_v36 = vadd.f32 %v1429_v34, %v1428_v31  ;;  %v1431_v37 = vpop.f32.mrb[6].mxu1  ;;  %v1368_v38 = vpop.f32.mrb[7].mxu0 }
 0x102   :  { %v1369_v39 = vadd.f32 %v1368_v38, %v1367_v35  ;;  %v1432_v40 = vpop.f32.mrb[7].mxu1 }
 0x103   :  { %v1433_v41 = vadd.f32 %v1432_v40, %v1431_v37  ;;  %v1899_v42 = vadd.f32 %v1430_v36, %v1366_v33 }
 0x105   :  { %v1901_v43 = vadd.f32 %v1433_v41, %v1369_v39 }
 0x106   :  { %v1370_v44 = vpop.f32.mrb[8].mxu0 }
 0x107   :  { %v1434_v45 = vpop.f32.mrb[8].mxu1  ;;  %v1371_v46 = vpop.f32.mrb[9].mxu0 }
 0x108   :  { %v1372_v47 = vadd.f32 %v1371_v46, %v1370_v44  ;;  %v1435_v48 = vpop.f32.mrb[9].mxu1  ;;  %v1373_v49 = vpop.f32.mrb[10].mxu0 }
 0x109   :  { %v1436_v50 = vadd.f32 %v1435_v48, %v1434_v45  ;;  %v1437_v51 = vpop.f32.mrb[10].mxu1  ;;  %v1374_v52 = vpop.f32.mrb[11].mxu0 }
 0x10a   :  { %v1375_v53 = vadd.f32 %v1374_v52, %v1373_v49  ;;  %v1438_v54 = vpop.f32.mrb[11].mxu1 }
 0x10b   :  { %v1439_v55 = vadd.f32 %v1438_v54, %v1437_v51  ;;  %v1903_v56 = vadd.f32 %v1436_v50, %v1372_v47 }
 0x10d   :  { %v1905_v57 = vadd.f32 %v1439_v55, %v1375_v53 }
 0x10e   :  { %v1376_v58 = vpop.f32.mrb[12].mxu0 }
 0x10f   :  { %v1440_v59 = vpop.f32.mrb[12].mxu1  ;;  %v1377_v60 = vpop.f32.mrb[13].mxu0 }
 0x110   :  { %v1378_v61 = vadd.f32 %v1377_v60, %v1376_v58  ;;  %v1441_v62 = vpop.f32.mrb[13].mxu1  ;;  %v1379_v63 = vpop.f32.mrb[14].mxu0 }
 0x111   :  { %v1442_v0 = vadd.f32 %v1441_v62, %v1440_v59  ;;  %v1443_v1 = vpop.f32.mrb[14].mxu1  ;;  %v1380_v2 = vpop.f32.mrb[15].mxu0 }
 0x112   :  { %v1381_v3 = vadd.f32 %v1380_v2, %v1379_v63  ;;  %v1444_v4 = vpop.f32.mrb[15].mxu1 }
 0x113   :  { %v1445_v5 = vadd.f32 %v1444_v4, %v1443_v1  ;;  %v1907_v6 = vadd.f32 %v1442_v0, %v1378_v61  ;;  %v1332_v4 = vld [vmem:[%s2035_s3 + $0x28] sm:$0xff]  }
 0x115   :  { %v1909_v7 = vadd.f32 %v1445_v5, %v1381_v3  ;;  %v1328_v3 = vld [vmem:[%s2035_s3 + $0x8] sm:$0xff]  }
 0x116   :  { %v1382_v8 = vpop.f32.mrb[16].mxu0 }
 0x117   :  { %v1446_v9 = vpop.f32.mrb[16].mxu1  ;;  %v1383_v10 = vpop.f32.mrb[17].mxu0 }
 0x118   :  { %v1384_v11 = vadd.f32 %v1383_v10, %v1382_v8  ;;  %v1447_v12 = vpop.f32.mrb[17].mxu1  ;;  %v1385_v13 = vpop.f32.mrb[18].mxu0  ;;  %v1257_v8 = vld [vmem:[%s2035_s3] sm:$0xff]  }
 0x119   :  { %v1448_v14 = vadd.f32 %v1447_v12, %v1446_v9  ;;  %v1449_v15 = vpop.f32.mrb[18].mxu1  ;;  %v1386_v16 = vpop.f32.mrb[19].mxu0  ;;  %v1331_v9 = vld [vmem:[%s2035_s3 + $0x20] sm:$0xff]   ;;  %v1262_v12 = vunpack.c.l.bf16 %v1328_v3 }
 0x11a   :  { %v1387_v17 = vadd.f32 %v1386_v16, %v1385_v13  ;;  %v1450_v18 = vpop.f32.mrb[19].mxu1  ;;  %v1278_v13 = vunpack.c.l.bf16 %v1332_v4 }
 0x11b   :  { %v1451_v19 = vadd.f32 %v1450_v18, %v1449_v15  ;;  %v1911_v20 = vadd.f32 %v1448_v14, %v1384_v11  ;;  %v1938_v11 = vld [vmem:[%s2035_s3 + $0x18] sm:$0xff]   ;;  %v1948_v15 = vld [vmem:[%s2035_s3 + $0x10] sm:$0xff]   ;;  %v1955_v18 = vld [vmem:[%s2036_s2] ss:$0 sm:$0xff] }
 0x11c   :  { %v1943_v14 = vld [vmem:[%s2035_s3 + $0x38] sm:$0xff]  }
 0x11d   :  { %v1913_v21 = vadd.f32 %v1451_v19, %v1387_v17  ;;  %v1258_v19 = vunpack.c.l.bf16 %v1257_v8 }
 0x11e   :  { %v1388_v22 = vpop.f32.mrb[20].mxu0 }
 0x11f   :  { %v1452_v23 = vpop.f32.mrb[20].mxu1  ;;  %v1389_v24 = vpop.f32.mrb[21].mxu0 }
 0x120   :  { %v1390_v25 = vadd.f32 %v1389_v24, %v1388_v22  ;;  %v1453_v26 = vpop.f32.mrb[21].mxu1  ;;  %v1391_v27 = vpop.f32.mrb[22].mxu0  ;;  %v1274_v22 = vunpack.c.l.bf16 %v1331_v9  ;;  %v1279_v24 = vunpack.c.h.bf16 %v1332_v4 }
 0x121   :  { %v1454_v30 = vadd.f32 %v1453_v26, %v1452_v23  ;;  %v1455_v31 = vpop.f32.mrb[22].mxu1  ;;  %v1392_v32 = vpop.f32.mrb[23].mxu0  ;;  %v1263_v23 = vunpack.c.h.bf16 %v1328_v3 }
 0x122   :  { %v1393_v33 = vadd.f32 %v1392_v32, %v1391_v27  ;;  %v1456_v34 = vpop.f32.mrb[23].mxu1  ;;  %v1275_v32 = vunpack.c.h.bf16 %v1331_v9 }
 0x123   :  { %v1457_v35 = vadd.f32 %v1456_v34, %v1455_v31  ;;  %v802_v36 = vadd.f32 %v1454_v30, %v1390_v25  ;;  %v1960_v25 = vld [vmem:[%s2035_s3 + $0x30] sm:$0xff]   ;;  %v1259_v31 = vunpack.c.h.bf16 %v1257_v8 }
 0x125   :  { %v1915_v37 = vadd.f32 %v1457_v35, %v1393_v33  ;;  %v1270_v33 = vunpack.c.l.bf16 %v1938_v11 }
 0x126   :  { %v1394_v38 = vpop.f32.mrb[24].mxu0 }
 0x127   :  { %v1458_v39 = vpop.f32.mrb[24].mxu1  ;;  %v1395_v40 = vpop.f32.mrb[25].mxu0 }
 0x128   :  { %v1396_v41 = vadd.f32 %v1395_v40, %v1394_v38  ;;  %v1459_v44 = vpop.f32.mrb[25].mxu1  ;;  %v1397_v45 = vpop.f32.mrb[26].mxu0  ;;  %v1286_v40 = vunpack.c.l.bf16 %v1943_v14 }
 0x129   :  { %v1460_v46 = vadd.f32 %v1459_v44, %v1458_v39  ;;  %v1461_v47 = vpop.f32.mrb[26].mxu1  ;;  %v1398_v48 = vpop.f32.mrb[27].mxu0 }
 0x12a   :  { %v1399_v49 = vadd.f32 %v1398_v48, %v1397_v45  ;;  %v1462_v50 = vpop.f32.mrb[27].mxu1  ;;  %v1282_v48 = vunpack.c.l.bf16 %v1960_v25 }
 0x12b   :  { %v1463_v51 = vadd.f32 %v1462_v50, %v1461_v47  ;;  %v1917_v52 = vadd.f32 %v1460_v46, %v1396_v41  ;;  %v1266_v41 = vunpack.c.l.bf16 %v1948_v15 }
 0x12d   :  { %v1919_v53 = vadd.f32 %v1463_v51, %v1399_v49 }
 0x12e   :  { %v1400_v54 = vpop.f32.mrb[28].mxu0 }
 0x12f   :  { %v1464_v55 = vpop.f32.mrb[28].mxu1  ;;  %v1401_v58 = vpop.f32.mrb[29].mxu0 }
 0x130   :  { %v1402_v59 = vadd.f32 %v1401_v58, %v1400_v54  ;;  %v1465_v60 = vpop.f32.mrb[29].mxu1  ;;  %v1403_v61 = vpop.f32.mrb[30].mxu0 }
 0x131   :  { %v1466_v62 = vadd.f32 %v1465_v60, %v1464_v55  ;;  %v1467_v63 = vpop.f32.mrb[30].mxu1  ;;  %v1404_v0 = vpop.f32.mrb[31].mxu0 }
 0x132   :  { %v1405_v1 = vadd.f32 %v1404_v0, %v1403_v61  ;;  %v1468_v2 = vpop.f32.mrb[31].mxu1 }
 0x133   :  { %v1469_v5 = vadd.f32 %v1468_v2, %v1467_v63  ;;  %v1933_v10 = vadd.f32 %v1466_v62, %v1402_v59 }
 0x135   :  { %v1950_v16 = vadd.f32 %v1469_v5, %v1405_v1 }
 0x136   :  { %v1504_v17 = vpop.f32.mrb[32].mxu0 }
 0x137   :  { %v867_v26 = vadd.f32 %v1504_v17, %v1899_v42  ;;  %v1512_v27 = vpop.f32.mrb[32].mxu1  ;;  %v858_v30 = vpop.f32.mrb[33].mxu0 }
 0x138   :  { %v899_v34 = vadd.f32 %v1512_v27, %v802_v36  ;;  %v859_v35 = vadd.f32 %v858_v30, %v1895_v28  ;;  %v890_v38 = vpop.f32.mrb[33].mxu1  ;;  %v1505_v39 = vpop.f32.mrb[34].mxu0 }
 0x139   :  { %v981_v44 = vadd.f32 %v1955_v18, %v867_v26  ;;  %v891_v45 = vadd.f32 %v890_v38, %v1911_v20  ;;  %v870_v42 = vadd.f32 %v1505_v39, %v1901_v43  ;;  %v1513_v46 = vpop.f32.mrb[34].mxu1  ;;  %v861_v47 = vpop.f32.mrb[35].mxu0 }
 0x13a   :  { %v989_v36 = vadd.f32 %v1955_v18, %v899_v34  ;;  %v979_v28 = vadd.f32 %v1955_v18, %v859_v35  ;;  %v902_v49 = vadd.f32 %v1513_v46, %v1915_v37  ;;  %v862_v50 = vadd.f32 %v861_v47, %v1897_v29  ;;  %v893_v51 = vpop.f32.mrb[35].mxu1 }
 0x13b   :  { %v1029_v54 = vadd.f32 %v1262_v12, %v981_v44  ;;  %v987_v55 = vadd.f32 %v1955_v18, %v891_v45  ;;  %v982_v20 = vadd.f32 %v1955_v18, %v870_v42  ;;  %v894_v43 = vadd.f32 %v893_v51, %v1913_v21 }
 0x13c   :  { %v1037_v58 = vadd.f32 %v1278_v13, %v989_v36  ;;  %v1027_v59 = vadd.f32 %v1258_v19, %v979_v28  ;;  %v990_v60 = vadd.f32 %v1955_v18, %v902_v49  ;;  %v980_v61 = vadd.f32 %v1955_v18, %v862_v50 }
 0x13d   :  { %v1045_v62 = vmax.f32 %v1029_v54, 0.0  ;;  %v1035_v63 = vadd.f32 %v1274_v22, %v987_v55  ;;  %v1030_v0 = vadd.f32 %v1263_v23, %v982_v20  ;;  %v988_v37 = vadd.f32 %v1955_v18, %v894_v43 }
 0x13e   :  { %v1053_v29 = vmax.f32 %v1037_v58, 0.0  ;;  %v1043_v1 = vmax.f32 %v1027_v59, 0.0  ;;  %v1038_v2 = vadd.f32 %v1279_v24, %v990_v60  ;;  %v1028_v3 = vadd.f32 %v1259_v31, %v980_v61  ;;  %v1508_v4 = vpop.f32.mrb[36].mxu0 }
 0x13f   :  { %v1051_v5 = vmax.f32 %v1035_v63, 0.0  ;;  %v1046_v8 = vmax.f32 %v1030_v0, 0.0  ;;  %v1036_v9 = vadd.f32 %v1275_v32, %v988_v37  ;;  %v883_v21 = vadd.f32 %v1508_v4, %v1907_v6  ;;  %v1516_v12 = vpop.f32.mrb[36].mxu1  ;;  %v874_v13 = vpop.f32.mrb[37].mxu0 }
 0x140   :  { %v1054_v17 = vmax.f32 %v1038_v2, 0.0  ;;  %v1044_v19 = vmax.f32 %v1028_v3, 0.0  ;;  %v915_v26 = vadd.f32 %v1516_v12, %v1933_v10  ;;  %v875_v22 = vadd.f32 %v874_v13, %v1903_v56  ;;  %v906_v23 = vpop.f32.mrb[37].mxu1  ;;  %v1509_v27 = vpop.f32.mrb[38].mxu0 }
 0x141   :  { %v1296_v30 = vpack.c.bf16 %v1046_v8, %v1045_v62  ;;  %v1052_v34 = vmax.f32 %v1036_v9, 0.0  ;;  %v985_v24 = vadd.f32 %v1955_v18, %v883_v21  ;;  %v907_v31 = vadd.f32 %v906_v23, %v1917_v52  ;;  %v1517_v35 = vpop.f32.mrb[38].mxu1  ;;  %v877_v32 = vpop.f32.mrb[39].mxu0 }
 0x142   :  { %v1316_v38 = vpack.c.bf16 %v1054_v17, %v1053_v29  ;;  %v1291_v6 = vpack.c.bf16 %v1044_v19, %v1043_v1  ;;  %v993_v39 = vadd.f32 %v1955_v18, %v915_v26  ;;  %v983_v44 = vadd.f32 %v1955_v18, %v875_v22  ;;  %v909_v45 = vpop.f32.mrb[39].mxu1 }
 0x143   :  { %1335 = vst [vmem:[%s2037_s4 + $0x8] sm:$0xff] %v1296_v30   ;;  %v1311_v56 = vpack.c.bf16 %v1052_v34, %v1051_v5  ;;  %v991_v10 = vadd.f32 %v1955_v18, %v907_v31  ;;  %v886_v42 = vadd.f32 %v1509_v27, %v1909_v7  ;;  %v1271_v52 = vunpack.c.h.bf16 %v1938_v11 }
 0x144   :  { %1339 = vst [vmem:[%s2037_s4 + $0x28] sm:$0xff] %v1316_v38   ;;  %1292 = vst [vmem:[%s2037_s4] sm:$0xff] %v1291_v6   ;;  %v918_v46 = vadd.f32 %v1517_v35, %v1950_v16  ;;  %v1287_v47 = vunpack.c.h.bf16 %v1943_v14  ;;  %v878_v36 = vadd.f32 %v877_v32, %v1905_v57  ;;  %v1267_v28 = vunpack.c.h.bf16 %v1948_v15 }
 0x145   :  { %1338 = vst [vmem:[%s2037_s4 + $0x20] sm:$0xff] %v1311_v56   ;;  %v1033_v7 = vadd.f32 %v1270_v33, %v985_v24  ;;  %v986_v49 = vadd.f32 %v1955_v18, %v886_v42  ;;  %v910_v50 = vadd.f32 %v909_v45, %v1919_v53  ;;  %v1283_v51 = vunpack.c.h.bf16 %v1960_v25 }
 0x146   :  { %v1041_v16 = vadd.f32 %v1286_v40, %v993_v39  ;;  %v1031_v57 = vadd.f32 %v1266_v41, %v983_v44  ;;  %v994_v54 = vadd.f32 %v1955_v18, %v918_v46  ;;  %v984_v55 = vadd.f32 %v1955_v18, %v878_v36 }
 0x147   :  { %v1039_v11 = vadd.f32 %v1282_v48, %v991_v10  ;;  %v1034_v33 = vadd.f32 %v1271_v52, %v986_v49  ;;  %v992_v20 = vadd.f32 %v1955_v18, %v910_v50  ;;  %v1049_v58 = vmax.f32 %v1033_v7, 0.0 }
 0x148   :  { %v1042_v43 = vadd.f32 %v1287_v47, %v994_v54  ;;  %v1032_v53 = vadd.f32 %v1267_v28, %v984_v55  ;;  %v1057_v14 = vmax.f32 %v1041_v16, 0.0  ;;  %v1047_v40 = vmax.f32 %v1031_v57, 0.0 }
 0x149   :  { %v1050_v59 = vmax.f32 %v1034_v33, 0.0  ;;  %v1040_v60 = vadd.f32 %v1283_v51, %v992_v20  ;;  %v1055_v41 = vmax.f32 %v1039_v11, 0.0 }
 0x14a   :  { %v1058_v61 = vmax.f32 %v1042_v43, 0.0  ;;  %v1048_v15 = vmax.f32 %v1032_v53, 0.0 }
 0x14b   :  { %v1306_v62 = vpack.c.bf16 %v1050_v59, %v1049_v58  ;;  %v1056_v63 = vmax.f32 %v1040_v60, 0.0 }
 0x14c   :  { %v1326_v0 = vpack.c.bf16 %v1058_v61, %v1057_v14  ;;  %v1301_v37 = vpack.c.bf16 %v1048_v15, %v1047_v40 }
 0x14d   :  { %1337 = vst [vmem:[%s2037_s4 + $0x18] sm:$0xff] %v1306_v62   ;;  %v1321_v25 = vpack.c.bf16 %v1056_v63, %v1055_v41 }
 0x14e   :  { %1341 = vst [vmem:[%s2037_s4 + $0x38] sm:$0xff] %v1326_v0   ;;  %1336 = vst [vmem:[%s2037_s4 + $0x10] sm:$0xff] %v1301_v37  }
 0x14f   :  { %1340 = vst [vmem:[%s2037_s4 + $0x30] sm:$0xff] %v1321_v25  }

// kernel: jigresnet_forward.41
= control target key start
LH: loop header
LB: loop body
LE: loop exit
PB: predicated region body
PF: predicated region fallthrough
CT: control target
= control target key end

     0   :  { %s1878_s1 = inlined_call_operand.vmem [shape: bf16[640,128], index: 1, kind: input, shape index: {}]   ;;  %s1879_s0 = inlined_call_operand.vmem [shape: bf16[128,640], index: 0, kind: input, shape index: {}]   ;;  %s1880_s2 = inlined_call_operand.vmem [shape: f32[1,128], index: 2, kind: input, shape index: {}]   ;;  %s1881_s3 = inlined_call_operand.vmem [shape: bf16[128,128], index: 3, kind: output, shape index: {}]  }
   0x1   :  { %v1444_v0 = vld [vmem:[%s1878_s1 + $0x40] sm:$0xff]   ;;  %v1448_v4 = vld [vmem:[%s1878_s1 + $0x48] sm:$0xff]   ;;  %v1452_v8 = vld [vmem:[%s1878_s1 + $0x50] sm:$0xff]  }
   0x2   :  { %v1445_v1 = vld [vmem:[%s1878_s1 + $0xc0] sm:$0xff]   ;;  %1252 = vmatprep.subr.bf16.mxu0 %v1444_v0  ;;  %v1449_v5 = vld [vmem:[%s1878_s1 + $0xc8] sm:$0xff]   ;;  %v1453_v9 = vld [vmem:[%s1878_s1 + $0xd0] sm:$0xff]  }
   0x3   :  { %v1446_v2 = vld [vmem:[%s1878_s1] sm:$0xff]   ;;  %1316 = vmatprep.subr.bf16.mxu1 %v1445_v1  ;;  %v1450_v6 = vld [vmem:[%s1878_s1 + $0x8] sm:$0xff]   ;;  %v1454_v10 = vld [vmem:[%s1878_s1 + $0x10] sm:$0xff]  }
   0x4   :  { %v1447_v3 = vld [vmem:[%s1878_s1 + $0x80] sm:$0xff]   ;;  %1253 = vmatpush3.bf16.msra.mxu0 %v1446_v2  ;;  %v1451_v7 = vld [vmem:[%s1878_s1 + $0x88] sm:$0xff]   ;;  %v1455_v11 = vld [vmem:[%s1878_s1 + $0x90] sm:$0xff]  }
   0x5   :  { %1317 = vmatpush3.bf16.msra.mxu1 %v1447_v3  ;;  %1254 = vmatprep.subr.bf16.mxu0 %v1448_v4  ;;  %v1456_v12 = vld [vmem:[%s1878_s1 + $0x58] sm:$0xff]   ;;  %v1460_v16 = vld [vmem:[%s1878_s1 + $0x60] sm:$0xff]   ;;  %v1464_v20 = vld [vmem:[%s1878_s1 + $0x68] sm:$0xff]  }
   0x6   :  { %1318 = vmatprep.subr.bf16.mxu1 %v1449_v5  ;;  %v1457_v13 = vld [vmem:[%s1878_s1 + $0xd8] sm:$0xff]   ;;  %v1461_v17 = vld [vmem:[%s1878_s1 + $0xe0] sm:$0xff]   ;;  %v1465_v21 = vld [vmem:[%s1878_s1 + $0xe8] sm:$0xff]  }
   0x7   :  { %v1458_v14 = vld [vmem:[%s1878_s1 + $0x18] sm:$0xff]   ;;  %v1462_v18 = vld [vmem:[%s1878_s1 + $0x20] sm:$0xff]   ;;  %v1466_v22 = vld [vmem:[%s1878_s1 + $0x28] sm:$0xff]  }
   0x8   :  { %1255 = vmatpush3.bf16.msra.mxu0 %v1450_v6  ;;  %v1459_v15 = vld [vmem:[%s1878_s1 + $0x98] sm:$0xff]   ;;  %v1463_v19 = vld [vmem:[%s1878_s1 + $0xa0] sm:$0xff]   ;;  %v1467_v23 = vld [vmem:[%s1878_s1 + $0xa8] sm:$0xff]  }
   0x9   :  { %1319 = vmatpush3.bf16.msra.mxu1 %v1451_v7  ;;  %1256 = vmatprep.subr.bf16.mxu0 %v1452_v8  ;;  %v1468_v24 = vld [vmem:[%s1878_s1 + $0x70] sm:$0xff]   ;;  %v1472_v28 = vld [vmem:[%s1878_s1 + $0x78] sm:$0xff]   ;;  %v1481_v35 = vld [vmem:[%s1879_s0 + $0xc] ss:$20 sps:$4 sm:$0xff]  }
   0xa   :  { %1320 = vmatprep.subr.bf16.mxu1 %v1453_v9  ;;  %v1469_v25 = vld [vmem:[%s1878_s1 + $0xf0] sm:$0xff]   ;;  %v1473_v29 = vld [vmem:[%s1878_s1 + $0xf8] sm:$0xff]   ;;  %v1482_v36 = vld [vmem:[%s1878_s1 + $0x100] sm:$0xff]   ;;  %756 = vmatprep.mubr.bf16.mxu1 %v1481_v35 }
   0xb   :  { %v1470_v26 = vld [vmem:[%s1878_s1 + $0x30] sm:$0xff]   ;;  %v1474_v30 = vld [vmem:[%s1878_s1 + $0x38] sm:$0xff]   ;;  %v1483_v37 = vld [vmem:[%s1879_s0 + $0x2c] ss:$20 sps:$4 sm:$0xff]  }
   0xc   :  { %1257 = vmatpush3.bf16.msra.mxu0 %v1454_v10  ;;  %v1471_v27 = vld [vmem:[%s1878_s1 + $0xb0] sm:$0xff]   ;;  %v1475_v31 = vld [vmem:[%s1878_s1 + $0xb8] sm:$0xff]   ;;  %v1489_v39 = vld [vmem:[%s1878_s1 + $0x108] sm:$0xff]  }
   0xd   :  { %1321 = vmatpush3.bf16.msra.mxu1 %v1455_v11  ;;  %1258 = vmatprep.subr.bf16.mxu0 %v1456_v12  ;;  %v1476_v32 = vld [vmem:[%s1879_s0] ss:$20 sps:$4 sm:$0xff]   ;;  %v1478_v33 = vld [vmem:[%s1879_s0 + $0x4] ss:$20 sps:$4 sm:$0xff]   ;;  %v1479_v34 = vld [vmem:[%s1879_s0 + $0x8] ss:$20 sps:$4 sm:$0xff]  }
   0xe   :  { %1322 = vmatprep.subr.bf16.mxu1 %v1457_v13  ;;  %659 = vmatprep.mubr.bf16.mxu0 %v1478_v33  ;;  %v1485_v38 = vld [vmem:[%s1879_s0 + $0x34] ss:$20 sps:$4 sm:$0xff]   ;;  %v1488_v41 = vld [vmem:[%s1879_s0 + $0x30] ss:$20 sps:$4 sm:$0xff]   ;;  %v1503_v45 = vld [vmem:[%s1878_s1 + $0x118] sm:$0xff]  }
   0xf   :  { %v1487_v40 = vld [vmem:[%s1879_s0 + $0x28] ss:$20 sps:$4 sm:$0xff]   ;;  %v1496_v44 = vld [vmem:[%s1878_s1 + $0x110] sm:$0xff]   ;;  %v1495_v47 = vld [vmem:[%s1879_s0 + $0x58] ss:$20 sps:$4 sm:$0xff]  }
  0x10   :  { %1259 = vmatpush3.bf16.msra.mxu0 %v1458_v14  ;;  %v1490_v42 = vld [vmem:[%s1879_s0 + $0x54] ss:$20 sps:$4 sm:$0xff]   ;;  %v1492_v43 = vld [vmem:[%s1879_s0 + $0x5c] ss:$20 sps:$4 sm:$0xff]   ;;  %v1499_v49 = vld [vmem:[%s1879_s0 + $0x84] ss:$20 sps:$4 sm:$0xff]  }
  0x11   :  { %1323 = vmatpush3.bf16.msra.mxu1 %v1459_v15  ;;  %1260 = vmatprep.subr.bf16.mxu0 %v1460_v16  ;;  %v1494_v46 = vld [vmem:[%s1879_s0 + $0x50] ss:$20 sps:$4 sm:$0xff]   ;;  %v1517_v51 = vld [vmem:[%s1878_s1 + $0x128] sm:$0xff]   ;;  %v1502_v53 = vld [vmem:[%s1879_s0 + $0x80] ss:$20 sps:$4 sm:$0xff]  }
  0x12   :  { %1324 = vmatprep.subr.bf16.mxu1 %v1461_v17  ;;  %v1497_v48 = vld [vmem:[%s1879_s0 + $0x7c] ss:$20 sps:$4 sm:$0xff]   ;;  %v1510_v50 = vld [vmem:[%s1878_s1 + $0x120] sm:$0xff]   ;;  %v1501_v52 = vld [vmem:[%s1879_s0 + $0x78] ss:$20 sps:$4 sm:$0xff]  }
  0x13   :  { %v1504_v54 = vld [vmem:[%s1879_s0 + $0xa4] ss:$20 sps:$4 sm:$0xff]   ;;  %v1524_v55 = vld [vmem:[%s1878_s1 + $0x130] sm:$0xff]   ;;  %v1506_v56 = vld [vmem:[%s1879_s0 + $0xac] ss:$20 sps:$4 sm:$0xff]  }
  0x14   :  { %1261 = vmatpush3.bf16.msra.mxu0 %v1462_v18  ;;  %v1531_v57 = vld [vmem:[%s1878_s1 + $0x138] sm:$0xff]   ;;  %v1508_v58 = vld [vmem:[%s1879_s0 + $0xa0] ss:$20 sps:$4 sm:$0xff]   ;;  %v1516_v63 = vld [vmem:[%s1879_s0 + $0xd0] ss:$20 sps:$4 sm:$0xff]  }
  0x15   :  { %1325 = vmatpush3.bf16.msra.mxu1 %v1463_v19  ;;  %1262 = vmatprep.subr.bf16.mxu0 %v1464_v20  ;;  %v1509_v59 = vld [vmem:[%s1879_s0 + $0xa8] ss:$20 sps:$4 sm:$0xff]   ;;  %v1511_v60 = vld [vmem:[%s1879_s0 + $0xcc] ss:$20 sps:$4 sm:$0xff]   ;;  %v1522_v2 = vld [vmem:[%s1879_s0 + $0xf0] ss:$20 sps:$4 sm:$0xff]  }
  0x16   :  { %1326 = vmatprep.subr.bf16.mxu1 %v1465_v21  ;;  %v1513_v61 = vld [vmem:[%s1879_s0 + $0xd4] ss:$20 sps:$4 sm:$0xff]   ;;  %v1520_v1 = vld [vmem:[%s1879_s0 + $0xfc] ss:$20 sps:$4 sm:$0xff]   ;;  %v1523_v3 = vld [vmem:[%s1879_s0 + $0xf8] ss:$20 sps:$4 sm:$0xff]  }
  0x17   :  { %v1515_v62 = vld [vmem:[%s1879_s0 + $0xc8] ss:$20 sps:$4 sm:$0xff]   ;;  %v1527_v5 = vld [vmem:[%s1879_s0 + $0x124] ss:$20 sps:$4 sm:$0xff]   ;;  %v1530_v7 = vld [vmem:[%s1879_s0 + $0x120] ss:$20 sps:$4 sm:$0xff]  }
  0x18   :  { %1263 = vmatpush3.bf16.msra.mxu0 %v1466_v22  ;;  %v1518_v0 = vld [vmem:[%s1879_s0 + $0xf4] ss:$20 sps:$4 sm:$0xff]   ;;  %v1525_v4 = vld [vmem:[%s1879_s0 + $0x11c] ss:$20 sps:$4 sm:$0xff]   ;;  %v1529_v6 = vld [vmem:[%s1879_s0 + $0x118] ss:$20 sps:$4 sm:$0xff]  }
  0x19   :  { %1327 = vmatpush3.bf16.msra.mxu1 %v1467_v23  ;;  %1264 = vmatprep.subr.bf16.mxu0 %v1468_v24  ;;  %v1532_v8 = vld [vmem:[%s1879_s0 + $0x10] ss:$20 sps:$4 sm:$0xff]   ;;  %v1534_v10 = vld [vmem:[%s1879_s0 + $0x38] ss:$20 sps:$4 sm:$0xff]   ;;  %v1536_v12 = vld [vmem:[%s1879_s0 + $0x60] ss:$20 sps:$4 sm:$0xff]  }
  0x1a   :  { %1328 = vmatprep.subr.bf16.mxu1 %v1469_v25  ;;  %v1533_v9 = vld [vmem:[%s1879_s0 + $0xb0] ss:$20 sps:$4 sm:$0xff]   ;;  %v1535_v11 = vld [vmem:[%s1879_s0 + $0xd8] ss:$20 sps:$4 sm:$0xff]   ;;  %v1537_v13 = vld [vmem:[%s1879_s0 + $0x100] ss:$20 sps:$4 sm:$0xff]  }
  0x1b   :  { %v1538_v14 = vld [vmem:[%s1879_s0 + $0x88] ss:$20 sps:$4 sm:$0xff]  }
  0x1c   :  { %1265 = vmatpush3.bf16.msra.mxu0 %v1470_v26  ;;  %v1539_v15 = vld [vmem:[%s1879_s0 + $0x128] ss:$20 sps:$4 sm:$0xff]  }
  0x1d   :  { %1329 = vmatpush3.bf16.msra.mxu1 %v1471_v27  ;;  %1266 = vmatprep.subr.bf16.mxu0 %v1472_v28 }
  0x1e   :  { %1330 = vmatprep.subr.bf16.mxu1 %v1473_v29 }
  0x20   :  { %1267 = vmatpush3.bf16.msra.mxu0 %v1474_v30 }
  0x21   :  { %1331 = vmatpush3.bf16.msra.mxu1 %v1475_v31  ;;  %1396 = vmatprep.subr.bf16.mxu0 %v1482_v36 }
  0x22   :  { %1428 = vmatprep.subr.bf16.mxu1 %v1482_v36 }
  0x23   :  { %660 = vmatmul.mubr.bf16.vlgmr.msra.gmra.mrb[0].mxu0 %v1476_v32 }
  0x24   :  { %757 = vmatmul.mubr.bf16.vlgmr.msra.gmra.mrb[0].mxu1 %v1479_v34  ;;  %1397 = vmatpush3.bf16.msra.mxu0 %v1482_v36 }
  0x25   :  { %1436 = vmatpush3.bf16.msra.mxu1 %v1482_v36  ;;  %667 = vmatprep.mubr.bf16.mxu0 %v1483_v37 }
  0x26   :  { %764 = vmatprep.mubr.bf16.mxu1 %v1485_v38  ;;  %1398 = vmatprep.subr.bf16.mxu0 %v1489_v39 }
  0x27   :  { %1429 = vmatprep.subr.bf16.mxu1 %v1489_v39 }
  0x28   :  { %1399 = vmatpush3.bf16.msra.mxu0 %v1489_v39 }
  0x29   :  { %1437 = vmatpush3.bf16.msra.mxu1 %v1489_v39  ;;  %1400 = vmatprep.subr.bf16.mxu0 %v1496_v44 }
  0x2a   :  { %1430 = vmatprep.subr.bf16.mxu1 %v1496_v44 }
  0x2b   :  { %668 = vmatmul.mubr.bf16.gmra.mrb[4].mxu0 %v1487_v40 }
  0x2c   :  { %765 = vmatmul.mubr.bf16.gmra.mrb[4].mxu1 %v1488_v41  ;;  %675 = vmatprep.mubr.bf16.mxu0 %v1490_v42 }
  0x2d   :  { %772 = vmatprep.mubr.bf16.mxu1 %v1492_v43  ;;  %1401 = vmatpush3.bf16.msra.mxu0 %v1496_v44 }
  0x2e   :  { %1438 = vmatpush3.bf16.msra.mxu1 %v1496_v44  ;;  %1402 = vmatprep.subr.bf16.mxu0 %v1503_v45 }
  0x2f   :  { %1431 = vmatprep.subr.bf16.mxu1 %v1503_v45 }
  0x31   :  { %1403 = vmatpush3.bf16.msra.mxu0 %v1503_v45 }
  0x32   :  { %1439 = vmatpush3.bf16.msra.mxu1 %v1503_v45  ;;  %1404 = vmatprep.subr.bf16.mxu0 %v1510_v50 }
  0x33   :  { %676 = vmatmul.mubr.bf16.gmra.mrb[8].mxu0 %v1494_v46  ;;  %1432 = vmatprep.subr.bf16.mxu1 %v1510_v50 }
  0x34   :  { %773 = vmatmul.mubr.bf16.gmra.mrb[8].mxu1 %v1495_v47  ;;  %683 = vmatprep.mubr.bf16.mxu0 %v1497_v48 }
  0x35   :  { %780 = vmatprep.mubr.bf16.mxu1 %v1499_v49  ;;  %1405 = vmatpush3.bf16.msra.mxu0 %v1510_v50 }
  0x36   :  { %1440 = vmatpush3.bf16.msra.mxu1 %v1510_v50  ;;  %1406 = vmatprep.subr.bf16.mxu0 %v1517_v51 }
  0x37   :  { %1433 = vmatprep.subr.bf16.mxu1 %v1517_v51 }
  0x39   :  { %1407 = vmatpush3.bf16.msra.mxu0 %v1517_v51 }
  0x3a   :  { %1441 = vmatpush3.bf16.msra.mxu1 %v1517_v51  ;;  %1408 = vmatprep.subr.bf16.mxu0 %v1524_v55 }
  0x3b   :  { %684 = vmatmul.mubr.bf16.gmra.mrb[12].mxu0 %v1501_v52  ;;  %1434 = vmatprep.subr.bf16.mxu1 %v1524_v55 }
  0x3c   :  { %781 = vmatmul.mubr.bf16.gmra.mrb[12].mxu1 %v1502_v53  ;;  %691 = vmatprep.mubr.bf16.mxu0 %v1504_v54 }
  0x3d   :  { %788 = vmatprep.mubr.bf16.mxu1 %v1506_v56  ;;  %1409 = vmatpush3.bf16.msra.mxu0 %v1524_v55 }
  0x3e   :  { %1442 = vmatpush3.bf16.msra.mxu1 %v1524_v55  ;;  %1410 = vmatprep.subr.bf16.mxu0 %v1531_v57 }
  0x3f   :  { %1435 = vmatprep.subr.bf16.mxu1 %v1531_v57 }
  0x41   :  { %1411 = vmatpush3.bf16.msra.mxu0 %v1531_v57 }
  0x42   :  { %1443 = vmatpush3.bf16.msra.mxu1 %v1531_v57 }
  0x43   :  { %692 = vmatmul.mubr.bf16.gmra.mrb[16].mxu0 %v1508_v58 }
  0x44   :  { %789 = vmatmul.mubr.bf16.gmra.mrb[16].mxu1 %v1509_v59  ;;  %699 = vmatprep.mubr.bf16.mxu0 %v1511_v60 }
  0x45   :  { %796 = vmatprep.mubr.bf16.mxu1 %v1513_v61 }
  0x4b   :  { %700 = vmatmul.mubr.bf16.gmra.mrb[20].mxu0 %v1515_v62 }
  0x4c   :  { %797 = vmatmul.mubr.bf16.gmra.mrb[20].mxu1 %v1516_v63  ;;  %707 = vmatprep.mubr.bf16.mxu0 %v1518_v0 }
  0x4d   :  { %804 = vmatprep.mubr.bf16.mxu1 %v1520_v1 }
  0x53   :  { %708 = vmatmul.mubr.bf16.gmra.mrb[24].mxu0 %v1522_v2 }
  0x54   :  { %805 = vmatmul.mubr.bf16.gmra.mrb[24].mxu1 %v1523_v3  ;;  %715 = vmatprep.mubr.bf16.mxu0 %v1525_v4 }
  0x55   :  { %812 = vmatprep.mubr.bf16.mxu1 %v1527_v5 }
  0x5b   :  { %716 = vmatmul.mubr.bf16.gmra.mrb[28].mxu0 %v1529_v6 }
  0x5c   :  { %813 = vmatmul.mubr.bf16.gmra.mrb[28].mxu1 %v1530_v7  ;;  %1412 = vmatprep.mubr.bf16.mxu0 %v1532_v8 }
  0x5d   :  { %1420 = vmatprep.mubr.bf16.mxu1 %v1533_v9 }
  0x63   :  { %1413 = vmatmul.mubr.bf16.vlgmr.msra.gmra.mrb[32].mxu0 %v1534_v10 }
  0x64   :  { %1421 = vmatmul.mubr.bf16.vlgmr.msra.gmra.mrb[32].mxu1 %v1535_v11  ;;  %1416 = vmatprep.mubr.bf16.mxu0 %v1536_v12 }
  0x65   :  { %1424 = vmatprep.mubr.bf16.mxu1 %v1537_v13 }
  0x6b   :  { %1417 = vmatmul.mubr.bf16.gmra.mrb[36].mxu0 %v1538_v14 }
  0x6c   :  { %1425 = vmatmul.mubr.bf16.gmra.mrb[36].mxu1 %v1539_v15 }
  0xf6   :  { %v1268_v16 = vpop.f32.mrb[0].mxu0 }
  0xf7   :  { %v1332_v17 = vpop.f32.mrb[0].mxu1  ;;  %v1269_v18 = vpop.f32.mrb[1].mxu0 }
  0xf8   :  { %v1270_v19 = vadd.f32 %v1269_v18, %v1268_v16  ;;  %v1333_v20 = vpop.f32.mrb[1].mxu1  ;;  %v1271_v21 = vpop.f32.mrb[2].mxu0 }
  0xf9   :  { %v1334_v22 = vadd.f32 %v1333_v20, %v1332_v17  ;;  %v1335_v23 = vpop.f32.mrb[2].mxu1  ;;  %v1272_v24 = vpop.f32.mrb[3].mxu0 }
  0xfa   :  { %v1273_v25 = vadd.f32 %v1272_v24, %v1271_v21  ;;  %v1336_v26 = vpop.f32.mrb[3].mxu1 }
  0xfb   :  { %v1337_v27 = vadd.f32 %v1336_v26, %v1335_v23  ;;  %v1800_v28 = vadd.f32 %v1334_v22, %v1270_v19 }
  0xfd   :  { %v1802_v29 = vadd.f32 %v1337_v27, %v1273_v25 }
  0xfe   :  { %v1274_v30 = vpop.f32.mrb[4].mxu0 }
  0xff   :  { %v1338_v31 = vpop.f32.mrb[4].mxu1  ;;  %v1275_v32 = vpop.f32.mrb[5].mxu0 }
 0x100   :  { %v1276_v33 = vadd.f32 %v1275_v32, %v1274_v30  ;;  %v1339_v34 = vpop.f32.mrb[5].mxu1  ;;  %v1277_v35 = vpop.f32.mrb[6].mxu0 }
 0x101   :  { %v1340_v36 = vadd.f32 %v1339_v34, %v1338_v31  ;;  %v1341_v37 = vpop.f32.mrb[6].mxu1  ;;  %v1278_v38 = vpop.f32.mrb[7].mxu0 }
 0x102   :  { %v1279_v39 = vadd.f32 %v1278_v38, %v1277_v35  ;;  %v1342_v40 = vpop.f32.mrb[7].mxu1 }
 0x103   :  { %v1343_v41 = vadd.f32 %v1342_v40, %v1341_v37  ;;  %v1804_v42 = vadd.f32 %v1340_v36, %v1276_v33 }
 0x105   :  { %v1806_v43 = vadd.f32 %v1343_v41, %v1279_v39 }
 0x106   :  { %v1280_v44 = vpop.f32.mrb[8].mxu0 }
 0x107   :  { %v1344_v45 = vpop.f32.mrb[8].mxu1  ;;  %v1281_v46 = vpop.f32.mrb[9].mxu0 }
 0x108   :  { %v1282_v47 = vadd.f32 %v1281_v46, %v1280_v44  ;;  %v1345_v48 = vpop.f32.mrb[9].mxu1  ;;  %v1283_v49 = vpop.f32.mrb[10].mxu0 }
 0x109   :  { %v1346_v50 = vadd.f32 %v1345_v48, %v1344_v45  ;;  %v1347_v51 = vpop.f32.mrb[10].mxu1  ;;  %v1284_v52 = vpop.f32.mrb[11].mxu0 }
 0x10a   :  { %v1285_v53 = vadd.f32 %v1284_v52, %v1283_v49  ;;  %v1348_v54 = vpop.f32.mrb[11].mxu1 }
 0x10b   :  { %v1349_v55 = vadd.f32 %v1348_v54, %v1347_v51  ;;  %v1808_v56 = vadd.f32 %v1346_v50, %v1282_v47 }
 0x10d   :  { %v1810_v57 = vadd.f32 %v1349_v55, %v1285_v53 }
 0x10e   :  { %v1286_v58 = vpop.f32.mrb[12].mxu0 }
 0x10f   :  { %v1350_v59 = vpop.f32.mrb[12].mxu1  ;;  %v1287_v60 = vpop.f32.mrb[13].mxu0 }
 0x110   :  { %v1288_v61 = vadd.f32 %v1287_v60, %v1286_v58  ;;  %v1351_v62 = vpop.f32.mrb[13].mxu1  ;;  %v1289_v63 = vpop.f32.mrb[14].mxu0 }
 0x111   :  { %v1352_v0 = vadd.f32 %v1351_v62, %v1350_v59  ;;  %v1353_v1 = vpop.f32.mrb[14].mxu1  ;;  %v1290_v2 = vpop.f32.mrb[15].mxu0 }
 0x112   :  { %v1291_v3 = vadd.f32 %v1290_v2, %v1289_v63  ;;  %v1354_v4 = vpop.f32.mrb[15].mxu1 }
 0x113   :  { %v1355_v5 = vadd.f32 %v1354_v4, %v1353_v1  ;;  %v1812_v6 = vadd.f32 %v1352_v0, %v1288_v61 }
 0x115   :  { %v1814_v7 = vadd.f32 %v1355_v5, %v1291_v3 }
 0x116   :  { %v1292_v8 = vpop.f32.mrb[16].mxu0 }
 0x117   :  { %v1356_v9 = vpop.f32.mrb[16].mxu1  ;;  %v1293_v10 = vpop.f32.mrb[17].mxu0 }
 0x118   :  { %v1294_v11 = vadd.f32 %v1293_v10, %v1292_v8  ;;  %v1357_v12 = vpop.f32.mrb[17].mxu1  ;;  %v1295_v13 = vpop.f32.mrb[18].mxu0 }
 0x119   :  { %v1358_v14 = vadd.f32 %v1357_v12, %v1356_v9  ;;  %v1359_v15 = vpop.f32.mrb[18].mxu1  ;;  %v1296_v16 = vpop.f32.mrb[19].mxu0  ;;  %v1825_v9 = vld [vmem:[%s1880_s2] ss:$0 sm:$0xff] }
 0x11a   :  { %v1297_v17 = vadd.f32 %v1296_v16, %v1295_v13  ;;  %v1360_v18 = vpop.f32.mrb[19].mxu1 }
 0x11b   :  { %v1361_v19 = vadd.f32 %v1360_v18, %v1359_v15  ;;  %v791_v20 = vadd.f32 %v1358_v14, %v1294_v11 }
 0x11d   :  { %v1816_v21 = vadd.f32 %v1361_v19, %v1297_v17 }
 0x11e   :  { %v1298_v22 = vpop.f32.mrb[20].mxu0 }
 0x11f   :  { %v1362_v23 = vpop.f32.mrb[20].mxu1  ;;  %v1299_v24 = vpop.f32.mrb[21].mxu0 }
 0x120   :  { %v1300_v25 = vadd.f32 %v1299_v24, %v1298_v22  ;;  %v1363_v26 = vpop.f32.mrb[21].mxu1  ;;  %v1301_v27 = vpop.f32.mrb[22].mxu0 }
 0x121   :  { %v1364_v30 = vadd.f32 %v1363_v26, %v1362_v23  ;;  %v1365_v31 = vpop.f32.mrb[22].mxu1  ;;  %v1302_v32 = vpop.f32.mrb[23].mxu0 }
 0x122   :  { %v1303_v33 = vadd.f32 %v1302_v32, %v1301_v27  ;;  %v1366_v34 = vpop.f32.mrb[23].mxu1 }
 0x123   :  { %v1367_v35 = vadd.f32 %v1366_v34, %v1365_v31  ;;  %v799_v36 = vadd.f32 %v1364_v30, %v1300_v25 }
 0x125   :  { %v802_v37 = vadd.f32 %v1367_v35, %v1303_v33 }
 0x126   :  { %v1304_v38 = vpop.f32.mrb[24].mxu0 }
 0x127   :  { %v1368_v39 = vpop.f32.mrb[24].mxu1  ;;  %v1305_v40 = vpop.f32.mrb[25].mxu0 }
 0x128   :  { %v1306_v41 = vadd.f32 %v1305_v40, %v1304_v38  ;;  %v1369_v44 = vpop.f32.mrb[25].mxu1  ;;  %v1307_v45 = vpop.f32.mrb[26].mxu0 }
 0x129   :  { %v1370_v46 = vadd.f32 %v1369_v44, %v1368_v39  ;;  %v1371_v47 = vpop.f32.mrb[26].mxu1  ;;  %v1308_v48 = vpop.f32.mrb[27].mxu0 }
 0x12a   :  { %v1309_v49 = vadd.f32 %v1308_v48, %v1307_v45  ;;  %v1372_v50 = vpop.f32.mrb[27].mxu1 }
 0x12b   :  { %v1373_v51 = vadd.f32 %v1372_v50, %v1371_v47  ;;  %v1818_v52 = vadd.f32 %v1370_v46, %v1306_v41 }
 0x12d   :  { %v1820_v53 = vadd.f32 %v1373_v51, %v1309_v49 }
 0x12e   :  { %v1310_v54 = vpop.f32.mrb[28].mxu0 }
 0x12f   :  { %v1374_v55 = vpop.f32.mrb[28].mxu1  ;;  %v1311_v58 = vpop.f32.mrb[29].mxu0 }
 0x130   :  { %v1312_v59 = vadd.f32 %v1311_v58, %v1310_v54  ;;  %v1375_v60 = vpop.f32.mrb[29].mxu1  ;;  %v1313_v61 = vpop.f32.mrb[30].mxu0 }
 0x131   :  { %v1376_v62 = vadd.f32 %v1375_v60, %v1374_v55  ;;  %v1377_v63 = vpop.f32.mrb[30].mxu1  ;;  %v1314_v0 = vpop.f32.mrb[31].mxu0 }
 0x132   :  { %v1315_v1 = vadd.f32 %v1314_v0, %v1313_v61  ;;  %v1378_v2 = vpop.f32.mrb[31].mxu1 }
 0x133   :  { %v1379_v3 = vadd.f32 %v1378_v2, %v1377_v63  ;;  %v815_v4 = vadd.f32 %v1376_v62, %v1312_v59 }
 0x135   :  { %v818_v5 = vadd.f32 %v1379_v3, %v1315_v1 }
 0x136   :  { %v1414_v8 = vpop.f32.mrb[32].mxu0 }
 0x137   :  { %v864_v10 = vadd.f32 %v1414_v8, %v1804_v42  ;;  %v1422_v11 = vpop.f32.mrb[32].mxu1  ;;  %v855_v12 = vpop.f32.mrb[33].mxu0 }
 0x138   :  { %v896_v13 = vadd.f32 %v1422_v11, %v799_v36  ;;  %v856_v14 = vadd.f32 %v855_v12, %v1800_v28  ;;  %v887_v15 = vpop.f32.mrb[33].mxu1  ;;  %v1415_v16 = vpop.f32.mrb[34].mxu0 }
 0x139   :  { %v978_v17 = vadd.f32 %v1825_v9, %v864_v10  ;;  %v888_v18 = vadd.f32 %v887_v15, %v791_v20  ;;  %v867_v19 = vadd.f32 %v1415_v16, %v1806_v43  ;;  %v1423_v22 = vpop.f32.mrb[34].mxu1  ;;  %v858_v23 = vpop.f32.mrb[35].mxu0 }
 0x13a   :  { %v986_v24 = vadd.f32 %v1825_v9, %v896_v13  ;;  %v976_v25 = vadd.f32 %v1825_v9, %v856_v14  ;;  %v899_v26 = vadd.f32 %v1423_v22, %v802_v37  ;;  %v859_v42 = vadd.f32 %v858_v23, %v1802_v29  ;;  %v890_v27 = vpop.f32.mrb[35].mxu1 }
 0x13b   :  { %v984_v30 = vadd.f32 %v1825_v9, %v888_v18  ;;  %v979_v28 = vadd.f32 %v1825_v9, %v867_v19  ;;  %v891_v31 = vadd.f32 %v890_v27, %v1816_v21  ;;  %v994_v32 = vmax.f32 %v978_v17, 0.0 }
 0x13c   :  { %v987_v20 = vadd.f32 %v1825_v9, %v899_v26  ;;  %v977_v43 = vadd.f32 %v1825_v9, %v859_v42  ;;  %v1002_v35 = vmax.f32 %v986_v24, 0.0  ;;  %v992_v36 = vmax.f32 %v976_v25, 0.0 }
 0x13d   :  { %v995_v33 = vmax.f32 %v979_v28, 0.0  ;;  %v985_v34 = vadd.f32 %v1825_v9, %v891_v31  ;;  %v1000_v39 = vmax.f32 %v984_v30, 0.0 }
 0x13e   :  { %v1003_v37 = vmax.f32 %v987_v20, 0.0  ;;  %v993_v38 = vmax.f32 %v977_v43, 0.0  ;;  %v1418_v29 = vpop.f32.mrb[36].mxu0 }
 0x13f   :  { %v1213_v40 = vpack.c.bf16 %v995_v33, %v994_v32  ;;  %v1001_v41 = vmax.f32 %v985_v34, 0.0  ;;  %v880_v44 = vadd.f32 %v1418_v29, %v1812_v6  ;;  %v1426_v45 = vpop.f32.mrb[36].mxu1  ;;  %v871_v21 = vpop.f32.mrb[37].mxu0 }
 0x140   :  { %v1233_v46 = vpack.c.bf16 %v1003_v37, %v1002_v35  ;;  %v1208_v47 = vpack.c.bf16 %v993_v38, %v992_v36  ;;  %v912_v48 = vadd.f32 %v1426_v45, %v815_v4  ;;  %v872_v49 = vadd.f32 %v871_v21, %v1808_v56  ;;  %v903_v50 = vpop.f32.mrb[37].mxu1  ;;  %v1419_v51 = vpop.f32.mrb[38].mxu0 }
 0x141   :  { %1245 = vst [vmem:[%s1881_s3 + $0x8] sm:$0xff] %v1213_v40   ;;  %v1228_v54 = vpack.c.bf16 %v1001_v41, %v1000_v39  ;;  %v982_v55 = vadd.f32 %v1825_v9, %v880_v44  ;;  %v904_v58 = vadd.f32 %v903_v50, %v1818_v52  ;;  %v883_v6 = vadd.f32 %v1419_v51, %v1814_v7  ;;  %v1427_v59 = vpop.f32.mrb[38].mxu1  ;;  %v874_v60 = vpop.f32.mrb[39].mxu0 }
 0x142   :  { %1249 = vst [vmem:[%s1881_s3 + $0x28] sm:$0xff] %v1233_v46   ;;  %1209 = vst [vmem:[%s1881_s3] sm:$0xff] %v1208_v47   ;;  %v990_v56 = vadd.f32 %v1825_v9, %v912_v48  ;;  %v980_v61 = vadd.f32 %v1825_v9, %v872_v49  ;;  %v915_v62 = vadd.f32 %v1427_v59, %v818_v5  ;;  %v906_v52 = vpop.f32.mrb[39].mxu1 }
 0x143   :  { %v875_v63 = vadd.f32 %v874_v60, %v1810_v57  ;;  %1248 = vst [vmem:[%s1881_s3 + $0x20] sm:$0xff] %v1228_v54   ;;  %v988_v7 = vadd.f32 %v1825_v9, %v904_v58  ;;  %v983_v0 = vadd.f32 %v1825_v9, %v883_v6  ;;  %v907_v1 = vadd.f32 %v906_v52, %v1820_v53 }
 0x144   :  { %v991_v2 = vadd.f32 %v1825_v9, %v915_v62  ;;  %v998_v4 = vmax.f32 %v982_v55, 0.0  ;;  %v1006_v57 = vmax.f32 %v990_v56, 0.0  ;;  %v996_v10 = vmax.f32 %v980_v61, 0.0 }
 0x145   :  { %v981_v3 = vadd.f32 %v1825_v9, %v875_v63  ;;  %v999_v8 = vmax.f32 %v983_v0, 0.0  ;;  %v989_v5 = vadd.f32 %v1825_v9, %v907_v1  ;;  %v1004_v13 = vmax.f32 %v988_v7, 0.0 }
 0x146   :  { %v1007_v11 = vmax.f32 %v991_v2, 0.0 }
 0x147   :  { %v997_v12 = vmax.f32 %v981_v3, 0.0  ;;  %v1223_v14 = vpack.c.bf16 %v999_v8, %v998_v4  ;;  %v1005_v15 = vmax.f32 %v989_v5, 0.0 }
 0x148   :  { %v1243_v16 = vpack.c.bf16 %v1007_v11, %v1006_v57 }
 0x149   :  { %v1218_v17 = vpack.c.bf16 %v997_v12, %v996_v10  ;;  %1247 = vst [vmem:[%s1881_s3 + $0x18] sm:$0xff] %v1223_v14   ;;  %v1238_v53 = vpack.c.bf16 %v1005_v15, %v1004_v13 }
 0x14a   :  { %1251 = vst [vmem:[%s1881_s3 + $0x38] sm:$0xff] %v1243_v16  }
 0x14b   :  { %1246 = vst [vmem:[%s1881_s3 + $0x10] sm:$0xff] %v1218_v17   ;;  %1250 = vst [vmem:[%s1881_s3 + $0x30] sm:$0xff] %v1238_v53  }

</bundles_post_ra>
